<compile_context>
chip_gen: v5e
topology: v5e:2x2
jax: 0.10.0
libtpu: 0.0.40
codegen_flags: <defaults>
</compile_context>

<pallas_src>
import jax
import jax.numpy as jnp
from jax import lax
from jax.experimental import pallas as pl
from jax.experimental.pallas import tpu as pltpu

# Small, deterministic hyper-params consistent with the module's structure
# (real resemblyzer uses 40 / 256 / 3 / 256; shrunk for the synthetic kernel).
MEL_N_CHANNELS = 16        # mel_n_channels
MODEL_HIDDEN_SIZE = 32     # model_hidden_size
MODEL_NUM_LAYERS = 3       # model_num_layers
MODEL_EMBEDDING_SIZE = 32  # model_embedding_size

HIDDEN_PAD = 128           # hidden dim padded to one 128-lane tile (gate-aligned slices)
EMBED_PAD = 128            # embedding dim padded to one 128-lane tile (lane-dense output)
SUBLANE = 8                # f32 sublane tile (batch padding target)


def voice_encoder_kernel(mels_ref,    # (T*BP, Dm)     time-major, batch-padded mels
                         w_ih0_ref,   # (Dm, 4*HP)     layer-0 input weights (gate-aligned)
                         w_ih_r_ref,  # (L-1, HP, 4*HP) layers 1.. input weights
                         w_hh_ref,    # (L, HP, 4*HP)  recurrent weights
                         b_ref,       # (L, 1, 4*HP)   merged biases (b_ih + b_hh)
                         w_lin_ref,   # (HP, EP)
                         b_lin_ref,   # (1, EP)
                         out_ref,     # (BP, EP)
                         seq_ref,     # scratch (T*BP, HP): inter-layer hidden sequence
                         gates_ref):  # scratch (T*BP, 4*HP): pre-projected gates
    TB, HP = seq_ref.shape
    L = w_hh_ref.shape[0]
    BP = out_ref.shape[0]
    T = TB // BP

    h0 = jnp.zeros((BP, HP), jnp.float32)
    c0 = jnp.zeros((BP, HP), jnp.float32)

    def run_layer(w_hh_t, write_seq):
        # Recurrent part only: gates[t] (pre-projected) + h @ W_hh, then the cell update.
        def step(t, carry):
            h, c = carry
            base = pl.multiple_of(t * BP, BP)
            gates = gates_ref[pl.ds(base, BP), :] + jnp.dot(
                h, w_hh_t, preferred_element_type=jnp.float32)       # (BP, 4*HP)
            # Gate slices are 128-lane aligned (HP == 128): whole-vreg selects, no XLU.
            i = jax.nn.sigmoid(gates[:, 0 * HP:1 * HP])
            f = jax.nn.sigmoid(gates[:, 1 * HP:2 * HP])
            g = jnp.tanh(gates[:, 2 * HP:3 * HP])
            o = jax.nn.sigmoid(gates[:, 3 * HP:4 * HP])
            c_new = f * c + i * g
            h_new = o * jnp.tanh(c_new)
            if write_seq:
                seq_ref[pl.ds(base, BP), :] = h_new
            return h_new, c_new
        return lax.fori_loop(0, T, step, (h0, c0), unroll=True)

    # ---- layer 0: hoisted input projection over all timesteps (one tall matmul) ----
    pre = jnp.dot(mels_ref[...], w_ih0_ref[...],
                  preferred_element_type=jnp.float32) + b_ref[0]      # (T*BP, 4*HP)
    gates_ref[...] = pre
    h, c = run_layer(w_hh_ref[0], write_seq=(L > 1))

    # ---- layers 1 .. L-1: project the whole previous-layer sequence at once ----
    for l in range(1, L):
        pre = jnp.dot(seq_ref[...], w_ih_r_ref[l - 1],
                      preferred_element_type=jnp.float32) + b_ref[l]  # (T*BP, 4*HP)
        gates_ref[...] = pre
        h, c = run_layer(w_hh_ref[l], write_seq=(l < L - 1))

    # ---- Linear -> ReLU -> row-wise L2 normalization (hidden[-1] == final h) ----
    emb = jnp.dot(h, w_lin_ref[...], preferred_element_type=jnp.float32) + b_lin_ref[...]
    emb = jnp.maximum(emb, 0.0)
    sumsq = jnp.sum(emb * emb, axis=1, keepdims=True)
    out_ref[...] = emb * lax.rsqrt(sumsq + 1e-12)


@jax.jit
def voice_encoder_forward(mels, w_ih0, w_ih_r, w_hh, b, w_lin, b_lin):
    """mels: (B, T, MEL_N_CHANNELS) batch-first, like the PyTorch module."""
    B, T, Dm = mels.shape
    HP = w_hh.shape[1]
    EP = w_lin.shape[1]
    BP = ((B + SUBLANE - 1) // SUBLANE) * SUBLANE          # pad batch to the sublane tile

    mels_tm = jnp.transpose(mels, (1, 0, 2))               # (T, B, Dm) time-major
    mels_tm = jnp.pad(mels_tm, ((0, 0), (0, BP - B), (0, 0)))
    mels_2d = mels_tm.reshape(T * BP, Dm)                  # flat for the hoisted projection

    out = pl.pallas_call(
        voice_encoder_kernel,
        out_shape=jax.ShapeDtypeStruct((BP, EP), jnp.float32),
        in_specs=[pl.BlockSpec(memory_space=pltpu.MemorySpace.VMEM)] * 7,
        out_specs=pl.BlockSpec(memory_space=pltpu.MemorySpace.VMEM),
        scratch_shapes=[pltpu.VMEM((T * BP, HP), jnp.float32),
                        pltpu.VMEM((T * BP, 4 * HP), jnp.float32)],
    )(mels_2d, w_ih0, w_ih_r, w_hh, b, w_lin, b_lin)
    return out[:B, :MODEL_EMBEDDING_SIZE]


# ----------------------------- parameter handling -----------------------------

def init_raw_params(key):
    """Deterministic synthetic weights in PyTorch nn.LSTM / nn.Linear shapes."""
    H, Dm, E, L = MODEL_HIDDEN_SIZE, MEL_N_CHANNELS, MODEL_EMBEDDING_SIZE, MODEL_NUM_LAYERS
    ks = jax.random.split(key, 4 * L + 2)
    scale = 0.1

    def rn(k, shape):
        return scale * jax.random.normal(k, shape, jnp.float32)

    w_ih, w_hh, b_ih, b_hh = [], [], [], []
    idx = 0
    for l in range(L):
        in_dim = Dm if l == 0 else H
        w_ih.append(rn(ks[idx], (4 * H, in_dim))); idx += 1   # weight_ih_l{l}
        w_hh.append(rn(ks[idx], (4 * H, H))); idx += 1        # weight_hh_l{l}
        b_ih.append(rn(ks[idx], (4 * H,))); idx += 1          # bias_ih_l{l}
        b_hh.append(rn(ks[idx], (4 * H,))); idx += 1          # bias_hh_l{l}
    w_lin = rn(ks[idx], (E, H)); idx += 1                      # linear.weight
    b_lin = rn(ks[idx], (E,))                                  # linear.bias
    return dict(w_ih=w_ih, w_hh=w_hh, b_ih=b_ih, b_hh=b_hh, w_lin=w_lin, b_lin=b_lin)


def pack_params(raw):
    """Repack PyTorch-shaped weights for the kernel: transpose, merge biases, and
    zero-pad the hidden/embedding dims so gate blocks are 128-lane aligned.
    Padded hidden units get all-zero weights/bias -> their h and c stay exactly 0."""
    H, Dm, E, L = MODEL_HIDDEN_SIZE, MEL_N_CHANNELS, MODEL_EMBEDDING_SIZE, MODEL_NUM_LAYERS
    HP, EP = HIDDEN_PAD, EMBED_PAD

    def pad_gate_weight(w, in_pad):
        # w: (4H, in_dim) PyTorch layout [i;f;g;o] -> (in_pad, 4*HP), gate-aligned columns.
        in_dim = w.shape[1]
        out = jnp.zeros((in_pad, 4 * HP), jnp.float32)
        for g in range(4):
            out = out.at[:in_dim, g * HP:g * HP + H].set(w[g * H:(g + 1) * H, :].T)
        return out

    def pad_gate_bias(bvec):
        out = jnp.zeros((1, 4 * HP), jnp.float32)
        for g in range(4):
            out = out.at[0, g * HP:g * HP + H].set(bvec[g * H:(g + 1) * H])
        return out

    w_ih0 = pad_gate_weight(raw["w_ih"][0], Dm)                                   # (Dm, 4HP)
    w_ih_r = jnp.stack([pad_gate_weight(raw["w_ih"][l], HP) for l in range(1, L)])  # (L-1,HP,4HP)
    w_hh = jnp.stack([pad_gate_weight(raw["w_hh"][l], HP) for l in range(L)])     # (L, HP, 4HP)
    b = jnp.stack([pad_gate_bias(raw["b_ih"][l] + raw["b_hh"][l]) for l in range(L)])  # (L,1,4HP)
    w_lin = jnp.zeros((HP, EP), jnp.float32).at[:H, :E].set(raw["w_lin"].T)       # (HP, EP)
    b_lin = jnp.zeros((1, EP), jnp.float32).at[0, :E].set(raw["b_lin"])           # (1, EP)
    return dict(w_ih0=w_ih0, w_ih_r=w_ih_r, w_hh=w_hh, b=b, w_lin=w_lin, b_lin=b_lin)


# ------------------------------ pure-JAX reference ------------------------------

def reference_forward(mels, raw):
    """PyTorch-semantics LSTM (gate order i,f,g,o) + Linear + ReLU + L2 norm."""
    B, T, _ = mels.shape
    H, L = MODEL_HIDDEN_SIZE, MODEL_NUM_LAYERS
    x = mels
    h = None
    for l in range(L):
        w_ih, w_hh = raw["w_ih"][l], raw["w_hh"][l]
        bias = raw["b_ih"][l] + raw["b_hh"][l]
        h = jnp.zeros((B, H), jnp.float32)
        c = jnp.zeros((B, H), jnp.float32)
        outs = []
        for t in range(T):
            gates = x[:, t, :] @ w_ih.T + h @ w_hh.T + bias
            i = jax.nn.sigmoid(gates[:, 0 * H:1 * H])
            f = jax.nn.sigmoid(gates[:, 1 * H:2 * H])
            g = jnp.tanh(gates[:, 2 * H:3 * H])
            o = jax.nn.sigmoid(gates[:, 3 * H:4 * H])
            c = f * c + i * g
            h = o * jnp.tanh(c)
            outs.append(h)
        x = jnp.stack(outs, axis=1)
    emb = jnp.maximum(h @ raw["w_lin"].T + raw["b_lin"], 0.0)
    return emb / jnp.linalg.norm(emb, axis=1, keepdims=True)


if __name__ == "__main__":
    key = jax.random.PRNGKey(0)
    k_data, k_params = jax.random.split(key)

    B, T = 2, 8
    mels = jax.random.normal(k_data, (B, T, MEL_N_CHANNELS), jnp.float32)
    raw = init_raw_params(k_params)
    packed = pack_params(raw)

    out = voice_encoder_forward(
        mels,
        packed["w_ih0"], packed["w_ih_r"], packed["w_hh"], packed["b"],
        packed["w_lin"], packed["b_lin"],
    )
    out = jax.block_until_ready(out)

    ref = reference_forward(mels, raw)
    assert out.shape == (B, MODEL_EMBEDDING_SIZE)
    assert jnp.all(jnp.isfinite(out))
    assert jnp.allclose(out, ref, atol=1e-3, rtol=1e-3)

    print("KERNEL_OK")
</pallas_src>

<mosaic_0001>
module attributes {stable_mosaic.version = 11 : i64} {
  func.func @voice_encoder_kernel(%arg0: memref<64x16xf32, #tpu.memory_space<vmem>>, %arg1: memref<16x512xf32, #tpu.memory_space<vmem>>, %arg2: memref<2x128x512xf32, #tpu.memory_space<vmem>>, %arg3: memref<3x128x512xf32, #tpu.memory_space<vmem>>, %arg4: memref<3x1x512xf32, #tpu.memory_space<vmem>>, %arg5: memref<128x128xf32, #tpu.memory_space<vmem>>, %arg6: memref<1x128xf32, #tpu.memory_space<vmem>>, %arg7: memref<8x128xf32, #tpu.memory_space<vmem>>, %arg8: memref<64x128xf32, #tpu.memory_space<vmem>>, %arg9: memref<64x512xf32, #tpu.memory_space<vmem>>) attributes {dimension_semantics = [], scalar_prefetch = 0 : i64, scratch_operands = 2 : i64, tpu.core_type = #tpu.core_type<tc>} {
    %cst = arith.constant 0.000000e+00 : f32
    %0 = vector.broadcast %cst : f32 to vector<8x128xf32>
    %cst_0 = arith.constant 0.000000e+00 : f32
    %1 = vector.broadcast %cst_0 : f32 to vector<8x128xf32>
    %c0 = arith.constant 0 : index
    %c0_1 = arith.constant 0 : index
    %2 = vector.load %arg0[%c0, %c0_1] : memref<64x16xf32, #tpu.memory_space<vmem>>, vector<64x16xf32>
    %c0_2 = arith.constant 0 : index
    %c0_3 = arith.constant 0 : index
    %3 = vector.load %arg1[%c0_2, %c0_3] : memref<16x512xf32, #tpu.memory_space<vmem>>, vector<16x512xf32>
    %cst_4 = arith.constant dense<0.000000e+00> : vector<64x512xf32>
    %4 = tpu.matmul %2, %3, %cst_4 {dimension_numbers = #tpu.dot_dimension_numbers<[1], [0], [0], [1], [0, 0, 1, 1], [], []>} : vector<64x16xf32>, vector<16x512xf32>, vector<64x512xf32> -> vector<64x512xf32>
    %c0_5 = arith.constant 0 : index
    %c0_6 = arith.constant 0 : index
    %c0_7 = arith.constant 0 : index
    %5 = vector.load %arg4[%c0_5, %c0_6, %c0_7] : memref<3x1x512xf32, #tpu.memory_space<vmem>>, vector<1x1x512xf32>
    %6 = vector.shape_cast %5 : vector<1x1x512xf32> to vector<1x512xf32>
    %7 = vector.broadcast %6 : vector<1x512xf32> to vector<64x512xf32>
    %8 = arith.addf %4, %7 : vector<64x512xf32>
    %c0_8 = arith.constant 0 : index
    %c0_9 = arith.constant 0 : index
    %9 = vector.load %arg9[%c0_8, %c0_9] : memref<64x512xf32, #tpu.memory_space<vmem>>, vector<64x512xf32>
    tpu.vector_store %arg9[%c0_8, %c0_9], %8 {strides = array<i32>} : memref<64x512xf32, #tpu.memory_space<vmem>>, vector<64x512xf32>,
    %c0_10 = arith.constant 0 : index
    %c0_11 = arith.constant 0 : index
    %c0_12 = arith.constant 0 : index
    %10 = vector.load %arg3[%c0_10, %c0_11, %c0_12] : memref<3x128x512xf32, #tpu.memory_space<vmem>>, vector<1x128x512xf32>
    %11 = vector.shape_cast %10 : vector<1x128x512xf32> to vector<128x512xf32>
    %c0_i32 = arith.constant 0 : i32
    %c8_i32 = arith.constant 8 : i32
    %12 = arith.muli %c0_i32, %c8_i32 : i32
    %13 = tpu.assume_multiple %12, 8 : i32
    %14 = arith.index_cast %13 : i32 to index
    %c0_13 = arith.constant 0 : index
    %15 = vector.load %arg9[%14, %c0_13] : memref<64x512xf32, #tpu.memory_space<vmem>>, vector<8x512xf32>
    %cst_14 = arith.constant dense<0.000000e+00> : vector<8x512xf32>
    %16 = tpu.matmul %0, %11, %cst_14 {dimension_numbers = #tpu.dot_dimension_numbers<[1], [0], [0], [1], [0, 0, 1, 1], [], []>} : vector<8x128xf32>, vector<128x512xf32>, vector<8x512xf32> -> vector<8x512xf32>
    %17 = arith.addf %15, %16 : vector<8x512xf32>
    %18 = vector.extract_strided_slice %17 {offsets = [0, 0], sizes = [8, 128], strides = [1, 1]} : vector<8x512xf32> to vector<8x128xf32>
    %19 = arith.negf %18 : vector<8x128xf32>
    %20 = math.exp %19 : vector<8x128xf32>
    %cst_15 = arith.constant 1.000000e+00 : f32
    %21 = vector.broadcast %cst_15 : f32 to vector<8x128xf32>
    %22 = arith.addf %21, %20 : vector<8x128xf32>
    %23 = arith.divf %21, %22 : vector<8x128xf32>
    %24 = vector.extract_strided_slice %17 {offsets = [0, 128], sizes = [8, 128], strides = [1, 1]} : vector<8x512xf32> to vector<8x128xf32>
    %25 = arith.negf %24 : vector<8x128xf32>
    %26 = math.exp %25 : vector<8x128xf32>
    %cst_16 = arith.constant 1.000000e+00 : f32
    %27 = vector.broadcast %cst_16 : f32 to vector<8x128xf32>
    %28 = arith.addf %27, %26 : vector<8x128xf32>
    %29 = arith.divf %27, %28 : vector<8x128xf32>
    %30 = vector.extract_strided_slice %17 {offsets = [0, 256], sizes = [8, 128], strides = [1, 1]} : vector<8x512xf32> to vector<8x128xf32>
    %31 = math.tanh %30 : vector<8x128xf32>
    %32 = vector.extract_strided_slice %17 {offsets = [0, 384], sizes = [8, 128], strides = [1, 1]} : vector<8x512xf32> to vector<8x128xf32>
    %33 = arith.negf %32 : vector<8x128xf32>
    %34 = math.exp %33 : vector<8x128xf32>
    %cst_17 = arith.constant 1.000000e+00 : f32
    %35 = vector.broadcast %cst_17 : f32 to vector<8x128xf32>
    %36 = arith.addf %35, %34 : vector<8x128xf32>
    %37 = arith.divf %35, %36 : vector<8x128xf32>
    %38 = arith.mulf %29, %1 : vector<8x128xf32>
    %39 = arith.mulf %23, %31 : vector<8x128xf32>
    %40 = arith.addf %38, %39 : vector<8x128xf32>
    %41 = math.tanh %40 : vector<8x128xf32>
    %42 = arith.mulf %37, %41 : vector<8x128xf32>
    %43 = arith.index_cast %13 : i32 to index
    %c0_18 = arith.constant 0 : index
    %44 = vector.load %arg8[%43, %c0_18] : memref<64x128xf32, #tpu.memory_space<vmem>>, vector<8x128xf32>
    tpu.vector_store %arg8[%43, %c0_18], %42 {strides = array<i32>} : memref<64x128xf32, #tpu.memory_space<vmem>>, vector<8x128xf32>,
    %c1_i32 = arith.constant 1 : i32
    %c8_i32_19 = arith.constant 8 : i32
    %45 = arith.muli %c1_i32, %c8_i32_19 : i32
    %46 = tpu.assume_multiple %45, 8 : i32
    %47 = arith.index_cast %46 : i32 to index
    %c0_20 = arith.constant 0 : index
    %48 = vector.load %arg9[%47, %c0_20] : memref<64x512xf32, #tpu.memory_space<vmem>>, vector<8x512xf32>
    %cst_21 = arith.constant dense<0.000000e+00> : vector<8x512xf32>
    %49 = tpu.matmul %42, %11, %cst_21 {dimension_numbers = #tpu.dot_dimension_numbers<[1], [0], [0], [1], [0, 0, 1, 1], [], []>} : vector<8x128xf32>, vector<128x512xf32>, vector<8x512xf32> -> vector<8x512xf32>
    %50 = arith.addf %48, %49 : vector<8x512xf32>
    %51 = vector.extract_strided_slice %50 {offsets = [0, 0], sizes = [8, 128], strides = [1, 1]} : vector<8x512xf32> to vector<8x128xf32>
    %52 = arith.negf %51 : vector<8x128xf32>
    %53 = math.exp %52 : vector<8x128xf32>
    %cst_22 = arith.constant 1.000000e+00 : f32
    %54 = vector.broadcast %cst_22 : f32 to vector<8x128xf32>
    %55 = arith.addf %54, %53 : vector<8x128xf32>
    %56 = arith.divf %54, %55 : vector<8x128xf32>
    %57 = vector.extract_strided_slice %50 {offsets = [0, 128], sizes = [8, 128], strides = [1, 1]} : vector<8x512xf32> to vector<8x128xf32>
    %58 = arith.negf %57 : vector<8x128xf32>
    %59 = math.exp %58 : vector<8x128xf32>
    %cst_23 = arith.constant 1.000000e+00 : f32
    %60 = vector.broadcast %cst_23 : f32 to vector<8x128xf32>
    %61 = arith.addf %60, %59 : vector<8x128xf32>
    %62 = arith.divf %60, %61 : vector<8x128xf32>
    %63 = vector.extract_strided_slice %50 {offsets = [0, 256], sizes = [8, 128], strides = [1, 1]} : vector<8x512xf32> to vector<8x128xf32>
    %64 = math.tanh %63 : vector<8x128xf32>
    %65 = vector.extract_strided_slice %50 {offsets = [0, 384], sizes = [8, 128], strides = [1, 1]} : vector<8x512xf32> to vector<8x128xf32>
    %66 = arith.negf %65 : vector<8x128xf32>
    %67 = math.exp %66 : vector<8x128xf32>
    %cst_24 = arith.constant 1.000000e+00 : f32
    %68 = vector.broadcast %cst_24 : f32 to vector<8x128xf32>
    %69 = arith.addf %68, %67 : vector<8x128xf32>
    %70 = arith.divf %68, %69 : vector<8x128xf32>
    %71 = arith.mulf %62, %40 : vector<8x128xf32>
    %72 = arith.mulf %56, %64 : vector<8x128xf32>
    %73 = arith.addf %71, %72 : vector<8x128xf32>
    %74 = math.tanh %73 : vector<8x128xf32>
    %75 = arith.mulf %70, %74 : vector<8x128xf32>
    %76 = arith.index_cast %46 : i32 to index
    %c0_25 = arith.constant 0 : index
    %77 = vector.load %arg8[%76, %c0_25] : memref<64x128xf32, #tpu.memory_space<vmem>>, vector<8x128xf32>
    tpu.vector_store %arg8[%76, %c0_25], %75 {strides = array<i32>} : memref<64x128xf32, #tpu.memory_space<vmem>>, vector<8x128xf32>,
    %c2_i32 = arith.constant 2 : i32
    %c8_i32_26 = arith.constant 8 : i32
    %78 = arith.muli %c2_i32, %c8_i32_26 : i32
    %79 = tpu.assume_multiple %78, 8 : i32
    %80 = arith.index_cast %79 : i32 to index
    %c0_27 = arith.constant 0 : index
    %81 = vector.load %arg9[%80, %c0_27] : memref<64x512xf32, #tpu.memory_space<vmem>>, vector<8x512xf32>
    %cst_28 = arith.constant dense<0.000000e+00> : vector<8x512xf32>
    %82 = tpu.matmul %75, %11, %cst_28 {dimension_numbers = #tpu.dot_dimension_numbers<[1], [0], [0], [1], [0, 0, 1, 1], [], []>} : vector<8x128xf32>, vector<128x512xf32>, vector<8x512xf32> -> vector<8x512xf32>
    %83 = arith.addf %81, %82 : vector<8x512xf32>
    %84 = vector.extract_strided_slice %83 {offsets = [0, 0], sizes = [8, 128], strides = [1, 1]} : vector<8x512xf32> to vector<8x128xf32>
    %85 = arith.negf %84 : vector<8x128xf32>
    %86 = math.exp %85 : vector<8x128xf32>
    %cst_29 = arith.constant 1.000000e+00 : f32
    %87 = vector.broadcast %cst_29 : f32 to vector<8x128xf32>
    %88 = arith.addf %87, %86 : vector<8x128xf32>
    %89 = arith.divf %87, %88 : vector<8x128xf32>
    %90 = vector.extract_strided_slice %83 {offsets = [0, 128], sizes = [8, 128], strides = [1, 1]} : vector<8x512xf32> to vector<8x128xf32>
    %91 = arith.negf %90 : vector<8x128xf32>
    %92 = math.exp %91 : vector<8x128xf32>
    %cst_30 = arith.constant 1.000000e+00 : f32
    %93 = vector.broadcast %cst_30 : f32 to vector<8x128xf32>
    %94 = arith.addf %93, %92 : vector<8x128xf32>
    %95 = arith.divf %93, %94 : vector<8x128xf32>
    %96 = vector.extract_strided_slice %83 {offsets = [0, 256], sizes = [8, 128], strides = [1, 1]} : vector<8x512xf32> to vector<8x128xf32>
    %97 = math.tanh %96 : vector<8x128xf32>
    %98 = vector.extract_strided_slice %83 {offsets = [0, 384], sizes = [8, 128], strides = [1, 1]} : vector<8x512xf32> to vector<8x128xf32>
    %99 = arith.negf %98 : vector<8x128xf32>
    %100 = math.exp %99 : vector<8x128xf32>
    %cst_31 = arith.constant 1.000000e+00 : f32
    %101 = vector.broadcast %cst_31 : f32 to vector<8x128xf32>
    %102 = arith.addf %101, %100 : vector<8x128xf32>
    %103 = arith.divf %101, %102 : vector<8x128xf32>
    %104 = arith.mulf %95, %73 : vector<8x128xf32>
    %105 = arith.mulf %89, %97 : vector<8x128xf32>
    %106 = arith.addf %104, %105 : vector<8x128xf32>
    %107 = math.tanh %106 : vector<8x128xf32>
    %108 = arith.mulf %103, %107 : vector<8x128xf32>
    %109 = arith.index_cast %79 : i32 to index
    %c0_32 = arith.constant 0 : index
    %110 = vector.load %arg8[%109, %c0_32] : memref<64x128xf32, #tpu.memory_space<vmem>>, vector<8x128xf32>
    tpu.vector_store %arg8[%109, %c0_32], %108 {strides = array<i32>} : memref<64x128xf32, #tpu.memory_space<vmem>>, vector<8x128xf32>,
    %c3_i32 = arith.constant 3 : i32
    %c8_i32_33 = arith.constant 8 : i32
    %111 = arith.muli %c3_i32, %c8_i32_33 : i32
    %112 = tpu.assume_multiple %111, 8 : i32
    %113 = arith.index_cast %112 : i32 to index
    %c0_34 = arith.constant 0 : index
    %114 = vector.load %arg9[%113, %c0_34] : memref<64x512xf32, #tpu.memory_space<vmem>>, vector<8x512xf32>
    %cst_35 = arith.constant dense<0.000000e+00> : vector<8x512xf32>
    %115 = tpu.matmul %108, %11, %cst_35 {dimension_numbers = #tpu.dot_dimension_numbers<[1], [0], [0], [1], [0, 0, 1, 1], [], []>} : vector<8x128xf32>, vector<128x512xf32>, vector<8x512xf32> -> vector<8x512xf32>
    %116 = arith.addf %114, %115 : vector<8x512xf32>
    %117 = vector.extract_strided_slice %116 {offsets = [0, 0], sizes = [8, 128], strides = [1, 1]} : vector<8x512xf32> to vector<8x128xf32>
    %118 = arith.negf %117 : vector<8x128xf32>
    %119 = math.exp %118 : vector<8x128xf32>
    %cst_36 = arith.constant 1.000000e+00 : f32
    %120 = vector.broadcast %cst_36 : f32 to vector<8x128xf32>
    %121 = arith.addf %120, %119 : vector<8x128xf32>
    %122 = arith.divf %120, %121 : vector<8x128xf32>
    %123 = vector.extract_strided_slice %116 {offsets = [0, 128], sizes = [8, 128], strides = [1, 1]} : vector<8x512xf32> to vector<8x128xf32>
    %124 = arith.negf %123 : vector<8x128xf32>
    %125 = math.exp %124 : vector<8x128xf32>
    %cst_37 = arith.constant 1.000000e+00 : f32
    %126 = vector.broadcast %cst_37 : f32 to vector<8x128xf32>
    %127 = arith.addf %126, %125 : vector<8x128xf32>
    %128 = arith.divf %126, %127 : vector<8x128xf32>
    %129 = vector.extract_strided_slice %116 {offsets = [0, 256], sizes = [8, 128], strides = [1, 1]} : vector<8x512xf32> to vector<8x128xf32>
    %130 = math.tanh %129 : vector<8x128xf32>
    %131 = vector.extract_strided_slice %116 {offsets = [0, 384], sizes = [8, 128], strides = [1, 1]} : vector<8x512xf32> to vector<8x128xf32>
    %132 = arith.negf %131 : vector<8x128xf32>
    %133 = math.exp %132 : vector<8x128xf32>
    %cst_38 = arith.constant 1.000000e+00 : f32
    %134 = vector.broadcast %cst_38 : f32 to vector<8x128xf32>
    %135 = arith.addf %134, %133 : vector<8x128xf32>
    %136 = arith.divf %134, %135 : vector<8x128xf32>
    %137 = arith.mulf %128, %106 : vector<8x128xf32>
    %138 = arith.mulf %122, %130 : vector<8x128xf32>
    %139 = arith.addf %137, %138 : vector<8x128xf32>
    %140 = math.tanh %139 : vector<8x128xf32>
    %141 = arith.mulf %136, %140 : vector<8x128xf32>
    %142 = arith.index_cast %112 : i32 to index
    %c0_39 = arith.constant 0 : index
    %143 = vector.load %arg8[%142, %c0_39] : memref<64x128xf32, #tpu.memory_space<vmem>>, vector<8x128xf32>
    tpu.vector_store %arg8[%142, %c0_39], %141 {strides = array<i32>} : memref<64x128xf32, #tpu.memory_space<vmem>>, vector<8x128xf32>,
    %c4_i32 = arith.constant 4 : i32
    %c8_i32_40 = arith.constant 8 : i32
    %144 = arith.muli %c4_i32, %c8_i32_40 : i32
    %145 = tpu.assume_multiple %144, 8 : i32
    %146 = arith.index_cast %145 : i32 to index
    %c0_41 = arith.constant 0 : index
    %147 = vector.load %arg9[%146, %c0_41] : memref<64x512xf32, #tpu.memory_space<vmem>>, vector<8x512xf32>
    %cst_42 = arith.constant dense<0.000000e+00> : vector<8x512xf32>
    %148 = tpu.matmul %141, %11, %cst_42 {dimension_numbers = #tpu.dot_dimension_numbers<[1], [0], [0], [1], [0, 0, 1, 1], [], []>} : vector<8x128xf32>, vector<128x512xf32>, vector<8x512xf32> -> vector<8x512xf32>
    %149 = arith.addf %147, %148 : vector<8x512xf32>
    %150 = vector.extract_strided_slice %149 {offsets = [0, 0], sizes = [8, 128], strides = [1, 1]} : vector<8x512xf32> to vector<8x128xf32>
    %151 = arith.negf %150 : vector<8x128xf32>
    %152 = math.exp %151 : vector<8x128xf32>
    %cst_43 = arith.constant 1.000000e+00 : f32
    %153 = vector.broadcast %cst_43 : f32 to vector<8x128xf32>
    %154 = arith.addf %153, %152 : vector<8x128xf32>
    %155 = arith.divf %153, %154 : vector<8x128xf32>
    %156 = vector.extract_strided_slice %149 {offsets = [0, 128], sizes = [8, 128], strides = [1, 1]} : vector<8x512xf32> to vector<8x128xf32>
    %157 = arith.negf %156 : vector<8x128xf32>
    %158 = math.exp %157 : vector<8x128xf32>
    %cst_44 = arith.constant 1.000000e+00 : f32
    %159 = vector.broadcast %cst_44 : f32 to vector<8x128xf32>
    %160 = arith.addf %159, %158 : vector<8x128xf32>
    %161 = arith.divf %159, %160 : vector<8x128xf32>
    %162 = vector.extract_strided_slice %149 {offsets = [0, 256], sizes = [8, 128], strides = [1, 1]} : vector<8x512xf32> to vector<8x128xf32>
    %163 = math.tanh %162 : vector<8x128xf32>
    %164 = vector.extract_strided_slice %149 {offsets = [0, 384], sizes = [8, 128], strides = [1, 1]} : vector<8x512xf32> to vector<8x128xf32>
    %165 = arith.negf %164 : vector<8x128xf32>
    %166 = math.exp %165 : vector<8x128xf32>
    %cst_45 = arith.constant 1.000000e+00 : f32
    %167 = vector.broadcast %cst_45 : f32 to vector<8x128xf32>
    %168 = arith.addf %167, %166 : vector<8x128xf32>
    %169 = arith.divf %167, %168 : vector<8x128xf32>
    %170 = arith.mulf %161, %139 : vector<8x128xf32>
    %171 = arith.mulf %155, %163 : vector<8x128xf32>
    %172 = arith.addf %170, %171 : vector<8x128xf32>
    %173 = math.tanh %172 : vector<8x128xf32>
    %174 = arith.mulf %169, %173 : vector<8x128xf32>
    %175 = arith.index_cast %145 : i32 to index
    %c0_46 = arith.constant 0 : index
    %176 = vector.load %arg8[%175, %c0_46] : memref<64x128xf32, #tpu.memory_space<vmem>>, vector<8x128xf32>
    tpu.vector_store %arg8[%175, %c0_46], %174 {strides = array<i32>} : memref<64x128xf32, #tpu.memory_space<vmem>>, vector<8x128xf32>,
    %c5_i32 = arith.constant 5 : i32
    %c8_i32_47 = arith.constant 8 : i32
    %177 = arith.muli %c5_i32, %c8_i32_47 : i32
    %178 = tpu.assume_multiple %177, 8 : i32
    %179 = arith.index_cast %178 : i32 to index
    %c0_48 = arith.constant 0 : index
    %180 = vector.load %arg9[%179, %c0_48] : memref<64x512xf32, #tpu.memory_space<vmem>>, vector<8x512xf32>
    %cst_49 = arith.constant dense<0.000000e+00> : vector<8x512xf32>
    %181 = tpu.matmul %174, %11, %cst_49 {dimension_numbers = #tpu.dot_dimension_numbers<[1], [0], [0], [1], [0, 0, 1, 1], [], []>} : vector<8x128xf32>, vector<128x512xf32>, vector<8x512xf32> -> vector<8x512xf32>
    %182 = arith.addf %180, %181 : vector<8x512xf32>
    %183 = vector.extract_strided_slice %182 {offsets = [0, 0], sizes = [8, 128], strides = [1, 1]} : vector<8x512xf32> to vector<8x128xf32>
    %184 = arith.negf %183 : vector<8x128xf32>
    %185 = math.exp %184 : vector<8x128xf32>
    %cst_50 = arith.constant 1.000000e+00 : f32
    %186 = vector.broadcast %cst_50 : f32 to vector<8x128xf32>
    %187 = arith.addf %186, %185 : vector<8x128xf32>
    %188 = arith.divf %186, %187 : vector<8x128xf32>
    %189 = vector.extract_strided_slice %182 {offsets = [0, 128], sizes = [8, 128], strides = [1, 1]} : vector<8x512xf32> to vector<8x128xf32>
    %190 = arith.negf %189 : vector<8x128xf32>
    %191 = math.exp %190 : vector<8x128xf32>
    %cst_51 = arith.constant 1.000000e+00 : f32
    %192 = vector.broadcast %cst_51 : f32 to vector<8x128xf32>
    %193 = arith.addf %192, %191 : vector<8x128xf32>
    %194 = arith.divf %192, %193 : vector<8x128xf32>
    %195 = vector.extract_strided_slice %182 {offsets = [0, 256], sizes = [8, 128], strides = [1, 1]} : vector<8x512xf32> to vector<8x128xf32>
    %196 = math.tanh %195 : vector<8x128xf32>
    %197 = vector.extract_strided_slice %182 {offsets = [0, 384], sizes = [8, 128], strides = [1, 1]} : vector<8x512xf32> to vector<8x128xf32>
    %198 = arith.negf %197 : vector<8x128xf32>
    %199 = math.exp %198 : vector<8x128xf32>
    %cst_52 = arith.constant 1.000000e+00 : f32
    %200 = vector.broadcast %cst_52 : f32 to vector<8x128xf32>
    %201 = arith.addf %200, %199 : vector<8x128xf32>
    %202 = arith.divf %200, %201 : vector<8x128xf32>
    %203 = arith.mulf %194, %172 : vector<8x128xf32>
    %204 = arith.mulf %188, %196 : vector<8x128xf32>
    %205 = arith.addf %203, %204 : vector<8x128xf32>
    %206 = math.tanh %205 : vector<8x128xf32>
    %207 = arith.mulf %202, %206 : vector<8x128xf32>
    %208 = arith.index_cast %178 : i32 to index
    %c0_53 = arith.constant 0 : index
    %209 = vector.load %arg8[%208, %c0_53] : memref<64x128xf32, #tpu.memory_space<vmem>>, vector<8x128xf32>
    tpu.vector_store %arg8[%208, %c0_53], %207 {strides = array<i32>} : memref<64x128xf32, #tpu.memory_space<vmem>>, vector<8x128xf32>,
    %c6_i32 = arith.constant 6 : i32
    %c8_i32_54 = arith.constant 8 : i32
    %210 = arith.muli %c6_i32, %c8_i32_54 : i32
    %211 = tpu.assume_multiple %210, 8 : i32
    %212 = arith.index_cast %211 : i32 to index
    %c0_55 = arith.constant 0 : index
    %213 = vector.load %arg9[%212, %c0_55] : memref<64x512xf32, #tpu.memory_space<vmem>>, vector<8x512xf32>
    %cst_56 = arith.constant dense<0.000000e+00> : vector<8x512xf32>
    %214 = tpu.matmul %207, %11, %cst_56 {dimension_numbers = #tpu.dot_dimension_numbers<[1], [0], [0], [1], [0, 0, 1, 1], [], []>} : vector<8x128xf32>, vector<128x512xf32>, vector<8x512xf32> -> vector<8x512xf32>
    %215 = arith.addf %213, %214 : vector<8x512xf32>
    %216 = vector.extract_strided_slice %215 {offsets = [0, 0], sizes = [8, 128], strides = [1, 1]} : vector<8x512xf32> to vector<8x128xf32>
    %217 = arith.negf %216 : vector<8x128xf32>
    %218 = math.exp %217 : vector<8x128xf32>
    %cst_57 = arith.constant 1.000000e+00 : f32
    %219 = vector.broadcast %cst_57 : f32 to vector<8x128xf32>
    %220 = arith.addf %219, %218 : vector<8x128xf32>
    %221 = arith.divf %219, %220 : vector<8x128xf32>
    %222 = vector.extract_strided_slice %215 {offsets = [0, 128], sizes = [8, 128], strides = [1, 1]} : vector<8x512xf32> to vector<8x128xf32>
    %223 = arith.negf %222 : vector<8x128xf32>
    %224 = math.exp %223 : vector<8x128xf32>
    %cst_58 = arith.constant 1.000000e+00 : f32
    %225 = vector.broadcast %cst_58 : f32 to vector<8x128xf32>
    %226 = arith.addf %225, %224 : vector<8x128xf32>
    %227 = arith.divf %225, %226 : vector<8x128xf32>
    %228 = vector.extract_strided_slice %215 {offsets = [0, 256], sizes = [8, 128], strides = [1, 1]} : vector<8x512xf32> to vector<8x128xf32>
    %229 = math.tanh %228 : vector<8x128xf32>
    %230 = vector.extract_strided_slice %215 {offsets = [0, 384], sizes = [8, 128], strides = [1, 1]} : vector<8x512xf32> to vector<8x128xf32>
    %231 = arith.negf %230 : vector<8x128xf32>
    %232 = math.exp %231 : vector<8x128xf32>
    %cst_59 = arith.constant 1.000000e+00 : f32
    %233 = vector.broadcast %cst_59 : f32 to vector<8x128xf32>
    %234 = arith.addf %233, %232 : vector<8x128xf32>
    %235 = arith.divf %233, %234 : vector<8x128xf32>
    %236 = arith.mulf %227, %205 : vector<8x128xf32>
    %237 = arith.mulf %221, %229 : vector<8x128xf32>
    %238 = arith.addf %236, %237 : vector<8x128xf32>
    %239 = math.tanh %238 : vector<8x128xf32>
    %240 = arith.mulf %235, %239 : vector<8x128xf32>
    %241 = arith.index_cast %211 : i32 to index
    %c0_60 = arith.constant 0 : index
    %242 = vector.load %arg8[%241, %c0_60] : memref<64x128xf32, #tpu.memory_space<vmem>>, vector<8x128xf32>
    tpu.vector_store %arg8[%241, %c0_60], %240 {strides = array<i32>} : memref<64x128xf32, #tpu.memory_space<vmem>>, vector<8x128xf32>,
    %c7_i32 = arith.constant 7 : i32
    %c8_i32_61 = arith.constant 8 : i32
    %243 = arith.muli %c7_i32, %c8_i32_61 : i32
    %244 = tpu.assume_multiple %243, 8 : i32
    %245 = arith.index_cast %244 : i32 to index
    %c0_62 = arith.constant 0 : index
    %246 = vector.load %arg9[%245, %c0_62] : memref<64x512xf32, #tpu.memory_space<vmem>>, vector<8x512xf32>
    %cst_63 = arith.constant dense<0.000000e+00> : vector<8x512xf32>
    %247 = tpu.matmul %240, %11, %cst_63 {dimension_numbers = #tpu.dot_dimension_numbers<[1], [0], [0], [1], [0, 0, 1, 1], [], []>} : vector<8x128xf32>, vector<128x512xf32>, vector<8x512xf32> -> vector<8x512xf32>
    %248 = arith.addf %246, %247 : vector<8x512xf32>
    %249 = vector.extract_strided_slice %248 {offsets = [0, 0], sizes = [8, 128], strides = [1, 1]} : vector<8x512xf32> to vector<8x128xf32>
    %250 = arith.negf %249 : vector<8x128xf32>
    %251 = math.exp %250 : vector<8x128xf32>
    %cst_64 = arith.constant 1.000000e+00 : f32
    %252 = vector.broadcast %cst_64 : f32 to vector<8x128xf32>
    %253 = arith.addf %252, %251 : vector<8x128xf32>
    %254 = arith.divf %252, %253 : vector<8x128xf32>
    %255 = vector.extract_strided_slice %248 {offsets = [0, 128], sizes = [8, 128], strides = [1, 1]} : vector<8x512xf32> to vector<8x128xf32>
    %256 = arith.negf %255 : vector<8x128xf32>
    %257 = math.exp %256 : vector<8x128xf32>
    %cst_65 = arith.constant 1.000000e+00 : f32
    %258 = vector.broadcast %cst_65 : f32 to vector<8x128xf32>
    %259 = arith.addf %258, %257 : vector<8x128xf32>
    %260 = arith.divf %258, %259 : vector<8x128xf32>
    %261 = vector.extract_strided_slice %248 {offsets = [0, 256], sizes = [8, 128], strides = [1, 1]} : vector<8x512xf32> to vector<8x128xf32>
    %262 = math.tanh %261 : vector<8x128xf32>
    %263 = vector.extract_strided_slice %248 {offsets = [0, 384], sizes = [8, 128], strides = [1, 1]} : vector<8x512xf32> to vector<8x128xf32>
    %264 = arith.negf %263 : vector<8x128xf32>
    %265 = math.exp %264 : vector<8x128xf32>
    %cst_66 = arith.constant 1.000000e+00 : f32
    %266 = vector.broadcast %cst_66 : f32 to vector<8x128xf32>
    %267 = arith.addf %266, %265 : vector<8x128xf32>
    %268 = arith.divf %266, %267 : vector<8x128xf32>
    %269 = arith.mulf %260, %238 : vector<8x128xf32>
    %270 = arith.mulf %254, %262 : vector<8x128xf32>
    %271 = arith.addf %269, %270 : vector<8x128xf32>
    %272 = math.tanh %271 : vector<8x128xf32>
    %273 = arith.mulf %268, %272 : vector<8x128xf32>
    %274 = arith.index_cast %244 : i32 to index
    %c0_67 = arith.constant 0 : index
    %275 = vector.load %arg8[%274, %c0_67] : memref<64x128xf32, #tpu.memory_space<vmem>>, vector<8x128xf32>
    tpu.vector_store %arg8[%274, %c0_67], %273 {strides = array<i32>} : memref<64x128xf32, #tpu.memory_space<vmem>>, vector<8x128xf32>,
    %c8_i32_68 = arith.constant 8 : i32
    %c0_69 = arith.constant 0 : index
    %c0_70 = arith.constant 0 : index
    %276 = vector.load %arg8[%c0_69, %c0_70] : memref<64x128xf32, #tpu.memory_space<vmem>>, vector<64x128xf32>
    %c0_71 = arith.constant 0 : index
    %c0_72 = arith.constant 0 : index
    %c0_73 = arith.constant 0 : index
    %277 = vector.load %arg2[%c0_71, %c0_72, %c0_73] : memref<2x128x512xf32, #tpu.memory_space<vmem>>, vector<1x128x512xf32>
    %278 = vector.shape_cast %277 : vector<1x128x512xf32> to vector<128x512xf32>
    %cst_74 = arith.constant dense<0.000000e+00> : vector<64x512xf32>
    %279 = tpu.matmul %276, %278, %cst_74 {dimension_numbers = #tpu.dot_dimension_numbers<[1], [0], [0], [1], [0, 0, 1, 1], [], []>} : vector<64x128xf32>, vector<128x512xf32>, vector<64x512xf32> -> vector<64x512xf32>
    %c1 = arith.constant 1 : index
    %c0_75 = arith.constant 0 : index
    %c0_76 = arith.constant 0 : index
    %280 = vector.load %arg4[%c1, %c0_75, %c0_76] : memref<3x1x512xf32, #tpu.memory_space<vmem>>, vector<1x1x512xf32>
    %281 = vector.shape_cast %280 : vector<1x1x512xf32> to vector<1x512xf32>
    %282 = vector.broadcast %281 : vector<1x512xf32> to vector<64x512xf32>
    %283 = arith.addf %279, %282 : vector<64x512xf32>
    %c0_77 = arith.constant 0 : index
    %c0_78 = arith.constant 0 : index
    %284 = vector.load %arg9[%c0_77, %c0_78] : memref<64x512xf32, #tpu.memory_space<vmem>>, vector<64x512xf32>
    tpu.vector_store %arg9[%c0_77, %c0_78], %283 {strides = array<i32>} : memref<64x512xf32, #tpu.memory_space<vmem>>, vector<64x512xf32>,
    %c1_79 = arith.constant 1 : index
    %c0_80 = arith.constant 0 : index
    %c0_81 = arith.constant 0 : index
    %285 = vector.load %arg3[%c1_79, %c0_80, %c0_81] : memref<3x128x512xf32, #tpu.memory_space<vmem>>, vector<1x128x512xf32>
    %286 = vector.shape_cast %285 : vector<1x128x512xf32> to vector<128x512xf32>
    %c0_i32_82 = arith.constant 0 : i32
    %c8_i32_83 = arith.constant 8 : i32
    %287 = arith.muli %c0_i32_82, %c8_i32_83 : i32
    %288 = tpu.assume_multiple %287, 8 : i32
    %289 = arith.index_cast %288 : i32 to index
    %c0_84 = arith.constant 0 : index
    %290 = vector.load %arg9[%289, %c0_84] : memref<64x512xf32, #tpu.memory_space<vmem>>, vector<8x512xf32>
    %cst_85 = arith.constant dense<0.000000e+00> : vector<8x512xf32>
    %291 = tpu.matmul %0, %286, %cst_85 {dimension_numbers = #tpu.dot_dimension_numbers<[1], [0], [0], [1], [0, 0, 1, 1], [], []>} : vector<8x128xf32>, vector<128x512xf32>, vector<8x512xf32> -> vector<8x512xf32>
    %292 = arith.addf %290, %291 : vector<8x512xf32>
    %293 = vector.extract_strided_slice %292 {offsets = [0, 0], sizes = [8, 128], strides = [1, 1]} : vector<8x512xf32> to vector<8x128xf32>
    %294 = arith.negf %293 : vector<8x128xf32>
    %295 = math.exp %294 : vector<8x128xf32>
    %cst_86 = arith.constant 1.000000e+00 : f32
    %296 = vector.broadcast %cst_86 : f32 to vector<8x128xf32>
    %297 = arith.addf %296, %295 : vector<8x128xf32>
    %298 = arith.divf %296, %297 : vector<8x128xf32>
    %299 = vector.extract_strided_slice %292 {offsets = [0, 128], sizes = [8, 128], strides = [1, 1]} : vector<8x512xf32> to vector<8x128xf32>
    %300 = arith.negf %299 : vector<8x128xf32>
    %301 = math.exp %300 : vector<8x128xf32>
    %cst_87 = arith.constant 1.000000e+00 : f32
    %302 = vector.broadcast %cst_87 : f32 to vector<8x128xf32>
    %303 = arith.addf %302, %301 : vector<8x128xf32>
    %304 = arith.divf %302, %303 : vector<8x128xf32>
    %305 = vector.extract_strided_slice %292 {offsets = [0, 256], sizes = [8, 128], strides = [1, 1]} : vector<8x512xf32> to vector<8x128xf32>
    %306 = math.tanh %305 : vector<8x128xf32>
    %307 = vector.extract_strided_slice %292 {offsets = [0, 384], sizes = [8, 128], strides = [1, 1]} : vector<8x512xf32> to vector<8x128xf32>
    %308 = arith.negf %307 : vector<8x128xf32>
    %309 = math.exp %308 : vector<8x128xf32>
    %cst_88 = arith.constant 1.000000e+00 : f32
    %310 = vector.broadcast %cst_88 : f32 to vector<8x128xf32>
    %311 = arith.addf %310, %309 : vector<8x128xf32>
    %312 = arith.divf %310, %311 : vector<8x128xf32>
    %313 = arith.mulf %304, %1 : vector<8x128xf32>
    %314 = arith.mulf %298, %306 : vector<8x128xf32>
    %315 = arith.addf %313, %314 : vector<8x128xf32>
    %316 = math.tanh %315 : vector<8x128xf32>
    %317 = arith.mulf %312, %316 : vector<8x128xf32>
    %318 = arith.index_cast %288 : i32 to index
    %c0_89 = arith.constant 0 : index
    %319 = vector.load %arg8[%318, %c0_89] : memref<64x128xf32, #tpu.memory_space<vmem>>, vector<8x128xf32>
    tpu.vector_store %arg8[%318, %c0_89], %317 {strides = array<i32>} : memref<64x128xf32, #tpu.memory_space<vmem>>, vector<8x128xf32>,
    %c1_i32_90 = arith.constant 1 : i32
    %c8_i32_91 = arith.constant 8 : i32
    %320 = arith.muli %c1_i32_90, %c8_i32_91 : i32
    %321 = tpu.assume_multiple %320, 8 : i32
    %322 = arith.index_cast %321 : i32 to index
    %c0_92 = arith.constant 0 : index
    %323 = vector.load %arg9[%322, %c0_92] : memref<64x512xf32, #tpu.memory_space<vmem>>, vector<8x512xf32>
    %cst_93 = arith.constant dense<0.000000e+00> : vector<8x512xf32>
    %324 = tpu.matmul %317, %286, %cst_93 {dimension_numbers = #tpu.dot_dimension_numbers<[1], [0], [0], [1], [0, 0, 1, 1], [], []>} : vector<8x128xf32>, vector<128x512xf32>, vector<8x512xf32> -> vector<8x512xf32>
    %325 = arith.addf %323, %324 : vector<8x512xf32>
    %326 = vector.extract_strided_slice %325 {offsets = [0, 0], sizes = [8, 128], strides = [1, 1]} : vector<8x512xf32> to vector<8x128xf32>
    %327 = arith.negf %326 : vector<8x128xf32>
    %328 = math.exp %327 : vector<8x128xf32>
    %cst_94 = arith.constant 1.000000e+00 : f32
    %329 = vector.broadcast %cst_94 : f32 to vector<8x128xf32>
    %330 = arith.addf %329, %328 : vector<8x128xf32>
    %331 = arith.divf %329, %330 : vector<8x128xf32>
    %332 = vector.extract_strided_slice %325 {offsets = [0, 128], sizes = [8, 128], strides = [1, 1]} : vector<8x512xf32> to vector<8x128xf32>
    %333 = arith.negf %332 : vector<8x128xf32>
    %334 = math.exp %333 : vector<8x128xf32>
    %cst_95 = arith.constant 1.000000e+00 : f32
    %335 = vector.broadcast %cst_95 : f32 to vector<8x128xf32>
    %336 = arith.addf %335, %334 : vector<8x128xf32>
    %337 = arith.divf %335, %336 : vector<8x128xf32>
    %338 = vector.extract_strided_slice %325 {offsets = [0, 256], sizes = [8, 128], strides = [1, 1]} : vector<8x512xf32> to vector<8x128xf32>
    %339 = math.tanh %338 : vector<8x128xf32>
    %340 = vector.extract_strided_slice %325 {offsets = [0, 384], sizes = [8, 128], strides = [1, 1]} : vector<8x512xf32> to vector<8x128xf32>
    %341 = arith.negf %340 : vector<8x128xf32>
    %342 = math.exp %341 : vector<8x128xf32>
    %cst_96 = arith.constant 1.000000e+00 : f32
    %343 = vector.broadcast %cst_96 : f32 to vector<8x128xf32>
    %344 = arith.addf %343, %342 : vector<8x128xf32>
    %345 = arith.divf %343, %344 : vector<8x128xf32>
    %346 = arith.mulf %337, %315 : vector<8x128xf32>
    %347 = arith.mulf %331, %339 : vector<8x128xf32>
    %348 = arith.addf %346, %347 : vector<8x128xf32>
    %349 = math.tanh %348 : vector<8x128xf32>
    %350 = arith.mulf %345, %349 : vector<8x128xf32>
    %351 = arith.index_cast %321 : i32 to index
    %c0_97 = arith.constant 0 : index
    %352 = vector.load %arg8[%351, %c0_97] : memref<64x128xf32, #tpu.memory_space<vmem>>, vector<8x128xf32>
    tpu.vector_store %arg8[%351, %c0_97], %350 {strides = array<i32>} : memref<64x128xf32, #tpu.memory_space<vmem>>, vector<8x128xf32>,
    %c2_i32_98 = arith.constant 2 : i32
    %c8_i32_99 = arith.constant 8 : i32
    %353 = arith.muli %c2_i32_98, %c8_i32_99 : i32
    %354 = tpu.assume_multiple %353, 8 : i32
    %355 = arith.index_cast %354 : i32 to index
    %c0_100 = arith.constant 0 : index
    %356 = vector.load %arg9[%355, %c0_100] : memref<64x512xf32, #tpu.memory_space<vmem>>, vector<8x512xf32>
    %cst_101 = arith.constant dense<0.000000e+00> : vector<8x512xf32>
    %357 = tpu.matmul %350, %286, %cst_101 {dimension_numbers = #tpu.dot_dimension_numbers<[1], [0], [0], [1], [0, 0, 1, 1], [], []>} : vector<8x128xf32>, vector<128x512xf32>, vector<8x512xf32> -> vector<8x512xf32>
    %358 = arith.addf %356, %357 : vector<8x512xf32>
    %359 = vector.extract_strided_slice %358 {offsets = [0, 0], sizes = [8, 128], strides = [1, 1]} : vector<8x512xf32> to vector<8x128xf32>
    %360 = arith.negf %359 : vector<8x128xf32>
    %361 = math.exp %360 : vector<8x128xf32>
    %cst_102 = arith.constant 1.000000e+00 : f32
    %362 = vector.broadcast %cst_102 : f32 to vector<8x128xf32>
    %363 = arith.addf %362, %361 : vector<8x128xf32>
    %364 = arith.divf %362, %363 : vector<8x128xf32>
    %365 = vector.extract_strided_slice %358 {offsets = [0, 128], sizes = [8, 128], strides = [1, 1]} : vector<8x512xf32> to vector<8x128xf32>
    %366 = arith.negf %365 : vector<8x128xf32>
    %367 = math.exp %366 : vector<8x128xf32>
    %cst_103 = arith.constant 1.000000e+00 : f32
    %368 = vector.broadcast %cst_103 : f32 to vector<8x128xf32>
    %369 = arith.addf %368, %367 : vector<8x128xf32>
    %370 = arith.divf %368, %369 : vector<8x128xf32>
    %371 = vector.extract_strided_slice %358 {offsets = [0, 256], sizes = [8, 128], strides = [1, 1]} : vector<8x512xf32> to vector<8x128xf32>
    %372 = math.tanh %371 : vector<8x128xf32>
    %373 = vector.extract_strided_slice %358 {offsets = [0, 384], sizes = [8, 128], strides = [1, 1]} : vector<8x512xf32> to vector<8x128xf32>
    %374 = arith.negf %373 : vector<8x128xf32>
    %375 = math.exp %374 : vector<8x128xf32>
    %cst_104 = arith.constant 1.000000e+00 : f32
    %376 = vector.broadcast %cst_104 : f32 to vector<8x128xf32>
    %377 = arith.addf %376, %375 : vector<8x128xf32>
    %378 = arith.divf %376, %377 : vector<8x128xf32>
    %379 = arith.mulf %370, %348 : vector<8x128xf32>
    %380 = arith.mulf %364, %372 : vector<8x128xf32>
    %381 = arith.addf %379, %380 : vector<8x128xf32>
    %382 = math.tanh %381 : vector<8x128xf32>
    %383 = arith.mulf %378, %382 : vector<8x128xf32>
    %384 = arith.index_cast %354 : i32 to index
    %c0_105 = arith.constant 0 : index
    %385 = vector.load %arg8[%384, %c0_105] : memref<64x128xf32, #tpu.memory_space<vmem>>, vector<8x128xf32>
    tpu.vector_store %arg8[%384, %c0_105], %383 {strides = array<i32>} : memref<64x128xf32, #tpu.memory_space<vmem>>, vector<8x128xf32>,
    %c3_i32_106 = arith.constant 3 : i32
    %c8_i32_107 = arith.constant 8 : i32
    %386 = arith.muli %c3_i32_106, %c8_i32_107 : i32
    %387 = tpu.assume_multiple %386, 8 : i32
    %388 = arith.index_cast %387 : i32 to index
    %c0_108 = arith.constant 0 : index
    %389 = vector.load %arg9[%388, %c0_108] : memref<64x512xf32, #tpu.memory_space<vmem>>, vector<8x512xf32>
    %cst_109 = arith.constant dense<0.000000e+00> : vector<8x512xf32>
    %390 = tpu.matmul %383, %286, %cst_109 {dimension_numbers = #tpu.dot_dimension_numbers<[1], [0], [0], [1], [0, 0, 1, 1], [], []>} : vector<8x128xf32>, vector<128x512xf32>, vector<8x512xf32> -> vector<8x512xf32>
    %391 = arith.addf %389, %390 : vector<8x512xf32>
    %392 = vector.extract_strided_slice %391 {offsets = [0, 0], sizes = [8, 128], strides = [1, 1]} : vector<8x512xf32> to vector<8x128xf32>
    %393 = arith.negf %392 : vector<8x128xf32>
    %394 = math.exp %393 : vector<8x128xf32>
    %cst_110 = arith.constant 1.000000e+00 : f32
    %395 = vector.broadcast %cst_110 : f32 to vector<8x128xf32>
    %396 = arith.addf %395, %394 : vector<8x128xf32>
    %397 = arith.divf %395, %396 : vector<8x128xf32>
    %398 = vector.extract_strided_slice %391 {offsets = [0, 128], sizes = [8, 128], strides = [1, 1]} : vector<8x512xf32> to vector<8x128xf32>
    %399 = arith.negf %398 : vector<8x128xf32>
    %400 = math.exp %399 : vector<8x128xf32>
    %cst_111 = arith.constant 1.000000e+00 : f32
    %401 = vector.broadcast %cst_111 : f32 to vector<8x128xf32>
    %402 = arith.addf %401, %400 : vector<8x128xf32>
    %403 = arith.divf %401, %402 : vector<8x128xf32>
    %404 = vector.extract_strided_slice %391 {offsets = [0, 256], sizes = [8, 128], strides = [1, 1]} : vector<8x512xf32> to vector<8x128xf32>
    %405 = math.tanh %404 : vector<8x128xf32>
    %406 = vector.extract_strided_slice %391 {offsets = [0, 384], sizes = [8, 128], strides = [1, 1]} : vector<8x512xf32> to vector<8x128xf32>
    %407 = arith.negf %406 : vector<8x128xf32>
    %408 = math.exp %407 : vector<8x128xf32>
    %cst_112 = arith.constant 1.000000e+00 : f32
    %409 = vector.broadcast %cst_112 : f32 to vector<8x128xf32>
    %410 = arith.addf %409, %408 : vector<8x128xf32>
    %411 = arith.divf %409, %410 : vector<8x128xf32>
    %412 = arith.mulf %403, %381 : vector<8x128xf32>
    %413 = arith.mulf %397, %405 : vector<8x128xf32>
    %414 = arith.addf %412, %413 : vector<8x128xf32>
    %415 = math.tanh %414 : vector<8x128xf32>
    %416 = arith.mulf %411, %415 : vector<8x128xf32>
    %417 = arith.index_cast %387 : i32 to index
    %c0_113 = arith.constant 0 : index
    %418 = vector.load %arg8[%417, %c0_113] : memref<64x128xf32, #tpu.memory_space<vmem>>, vector<8x128xf32>
    tpu.vector_store %arg8[%417, %c0_113], %416 {strides = array<i32>} : memref<64x128xf32, #tpu.memory_space<vmem>>, vector<8x128xf32>,
    %c4_i32_114 = arith.constant 4 : i32
    %c8_i32_115 = arith.constant 8 : i32
    %419 = arith.muli %c4_i32_114, %c8_i32_115 : i32
    %420 = tpu.assume_multiple %419, 8 : i32
    %421 = arith.index_cast %420 : i32 to index
    %c0_116 = arith.constant 0 : index
    %422 = vector.load %arg9[%421, %c0_116] : memref<64x512xf32, #tpu.memory_space<vmem>>, vector<8x512xf32>
    %cst_117 = arith.constant dense<0.000000e+00> : vector<8x512xf32>
    %423 = tpu.matmul %416, %286, %cst_117 {dimension_numbers = #tpu.dot_dimension_numbers<[1], [0], [0], [1], [0, 0, 1, 1], [], []>} : vector<8x128xf32>, vector<128x512xf32>, vector<8x512xf32> -> vector<8x512xf32>
    %424 = arith.addf %422, %423 : vector<8x512xf32>
    %425 = vector.extract_strided_slice %424 {offsets = [0, 0], sizes = [8, 128], strides = [1, 1]} : vector<8x512xf32> to vector<8x128xf32>
    %426 = arith.negf %425 : vector<8x128xf32>
    %427 = math.exp %426 : vector<8x128xf32>
    %cst_118 = arith.constant 1.000000e+00 : f32
    %428 = vector.broadcast %cst_118 : f32 to vector<8x128xf32>
    %429 = arith.addf %428, %427 : vector<8x128xf32>
    %430 = arith.divf %428, %429 : vector<8x128xf32>
    %431 = vector.extract_strided_slice %424 {offsets = [0, 128], sizes = [8, 128], strides = [1, 1]} : vector<8x512xf32> to vector<8x128xf32>
    %432 = arith.negf %431 : vector<8x128xf32>
    %433 = math.exp %432 : vector<8x128xf32>
    %cst_119 = arith.constant 1.000000e+00 : f32
    %434 = vector.broadcast %cst_119 : f32 to vector<8x128xf32>
    %435 = arith.addf %434, %433 : vector<8x128xf32>
    %436 = arith.divf %434, %435 : vector<8x128xf32>
    %437 = vector.extract_strided_slice %424 {offsets = [0, 256], sizes = [8, 128], strides = [1, 1]} : vector<8x512xf32> to vector<8x128xf32>
    %438 = math.tanh %437 : vector<8x128xf32>
    %439 = vector.extract_strided_slice %424 {offsets = [0, 384], sizes = [8, 128], strides = [1, 1]} : vector<8x512xf32> to vector<8x128xf32>
    %440 = arith.negf %439 : vector<8x128xf32>
    %441 = math.exp %440 : vector<8x128xf32>
    %cst_120 = arith.constant 1.000000e+00 : f32
    %442 = vector.broadcast %cst_120 : f32 to vector<8x128xf32>
    %443 = arith.addf %442, %441 : vector<8x128xf32>
    %444 = arith.divf %442, %443 : vector<8x128xf32>
    %445 = arith.mulf %436, %414 : vector<8x128xf32>
    %446 = arith.mulf %430, %438 : vector<8x128xf32>
    %447 = arith.addf %445, %446 : vector<8x128xf32>
    %448 = math.tanh %447 : vector<8x128xf32>
    %449 = arith.mulf %444, %448 : vector<8x128xf32>
    %450 = arith.index_cast %420 : i32 to index
    %c0_121 = arith.constant 0 : index
    %451 = vector.load %arg8[%450, %c0_121] : memref<64x128xf32, #tpu.memory_space<vmem>>, vector<8x128xf32>
    tpu.vector_store %arg8[%450, %c0_121], %449 {strides = array<i32>} : memref<64x128xf32, #tpu.memory_space<vmem>>, vector<8x128xf32>,
    %c5_i32_122 = arith.constant 5 : i32
    %c8_i32_123 = arith.constant 8 : i32
    %452 = arith.muli %c5_i32_122, %c8_i32_123 : i32
    %453 = tpu.assume_multiple %452, 8 : i32
    %454 = arith.index_cast %453 : i32 to index
    %c0_124 = arith.constant 0 : index
    %455 = vector.load %arg9[%454, %c0_124] : memref<64x512xf32, #tpu.memory_space<vmem>>, vector<8x512xf32>
    %cst_125 = arith.constant dense<0.000000e+00> : vector<8x512xf32>
    %456 = tpu.matmul %449, %286, %cst_125 {dimension_numbers = #tpu.dot_dimension_numbers<[1], [0], [0], [1], [0, 0, 1, 1], [], []>} : vector<8x128xf32>, vector<128x512xf32>, vector<8x512xf32> -> vector<8x512xf32>
    %457 = arith.addf %455, %456 : vector<8x512xf32>
    %458 = vector.extract_strided_slice %457 {offsets = [0, 0], sizes = [8, 128], strides = [1, 1]} : vector<8x512xf32> to vector<8x128xf32>
    %459 = arith.negf %458 : vector<8x128xf32>
    %460 = math.exp %459 : vector<8x128xf32>
    %cst_126 = arith.constant 1.000000e+00 : f32
    %461 = vector.broadcast %cst_126 : f32 to vector<8x128xf32>
    %462 = arith.addf %461, %460 : vector<8x128xf32>
    %463 = arith.divf %461, %462 : vector<8x128xf32>
    %464 = vector.extract_strided_slice %457 {offsets = [0, 128], sizes = [8, 128], strides = [1, 1]} : vector<8x512xf32> to vector<8x128xf32>
    %465 = arith.negf %464 : vector<8x128xf32>
    %466 = math.exp %465 : vector<8x128xf32>
    %cst_127 = arith.constant 1.000000e+00 : f32
    %467 = vector.broadcast %cst_127 : f32 to vector<8x128xf32>
    %468 = arith.addf %467, %466 : vector<8x128xf32>
    %469 = arith.divf %467, %468 : vector<8x128xf32>
    %470 = vector.extract_strided_slice %457 {offsets = [0, 256], sizes = [8, 128], strides = [1, 1]} : vector<8x512xf32> to vector<8x128xf32>
    %471 = math.tanh %470 : vector<8x128xf32>
    %472 = vector.extract_strided_slice %457 {offsets = [0, 384], sizes = [8, 128], strides = [1, 1]} : vector<8x512xf32> to vector<8x128xf32>
    %473 = arith.negf %472 : vector<8x128xf32>
    %474 = math.exp %473 : vector<8x128xf32>
    %cst_128 = arith.constant 1.000000e+00 : f32
    %475 = vector.broadcast %cst_128 : f32 to vector<8x128xf32>
    %476 = arith.addf %475, %474 : vector<8x128xf32>
    %477 = arith.divf %475, %476 : vector<8x128xf32>
    %478 = arith.mulf %469, %447 : vector<8x128xf32>
    %479 = arith.mulf %463, %471 : vector<8x128xf32>
    %480 = arith.addf %478, %479 : vector<8x128xf32>
    %481 = math.tanh %480 : vector<8x128xf32>
    %482 = arith.mulf %477, %481 : vector<8x128xf32>
    %483 = arith.index_cast %453 : i32 to index
    %c0_129 = arith.constant 0 : index
    %484 = vector.load %arg8[%483, %c0_129] : memref<64x128xf32, #tpu.memory_space<vmem>>, vector<8x128xf32>
    tpu.vector_store %arg8[%483, %c0_129], %482 {strides = array<i32>} : memref<64x128xf32, #tpu.memory_space<vmem>>, vector<8x128xf32>,
    %c6_i32_130 = arith.constant 6 : i32
    %c8_i32_131 = arith.constant 8 : i32
    %485 = arith.muli %c6_i32_130, %c8_i32_131 : i32
    %486 = tpu.assume_multiple %485, 8 : i32
    %487 = arith.index_cast %486 : i32 to index
    %c0_132 = arith.constant 0 : index
    %488 = vector.load %arg9[%487, %c0_132] : memref<64x512xf32, #tpu.memory_space<vmem>>, vector<8x512xf32>
    %cst_133 = arith.constant dense<0.000000e+00> : vector<8x512xf32>
    %489 = tpu.matmul %482, %286, %cst_133 {dimension_numbers = #tpu.dot_dimension_numbers<[1], [0], [0], [1], [0, 0, 1, 1], [], []>} : vector<8x128xf32>, vector<128x512xf32>, vector<8x512xf32> -> vector<8x512xf32>
    %490 = arith.addf %488, %489 : vector<8x512xf32>
    %491 = vector.extract_strided_slice %490 {offsets = [0, 0], sizes = [8, 128], strides = [1, 1]} : vector<8x512xf32> to vector<8x128xf32>
    %492 = arith.negf %491 : vector<8x128xf32>
    %493 = math.exp %492 : vector<8x128xf32>
    %cst_134 = arith.constant 1.000000e+00 : f32
    %494 = vector.broadcast %cst_134 : f32 to vector<8x128xf32>
    %495 = arith.addf %494, %493 : vector<8x128xf32>
    %496 = arith.divf %494, %495 : vector<8x128xf32>
    %497 = vector.extract_strided_slice %490 {offsets = [0, 128], sizes = [8, 128], strides = [1, 1]} : vector<8x512xf32> to vector<8x128xf32>
    %498 = arith.negf %497 : vector<8x128xf32>
    %499 = math.exp %498 : vector<8x128xf32>
    %cst_135 = arith.constant 1.000000e+00 : f32
    %500 = vector.broadcast %cst_135 : f32 to vector<8x128xf32>
    %501 = arith.addf %500, %499 : vector<8x128xf32>
    %502 = arith.divf %500, %501 : vector<8x128xf32>
    %503 = vector.extract_strided_slice %490 {offsets = [0, 256], sizes = [8, 128], strides = [1, 1]} : vector<8x512xf32> to vector<8x128xf32>
    %504 = math.tanh %503 : vector<8x128xf32>
    %505 = vector.extract_strided_slice %490 {offsets = [0, 384], sizes = [8, 128], strides = [1, 1]} : vector<8x512xf32> to vector<8x128xf32>
    %506 = arith.negf %505 : vector<8x128xf32>
    %507 = math.exp %506 : vector<8x128xf32>
    %cst_136 = arith.constant 1.000000e+00 : f32
    %508 = vector.broadcast %cst_136 : f32 to vector<8x128xf32>
    %509 = arith.addf %508, %507 : vector<8x128xf32>
    %510 = arith.divf %508, %509 : vector<8x128xf32>
    %511 = arith.mulf %502, %480 : vector<8x128xf32>
    %512 = arith.mulf %496, %504 : vector<8x128xf32>
    %513 = arith.addf %511, %512 : vector<8x128xf32>
    %514 = math.tanh %513 : vector<8x128xf32>
    %515 = arith.mulf %510, %514 : vector<8x128xf32>
    %516 = arith.index_cast %486 : i32 to index
    %c0_137 = arith.constant 0 : index
    %517 = vector.load %arg8[%516, %c0_137] : memref<64x128xf32, #tpu.memory_space<vmem>>, vector<8x128xf32>
    tpu.vector_store %arg8[%516, %c0_137], %515 {strides = array<i32>} : memref<64x128xf32, #tpu.memory_space<vmem>>, vector<8x128xf32>,
    %c7_i32_138 = arith.constant 7 : i32
    %c8_i32_139 = arith.constant 8 : i32
    %518 = arith.muli %c7_i32_138, %c8_i32_139 : i32
    %519 = tpu.assume_multiple %518, 8 : i32
    %520 = arith.index_cast %519 : i32 to index
    %c0_140 = arith.constant 0 : index
    %521 = vector.load %arg9[%520, %c0_140] : memref<64x512xf32, #tpu.memory_space<vmem>>, vector<8x512xf32>
    %cst_141 = arith.constant dense<0.000000e+00> : vector<8x512xf32>
    %522 = tpu.matmul %515, %286, %cst_141 {dimension_numbers = #tpu.dot_dimension_numbers<[1], [0], [0], [1], [0, 0, 1, 1], [], []>} : vector<8x128xf32>, vector<128x512xf32>, vector<8x512xf32> -> vector<8x512xf32>
    %523 = arith.addf %521, %522 : vector<8x512xf32>
    %524 = vector.extract_strided_slice %523 {offsets = [0, 0], sizes = [8, 128], strides = [1, 1]} : vector<8x512xf32> to vector<8x128xf32>
    %525 = arith.negf %524 : vector<8x128xf32>
    %526 = math.exp %525 : vector<8x128xf32>
    %cst_142 = arith.constant 1.000000e+00 : f32
    %527 = vector.broadcast %cst_142 : f32 to vector<8x128xf32>
    %528 = arith.addf %527, %526 : vector<8x128xf32>
    %529 = arith.divf %527, %528 : vector<8x128xf32>
    %530 = vector.extract_strided_slice %523 {offsets = [0, 128], sizes = [8, 128], strides = [1, 1]} : vector<8x512xf32> to vector<8x128xf32>
    %531 = arith.negf %530 : vector<8x128xf32>
    %532 = math.exp %531 : vector<8x128xf32>
    %cst_143 = arith.constant 1.000000e+00 : f32
    %533 = vector.broadcast %cst_143 : f32 to vector<8x128xf32>
    %534 = arith.addf %533, %532 : vector<8x128xf32>
    %535 = arith.divf %533, %534 : vector<8x128xf32>
    %536 = vector.extract_strided_slice %523 {offsets = [0, 256], sizes = [8, 128], strides = [1, 1]} : vector<8x512xf32> to vector<8x128xf32>
    %537 = math.tanh %536 : vector<8x128xf32>
    %538 = vector.extract_strided_slice %523 {offsets = [0, 384], sizes = [8, 128], strides = [1, 1]} : vector<8x512xf32> to vector<8x128xf32>
    %539 = arith.negf %538 : vector<8x128xf32>
    %540 = math.exp %539 : vector<8x128xf32>
    %cst_144 = arith.constant 1.000000e+00 : f32
    %541 = vector.broadcast %cst_144 : f32 to vector<8x128xf32>
    %542 = arith.addf %541, %540 : vector<8x128xf32>
    %543 = arith.divf %541, %542 : vector<8x128xf32>
    %544 = arith.mulf %535, %513 : vector<8x128xf32>
    %545 = arith.mulf %529, %537 : vector<8x128xf32>
    %546 = arith.addf %544, %545 : vector<8x128xf32>
    %547 = math.tanh %546 : vector<8x128xf32>
    %548 = arith.mulf %543, %547 : vector<8x128xf32>
    %549 = arith.index_cast %519 : i32 to index
    %c0_145 = arith.constant 0 : index
    %550 = vector.load %arg8[%549, %c0_145] : memref<64x128xf32, #tpu.memory_space<vmem>>, vector<8x128xf32>
    tpu.vector_store %arg8[%549, %c0_145], %548 {strides = array<i32>} : memref<64x128xf32, #tpu.memory_space<vmem>>, vector<8x128xf32>,
    %c8_i32_146 = arith.constant 8 : i32
    %c0_147 = arith.constant 0 : index
    %c0_148 = arith.constant 0 : index
    %551 = vector.load %arg8[%c0_147, %c0_148] : memref<64x128xf32, #tpu.memory_space<vmem>>, vector<64x128xf32>
    %c1_149 = arith.constant 1 : index
    %c0_150 = arith.constant 0 : index
    %c0_151 = arith.constant 0 : index
    %552 = vector.load %arg2[%c1_149, %c0_150, %c0_151] : memref<2x128x512xf32, #tpu.memory_space<vmem>>, vector<1x128x512xf32>
    %553 = vector.shape_cast %552 : vector<1x128x512xf32> to vector<128x512xf32>
    %cst_152 = arith.constant dense<0.000000e+00> : vector<64x512xf32>
    %554 = tpu.matmul %551, %553, %cst_152 {dimension_numbers = #tpu.dot_dimension_numbers<[1], [0], [0], [1], [0, 0, 1, 1], [], []>} : vector<64x128xf32>, vector<128x512xf32>, vector<64x512xf32> -> vector<64x512xf32>
    %c2 = arith.constant 2 : index
    %c0_153 = arith.constant 0 : index
    %c0_154 = arith.constant 0 : index
    %555 = vector.load %arg4[%c2, %c0_153, %c0_154] : memref<3x1x512xf32, #tpu.memory_space<vmem>>, vector<1x1x512xf32>
    %556 = vector.shape_cast %555 : vector<1x1x512xf32> to vector<1x512xf32>
    %557 = vector.broadcast %556 : vector<1x512xf32> to vector<64x512xf32>
    %558 = arith.addf %554, %557 : vector<64x512xf32>
    %c0_155 = arith.constant 0 : index
    %c0_156 = arith.constant 0 : index
    %559 = vector.load %arg9[%c0_155, %c0_156] : memref<64x512xf32, #tpu.memory_space<vmem>>, vector<64x512xf32>
    tpu.vector_store %arg9[%c0_155, %c0_156], %558 {strides = array<i32>} : memref<64x512xf32, #tpu.memory_space<vmem>>, vector<64x512xf32>,
    %c2_157 = arith.constant 2 : index
    %c0_158 = arith.constant 0 : index
    %c0_159 = arith.constant 0 : index
    %560 = vector.load %arg3[%c2_157, %c0_158, %c0_159] : memref<3x128x512xf32, #tpu.memory_space<vmem>>, vector<1x128x512xf32>
    %561 = vector.shape_cast %560 : vector<1x128x512xf32> to vector<128x512xf32>
    %c0_i32_160 = arith.constant 0 : i32
    %c8_i32_161 = arith.constant 8 : i32
    %562 = arith.muli %c0_i32_160, %c8_i32_161 : i32
    %563 = tpu.assume_multiple %562, 8 : i32
    %564 = arith.index_cast %563 : i32 to index
    %c0_162 = arith.constant 0 : index
    %565 = vector.load %arg9[%564, %c0_162] : memref<64x512xf32, #tpu.memory_space<vmem>>, vector<8x512xf32>
    %cst_163 = arith.constant dense<0.000000e+00> : vector<8x512xf32>
    %566 = tpu.matmul %0, %561, %cst_163 {dimension_numbers = #tpu.dot_dimension_numbers<[1], [0], [0], [1], [0, 0, 1, 1], [], []>} : vector<8x128xf32>, vector<128x512xf32>, vector<8x512xf32> -> vector<8x512xf32>
    %567 = arith.addf %565, %566 : vector<8x512xf32>
    %568 = vector.extract_strided_slice %567 {offsets = [0, 0], sizes = [8, 128], strides = [1, 1]} : vector<8x512xf32> to vector<8x128xf32>
    %569 = arith.negf %568 : vector<8x128xf32>
    %570 = math.exp %569 : vector<8x128xf32>
    %cst_164 = arith.constant 1.000000e+00 : f32
    %571 = vector.broadcast %cst_164 : f32 to vector<8x128xf32>
    %572 = arith.addf %571, %570 : vector<8x128xf32>
    %573 = arith.divf %571, %572 : vector<8x128xf32>
    %574 = vector.extract_strided_slice %567 {offsets = [0, 128], sizes = [8, 128], strides = [1, 1]} : vector<8x512xf32> to vector<8x128xf32>
    %575 = arith.negf %574 : vector<8x128xf32>
    %576 = math.exp %575 : vector<8x128xf32>
    %cst_165 = arith.constant 1.000000e+00 : f32
    %577 = vector.broadcast %cst_165 : f32 to vector<8x128xf32>
    %578 = arith.addf %577, %576 : vector<8x128xf32>
    %579 = arith.divf %577, %578 : vector<8x128xf32>
    %580 = vector.extract_strided_slice %567 {offsets = [0, 256], sizes = [8, 128], strides = [1, 1]} : vector<8x512xf32> to vector<8x128xf32>
    %581 = math.tanh %580 : vector<8x128xf32>
    %582 = vector.extract_strided_slice %567 {offsets = [0, 384], sizes = [8, 128], strides = [1, 1]} : vector<8x512xf32> to vector<8x128xf32>
    %583 = arith.negf %582 : vector<8x128xf32>
    %584 = math.exp %583 : vector<8x128xf32>
    %cst_166 = arith.constant 1.000000e+00 : f32
    %585 = vector.broadcast %cst_166 : f32 to vector<8x128xf32>
    %586 = arith.addf %585, %584 : vector<8x128xf32>
    %587 = arith.divf %585, %586 : vector<8x128xf32>
    %588 = arith.mulf %579, %1 : vector<8x128xf32>
    %589 = arith.mulf %573, %581 : vector<8x128xf32>
    %590 = arith.addf %588, %589 : vector<8x128xf32>
    %591 = math.tanh %590 : vector<8x128xf32>
    %592 = arith.mulf %587, %591 : vector<8x128xf32>
    %c1_i32_167 = arith.constant 1 : i32
    %c8_i32_168 = arith.constant 8 : i32
    %593 = arith.muli %c1_i32_167, %c8_i32_168 : i32
    %594 = tpu.assume_multiple %593, 8 : i32
    %595 = arith.index_cast %594 : i32 to index
    %c0_169 = arith.constant 0 : index
    %596 = vector.load %arg9[%595, %c0_169] : memref<64x512xf32, #tpu.memory_space<vmem>>, vector<8x512xf32>
    %cst_170 = arith.constant dense<0.000000e+00> : vector<8x512xf32>
    %597 = tpu.matmul %592, %561, %cst_170 {dimension_numbers = #tpu.dot_dimension_numbers<[1], [0], [0], [1], [0, 0, 1, 1], [], []>} : vector<8x128xf32>, vector<128x512xf32>, vector<8x512xf32> -> vector<8x512xf32>
    %598 = arith.addf %596, %597 : vector<8x512xf32>
    %599 = vector.extract_strided_slice %598 {offsets = [0, 0], sizes = [8, 128], strides = [1, 1]} : vector<8x512xf32> to vector<8x128xf32>
    %600 = arith.negf %599 : vector<8x128xf32>
    %601 = math.exp %600 : vector<8x128xf32>
    %cst_171 = arith.constant 1.000000e+00 : f32
    %602 = vector.broadcast %cst_171 : f32 to vector<8x128xf32>
    %603 = arith.addf %602, %601 : vector<8x128xf32>
    %604 = arith.divf %602, %603 : vector<8x128xf32>
    %605 = vector.extract_strided_slice %598 {offsets = [0, 128], sizes = [8, 128], strides = [1, 1]} : vector<8x512xf32> to vector<8x128xf32>
    %606 = arith.negf %605 : vector<8x128xf32>
    %607 = math.exp %606 : vector<8x128xf32>
    %cst_172 = arith.constant 1.000000e+00 : f32
    %608 = vector.broadcast %cst_172 : f32 to vector<8x128xf32>
    %609 = arith.addf %608, %607 : vector<8x128xf32>
    %610 = arith.divf %608, %609 : vector<8x128xf32>
    %611 = vector.extract_strided_slice %598 {offsets = [0, 256], sizes = [8, 128], strides = [1, 1]} : vector<8x512xf32> to vector<8x128xf32>
    %612 = math.tanh %611 : vector<8x128xf32>
    %613 = vector.extract_strided_slice %598 {offsets = [0, 384], sizes = [8, 128], strides = [1, 1]} : vector<8x512xf32> to vector<8x128xf32>
    %614 = arith.negf %613 : vector<8x128xf32>
    %615 = math.exp %614 : vector<8x128xf32>
    %cst_173 = arith.constant 1.000000e+00 : f32
    %616 = vector.broadcast %cst_173 : f32 to vector<8x128xf32>
    %617 = arith.addf %616, %615 : vector<8x128xf32>
    %618 = arith.divf %616, %617 : vector<8x128xf32>
    %619 = arith.mulf %610, %590 : vector<8x128xf32>
    %620 = arith.mulf %604, %612 : vector<8x128xf32>
    %621 = arith.addf %619, %620 : vector<8x128xf32>
    %622 = math.tanh %621 : vector<8x128xf32>
    %623 = arith.mulf %618, %622 : vector<8x128xf32>
    %c2_i32_174 = arith.constant 2 : i32
    %c8_i32_175 = arith.constant 8 : i32
    %624 = arith.muli %c2_i32_174, %c8_i32_175 : i32
    %625 = tpu.assume_multiple %624, 8 : i32
    %626 = arith.index_cast %625 : i32 to index
    %c0_176 = arith.constant 0 : index
    %627 = vector.load %arg9[%626, %c0_176] : memref<64x512xf32, #tpu.memory_space<vmem>>, vector<8x512xf32>
    %cst_177 = arith.constant dense<0.000000e+00> : vector<8x512xf32>
    %628 = tpu.matmul %623, %561, %cst_177 {dimension_numbers = #tpu.dot_dimension_numbers<[1], [0], [0], [1], [0, 0, 1, 1], [], []>} : vector<8x128xf32>, vector<128x512xf32>, vector<8x512xf32> -> vector<8x512xf32>
    %629 = arith.addf %627, %628 : vector<8x512xf32>
    %630 = vector.extract_strided_slice %629 {offsets = [0, 0], sizes = [8, 128], strides = [1, 1]} : vector<8x512xf32> to vector<8x128xf32>
    %631 = arith.negf %630 : vector<8x128xf32>
    %632 = math.exp %631 : vector<8x128xf32>
    %cst_178 = arith.constant 1.000000e+00 : f32
    %633 = vector.broadcast %cst_178 : f32 to vector<8x128xf32>
    %634 = arith.addf %633, %632 : vector<8x128xf32>
    %635 = arith.divf %633, %634 : vector<8x128xf32>
    %636 = vector.extract_strided_slice %629 {offsets = [0, 128], sizes = [8, 128], strides = [1, 1]} : vector<8x512xf32> to vector<8x128xf32>
    %637 = arith.negf %636 : vector<8x128xf32>
    %638 = math.exp %637 : vector<8x128xf32>
    %cst_179 = arith.constant 1.000000e+00 : f32
    %639 = vector.broadcast %cst_179 : f32 to vector<8x128xf32>
    %640 = arith.addf %639, %638 : vector<8x128xf32>
    %641 = arith.divf %639, %640 : vector<8x128xf32>
    %642 = vector.extract_strided_slice %629 {offsets = [0, 256], sizes = [8, 128], strides = [1, 1]} : vector<8x512xf32> to vector<8x128xf32>
    %643 = math.tanh %642 : vector<8x128xf32>
    %644 = vector.extract_strided_slice %629 {offsets = [0, 384], sizes = [8, 128], strides = [1, 1]} : vector<8x512xf32> to vector<8x128xf32>
    %645 = arith.negf %644 : vector<8x128xf32>
    %646 = math.exp %645 : vector<8x128xf32>
    %cst_180 = arith.constant 1.000000e+00 : f32
    %647 = vector.broadcast %cst_180 : f32 to vector<8x128xf32>
    %648 = arith.addf %647, %646 : vector<8x128xf32>
    %649 = arith.divf %647, %648 : vector<8x128xf32>
    %650 = arith.mulf %641, %621 : vector<8x128xf32>
    %651 = arith.mulf %635, %643 : vector<8x128xf32>
    %652 = arith.addf %650, %651 : vector<8x128xf32>
    %653 = math.tanh %652 : vector<8x128xf32>
    %654 = arith.mulf %649, %653 : vector<8x128xf32>
    %c3_i32_181 = arith.constant 3 : i32
    %c8_i32_182 = arith.constant 8 : i32
    %655 = arith.muli %c3_i32_181, %c8_i32_182 : i32
    %656 = tpu.assume_multiple %655, 8 : i32
    %657 = arith.index_cast %656 : i32 to index
    %c0_183 = arith.constant 0 : index
    %658 = vector.load %arg9[%657, %c0_183] : memref<64x512xf32, #tpu.memory_space<vmem>>, vector<8x512xf32>
    %cst_184 = arith.constant dense<0.000000e+00> : vector<8x512xf32>
    %659 = tpu.matmul %654, %561, %cst_184 {dimension_numbers = #tpu.dot_dimension_numbers<[1], [0], [0], [1], [0, 0, 1, 1], [], []>} : vector<8x128xf32>, vector<128x512xf32>, vector<8x512xf32> -> vector<8x512xf32>
    %660 = arith.addf %658, %659 : vector<8x512xf32>
    %661 = vector.extract_strided_slice %660 {offsets = [0, 0], sizes = [8, 128], strides = [1, 1]} : vector<8x512xf32> to vector<8x128xf32>
    %662 = arith.negf %661 : vector<8x128xf32>
    %663 = math.exp %662 : vector<8x128xf32>
    %cst_185 = arith.constant 1.000000e+00 : f32
    %664 = vector.broadcast %cst_185 : f32 to vector<8x128xf32>
    %665 = arith.addf %664, %663 : vector<8x128xf32>
    %666 = arith.divf %664, %665 : vector<8x128xf32>
    %667 = vector.extract_strided_slice %660 {offsets = [0, 128], sizes = [8, 128], strides = [1, 1]} : vector<8x512xf32> to vector<8x128xf32>
    %668 = arith.negf %667 : vector<8x128xf32>
    %669 = math.exp %668 : vector<8x128xf32>
    %cst_186 = arith.constant 1.000000e+00 : f32
    %670 = vector.broadcast %cst_186 : f32 to vector<8x128xf32>
    %671 = arith.addf %670, %669 : vector<8x128xf32>
    %672 = arith.divf %670, %671 : vector<8x128xf32>
    %673 = vector.extract_strided_slice %660 {offsets = [0, 256], sizes = [8, 128], strides = [1, 1]} : vector<8x512xf32> to vector<8x128xf32>
    %674 = math.tanh %673 : vector<8x128xf32>
    %675 = vector.extract_strided_slice %660 {offsets = [0, 384], sizes = [8, 128], strides = [1, 1]} : vector<8x512xf32> to vector<8x128xf32>
    %676 = arith.negf %675 : vector<8x128xf32>
    %677 = math.exp %676 : vector<8x128xf32>
    %cst_187 = arith.constant 1.000000e+00 : f32
    %678 = vector.broadcast %cst_187 : f32 to vector<8x128xf32>
    %679 = arith.addf %678, %677 : vector<8x128xf32>
    %680 = arith.divf %678, %679 : vector<8x128xf32>
    %681 = arith.mulf %672, %652 : vector<8x128xf32>
    %682 = arith.mulf %666, %674 : vector<8x128xf32>
    %683 = arith.addf %681, %682 : vector<8x128xf32>
    %684 = math.tanh %683 : vector<8x128xf32>
    %685 = arith.mulf %680, %684 : vector<8x128xf32>
    %c4_i32_188 = arith.constant 4 : i32
    %c8_i32_189 = arith.constant 8 : i32
    %686 = arith.muli %c4_i32_188, %c8_i32_189 : i32
    %687 = tpu.assume_multiple %686, 8 : i32
    %688 = arith.index_cast %687 : i32 to index
    %c0_190 = arith.constant 0 : index
    %689 = vector.load %arg9[%688, %c0_190] : memref<64x512xf32, #tpu.memory_space<vmem>>, vector<8x512xf32>
    %cst_191 = arith.constant dense<0.000000e+00> : vector<8x512xf32>
    %690 = tpu.matmul %685, %561, %cst_191 {dimension_numbers = #tpu.dot_dimension_numbers<[1], [0], [0], [1], [0, 0, 1, 1], [], []>} : vector<8x128xf32>, vector<128x512xf32>, vector<8x512xf32> -> vector<8x512xf32>
    %691 = arith.addf %689, %690 : vector<8x512xf32>
    %692 = vector.extract_strided_slice %691 {offsets = [0, 0], sizes = [8, 128], strides = [1, 1]} : vector<8x512xf32> to vector<8x128xf32>
    %693 = arith.negf %692 : vector<8x128xf32>
    %694 = math.exp %693 : vector<8x128xf32>
    %cst_192 = arith.constant 1.000000e+00 : f32
    %695 = vector.broadcast %cst_192 : f32 to vector<8x128xf32>
    %696 = arith.addf %695, %694 : vector<8x128xf32>
    %697 = arith.divf %695, %696 : vector<8x128xf32>
    %698 = vector.extract_strided_slice %691 {offsets = [0, 128], sizes = [8, 128], strides = [1, 1]} : vector<8x512xf32> to vector<8x128xf32>
    %699 = arith.negf %698 : vector<8x128xf32>
    %700 = math.exp %699 : vector<8x128xf32>
    %cst_193 = arith.constant 1.000000e+00 : f32
    %701 = vector.broadcast %cst_193 : f32 to vector<8x128xf32>
    %702 = arith.addf %701, %700 : vector<8x128xf32>
    %703 = arith.divf %701, %702 : vector<8x128xf32>
    %704 = vector.extract_strided_slice %691 {offsets = [0, 256], sizes = [8, 128], strides = [1, 1]} : vector<8x512xf32> to vector<8x128xf32>
    %705 = math.tanh %704 : vector<8x128xf32>
    %706 = vector.extract_strided_slice %691 {offsets = [0, 384], sizes = [8, 128], strides = [1, 1]} : vector<8x512xf32> to vector<8x128xf32>
    %707 = arith.negf %706 : vector<8x128xf32>
    %708 = math.exp %707 : vector<8x128xf32>
    %cst_194 = arith.constant 1.000000e+00 : f32
    %709 = vector.broadcast %cst_194 : f32 to vector<8x128xf32>
    %710 = arith.addf %709, %708 : vector<8x128xf32>
    %711 = arith.divf %709, %710 : vector<8x128xf32>
    %712 = arith.mulf %703, %683 : vector<8x128xf32>
    %713 = arith.mulf %697, %705 : vector<8x128xf32>
    %714 = arith.addf %712, %713 : vector<8x128xf32>
    %715 = math.tanh %714 : vector<8x128xf32>
    %716 = arith.mulf %711, %715 : vector<8x128xf32>
    %c5_i32_195 = arith.constant 5 : i32
    %c8_i32_196 = arith.constant 8 : i32
    %717 = arith.muli %c5_i32_195, %c8_i32_196 : i32
    %718 = tpu.assume_multiple %717, 8 : i32
    %719 = arith.index_cast %718 : i32 to index
    %c0_197 = arith.constant 0 : index
    %720 = vector.load %arg9[%719, %c0_197] : memref<64x512xf32, #tpu.memory_space<vmem>>, vector<8x512xf32>
    %cst_198 = arith.constant dense<0.000000e+00> : vector<8x512xf32>
    %721 = tpu.matmul %716, %561, %cst_198 {dimension_numbers = #tpu.dot_dimension_numbers<[1], [0], [0], [1], [0, 0, 1, 1], [], []>} : vector<8x128xf32>, vector<128x512xf32>, vector<8x512xf32> -> vector<8x512xf32>
    %722 = arith.addf %720, %721 : vector<8x512xf32>
    %723 = vector.extract_strided_slice %722 {offsets = [0, 0], sizes = [8, 128], strides = [1, 1]} : vector<8x512xf32> to vector<8x128xf32>
    %724 = arith.negf %723 : vector<8x128xf32>
    %725 = math.exp %724 : vector<8x128xf32>
    %cst_199 = arith.constant 1.000000e+00 : f32
    %726 = vector.broadcast %cst_199 : f32 to vector<8x128xf32>
    %727 = arith.addf %726, %725 : vector<8x128xf32>
    %728 = arith.divf %726, %727 : vector<8x128xf32>
    %729 = vector.extract_strided_slice %722 {offsets = [0, 128], sizes = [8, 128], strides = [1, 1]} : vector<8x512xf32> to vector<8x128xf32>
    %730 = arith.negf %729 : vector<8x128xf32>
    %731 = math.exp %730 : vector<8x128xf32>
    %cst_200 = arith.constant 1.000000e+00 : f32
    %732 = vector.broadcast %cst_200 : f32 to vector<8x128xf32>
    %733 = arith.addf %732, %731 : vector<8x128xf32>
    %734 = arith.divf %732, %733 : vector<8x128xf32>
    %735 = vector.extract_strided_slice %722 {offsets = [0, 256], sizes = [8, 128], strides = [1, 1]} : vector<8x512xf32> to vector<8x128xf32>
    %736 = math.tanh %735 : vector<8x128xf32>
    %737 = vector.extract_strided_slice %722 {offsets = [0, 384], sizes = [8, 128], strides = [1, 1]} : vector<8x512xf32> to vector<8x128xf32>
    %738 = arith.negf %737 : vector<8x128xf32>
    %739 = math.exp %738 : vector<8x128xf32>
    %cst_201 = arith.constant 1.000000e+00 : f32
    %740 = vector.broadcast %cst_201 : f32 to vector<8x128xf32>
    %741 = arith.addf %740, %739 : vector<8x128xf32>
    %742 = arith.divf %740, %741 : vector<8x128xf32>
    %743 = arith.mulf %734, %714 : vector<8x128xf32>
    %744 = arith.mulf %728, %736 : vector<8x128xf32>
    %745 = arith.addf %743, %744 : vector<8x128xf32>
    %746 = math.tanh %745 : vector<8x128xf32>
    %747 = arith.mulf %742, %746 : vector<8x128xf32>
    %c6_i32_202 = arith.constant 6 : i32
    %c8_i32_203 = arith.constant 8 : i32
    %748 = arith.muli %c6_i32_202, %c8_i32_203 : i32
    %749 = tpu.assume_multiple %748, 8 : i32
    %750 = arith.index_cast %749 : i32 to index
    %c0_204 = arith.constant 0 : index
    %751 = vector.load %arg9[%750, %c0_204] : memref<64x512xf32, #tpu.memory_space<vmem>>, vector<8x512xf32>
    %cst_205 = arith.constant dense<0.000000e+00> : vector<8x512xf32>
    %752 = tpu.matmul %747, %561, %cst_205 {dimension_numbers = #tpu.dot_dimension_numbers<[1], [0], [0], [1], [0, 0, 1, 1], [], []>} : vector<8x128xf32>, vector<128x512xf32>, vector<8x512xf32> -> vector<8x512xf32>
    %753 = arith.addf %751, %752 : vector<8x512xf32>
    %754 = vector.extract_strided_slice %753 {offsets = [0, 0], sizes = [8, 128], strides = [1, 1]} : vector<8x512xf32> to vector<8x128xf32>
    %755 = arith.negf %754 : vector<8x128xf32>
    %756 = math.exp %755 : vector<8x128xf32>
    %cst_206 = arith.constant 1.000000e+00 : f32
    %757 = vector.broadcast %cst_206 : f32 to vector<8x128xf32>
    %758 = arith.addf %757, %756 : vector<8x128xf32>
    %759 = arith.divf %757, %758 : vector<8x128xf32>
    %760 = vector.extract_strided_slice %753 {offsets = [0, 128], sizes = [8, 128], strides = [1, 1]} : vector<8x512xf32> to vector<8x128xf32>
    %761 = arith.negf %760 : vector<8x128xf32>
    %762 = math.exp %761 : vector<8x128xf32>
    %cst_207 = arith.constant 1.000000e+00 : f32
    %763 = vector.broadcast %cst_207 : f32 to vector<8x128xf32>
    %764 = arith.addf %763, %762 : vector<8x128xf32>
    %765 = arith.divf %763, %764 : vector<8x128xf32>
    %766 = vector.extract_strided_slice %753 {offsets = [0, 256], sizes = [8, 128], strides = [1, 1]} : vector<8x512xf32> to vector<8x128xf32>
    %767 = math.tanh %766 : vector<8x128xf32>
    %768 = vector.extract_strided_slice %753 {offsets = [0, 384], sizes = [8, 128], strides = [1, 1]} : vector<8x512xf32> to vector<8x128xf32>
    %769 = arith.negf %768 : vector<8x128xf32>
    %770 = math.exp %769 : vector<8x128xf32>
    %cst_208 = arith.constant 1.000000e+00 : f32
    %771 = vector.broadcast %cst_208 : f32 to vector<8x128xf32>
    %772 = arith.addf %771, %770 : vector<8x128xf32>
    %773 = arith.divf %771, %772 : vector<8x128xf32>
    %774 = arith.mulf %765, %745 : vector<8x128xf32>
    %775 = arith.mulf %759, %767 : vector<8x128xf32>
    %776 = arith.addf %774, %775 : vector<8x128xf32>
    %777 = math.tanh %776 : vector<8x128xf32>
    %778 = arith.mulf %773, %777 : vector<8x128xf32>
    %c7_i32_209 = arith.constant 7 : i32
    %c8_i32_210 = arith.constant 8 : i32
    %779 = arith.muli %c7_i32_209, %c8_i32_210 : i32
    %780 = tpu.assume_multiple %779, 8 : i32
    %781 = arith.index_cast %780 : i32 to index
    %c0_211 = arith.constant 0 : index
    %782 = vector.load %arg9[%781, %c0_211] : memref<64x512xf32, #tpu.memory_space<vmem>>, vector<8x512xf32>
    %cst_212 = arith.constant dense<0.000000e+00> : vector<8x512xf32>
    %783 = tpu.matmul %778, %561, %cst_212 {dimension_numbers = #tpu.dot_dimension_numbers<[1], [0], [0], [1], [0, 0, 1, 1], [], []>} : vector<8x128xf32>, vector<128x512xf32>, vector<8x512xf32> -> vector<8x512xf32>
    %784 = arith.addf %782, %783 : vector<8x512xf32>
    %785 = vector.extract_strided_slice %784 {offsets = [0, 0], sizes = [8, 128], strides = [1, 1]} : vector<8x512xf32> to vector<8x128xf32>
    %786 = arith.negf %785 : vector<8x128xf32>
    %787 = math.exp %786 : vector<8x128xf32>
    %cst_213 = arith.constant 1.000000e+00 : f32
    %788 = vector.broadcast %cst_213 : f32 to vector<8x128xf32>
    %789 = arith.addf %788, %787 : vector<8x128xf32>
    %790 = arith.divf %788, %789 : vector<8x128xf32>
    %791 = vector.extract_strided_slice %784 {offsets = [0, 128], sizes = [8, 128], strides = [1, 1]} : vector<8x512xf32> to vector<8x128xf32>
    %792 = arith.negf %791 : vector<8x128xf32>
    %793 = math.exp %792 : vector<8x128xf32>
    %cst_214 = arith.constant 1.000000e+00 : f32
    %794 = vector.broadcast %cst_214 : f32 to vector<8x128xf32>
    %795 = arith.addf %794, %793 : vector<8x128xf32>
    %796 = arith.divf %794, %795 : vector<8x128xf32>
    %797 = vector.extract_strided_slice %784 {offsets = [0, 256], sizes = [8, 128], strides = [1, 1]} : vector<8x512xf32> to vector<8x128xf32>
    %798 = math.tanh %797 : vector<8x128xf32>
    %799 = vector.extract_strided_slice %784 {offsets = [0, 384], sizes = [8, 128], strides = [1, 1]} : vector<8x512xf32> to vector<8x128xf32>
    %800 = arith.negf %799 : vector<8x128xf32>
    %801 = math.exp %800 : vector<8x128xf32>
    %cst_215 = arith.constant 1.000000e+00 : f32
    %802 = vector.broadcast %cst_215 : f32 to vector<8x128xf32>
    %803 = arith.addf %802, %801 : vector<8x128xf32>
    %804 = arith.divf %802, %803 : vector<8x128xf32>
    %805 = arith.mulf %796, %776 : vector<8x128xf32>
    %806 = arith.mulf %790, %798 : vector<8x128xf32>
    %807 = arith.addf %805, %806 : vector<8x128xf32>
    %808 = math.tanh %807 : vector<8x128xf32>
    %809 = arith.mulf %804, %808 : vector<8x128xf32>
    %c8_i32_216 = arith.constant 8 : i32
    %c0_217 = arith.constant 0 : index
    %c0_218 = arith.constant 0 : index
    %810 = vector.load %arg5[%c0_217, %c0_218] : memref<128x128xf32, #tpu.memory_space<vmem>>, vector<128x128xf32>
    %cst_219 = arith.constant dense<0.000000e+00> : vector<8x128xf32>
    %811 = tpu.matmul %809, %810, %cst_219 {dimension_numbers = #tpu.dot_dimension_numbers<[1], [0], [0], [1], [0, 0, 1, 1], [], []>} : vector<8x128xf32>, vector<128x128xf32>, vector<8x128xf32> -> vector<8x128xf32>
    %c0_220 = arith.constant 0 : index
    %c0_221 = arith.constant 0 : index
    %812 = vector.load %arg6[%c0_220, %c0_221] : memref<1x128xf32, #tpu.memory_space<vmem>>, vector<1x128xf32>
    %813 = vector.broadcast %812 : vector<1x128xf32> to vector<8x128xf32>
    %814 = arith.addf %811, %813 : vector<8x128xf32>
    %cst_222 = arith.constant 0.000000e+00 : f32
    %815 = vector.broadcast %cst_222 : f32 to vector<8x128xf32>
    %816 = arith.maximumf %814, %815 : vector<8x128xf32>
    %817 = arith.mulf %816, %816 : vector<8x128xf32>
    %cst_223 = arith.constant dense<0.000000e+00> : vector<8xf32>
    %818 = vector.multi_reduction <add>, %817, %cst_223 [1] : vector<8x128xf32> to vector<8xf32>
    %819 = vector.shape_cast %818 : vector<8xf32> to vector<8x1xf32>
    %cst_224 = arith.constant 9.99999996E-13 : f32
    %820 = vector.broadcast %cst_224 : f32 to vector<8x1xf32>
    %821 = arith.addf %819, %820 : vector<8x1xf32>
    %822 = math.rsqrt %821 : vector<8x1xf32>
    %823 = vector.broadcast %822 : vector<8x1xf32> to vector<8x128xf32>
    %824 = arith.mulf %816, %823 : vector<8x128xf32>
    %c0_225 = arith.constant 0 : index
    %c0_226 = arith.constant 0 : index
    %825 = vector.load %arg7[%c0_225, %c0_226] : memref<8x128xf32, #tpu.memory_space<vmem>>, vector<8x128xf32>
    tpu.vector_store %arg7[%c0_225, %c0_226], %824 {strides = array<i32>} : memref<8x128xf32, #tpu.memory_space<vmem>>, vector<8x128xf32>,
    return
  }
}

</mosaic_0001>

<bundles_post_ra>
// kernel: voice_encoder_forward.1
= control target key start
LH: loop header
LB: loop body
LE: loop exit
PB: predicated region body
PF: predicated region fallthrough
CT: control target
= control target key end

     0   :  { %12 = vsyncpa [#allocation5], 0  ;;  %s8739_s0 = inlined_call_operand.vmem [shape: f32[64,16], index: 0, kind: input, shape index: {}]   ;;  %s8740_s1 = inlined_call_operand.vmem [shape: f32[16,512], index: 1, kind: input, shape index: {}]   ;;  %s8741_s2 = inlined_call_operand.hbm [shape: f32[2,128,512], index: 2, kind: input, shape index: {}]   ;;  %s8742_s3 = inlined_call_operand.hbm [shape: f32[3,128,512], index: 3, kind: input, shape index: {}]   ;;  %s8743_s4 = inlined_call_operand.vmem [shape: f32[3,1,512], index: 4, kind: input, shape index: {}]   ;;  %s8744_s5 = inlined_call_operand.hbm [shape: f32[128,128], index: 5, kind: input, shape index: {}]   ;;  %s8745_s6 = inlined_call_operand.vmem [shape: f32[1,128], index: 6, kind: input, shape index: {}]   ;;  %s8746_s7 = inlined_call_operand.vmem [shape: f32[8,128], index: 7, kind: output, shape index: {}]  }
   0x1   :  { %13 = vsyncpa [#allocation7], 0  ;;  %s35_s26 = sshll.u32 %s8742_s3, 4  ;;  %s5589_s27 = smov [#allocation6]   ;;  %s36_s26 = int_to_ptr.hbm [resolvable:$true] %s35_s26 }
   0x2   :  { %s37_s28 = sshll.u32 %s5589_s27, 4  ;;  %s22_s8 = sshll.u32 %s8741_s2, 4  ;;  %s38_s28 = int_to_ptr.vmem [resolvable:$true] %s37_s28  ;;  %s23_s8 = int_to_ptr.hbm [resolvable:$true] %s22_s8 }
   0x3   :  { %s5590_s9 = smov 512   ;;  %s5591_s10 = smov 32  }
   0x4   :  { %43 = dma.hbm_to_vmem [thread:$0]  %s36_s26, 24576, %s38_s28, [#allocation7], %s5590_s9, %s5590_s9, %s5591_s10  }
   0x5   :  { %s5592_s11 = smov [#allocation4]   ;;  %s50_s15 = sshll.u32 %s8744_s5, 4  ;;  %s51_s15 = int_to_ptr.hbm [resolvable:$true] %s50_s15 }
   0x6   :  { %s24_s12 = sshll.u32 %s5592_s11, 4  ;;  %s5593_s3 = smov [#allocation8]   ;;  %s25_s12 = int_to_ptr.vmem [resolvable:$true] %s24_s12 }
   0x7   :  { %30 = dma.hbm_to_vmem [thread:$0]  %s23_s8, 16384, %s25_s12, [#allocation5], %s5590_s9, %s5590_s9, %s5591_s10  }
   0x8   :  { %s52_s16 = sshll.u32 %s5593_s3, 4  ;;  %s5594_s17 = smov 128   ;;  %s53_s16 = int_to_ptr.vmem [resolvable:$true] %s52_s16 }
   0x9   :  { %s5595_s18 = smov 8  }
   0xa   :  { %58 = dma.hbm_to_vmem [thread:$0]  %s51_s15, 2048, %s53_s16, [#allocation7], %s5594_s17, %s5594_s17, %s5595_s18  }
   0xb   :  { %5585 = dma.done.wait [#allocation5], 16384  }
   0xc   :  { %5586 = vsyncadd [#allocation5], 4294950912 }
   0xd   :  { %5587 = dma.done.wait [#allocation7], 26624  }
   0xe   :  { %5588 = vsyncadd [#allocation7], 4294940672  ;;  %v85_v0 = vld [vmem:[%s8740_s1 + $0x20] sm:$0xff]  ;;  %vm99_vm0 = vcmask 130048   ;;  %v5658_v3 = vld [vmem:[%s8739_s0 + $0x28] sm:$0xff] }
   0xf   :  { %v81_v1 = vld [vmem:[%s8740_s1] sm:$0xff]  ;;  %138 = vmatpush.msra.mxu0 %v85_v0  ;;  %4920 = vmatpush.msra.mxu1 %v85_v0  ;;  %v5663_v4 = vld [vmem:[%s8739_s0 + $0x30] sm:$0xff]  ;;  %v5668_v5 = vld [vmem:[%s8739_s0 + $0x38] sm:$0xff] }
  0x10   :  { %4921 = vmatpush.msra.mxu2 %v85_v0  ;;  %4922 = vmatpush.msra.mxu3 %v85_v0  ;;  %v73_v2 = vld [vmem:[%s8739_s0] sm:$0xff]  ;;  %v86_v6 = vld [vmem:[%s8740_s1 + $0x28] sm:$0xff]  ;;  %v87_v7 = vld [vmem:[%s8740_s1 + $0x30] sm:$0xff] }
  0x11   :  { %139 = vmatpush.msra.mxu0 %v81_v1  ;;  %4923 = vmatpush.msra.mxu1 %v81_v1  ;;  %v88_v8 = vld [vmem:[%s8740_s1 + $0x38] sm:$0xff]  ;;  %v5682_v9 = vld [vmem:[#allocation6 + $0x1e0] sm:$0xff]  ;;  %v82_v10 = vld [vmem:[%s8740_s1 + $0x8] sm:$0xff] }
  0x12   :  { %4924 = vmatpush.msra.mxu2 %v81_v1  ;;  %4925 = vmatpush.msra.mxu3 %v81_v1  ;;  %v83_v11 = vld [vmem:[%s8740_s1 + $0x10] sm:$0xff]  ;;  %v84_v12 = vld [vmem:[%s8740_s1 + $0x18] sm:$0xff]  ;;  %v5697_v13 = vld [vmem:[#allocation6 + $0x1e8] sm:$0xff] }
  0x13   :  { %4814 = vmatmul.msk.f32.vlgmr.msra.gmra.mxu0 %vm99_vm0, %v73_v2  ;;  %4819 = vmatmul.msk.f32.vlgmr.msra.gmra.mxu1 %vm99_vm0, %v5658_v3  ;;  %v5700_v14 = vld [vmem:[#allocation6 + $0x1c0] sm:$0xff]  ;;  %v5702_v15 = vld [vmem:[#allocation6 + $0x1f8] sm:$0xff]  ;;  %v5704_v16 = vld [vmem:[#allocation6 + $0x1c8] sm:$0xff] }
  0x14   :  { %4820 = vmatmul.msk.f32.vlgmr.msra.gmra.mxu2 %vm99_vm0, %v5663_v4  ;;  %4821 = vmatmul.msk.f32.vlgmr.msra.gmra.mxu3 %vm99_vm0, %v5668_v5  ;;  %v5706_v17 = vld [vmem:[#allocation6 + $0x1f0] sm:$0xff]  ;;  %v74_v18 = vld [vmem:[%s8739_s0 + $0x8] sm:$0xff]  ;;  %v5715_v19 = vld [vmem:[#allocation6 + $0x1a0] sm:$0xff] }
  0x15   :  { %179 = vmatpush.msrb.mxu1 %v86_v6  ;;  %220 = vmatpush.msrb.mxu2 %v87_v7  ;;  %v5717_v20 = vld [vmem:[#allocation6 + $0x1a8] sm:$0xff]  ;;  %v5722_v21 = vld [vmem:[#allocation6 + $0x1d8] sm:$0xff]  ;;  %v5724_v22 = vld [vmem:[#allocation6 + $0x1d0] sm:$0xff] }
  0x16   :  { %261 = vmatpush.msrb.mxu3 %v88_v8  ;;  %391 = vmatpush.msrb.mxu0 %v5682_v9  ;;  %v5728_v23 = vld [vmem:[#allocation6 + $0x180] sm:$0xff]  ;;  %v5730_v24 = vld [vmem:[#allocation6 + $0x188] sm:$0xff]  ;;  %v5734_v25 = vld [vmem:[#allocation6 + $0x1b8] sm:$0xff] }
  0x17   :  { %180 = vmatpush.msrb.mxu1 %v82_v10  ;;  %221 = vmatpush.msrb.mxu2 %v83_v11  ;;  %v5736_v26 = vld [vmem:[#allocation6 + $0x1b0] sm:$0xff]  ;;  %v5738_v27 = vld [vmem:[#allocation6 + $0x160] sm:$0xff]  ;;  %v5741_v28 = vld [vmem:[#allocation6 + $0x168] sm:$0xff] }
  0x18   :  { %262 = vmatpush.msrb.mxu3 %v84_v12  ;;  %392 = vmatpush.msrb.mxu0 %v5700_v14  ;;  %v5746_v29 = vld [vmem:[#allocation6 + $0x198] sm:$0xff]  ;;  %v5748_v30 = vld [vmem:[#allocation6 + $0x190] sm:$0xff]  ;;  %v5757_v32 = vld [vmem:[#allocation6 + $0x140] sm:$0xff] }
  0x19   :  { %411 = vmatpush.msra.mxu1 %v5697_v13  ;;  %431 = vmatpush.msra.mxu2 %v5706_v17  ;;  %v75_v31 = vld [vmem:[%s8739_s0 + $0x10] sm:$0xff]  ;;  %v5760_v33 = vld [vmem:[#allocation6 + $0x148] sm:$0xff]  ;;  %v5765_v34 = vld [vmem:[#allocation6 + $0x178] sm:$0xff] }
  0x1a   :  { %451 = vmatpush.msra.mxu3 %v5702_v15  ;;  %393 = vmatpush.msrb.mxu0 %v5715_v19  ;;  %v5767_v35 = vld [vmem:[#allocation6 + $0x170] sm:$0xff]  ;;  %v5771_v36 = vld [vmem:[#allocation6 + $0x120] sm:$0xff]  ;;  %v5773_v37 = vld [vmem:[#allocation6 + $0x128] sm:$0xff] }
  0x1b   :  { %412 = vmatpush.msra.mxu1 %v5704_v16  ;;  %4815 = vmatmul.msk.f32.gmra.mxu0 %vm99_vm0, %v74_v18  ;;  %v5777_v38 = vld [vmem:[#allocation6 + $0x158] sm:$0xff]  ;;  %v5779_v39 = vld [vmem:[#allocation6 + $0x150] sm:$0xff]  ;;  %v5781_v40 = vld [vmem:[#allocation6 + $0x100] sm:$0xff] }
  0x1c   :  { %4822 = vmatmul.msk.f32.vlgmr.msrb.gmra.mxu1 %vm99_vm0, %v73_v2  ;;  %4830 = vmatmul.msk.f32.vlgmr.msrb.gmra.mxu2 %vm99_vm0, %v73_v2  ;;  %v5784_v41 = vld [vmem:[#allocation6 + $0x108] sm:$0xff]  ;;  %v5789_v42 = vld [vmem:[#allocation6 + $0x138] sm:$0xff]  ;;  %v5791_v43 = vld [vmem:[#allocation6 + $0x130] sm:$0xff] }
  0x1d   :  { %4838 = vmatmul.msk.f32.vlgmr.msrb.gmra.mxu3 %vm99_vm0, %v73_v2  ;;  %413 = vmatpush.msra.mxu1 %v5717_v20  ;;  %v76_v44 = vld [vmem:[%s8739_s0 + $0x18] sm:$0xff]  ;;  %v5800_v45 = vld [vmem:[#allocation6 + $0xe0] sm:$0xff]  ;;  %v5803_v46 = vld [vmem:[#allocation6 + $0xe8] sm:$0xff] }
  0x1e   :  { %452 = vmatpush.msra.mxu3 %v5722_v21  ;;  %432 = vmatpush.msra.mxu2 %v5724_v22  ;;  %v5808_v47 = vld [vmem:[#allocation6 + $0x118] sm:$0xff]  ;;  %v5810_v48 = vld [vmem:[#allocation6 + $0x110] sm:$0xff]  ;;  %v5814_v49 = vld [vmem:[#allocation6 + $0xc0] sm:$0xff] }
  0x1f   :  { %394 = vmatpush.msrb.mxu0 %v5728_v23  ;;  %414 = vmatpush.msra.mxu1 %v5730_v24  ;;  %v5816_v50 = vld [vmem:[#allocation6 + $0xc8] sm:$0xff]  ;;  %v5820_v51 = vld [vmem:[#allocation6 + $0xf8] sm:$0xff]  ;;  %v5822_v52 = vld [vmem:[#allocation6 + $0xf0] sm:$0xff] }
  0x20   :  { %453 = vmatpush.msra.mxu3 %v5734_v25  ;;  %433 = vmatpush.msra.mxu2 %v5736_v26  ;;  %v5824_v53 = vld [vmem:[#allocation6 + $0xa0] sm:$0xff]  ;;  %v5827_v54 = vld [vmem:[#allocation6 + $0xa8] sm:$0xff]  ;;  %v5832_v55 = vld [vmem:[#allocation6 + $0xd8] sm:$0xff] }
  0x21   :  { %395 = vmatpush.msrb.mxu0 %v5738_v27  ;;  %415 = vmatpush.msra.mxu1 %v5741_v28  ;;  %9154 = vst [vmem:[#allocation11_spill] sm:$0xff] %v5824_v53  ;;  %v5834_v56 = vld [vmem:[#allocation6 + $0xd0] sm:$0xff]  ;;  %v5836_v57 = vld [vmem:[#allocation6 + $0x80] sm:$0xff]  ;;  %v5851_v60 = vld [vmem:[#allocation6 + $0x88] sm:$0xff] }
  0x22   :  { %454 = vmatpush.msra.mxu3 %v5746_v29  ;;  %434 = vmatpush.msra.mxu2 %v5748_v30  ;;  %9155 = vst [vmem:[#allocation12_spill] sm:$0xff] %v5827_v54  ;;  %v77_v58 = vld [vmem:[%s8739_s0 + $0x20] sm:$0xff]  ;;  %v5853_v61 = vld [vmem:[#allocation6 + $0xb8] sm:$0xff]  ;;  %v5859_v63 = vld [vmem:[#allocation6 + $0xb0] sm:$0xff] }
  0x23   :  { %4816 = vmatmul.msk.f32.gmra.mxu0 %vm99_vm0, %v75_v31  ;;  %416 = vmatpush.msra.mxu1 %v5760_v33  ;;  %9156 = vst [vmem:[#allocation13_spill] sm:$0xff] %v5832_v55  ;;  %v5845_v59 = vld [vmem:[#allocation6 + $0x60] sm:$0xff]  ;;  %v5863_v0 = vld [vmem:[#allocation6 + $0x68] sm:$0xff]  ;;  %v5865_v1 = vld [vmem:[#allocation6 + $0x98] sm:$0xff] }
  0x24   :  { %4823 = vmatmul.msk.f32.gmra.mxu1 %vm99_vm0, %v74_v18  ;;  %4831 = vmatmul.msk.f32.gmra.mxu2 %vm99_vm0, %v74_v18  ;;  %9157 = vst [vmem:[#allocation14_spill] sm:$0xff] %v5836_v57  ;;  %v5857_v62 = vld [vmem:[#allocation6 + $0x40] sm:$0xff]  ;;  %v5871_v6 = vld [vmem:[#allocation6 + $0x90] sm:$0xff]  ;;  %v5874_v7 = vld [vmem:[#allocation6 + $0x48] sm:$0xff] }
  0x25   :  { %4839 = vmatmul.msk.f32.gmra.mxu3 %vm99_vm0, %v74_v18  ;;  %396 = vmatpush.msrb.mxu0 %v5757_v32  ;;  %9158 = vst [vmem:[#allocation15_spill] sm:$0xff] %v5845_v59  ;;  %v5867_v2 = vld [vmem:[#allocation6 + $0x20] sm:$0xff]  ;;  %v5877_v8 = vld [vmem:[#allocation6 + $0x78] sm:$0xff]  ;;  %v5887_v11 = vld [vmem:[#allocation6 + $0x28] sm:$0xff] }
  0x26   :  { %455 = vmatpush.msra.mxu3 %v5765_v34  ;;  %435 = vmatpush.msra.mxu2 %v5767_v35  ;;  %9159 = vst [vmem:[#allocation16_spill] sm:$0xff] %v5851_v60  ;;  %v5879_v10 = vld [vmem:[#allocation6] sm:$0xff]  ;;  %v5891_v12 = vld [vmem:[#allocation6 + $0x70] sm:$0xff]  ;;  %v5893_v18 = vld [vmem:[#allocation6 + $0x58] sm:$0xff] }
  0x27   :  { %397 = vmatpush.msrb.mxu0 %v5771_v36  ;;  %417 = vmatpush.msra.mxu1 %v5773_v37  ;;  %9160 = vst [vmem:[#allocation17_spill] sm:$0xff] %v5853_v61 }
  0x28   :  { %456 = vmatpush.msra.mxu3 %v5777_v38  ;;  %436 = vmatpush.msra.mxu2 %v5779_v39  ;;  %9161 = vst [vmem:[#allocation18_spill] sm:$0xff] %v5857_v62 }
  0x29   :  { %398 = vmatpush.msrb.mxu0 %v5781_v40  ;;  %418 = vmatpush.msra.mxu1 %v5784_v41  ;;  %9162 = vst [vmem:[#allocation19_spill] sm:$0xff] %v5859_v63 }
  0x2a   :  { %457 = vmatpush.msra.mxu3 %v5789_v42  ;;  %437 = vmatpush.msra.mxu2 %v5791_v43  ;;  %9163 = vst [vmem:[#allocation20_spill] sm:$0xff] %v5863_v0 }
  0x2b   :  { %4817 = vmatmul.msk.f32.gmra.mxu0 %vm99_vm0, %v76_v44  ;;  %419 = vmatpush.msra.mxu1 %v5803_v46  ;;  %9164 = vst [vmem:[#allocation21_spill] sm:$0xff] %v5865_v1 }
  0x2c   :  { %4824 = vmatmul.msk.f32.gmra.mxu1 %vm99_vm0, %v75_v31  ;;  %4832 = vmatmul.msk.f32.gmra.mxu2 %vm99_vm0, %v75_v31  ;;  %9165 = vst [vmem:[#allocation22_spill] sm:$0xff] %v5867_v2 }
  0x2d   :  { %4840 = vmatmul.msk.f32.gmra.mxu3 %vm99_vm0, %v75_v31  ;;  %399 = vmatpush.msrb.mxu0 %v5800_v45  ;;  %9166 = vst [vmem:[#allocation23_spill] sm:$0xff] %v5871_v6  ;;  %v8755_v31 = vmov 0.0  }
  0x2e   :  { %458 = vmatpush.msra.mxu3 %v5808_v47  ;;  %438 = vmatpush.msra.mxu2 %v5810_v48  ;;  %9167 = vst [vmem:[#allocation24_spill] sm:$0xff] %v5874_v7 }
  0x2f   :  { %400 = vmatpush.msrb.mxu0 %v5814_v49  ;;  %420 = vmatpush.msra.mxu1 %v5816_v50  ;;  %9168 = vst [vmem:[#allocation25_spill] sm:$0xff] %v5877_v8 }
  0x30   :  { %459 = vmatpush.msra.mxu3 %v5820_v51  ;;  %439 = vmatpush.msra.mxu2 %v5822_v52  ;;  %9169 = vst [vmem:[#allocation26_spill] sm:$0xff] %v5879_v10 }
  0x31   :  { %401 = vmatpush.msrb.mxu0 %v5824_v53  ;;  %421 = vmatpush.msra.mxu1 %v5827_v54  ;;  %9170 = vst [vmem:[#allocation27_spill] sm:$0xff] %v5887_v11 }
  0x32   :  { %460 = vmatpush.msra.mxu3 %v5832_v55  ;;  %440 = vmatpush.msra.mxu2 %v5834_v56  ;;  %9171 = vst [vmem:[#allocation28_spill] sm:$0xff] %v5891_v12 }
  0x33   :  { %402 = vmatpush.msrb.mxu0 %v5836_v57  ;;  %422 = vmatpush.msra.mxu1 %v5851_v60  ;;  %9172 = vst [vmem:[#allocation29_spill] sm:$0xff] %v5893_v18 }
  0x34   :  { %4825 = vmatmul.msk.f32.gmra.mxu1 %vm99_vm0, %v76_v44  ;;  %4818 = vmatmul.msk.f32.gmra.mxu0 %vm99_vm0, %v77_v58 }
  0x35   :  { %4833 = vmatmul.msk.f32.gmra.mxu2 %vm99_vm0, %v76_v44  ;;  %4841 = vmatmul.msk.f32.gmra.mxu3 %vm99_vm0, %v76_v44  ;;  %v5897_v44 = vld [vmem:[#allocation6 + $0x8] sm:$0xff] }
  0x36   :  { %403 = vmatpush.msrb.mxu0 %v5845_v59  ;;  %461 = vmatpush.msra.mxu3 %v5853_v61  ;;  %9173 = vst [vmem:[#allocation30_spill] sm:$0xff] %v5897_v44 }
  0x37   :  { %441 = vmatpush.msra.mxu2 %v5859_v63  ;;  %423 = vmatpush.msra.mxu1 %v5863_v0 }
  0x38   :  { %404 = vmatpush.msrb.mxu0 %v5857_v62  ;;  %462 = vmatpush.msra.mxu3 %v5865_v1 }
  0x39   :  { %442 = vmatpush.msra.mxu2 %v5871_v6  ;;  %424 = vmatpush.msra.mxu1 %v5874_v7  ;;  %v5908_v7 = vld [vmem:[#allocation6 + $0x30] sm:$0xff] }
  0x3a   :  { %405 = vmatpush.msrb.mxu0 %v5867_v2  ;;  %463 = vmatpush.msra.mxu3 %v5877_v8  ;;  %v5901_v2 = vld [vmem:[#allocation6 + $0x50] sm:$0xff]  ;;  %9176 = vst [vmem:[#allocation33_spill] sm:$0xff] %v5908_v7  ;;  %v5910_v8 = vld [vmem:[#allocation6 + $0x18] sm:$0xff] }
  0x3b   :  { %425 = vmatpush.msra.mxu1 %v5887_v11  ;;  %9174 = vst [vmem:[#allocation31_spill] sm:$0xff] %v5901_v2  ;;  %443 = vmatpush.msra.mxu2 %v5891_v12 }
  0x3c   :  { %406 = vmatpush.msrb.mxu0 %v5879_v10  ;;  %4826 = vmatmul.msk.f32.gmra.mxu1 %vm99_vm0, %v77_v58  ;;  %v5903_v10 = vld [vmem:[#allocation6 + $0x38] sm:$0xff]  ;;  %9177 = vst [vmem:[#allocation34_spill] sm:$0xff] %v5910_v8 }
  0x3d   :  { %4834 = vmatmul.msk.f32.gmra.mxu2 %vm99_vm0, %v77_v58  ;;  %407 = vmatmul.f32.vlgmr.msrb.gmra.mxu0 %v8755_v31  ;;  %9175 = vst [vmem:[#allocation32_spill] sm:$0xff] %v5903_v10 }
  0x3e   :  { %4842 = vmatmul.msk.f32.gmra.mxu3 %vm99_vm0, %v77_v58  ;;  %426 = vmatpush.msra.mxu1 %v5897_v44  ;;  %v5918_v58 = vld [vmem:[#allocation6 + $0x10] sm:$0xff] }
  0x3f   :  { %464 = vmatpush.msra.mxu3 %v5893_v18  ;;  %546 = vmatpush.msra.mxu0 %v5682_v9  ;;  %9178 = vst [vmem:[#allocation35_spill] sm:$0xff] %v5918_v58 }
  0x40   :  { %444 = vmatpush.msra.mxu2 %v5901_v2  ;;  %566 = vmatpush.msrb.mxu1 %v5697_v13 }
  0x41   :  { %465 = vmatpush.msra.mxu3 %v5903_v10  ;;  %547 = vmatpush.msra.mxu0 %v5700_v14 }
  0x42   :  { %445 = vmatpush.msra.mxu2 %v5908_v7  ;;  %567 = vmatpush.msrb.mxu1 %v5704_v16 }
  0x43   :  { %466 = vmatpush.msra.mxu3 %v5910_v8  ;;  %548 = vmatpush.msra.mxu0 %v5715_v19 }
  0x44   :  { %4827 = vmatmul.msk.f32.gmra.mxu1 %vm99_vm0, %v5658_v3  ;;  %446 = vmatpush.msra.mxu2 %v5918_v58 }
  0x45   :  { %606 = vmatpush.msrb.mxu3 %v5702_v15  ;;  %4835 = vmatmul.msk.f32.gmra.mxu2 %vm99_vm0, %v5658_v3 }
  0x46   :  { %4843 = vmatmul.msk.f32.gmra.mxu3 %vm99_vm0, %v5658_v3  ;;  %586 = vmatpush.msrb.mxu2 %v5706_v17  ;;  %v9179_v3 = vld [vmem:[#allocation25_spill] sm:$0xff] }
  0x47   :  { %607 = vmatpush.msrb.mxu3 %v5722_v21  ;;  %568 = vmatpush.msrb.mxu1 %v5717_v20 }
  0x48   :  { %587 = vmatpush.msrb.mxu2 %v5724_v22  ;;  %549 = vmatpush.msra.mxu0 %v5728_v23 }
  0x49   :  { %608 = vmatpush.msrb.mxu3 %v5734_v25  ;;  %569 = vmatpush.msrb.mxu1 %v5730_v24 }
  0x4a   :  { %588 = vmatpush.msrb.mxu2 %v5736_v26  ;;  %550 = vmatpush.msra.mxu0 %v5738_v27 }
  0x4b   :  { %609 = vmatpush.msrb.mxu3 %v5746_v29  ;;  %570 = vmatpush.msrb.mxu1 %v5741_v28 }
  0x4c   :  { %4828 = vmatmul.msk.f32.gmra.mxu1 %vm99_vm0, %v5663_v4  ;;  %589 = vmatpush.msrb.mxu2 %v5748_v30 }
  0x4d   :  { %4836 = vmatmul.msk.f32.gmra.mxu2 %vm99_vm0, %v5663_v4  ;;  %610 = vmatpush.msrb.mxu3 %v5765_v34 }
  0x4e   :  { %4844 = vmatmul.msk.f32.gmra.mxu3 %vm99_vm0, %v5663_v4  ;;  %551 = vmatpush.msra.mxu0 %v5757_v32  ;;  %v9180_v4 = vld [vmem:[#allocation24_spill] sm:$0xff] }
  0x4f   :  { %590 = vmatpush.msrb.mxu2 %v5767_v35  ;;  %571 = vmatpush.msrb.mxu1 %v5760_v33 }
  0x50   :  { %611 = vmatpush.msrb.mxu3 %v5777_v38  ;;  %552 = vmatpush.msra.mxu0 %v5771_v36 }
  0x51   :  { %591 = vmatpush.msrb.mxu2 %v5779_v39  ;;  %572 = vmatpush.msrb.mxu1 %v5773_v37 }
  0x52   :  { %612 = vmatpush.msrb.mxu3 %v5789_v42  ;;  %553 = vmatpush.msra.mxu0 %v5781_v40 }
  0x53   :  { %592 = vmatpush.msrb.mxu2 %v5791_v43  ;;  %573 = vmatpush.msrb.mxu1 %v5784_v41 }
  0x54   :  { %4829 = vmatmul.msk.f32.gmra.mxu1 %vm99_vm0, %v5668_v5  ;;  %613 = vmatpush.msrb.mxu3 %v5808_v47 }
  0x55   :  { %4837 = vmatmul.msk.f32.gmra.mxu2 %vm99_vm0, %v5668_v5  ;;  %554 = vmatpush.msra.mxu0 %v5800_v45 }
  0x56   :  { %4845 = vmatmul.msk.f32.gmra.mxu3 %vm99_vm0, %v5668_v5  ;;  %593 = vmatpush.msrb.mxu2 %v5810_v48  ;;  %v9181_v5 = vld [vmem:[#allocation22_spill] sm:$0xff] }
  0x57   :  { %574 = vmatpush.msrb.mxu1 %v5803_v46  ;;  %614 = vmatpush.msrb.mxu3 %v5820_v51 }
  0x58   :  { %594 = vmatpush.msrb.mxu2 %v5822_v52  ;;  %555 = vmatpush.msra.mxu0 %v5814_v49 }
  0x59   :  { %575 = vmatpush.msrb.mxu1 %v5816_v50  ;;  %615 = vmatpush.msrb.mxu3 %v5832_v55 }
  0x5a   :  { %595 = vmatpush.msrb.mxu2 %v5834_v56  ;;  %556 = vmatpush.msra.mxu0 %v5824_v53 }
  0x5b   :  { %576 = vmatpush.msrb.mxu1 %v5827_v54  ;;  %616 = vmatpush.msrb.mxu3 %v5853_v61 }
  0x5c   :  { %427 = vmatmul.f32.vlgmr.msra.gmra.mxu1 %v8755_v31  ;;  %596 = vmatpush.msrb.mxu2 %v5859_v63 }
  0x5d   :  { %447 = vmatmul.f32.vlgmr.msra.gmra.mxu2 %v8755_v31  ;;  %557 = vmatpush.msra.mxu0 %v5836_v57 }
  0x5e   :  { %467 = vmatmul.f32.vlgmr.msra.gmra.mxu3 %v8755_v31  ;;  %577 = vmatpush.msrb.mxu1 %v5851_v60  ;;  %v9182_v31 = vld [vmem:[#allocation26_spill] sm:$0xff] }
  0x5f   :  { %597 = vmatpush.msrb.mxu2 %v5871_v6  ;;  %558 = vmatpush.msra.mxu0 %v5845_v59 }
  0x60   :  { %617 = vmatpush.msrb.mxu3 %v5865_v1  ;;  %578 = vmatpush.msrb.mxu1 %v5863_v0 }
  0x61   :  { %598 = vmatpush.msrb.mxu2 %v5891_v12  ;;  %559 = vmatpush.msra.mxu0 %v5857_v62 }
  0x62   :  { %618 = vmatpush.msrb.mxu3 %v9179_v3  ;;  %579 = vmatpush.msrb.mxu1 %v9180_v4 }
  0x63   :  { %599 = vmatpush.msrb.mxu2 %v5901_v2  ;;  %560 = vmatpush.msra.mxu0 %v9181_v5 }
  0x64   :  { %619 = vmatpush.msrb.mxu3 %v5893_v18  ;;  %580 = vmatpush.msrb.mxu1 %v5887_v11 }
  0x65   :  { %600 = vmatpush.msrb.mxu2 %v5908_v7  ;;  %561 = vmatpush.msra.mxu0 %v9182_v31 }
  0x66   :  { %620 = vmatpush.msrb.mxu3 %v5903_v10  ;;  %581 = vmatpush.msrb.mxu1 %v5897_v44 }
  0x67   :  { %601 = vmatpush.msrb.mxu2 %v5918_v58  ;;  %702 = vmatpush.msrb.mxu0 %v5682_v9 }
  0x68   :  { %621 = vmatpush.msrb.mxu3 %v5910_v8  ;;  %722 = vmatpush.msra.mxu1 %v5697_v13 }
  0x69   :  { %742 = vmatpush.msra.mxu2 %v5706_v17  ;;  %703 = vmatpush.msrb.mxu0 %v5700_v14 }
  0x6a   :  { %762 = vmatpush.msra.mxu3 %v5702_v15  ;;  %723 = vmatpush.msra.mxu1 %v5704_v16 }
  0x6b   :  { %743 = vmatpush.msra.mxu2 %v5724_v22  ;;  %704 = vmatpush.msrb.mxu0 %v5715_v19 }
  0x6c   :  { %763 = vmatpush.msra.mxu3 %v5722_v21  ;;  %724 = vmatpush.msra.mxu1 %v5717_v20 }
  0x6d   :  { %744 = vmatpush.msra.mxu2 %v5736_v26  ;;  %705 = vmatpush.msrb.mxu0 %v5728_v23 }
  0x6e   :  { %764 = vmatpush.msra.mxu3 %v5734_v25  ;;  %725 = vmatpush.msra.mxu1 %v5730_v24 }
  0x6f   :  { %745 = vmatpush.msra.mxu2 %v5748_v30  ;;  %706 = vmatpush.msrb.mxu0 %v5738_v27 }
  0x70   :  { %765 = vmatpush.msra.mxu3 %v5746_v29  ;;  %726 = vmatpush.msra.mxu1 %v5741_v28 }
  0x71   :  { %746 = vmatpush.msra.mxu2 %v5767_v35  ;;  %707 = vmatpush.msrb.mxu0 %v5757_v32 }
  0x72   :  { %766 = vmatpush.msra.mxu3 %v5765_v34  ;;  %727 = vmatpush.msra.mxu1 %v5760_v33 }
  0x73   :  { %747 = vmatpush.msra.mxu2 %v5779_v39  ;;  %708 = vmatpush.msrb.mxu0 %v5771_v36 }
  0x74   :  { %767 = vmatpush.msra.mxu3 %v5777_v38  ;;  %728 = vmatpush.msra.mxu1 %v5773_v37 }
  0x75   :  { %748 = vmatpush.msra.mxu2 %v5791_v43  ;;  %709 = vmatpush.msrb.mxu0 %v5781_v40 }
  0x76   :  { %768 = vmatpush.msra.mxu3 %v5789_v42  ;;  %729 = vmatpush.msra.mxu1 %v5784_v41 }
  0x77   :  { %749 = vmatpush.msra.mxu2 %v5810_v48  ;;  %710 = vmatpush.msrb.mxu0 %v5800_v45 }
  0x78   :  { %769 = vmatpush.msra.mxu3 %v5808_v47  ;;  %730 = vmatpush.msra.mxu1 %v5803_v46 }
  0x79   :  { %750 = vmatpush.msra.mxu2 %v5822_v52  ;;  %711 = vmatpush.msrb.mxu0 %v5814_v49 }
  0x7a   :  { %770 = vmatpush.msra.mxu3 %v5820_v51  ;;  %731 = vmatpush.msra.mxu1 %v5816_v50 }
  0x7b   :  { %751 = vmatpush.msra.mxu2 %v5834_v56  ;;  %712 = vmatpush.msrb.mxu0 %v5824_v53 }
  0x7c   :  { %771 = vmatpush.msra.mxu3 %v5832_v55  ;;  %732 = vmatpush.msra.mxu1 %v5827_v54 }
  0x7d   :  { %752 = vmatpush.msra.mxu2 %v5859_v63  ;;  %713 = vmatpush.msrb.mxu0 %v5836_v57 }
  0x7e   :  { %772 = vmatpush.msra.mxu3 %v5853_v61  ;;  %733 = vmatpush.msra.mxu1 %v5851_v60 }
  0x7f   :  { %753 = vmatpush.msra.mxu2 %v5871_v6  ;;  %714 = vmatpush.msrb.mxu0 %v5845_v59 }
  0x80   :  { %773 = vmatpush.msra.mxu3 %v5865_v1  ;;  %734 = vmatpush.msra.mxu1 %v5863_v0 }
  0x81   :  { %754 = vmatpush.msra.mxu2 %v5891_v12  ;;  %715 = vmatpush.msrb.mxu0 %v5857_v62 }
  0x82   :  { %774 = vmatpush.msra.mxu3 %v9179_v3  ;;  %735 = vmatpush.msra.mxu1 %v9180_v4 }
  0x83   :  { %755 = vmatpush.msra.mxu2 %v5901_v2  ;;  %716 = vmatpush.msrb.mxu0 %v9181_v5 }
  0x84   :  { %775 = vmatpush.msra.mxu3 %v5893_v18  ;;  %736 = vmatpush.msra.mxu1 %v5887_v11 }
  0x85   :  { %756 = vmatpush.msra.mxu2 %v5908_v7  ;;  %717 = vmatpush.msrb.mxu0 %v9182_v31 }
  0x86   :  { %776 = vmatpush.msra.mxu3 %v5903_v10  ;;  %737 = vmatpush.msra.mxu1 %v5897_v44 }
  0x87   :  { %757 = vmatpush.msra.mxu2 %v5918_v58 }
  0x88   :  { %777 = vmatpush.msra.mxu3 %v5910_v8 }
  0x90   :  { %v141_v4 = vpop.f32.mrf.mxu0  ;;  %v6068_v2 = vpop.f32.mrf.mxu1 }
  0x91   :  { %9183 = vst [vmem:[#allocation36_spill] sm:$0xff] %v6068_v2 }
  0x97   :  { %v6070_v18 = vpop.f32.mrf.mxu2  ;;  %v6072_v5 = vpop.f32.mrf.mxu3 }
  0x98   :  { %9184 = vst [vmem:[#allocation37_spill] sm:$0xff] %v6070_v18  ;;  %v6074_v62 = vpop.f32.mrf.mxu0 }
  0x99   :  { %9185 = vst [vmem:[#allocation38_spill] sm:$0xff] %v6072_v5  ;;  %v182_v11 = vpop.f32.mrf.mxu1 }
  0x9a   :  { %9186 = vst [vmem:[#allocation39_spill] sm:$0xff] %v6074_v62 }
  0x9f   :  { %v223_v7 = vpop.f32.mrf.mxu2 }
  0xa0   :  { %v264_v10 = vpop.f32.mrf.mxu3  ;;  %v6078_v31 = vpop.f32.mrf.mxu0 }
  0xa1   :  { %v6076_v3 = vpop.f32.mrf.mxu1  ;;  %9188 = vst [vmem:[#allocation41_spill] sm:$0xff] %v6078_v31 }
  0xa2   :  { %9187 = vst [vmem:[#allocation40_spill] sm:$0xff] %v6076_v3 }
  0xa7   :  { %v6080_v44 = vpop.f32.mrf.mxu2 }
  0xa8   :  { %9189 = vst [vmem:[#allocation42_spill] sm:$0xff] %v6080_v44  ;;  %v6082_v58 = vpop.f32.mrf.mxu3  ;;  %v6086_v2 = vpop.f32.mrf.mxu0 }
  0xa9   :  { %9190 = vst [vmem:[#allocation43_spill] sm:$0xff] %v6082_v58  ;;  %v6084_v8 = vpop.f32.mrf.mxu1 }
  0xaa   :  { %9191 = vst [vmem:[#allocation44_spill] sm:$0xff] %v6084_v8  ;;  %v89_v8 = vld [vmem:[%s8743_s4] sm:$0xf] }
  0xab   :  { %9192 = vst [vmem:[#allocation45_spill] sm:$0xff] %v6086_v2  ;;  %v6126_v6 = vperm.slane %v89_v8, 1 }
  0xad   :  { %9210 = vst [vmem:[#allocation63_spill] sm:$0xff] %v6126_v6 }
  0xaf   :  { %v6088_v18 = vpop.f32.mrf.mxu2 }
  0xb0   :  { %9193 = vst [vmem:[#allocation46_spill] sm:$0xff] %v6088_v18  ;;  %v6090_v5 = vpop.f32.mrf.mxu3 }
  0xb1   :  { %9194 = vst [vmem:[#allocation47_spill] sm:$0xff] %v6090_v5  ;;  %v6092_v12 = vpop.f32.mrf.mxu1  ;;  %v6094_v62 = vpop.f32.mrf.mxu0  ;;  %v6111_v5 = vperm.slane %v89_v8, 0 }
  0xb2   :  { %9195 = vst [vmem:[#allocation48_spill] sm:$0xff] %v6092_v12 }
  0xb3   :  { %9196 = vst [vmem:[#allocation49_spill] sm:$0xff] %v6094_v62  ;;  %v142_v62 = vadd.f32 %v141_v4, %v6111_v5 }
  0xb4   :  { %9203 = vst [vmem:[#allocation56_spill] sm:$0xff] %v6111_v5 }
  0xb8   :  { %v6096_v0 = vpop.f32.mrf.mxu2  ;;  %v6098_v3 = vpop.f32.mrf.mxu3 }
  0xb9   :  { %9197 = vst [vmem:[#allocation50_spill] sm:$0xff] %v6096_v0  ;;  %v6100_v31 = vpop.f32.mrf.mxu1 }
  0xba   :  { %9198 = vst [vmem:[#allocation51_spill] sm:$0xff] %v6098_v3  ;;  %v408_v12 = vpop.f32.mrf.mxu0 }
  0xbb   :  { %9199 = vst [vmem:[#allocation52_spill] sm:$0xff] %v6100_v31  ;;  %v471_v0 = vadd.f32 %v408_v12, %v142_v62  ;;  %v183_v62 = vadd.f32 %v182_v11, %v6126_v6 }
  0xbd   :  { %v4846_v59 = vmul.f32 -1.442695, %v471_v0 }
  0xbf   :  { %4935 = vpow2.f32 %v4846_v59 }
  0xc0   :  { %v6105_v44 = vpop.f32.mrf.mxu2 }
  0xc1   :  { %9200 = vst [vmem:[#allocation53_spill] sm:$0xff] %v6105_v44  ;;  %v6107_v2 = vpop.f32.mrf.mxu3  ;;  %v6109_v18 = vpop.f32.mrf.mxu1 }
  0xc2   :  { %9201 = vst [vmem:[#allocation54_spill] sm:$0xff] %v6107_v2 }
  0xc3   :  { %9202 = vst [vmem:[#allocation55_spill] sm:$0xff] %v6109_v18 }
  0xc5   :  { %v4936_v18 = vpop.eup %4935 }
  0xc6   :  { %v478_v60 = vadd.f32 1.0, %v4936_v18  ;;  %v6136_v18 = vperm.slane %v89_v8, 2 }
  0xc8   :  { %v6114_v58 = vpop.f32.mrf.mxu2  ;;  %4937 = vrcp.f32 %v478_v60  ;;  %9214 = vst [vmem:[#allocation67_spill] sm:$0xff] %v6136_v18  ;;  %vm484_vm2 = vweird.f32 %v478_v60 }
  0xc9   :  { %9204 = vst [vmem:[#allocation57_spill] sm:$0xff] %v6114_v58  ;;  %v6116_v3 = vpop.f32.mrf.mxu3  ;;  %v6118_v31 = vpop.f32.mrf.mxu1 }
  0xca   :  { %9205 = vst [vmem:[#allocation58_spill] sm:$0xff] %v6116_v3 }
  0xcb   :  { %9206 = vst [vmem:[#allocation59_spill] sm:$0xff] %v6118_v31  ;;  %v6131_v31 = vperm.slane %v89_v8, 3 }
  0xcd   :  { %9212 = vst [vmem:[#allocation65_spill] sm:$0xff] %v6131_v31 }
  0xd0   :  { %v6124_v2 = vpop.f32.mrf.mxu2 }
  0xd1   :  { %v6120_v1 = vpop.f32.mrf.mxu3  ;;  %v6122_v44 = vpop.f32.mrf.mxu1  ;;  %9209 = vst [vmem:[#allocation62_spill] sm:$0xff] %v6124_v2 }
  0xd2   :  { %9207 = vst [vmem:[#allocation60_spill] sm:$0xff] %v6120_v1  ;;  %v4938_v2 = vpop.eup %4937 }
  0xd3   :  { %9208 = vst [vmem:[#allocation61_spill] sm:$0xff] %v6122_v44  ;;  %v265_v44 = vadd.f32 %v264_v10, %v6131_v31  ;;  %v480_v11 = vmul.f32 %v4938_v2, %v478_v60  ;;  %vm485_vm1 = vweird.f32 %v4938_v2 }
  0xd4   :  { %vm486_vm4 = vmor %vm484_vm2, %vm485_vm1 }
  0xd8   :  { %v6133_v0 = vpop.f32.mrf.mxu2 }
  0xd9   :  { %v6129_v12 = vpop.f32.mrf.mxu3  ;;  %v428_v4 = vpop.f32.mrf.mxu1  ;;  %9213 = vst [vmem:[#allocation66_spill] sm:$0xff] %v6133_v0 }
  0xda   :  { %9211 = vst [vmem:[#allocation64_spill] sm:$0xff] %v6129_v12  ;;  %v472_v58 = vadd.f32 %v428_v4, %v183_v62  ;;  %v224_v4 = vadd.f32 %v223_v7, %v6136_v18 }
  0xdc   :  { %v4847_v59 = vmul.f32 -1.442695, %v472_v58  ;;  %v481_v58 = vsub.f32 1.0, %v480_v11 }
  0xde   :  { %4939 = vpow2.f32 %v4847_v59  ;;  %v482_v59 = vmul.f32 %v4938_v2, %v481_v58 }
  0xe0   :  { %v448_v62 = vpop.f32.mrf.mxu2  ;;  %v483_v8 = vadd.f32 %v4938_v2, %v482_v59 }
  0xe1   :  { %v468_v1 = vpop.f32.mrf.mxu3  ;;  %v473_v57 = vadd.f32 %v448_v62, %v224_v4 }
  0xe2   :  { %v474_v3 = vadd.f32 %v468_v1, %v265_v44  ;;  %v487_v11 = vsel %vm486_vm4, %v4938_v2, %v483_v8 }
  0xe4   :  { %v4940_v5 = vpop.eup %4939  ;;  %v4848_v6 = vmul.f32 -1.442695, %v474_v3  ;;  %v490_v3 = vand.u32 2147483648, %v478_v60 }
  0xe5   :  { %v497_v12 = vadd.f32 1.0, %v4940_v5  ;;  %v488_v5 = vand.u32 2147483647, %v478_v60 }
  0xe6   :  { %4941 = vpow2.f32 %v4848_v6  ;;  %v491_v58 = vor.u32 1.1754944e-38, %v490_v3 }
  0xe7   :  { %4943 = vrcp.f32 %v497_v12  ;;  %v509_v44 = vand.u32 2147483648, %v497_v12  ;;  %v507_v63 = vand.u32 2147483647, %v497_v12  ;;  %vm503_vm5 = vweird.f32 %v497_v12 }
  0xe8   :  { %4945 = vtanh.f32 %v473_v57  ;;  %vm489_vm7 = vcmp.eq.f32.partialorder %v488_v5, 8.507059e+37 }
  0xe9   :  { %vm508_vm8 = vcmp.eq.f32.partialorder %v507_v63, 8.507059e+37  ;;  %v492_v59 = vsel %vm489_vm7, %v491_v58, %v487_v11 }
  0xec   :  { %v4942_v0 = vpop.eup %4941 }
  0xed   :  { %v4944_v61 = vpop.eup %4943  ;;  %v517_v10 = vadd.f32 1.0, %v4942_v0  ;;  %v510_v0 = vor.u32 1.1754944e-38, %v509_v44 }
  0xee   :  { %v499_v31 = vmul.f32 %v4944_v61, %v497_v12  ;;  %vm504_vm3 = vweird.f32 %v4944_v61  ;;  %v4946_v7 = vpop.eup %4945 }
  0xef   :  { %4947 = vrcp.f32 %v517_v10  ;;  %vm505_vm6 = vmor %vm503_vm5, %vm504_vm3  ;;  %v529_v12 = vand.u32 2147483648, %v517_v10  ;;  %vm523_vm10 = vweird.f32 %v517_v10  ;;  %v527_v8 = vand.u32 2147483647, %v517_v10 }
  0xf0   :  { %v500_v1 = vsub.f32 1.0, %v499_v31 }
  0xf1   :  { %vm528_vm12 = vcmp.eq.f32.partialorder %v527_v8, 8.507059e+37 }
  0xf2   :  { %v501_v6 = vmul.f32 %v4944_v61, %v500_v1  ;;  %v534_v1 = vmul.f32 %v4946_v7, %v492_v59 }
  0xf4   :  { %v502_v62 = vadd.f32 %v4944_v61, %v501_v6 }
  0xf5   :  { %v4948_v4 = vpop.eup %4947 }
  0xf6   :  { %v506_v57 = vsel %vm505_vm6, %v4944_v61, %v502_v62  ;;  %v519_v31 = vmul.f32 %v4948_v4, %v517_v10  ;;  %vm524_vm9 = vweird.f32 %v4948_v4  ;;  %v530_v61 = vor.u32 1.1754944e-38, %v529_v12  ;;  %v9246_v10 = vld [vmem:[#allocation43_spill] sm:$0xff] }
  0xf7   :  { %v511_v18 = vsel %vm508_vm8, %v510_v0, %v506_v57  ;;  %vm525_vm11 = vmor %vm523_vm10, %vm524_vm9 }
  0xf8   :  { %v533_v54 = vmul.f32 0.0, %v511_v18  ;;  %v520_v60 = vsub.f32 1.0, %v519_v31  ;;  %v9245_v18 = vld [vmem:[#allocation65_spill] sm:$0xff] }
  0xf9   :  { %v268_v5 = vadd.f32 %v9246_v10, %v9245_v18 }
  0xfa   :  { %v6139_v53 = vadd.f32 %v534_v1, %v533_v54  ;;  %v521_v55 = vmul.f32 %v4948_v4, %v520_v60  ;;  %v9247_v1 = vld [vmem:[#allocation67_spill] sm:$0xff]  ;;  %v9248_v60 = vld [vmem:[#allocation42_spill] sm:$0xff] }
  0xfc   :  { %4949 = vtanh.f32 %v6139_v53  ;;  %v522_v2 = vadd.f32 %v4948_v4, %v521_v55 }
  0xfe   :  { %v526_v44 = vsel %vm525_vm11, %v4948_v4, %v522_v2  ;;  %v227_v2 = vadd.f32 %v9248_v60, %v9247_v1 }
  0xff   :  { %v531_v3 = vsel %vm528_vm12, %v530_v61, %v526_v44 }
 0x102   :  { %v4950_v63 = vpop.eup %4949 }
 0x103   :  { %v6142_v6 = vmul.f32 %v4950_v63, %v531_v3 }
 0x105   :  { %9215 = vst [vmem:[#allocation68_spill] sm:$0xff] %v6142_v6  ;;  %562 = vmatmul.f32.vlgmr.msra.gmra.mxu0 %v6142_v6  ;;  %582 = vmatmul.f32.vlgmr.msrb.gmra.mxu1 %v6142_v6 }
 0x106   :  { %602 = vmatmul.f32.vlgmr.msrb.gmra.mxu2 %v6142_v6  ;;  %622 = vmatmul.f32.vlgmr.msrb.gmra.mxu3 %v6142_v6  ;;  %v6317_v6 = vld [vmem:[#allocation6 + $0x108] sm:$0xff] }
 0x107   :  { %858 = vmatpush.msra.mxu0 %v5682_v9  ;;  %878 = vmatpush.msrb.mxu1 %v5697_v13  ;;  %v9216_v9 = vld [vmem:[#allocation13_spill] sm:$0xff]  ;;  %v9217_v13 = vld [vmem:[#allocation11_spill] sm:$0xff] }
 0x108   :  { %898 = vmatpush.msrb.mxu2 %v5706_v17  ;;  %918 = vmatpush.msrb.mxu3 %v5702_v15  ;;  %v9219_v15 = vld [vmem:[#allocation19_spill] sm:$0xff]  ;;  %v9221_v17 = vld [vmem:[#allocation14_spill] sm:$0xff] }
 0x109   :  { %859 = vmatpush.msra.mxu0 %v5700_v14  ;;  %879 = vmatpush.msrb.mxu1 %v5704_v16  ;;  %v9218_v14 = vld [vmem:[#allocation12_spill] sm:$0xff]  ;;  %v9220_v16 = vld [vmem:[#allocation17_spill] sm:$0xff] }
 0x10a   :  { %899 = vmatpush.msrb.mxu2 %v5724_v22  ;;  %919 = vmatpush.msrb.mxu3 %v5722_v21  ;;  %v9224_v21 = vld [vmem:[#allocation21_spill] sm:$0xff]  ;;  %v9225_v22 = vld [vmem:[#allocation15_spill] sm:$0xff] }
 0x10b   :  { %860 = vmatpush.msra.mxu0 %v5715_v19  ;;  %880 = vmatpush.msrb.mxu1 %v5717_v20  ;;  %v9222_v19 = vld [vmem:[#allocation16_spill] sm:$0xff]  ;;  %v9223_v20 = vld [vmem:[#allocation23_spill] sm:$0xff] }
 0x10c   :  { %900 = vmatpush.msrb.mxu2 %v5736_v26  ;;  %920 = vmatpush.msrb.mxu3 %v5734_v25  ;;  %v9228_v25 = vld [vmem:[#allocation25_spill] sm:$0xff]  ;;  %v9229_v26 = vld [vmem:[#allocation18_spill] sm:$0xff] }
 0x10d   :  { %861 = vmatpush.msra.mxu0 %v5728_v23  ;;  %881 = vmatpush.msrb.mxu1 %v5730_v24  ;;  %v9226_v23 = vld [vmem:[#allocation20_spill] sm:$0xff] }
 0x10e   :  { %901 = vmatpush.msrb.mxu2 %v5748_v30  ;;  %921 = vmatpush.msrb.mxu3 %v5746_v29  ;;  %v9227_v24 = vld [vmem:[#allocation28_spill] sm:$0xff]  ;;  %v9232_v29 = vld [vmem:[#allocation29_spill] sm:$0xff]  ;;  %v9233_v30 = vld [vmem:[#allocation22_spill] sm:$0xff] }
 0x10f   :  { %862 = vmatpush.msra.mxu0 %v5738_v27  ;;  %882 = vmatpush.msrb.mxu1 %v5741_v28  ;;  %v9230_v27 = vld [vmem:[#allocation24_spill] sm:$0xff]  ;;  %v9231_v28 = vld [vmem:[#allocation31_spill] sm:$0xff] }
 0x110   :  { %902 = vmatpush.msrb.mxu2 %v5767_v35  ;;  %922 = vmatpush.msrb.mxu3 %v5765_v34  ;;  %v9236_v34 = vld [vmem:[#allocation32_spill] sm:$0xff]  ;;  %v9237_v35 = vld [vmem:[#allocation26_spill] sm:$0xff] }
 0x111   :  { %863 = vmatpush.msra.mxu0 %v5757_v32  ;;  %883 = vmatpush.msrb.mxu1 %v5760_v33  ;;  %v9234_v32 = vld [vmem:[#allocation27_spill] sm:$0xff]  ;;  %v9235_v33 = vld [vmem:[#allocation33_spill] sm:$0xff] }
 0x112   :  { %903 = vmatpush.msrb.mxu2 %v5779_v39  ;;  %923 = vmatpush.msrb.mxu3 %v5777_v38  ;;  %v9240_v38 = vld [vmem:[#allocation34_spill] sm:$0xff]  ;;  %v9241_v39 = vld [vmem:[#allocation56_spill] sm:$0xff] }
 0x113   :  { %864 = vmatpush.msra.mxu0 %v5771_v36  ;;  %884 = vmatpush.msrb.mxu1 %v5773_v37  ;;  %v9238_v36 = vld [vmem:[#allocation30_spill] sm:$0xff]  ;;  %v9239_v37 = vld [vmem:[#allocation35_spill] sm:$0xff] }
 0x114   :  { %904 = vmatpush.msrb.mxu2 %v5791_v43  ;;  %924 = vmatpush.msrb.mxu3 %v5789_v42  ;;  %v9243_v42 = vld [vmem:[#allocation63_spill] sm:$0xff]  ;;  %v9244_v43 = vld [vmem:[#allocation40_spill] sm:$0xff] }
 0x115   :  { %865 = vmatpush.msra.mxu0 %v5781_v40  ;;  %885 = vmatpush.msrb.mxu1 %v5784_v41  ;;  %v9242_v40 = vld [vmem:[#allocation39_spill] sm:$0xff] }
 0x116   :  { %905 = vmatpush.msrb.mxu2 %v5810_v48  ;;  %925 = vmatpush.msrb.mxu3 %v5808_v47  ;;  %v145_v41 = vadd.f32 %v9242_v40, %v9241_v39 }
 0x117   :  { %866 = vmatpush.msra.mxu0 %v5800_v45  ;;  %886 = vmatpush.msrb.mxu1 %v5803_v46  ;;  %v186_v45 = vadd.f32 %v9244_v43, %v9243_v42 }
 0x118   :  { %906 = vmatpush.msrb.mxu2 %v5822_v52  ;;  %926 = vmatpush.msrb.mxu3 %v5820_v51 }
 0x119   :  { %867 = vmatpush.msra.mxu0 %v5814_v49  ;;  %887 = vmatpush.msrb.mxu1 %v5816_v50 }
 0x11a   :  { %907 = vmatpush.msrb.mxu2 %v5834_v56  ;;  %927 = vmatpush.msrb.mxu3 %v9216_v9 }
 0x11b   :  { %868 = vmatpush.msra.mxu0 %v9217_v13  ;;  %888 = vmatpush.msrb.mxu1 %v9218_v14 }
 0x11c   :  { %908 = vmatpush.msrb.mxu2 %v9219_v15  ;;  %928 = vmatpush.msrb.mxu3 %v9220_v16 }
 0x11d   :  { %869 = vmatpush.msra.mxu0 %v9221_v17  ;;  %889 = vmatpush.msrb.mxu1 %v9222_v19 }
 0x11e   :  { %909 = vmatpush.msrb.mxu2 %v9223_v20  ;;  %929 = vmatpush.msrb.mxu3 %v9224_v21 }
 0x11f   :  { %870 = vmatpush.msra.mxu0 %v9225_v22  ;;  %890 = vmatpush.msrb.mxu1 %v9226_v23 }
 0x120   :  { %910 = vmatpush.msrb.mxu2 %v9227_v24  ;;  %930 = vmatpush.msrb.mxu3 %v9228_v25 }
 0x121   :  { %871 = vmatpush.msra.mxu0 %v9229_v26  ;;  %891 = vmatpush.msrb.mxu1 %v9230_v27 }
 0x122   :  { %911 = vmatpush.msrb.mxu2 %v9231_v28  ;;  %931 = vmatpush.msrb.mxu3 %v9232_v29 }
 0x123   :  { %872 = vmatpush.msra.mxu0 %v9233_v30  ;;  %892 = vmatpush.msrb.mxu1 %v9234_v32 }
 0x124   :  { %912 = vmatpush.msrb.mxu2 %v9235_v33  ;;  %932 = vmatpush.msrb.mxu3 %v9236_v34 }
 0x125   :  { %873 = vmatpush.msra.mxu0 %v9237_v35  ;;  %893 = vmatpush.msrb.mxu1 %v9238_v36 }
 0x126   :  { %913 = vmatpush.msrb.mxu2 %v9239_v37  ;;  %933 = vmatpush.msrb.mxu3 %v9240_v38 }
 0x182   :  { %v563_v46 = vpop.f32.mrf.mxu0  ;;  %v583_v47 = vpop.f32.mrf.mxu1 }
 0x183   :  { %v626_v49 = vadd.f32 %v563_v46, %v145_v41  ;;  %v627_v50 = vadd.f32 %v583_v47, %v186_v45 }
 0x185   :  { %v4849_v54 = vmul.f32 -1.442695, %v626_v49  ;;  %v4850_v55 = vmul.f32 -1.442695, %v627_v50 }
 0x187   :  { %4951 = vpow2.f32 %v4849_v54 }
 0x188   :  { %4953 = vpow2.f32 %v4850_v55 }
 0x189   :  { %v623_v7 = vpop.f32.mrf.mxu3  ;;  %v603_v31 = vpop.f32.mrf.mxu2 }
 0x18a   :  { %v629_v11 = vadd.f32 %v623_v7, %v268_v5  ;;  %v628_v44 = vadd.f32 %v603_v31, %v227_v2 }
 0x18c   :  { %v4851_v62 = vmul.f32 -1.442695, %v629_v11 }
 0x18d   :  { %v4952_v4 = vpop.eup %4951 }
 0x18e   :  { %v4954_v0 = vpop.eup %4953  ;;  %v633_v58 = vadd.f32 1.0, %v4952_v4  ;;  %4955 = vpow2.f32 %v4851_v62 }
 0x18f   :  { %v652_v57 = vadd.f32 1.0, %v4954_v0 }
 0x190   :  { %4957 = vrcp.f32 %v633_v58  ;;  %v645_v43 = vand.u32 2147483648, %v633_v58  ;;  %v643_v47 = vand.u32 2147483647, %v633_v58  ;;  %vm639_vm15 = vweird.f32 %v633_v58 }
 0x191   :  { %4959 = vrcp.f32 %v652_v57  ;;  %v664_v45 = vand.u32 2147483648, %v652_v57  ;;  %v662_v50 = vand.u32 2147483647, %v652_v57  ;;  %vm658_vm0 = vweird.f32 %v652_v57 }
 0x192   :  { %v646_v10 = vor.u32 1.1754944e-38, %v645_v43  ;;  %vm644_vm3 = vcmp.eq.f32.partialorder %v643_v47, 8.507059e+37  ;;  %v6239_v47 = vld [vmem:[#allocation6 + $0x1f8] sm:$0xff] }
 0x193   :  { %v665_v11 = vor.u32 1.1754944e-38, %v664_v45  ;;  %vm663_vm4 = vcmp.eq.f32.partialorder %v662_v50, 8.507059e+37  ;;  %v6245_v50 = vld [vmem:[#allocation6 + $0x1c8] sm:$0xff] }
 0x194   :  { %v4956_v59 = vpop.eup %4955 }
 0x195   :  { %v672_v12 = vadd.f32 1.0, %v4956_v59 }
 0x196   :  { %v4958_v8 = vpop.eup %4957 }
 0x197   :  { %v4960_v61 = vpop.eup %4959  ;;  %v635_v63 = vmul.f32 %v4958_v8, %v633_v58  ;;  %4961 = vrcp.f32 %v672_v12  ;;  %vm640_vm13 = vweird.f32 %v4958_v8  ;;  %vm678_vm6 = vweird.f32 %v672_v12 }
 0x198   :  { %v654_v3 = vmul.f32 %v4960_v61, %v652_v57  ;;  %4963 = vtanh.f32 %v628_v44  ;;  %vm659_vm14 = vweird.f32 %v4960_v61  ;;  %vm641_vm1 = vmor %vm639_vm15, %vm640_vm13 }
 0x199   :  { %v636_v40 = vsub.f32 1.0, %v635_v63  ;;  %vm660_vm2 = vmor %vm658_vm0, %vm659_vm14 }
 0x19a   :  { %v655_v41 = vsub.f32 1.0, %v654_v3  ;;  %v684_v3 = vand.u32 2147483648, %v672_v12 }
 0x19b   :  { %v637_v46 = vmul.f32 %v4958_v8, %v636_v40 }
 0x19c   :  { %v656_v49 = vmul.f32 %v4960_v61, %v655_v41  ;;  %v685_v41 = vor.u32 1.1754944e-38, %v684_v3  ;;  %v6296_v3 = vld [vmem:[#allocation6 + $0x150] sm:$0xff] }
 0x19d   :  { %v4962_v54 = vpop.eup %4961  ;;  %v638_v55 = vadd.f32 %v4958_v8, %v637_v46  ;;  %v6236_v46 = vld [vmem:[#allocation6 + $0x1f0] sm:$0xff] }
 0x19e   :  { %v657_v5 = vadd.f32 %v4960_v61, %v656_v49  ;;  %v674_v7 = vmul.f32 %v4962_v54, %v672_v12  ;;  %v4964_v4 = vpop.eup %4963  ;;  %vm679_vm5 = vweird.f32 %v4962_v54  ;;  %v6242_v49 = vld [vmem:[#allocation6 + $0x1c0] sm:$0xff] }
 0x19f   :  { %v642_v62 = vsel %vm641_vm1, %v4958_v8, %v638_v55  ;;  %v682_v8 = vand.u32 2147483647, %v672_v12  ;;  %vm680_vm7 = vmor %vm678_vm6, %vm679_vm5  ;;  %v6233_v12 = vld [vmem:[#allocation6 + $0x1e8] sm:$0xff]  ;;  %v6251_v55 = vld [vmem:[#allocation6 + $0x1d8] sm:$0xff] }
 0x1a0   :  { %v647_v0 = vsel %vm644_vm3, %v646_v10, %v642_v62  ;;  %v661_v31 = vsel %vm660_vm2, %v4960_v61, %v657_v5  ;;  %v675_v59 = vsub.f32 1.0, %v674_v7  ;;  %v6254_v10 = vld [vmem:[#allocation6 + $0x1a0] sm:$0xff]  ;;  %v6257_v5 = vld [vmem:[#allocation6 + $0x1a8] sm:$0xff]  ;;  %v6260_v7 = vld [vmem:[#allocation6 + $0x1b0] sm:$0xff] }
 0x1a1   :  { %v666_v60 = vsel %vm663_vm4, %v665_v11, %v661_v31  ;;  %v689_v2 = vmul.f32 %v4964_v4, %v647_v0  ;;  %vm683_vm8 = vcmp.eq.f32.partialorder %v682_v8, 8.507059e+37  ;;  %v6263_v11 = vld [vmem:[#allocation6 + $0x1b8] sm:$0xff]  ;;  %v6266_v62 = vld [vmem:[#allocation6 + $0x180] sm:$0xff]  ;;  %v6269_v4 = vld [vmem:[#allocation6 + $0x188] sm:$0xff] }
 0x1a2   :  { %v688_v44 = vmul.f32 %v666_v60, %v6139_v53  ;;  %v676_v63 = vmul.f32 %v4962_v54, %v675_v59  ;;  %v6230_v53 = vld [vmem:[#allocation6 + $0x1e0] sm:$0xff]  ;;  %v6272_v0 = vld [vmem:[#allocation6 + $0x190] sm:$0xff]  ;;  %v6275_v31 = vld [vmem:[#allocation6 + $0x198] sm:$0xff] }
 0x1a3   :  { %v6278_v59 = vld [vmem:[#allocation6 + $0x160] sm:$0xff]  ;;  %v6281_v60 = vld [vmem:[#allocation6 + $0x168] sm:$0xff]  ;;  %v6299_v8 = vld [vmem:[#allocation6 + $0x158] sm:$0xff] }
 0x1a4   :  { %v6221_v58 = vadd.f32 %v689_v2, %v688_v44  ;;  %v677_v57 = vadd.f32 %v4962_v54, %v676_v63  ;;  %v6284_v2 = vld [vmem:[#allocation6 + $0x170] sm:$0xff]  ;;  %v6287_v44 = vld [vmem:[#allocation6 + $0x178] sm:$0xff]  ;;  %v6290_v63 = vld [vmem:[#allocation6 + $0x140] sm:$0xff] }
 0x1a6   :  { %4965 = vtanh.f32 %v6221_v58  ;;  %v681_v40 = vsel %vm680_vm7, %v4962_v54, %v677_v57  ;;  %v6248_v54 = vld [vmem:[#allocation6 + $0x1d0] sm:$0xff]  ;;  %v6293_v57 = vld [vmem:[#allocation6 + $0x148] sm:$0xff] }
 0x1a7   :  { %v686_v43 = vsel %vm683_vm8, %v685_v41, %v681_v40  ;;  %v6302_v40 = vld [vmem:[#allocation6 + $0x120] sm:$0xff]  ;;  %v6305_v41 = vld [vmem:[#allocation6 + $0x128] sm:$0xff] }
 0x1a8   :  { %9250 = vst [vmem:[#allocation11_spill] sm:$0xff] %v6302_v40 }
 0x1a9   :  { %9251 = vst [vmem:[#allocation12_spill] sm:$0xff] %v6305_v41 }
 0x1ac   :  { %v4966_v61 = vpop.eup %4965 }
 0x1ad   :  { %v6224_v45 = vmul.f32 %v4966_v61, %v686_v43  ;;  %v6308_v61 = vld [vmem:[#allocation6 + $0x130] sm:$0xff]  ;;  %v6311_v43 = vld [vmem:[#allocation6 + $0x138] sm:$0xff] }
 0x1ae   :  { %9252 = vst [vmem:[#allocation19_spill] sm:$0xff] %v6308_v61 }
 0x1af   :  { %9249 = vst [vmem:[#allocation13_spill] sm:$0xff] %v6224_v45  ;;  %718 = vmatmul.f32.vlgmr.msrb.gmra.mxu0 %v6224_v45  ;;  %738 = vmatmul.f32.vlgmr.msra.gmra.mxu1 %v6224_v45 }
 0x1b0   :  { %758 = vmatmul.f32.vlgmr.msra.gmra.mxu2 %v6224_v45  ;;  %778 = vmatmul.f32.vlgmr.msra.gmra.mxu3 %v6224_v45  ;;  %v6314_v45 = vld [vmem:[#allocation6 + $0x100] sm:$0xff] }
 0x1b1   :  { %1014 = vmatpush.msrb.mxu0 %v6230_v53  ;;  %1034 = vmatpush.msra.mxu1 %v6233_v12  ;;  %9253 = vst [vmem:[#allocation17_spill] sm:$0xff] %v6314_v45 }
 0x1b2   :  { %1054 = vmatpush.msra.mxu2 %v6236_v46  ;;  %1074 = vmatpush.msra.mxu3 %v6239_v47 }
 0x1b3   :  { %1015 = vmatpush.msrb.mxu0 %v6242_v49  ;;  %1035 = vmatpush.msra.mxu1 %v6245_v50 }
 0x1b4   :  { %1055 = vmatpush.msra.mxu2 %v6248_v54  ;;  %1075 = vmatpush.msra.mxu3 %v6251_v55 }
 0x1b5   :  { %1016 = vmatpush.msrb.mxu0 %v6254_v10  ;;  %1036 = vmatpush.msra.mxu1 %v6257_v5 }
 0x1b6   :  { %1056 = vmatpush.msra.mxu2 %v6260_v7  ;;  %1076 = vmatpush.msra.mxu3 %v6263_v11 }
 0x1b7   :  { %1017 = vmatpush.msrb.mxu0 %v6266_v62  ;;  %1037 = vmatpush.msra.mxu1 %v6269_v4 }
 0x1b8   :  { %1057 = vmatpush.msra.mxu2 %v6272_v0  ;;  %1077 = vmatpush.msra.mxu3 %v6275_v31 }
 0x1b9   :  { %1018 = vmatpush.msrb.mxu0 %v6278_v59  ;;  %1038 = vmatpush.msra.mxu1 %v6281_v60 }
 0x1ba   :  { %1058 = vmatpush.msra.mxu2 %v6284_v2  ;;  %1078 = vmatpush.msra.mxu3 %v6287_v44 }
 0x1bb   :  { %1019 = vmatpush.msrb.mxu0 %v6290_v63  ;;  %1039 = vmatpush.msra.mxu1 %v6293_v57 }
 0x1bc   :  { %1059 = vmatpush.msra.mxu2 %v6296_v3  ;;  %1079 = vmatpush.msra.mxu3 %v6299_v8 }
 0x1bd   :  { %1020 = vmatpush.msrb.mxu0 %v6302_v40  ;;  %1040 = vmatpush.msra.mxu1 %v6305_v41  ;;  %v6321_v40 = vld [vmem:[#allocation6 + $0x118] sm:$0xff]  ;;  %v6324_v41 = vld [vmem:[#allocation6 + $0xe0] sm:$0xff] }
 0x1be   :  { %1060 = vmatpush.msra.mxu2 %v6308_v61  ;;  %1080 = vmatpush.msra.mxu3 %v6311_v43  ;;  %v6327_v61 = vld [vmem:[#allocation6 + $0xe8] sm:$0xff] }
 0x1bf   :  { %1021 = vmatpush.msrb.mxu0 %v6314_v45  ;;  %1041 = vmatpush.msra.mxu1 %v6317_v6  ;;  %v6332_v45 = vld [vmem:[#allocation6 + $0xc0] sm:$0xff] }
 0x1c0   :  { %1061 = vmatpush.msra.mxu2 %v5810_v48  ;;  %1081 = vmatpush.msra.mxu3 %v6321_v40  ;;  %v6335_v48 = vld [vmem:[#allocation6 + $0xc8] sm:$0xff] }
 0x1c1   :  { %1022 = vmatpush.msrb.mxu0 %v6324_v41  ;;  %1042 = vmatpush.msra.mxu1 %v6327_v61 }
 0x1c2   :  { %1062 = vmatpush.msra.mxu2 %v5822_v52  ;;  %1082 = vmatpush.msra.mxu3 %v5820_v51  ;;  %v9254_v51 = vld [vmem:[#allocation41_spill] sm:$0xff] }
 0x1c3   :  { %1023 = vmatpush.msrb.mxu0 %v6332_v45  ;;  %1043 = vmatpush.msra.mxu1 %v6335_v48  ;;  %v148_v52 = vadd.f32 %v9254_v51, %v9241_v39 }
 0x1c4   :  { %1063 = vmatpush.msra.mxu2 %v5834_v56  ;;  %1083 = vmatpush.msra.mxu3 %v9216_v9  ;;  %v9255_v56 = vld [vmem:[#allocation44_spill] sm:$0xff] }
 0x1c5   :  { %1024 = vmatpush.msrb.mxu0 %v9217_v13  ;;  %1044 = vmatpush.msra.mxu1 %v9218_v14  ;;  %v189_v9 = vadd.f32 %v9255_v56, %v9243_v42 }
 0x1c6   :  { %1064 = vmatpush.msra.mxu2 %v9219_v15  ;;  %1084 = vmatpush.msra.mxu3 %v9220_v16 }
 0x1c7   :  { %1025 = vmatpush.msrb.mxu0 %v9221_v17  ;;  %1045 = vmatpush.msra.mxu1 %v9222_v19 }
 0x1c8   :  { %1065 = vmatpush.msra.mxu2 %v9223_v20  ;;  %1085 = vmatpush.msra.mxu3 %v9224_v21  ;;  %v9256_v20 = vld [vmem:[#allocation47_spill] sm:$0xff] }
 0x1c9   :  { %1026 = vmatpush.msrb.mxu0 %v9225_v22  ;;  %1046 = vmatpush.msra.mxu1 %v9226_v23  ;;  %v271_v21 = vadd.f32 %v9256_v20, %v9245_v18 }
 0x1ca   :  { %1066 = vmatpush.msra.mxu2 %v9227_v24  ;;  %1086 = vmatpush.msra.mxu3 %v9228_v25 }
 0x1cb   :  { %1027 = vmatpush.msrb.mxu0 %v9229_v26  ;;  %1047 = vmatpush.msra.mxu1 %v9230_v27 }
 0x1cc   :  { %1067 = vmatpush.msra.mxu2 %v9231_v28  ;;  %1087 = vmatpush.msra.mxu3 %v9232_v29 }
 0x1cd   :  { %1028 = vmatpush.msrb.mxu0 %v9233_v30  ;;  %1048 = vmatpush.msra.mxu1 %v9234_v32  ;;  %v9257_v32 = vld [vmem:[#allocation46_spill] sm:$0xff] }
 0x1ce   :  { %1068 = vmatpush.msra.mxu2 %v9235_v33  ;;  %1088 = vmatpush.msra.mxu3 %v9236_v34  ;;  %v230_v33 = vadd.f32 %v9257_v32, %v9247_v1 }
 0x1cf   :  { %1029 = vmatpush.msrb.mxu0 %v9237_v35  ;;  %1049 = vmatpush.msra.mxu1 %v9238_v36 }
 0x1d0   :  { %1069 = vmatpush.msra.mxu2 %v9239_v37  ;;  %1089 = vmatpush.msra.mxu3 %v9240_v38 }
 0x22c   :  { %v719_v13 = vpop.f32.mrf.mxu0  ;;  %v739_v14 = vpop.f32.mrf.mxu1 }
 0x22d   :  { %v782_v15 = vadd.f32 %v719_v13, %v148_v52  ;;  %v783_v16 = vadd.f32 %v739_v14, %v189_v9 }
 0x22f   :  { %v4852_v17 = vmul.f32 -1.442695, %v782_v15  ;;  %v4853_v19 = vmul.f32 -1.442695, %v783_v16 }
 0x231   :  { %4967 = vpow2.f32 %v4852_v17 }
 0x232   :  { %4969 = vpow2.f32 %v4853_v19 }
 0x233   :  { %v779_v22 = vpop.f32.mrf.mxu3  ;;  %v759_v29 = vpop.f32.mrf.mxu2 }
 0x234   :  { %v785_v23 = vadd.f32 %v779_v22, %v271_v21  ;;  %v784_v36 = vadd.f32 %v759_v29, %v230_v33 }
 0x236   :  { %v4854_v24 = vmul.f32 -1.442695, %v785_v23 }
 0x237   :  { %v4968_v25 = vpop.eup %4967 }
 0x238   :  { %v4970_v26 = vpop.eup %4969  ;;  %v789_v27 = vadd.f32 1.0, %v4968_v25  ;;  %4971 = vpow2.f32 %v4854_v24 }
 0x239   :  { %v808_v28 = vadd.f32 1.0, %v4970_v26 }
 0x23a   :  { %4973 = vrcp.f32 %v789_v27  ;;  %v801_v9 = vand.u32 2147483648, %v789_v27  ;;  %v799_v15 = vand.u32 2147483647, %v789_v27  ;;  %vm795_vm11 = vweird.f32 %v789_v27 }
 0x23b   :  { %4975 = vrcp.f32 %v808_v28  ;;  %v820_v13 = vand.u32 2147483648, %v808_v28  ;;  %v818_v17 = vand.u32 2147483647, %v808_v28  ;;  %vm814_vm12 = vweird.f32 %v808_v28 }
 0x23c   :  { %v802_v21 = vor.u32 1.1754944e-38, %v801_v9  ;;  %vm800_vm15 = vcmp.eq.f32.partialorder %v799_v15, 8.507059e+37  ;;  %v9261_v15 = vld [vmem:[#allocation19_spill] sm:$0xff] }
 0x23d   :  { %v821_v24 = vor.u32 1.1754944e-38, %v820_v13  ;;  %vm819_vm0 = vcmp.eq.f32.partialorder %v818_v17, 8.507059e+37  ;;  %v6412_v17 = vld [vmem:[#allocation6 + $0x110] sm:$0xff] }
 0x23e   :  { %v4972_v30 = vpop.eup %4971 }
 0x23f   :  { %v828_v34 = vadd.f32 1.0, %v4972_v30 }
 0x240   :  { %v4974_v35 = vpop.eup %4973 }
 0x241   :  { %v4976_v37 = vpop.eup %4975  ;;  %v791_v38 = vmul.f32 %v4974_v35, %v789_v27  ;;  %4977 = vrcp.f32 %v828_v34  ;;  %vm796_vm9 = vweird.f32 %v4974_v35  ;;  %vm834_vm2 = vweird.f32 %v828_v34 }
 0x242   :  { %v810_v51 = vmul.f32 %v4976_v37, %v808_v28  ;;  %4979 = vtanh.f32 %v784_v36  ;;  %vm815_vm10 = vweird.f32 %v4976_v37  ;;  %vm797_vm13 = vmor %vm795_vm11, %vm796_vm9 }
 0x243   :  { %v792_v52 = vsub.f32 1.0, %v791_v38  ;;  %vm816_vm14 = vmor %vm814_vm12, %vm815_vm10 }
 0x244   :  { %v811_v56 = vsub.f32 1.0, %v810_v51 }
 0x245   :  { %v793_v14 = vmul.f32 %v4974_v35, %v792_v52  ;;  %v840_v52 = vand.u32 2147483648, %v828_v34 }
 0x246   :  { %v812_v16 = vmul.f32 %v4976_v37, %v811_v56 }
 0x247   :  { %v4978_v19 = vpop.eup %4977  ;;  %v794_v20 = vadd.f32 %v4974_v35, %v793_v14  ;;  %v841_v9 = vor.u32 1.1754944e-38, %v840_v52  ;;  %v6468_v52 = vld [vmem:[#allocation6 + $0x40] sm:$0xff] }
 0x248   :  { %v813_v22 = vadd.f32 %v4976_v37, %v812_v16  ;;  %v830_v23 = vmul.f32 %v4978_v19, %v828_v34  ;;  %v4980_v26 = vpop.eup %4979  ;;  %vm835_vm1 = vweird.f32 %v4978_v19  ;;  %v9262_v16 = vld [vmem:[#allocation17_spill] sm:$0xff]  ;;  %9277 = vst [vmem:[#allocation32_spill] sm:$0xff] %v6468_v52 }
 0x249   :  { %v798_v25 = vsel %vm797_vm13, %v4974_v35, %v794_v20  ;;  %v838_v35 = vand.u32 2147483647, %v828_v34  ;;  %vm836_vm3 = vmor %vm834_vm2, %vm835_vm1  ;;  %v9260_v34 = vld [vmem:[#allocation12_spill] sm:$0xff]  ;;  %v6421_v20 = vld [vmem:[#allocation6 + $0xf8] sm:$0xff] }
 0x24a   :  { %v803_v29 = vsel %vm800_vm15, %v802_v21, %v798_v25  ;;  %v817_v30 = vsel %vm816_vm14, %v4976_v37, %v813_v22  ;;  %v831_v32 = vsub.f32 1.0, %v830_v23  ;;  %v6426_v21 = vld [vmem:[#allocation6 + $0xd0] sm:$0xff]  ;;  %v6429_v22 = vld [vmem:[#allocation6 + $0xd8] sm:$0xff]  ;;  %v6432_v23 = vld [vmem:[#allocation6 + $0xa0] sm:$0xff] }
 0x24b   :  { %v822_v33 = vsel %vm819_vm0, %v821_v24, %v817_v30  ;;  %v845_v36 = vmul.f32 %v4980_v26, %v803_v29  ;;  %vm839_vm4 = vcmp.eq.f32.partialorder %v838_v35, 8.507059e+37  ;;  %9263 = vst [vmem:[#allocation16_spill] sm:$0xff] %v6426_v21  ;;  %v6435_v24 = vld [vmem:[#allocation6 + $0xa8] sm:$0xff]  ;;  %v6438_v25 = vld [vmem:[#allocation6 + $0xb0] sm:$0xff]  ;;  %v6441_v26 = vld [vmem:[#allocation6 + $0xb8] sm:$0xff] }
 0x24c   :  { %v844_v38 = vmul.f32 %v822_v33, %v6221_v58  ;;  %v832_v51 = vmul.f32 %v4978_v19, %v831_v32  ;;  %v9259_v58 = vld [vmem:[#allocation11_spill] sm:$0xff]  ;;  %9264 = vst [vmem:[#allocation23_spill] sm:$0xff] %v6429_v22  ;;  %v6447_v30 = vld [vmem:[#allocation6 + $0x88] sm:$0xff]  ;;  %v6450_v32 = vld [vmem:[#allocation6 + $0x90] sm:$0xff] }
 0x24d   :  { %9265 = vst [vmem:[#allocation21_spill] sm:$0xff] %v6432_v23  ;;  %v6444_v29 = vld [vmem:[#allocation6 + $0x80] sm:$0xff]  ;;  %v6453_v33 = vld [vmem:[#allocation6 + $0x98] sm:$0xff]  ;;  %v6471_v35 = vld [vmem:[#allocation6 + $0x48] sm:$0xff] }
 0x24e   :  { %v6373_v27 = vadd.f32 %v845_v36, %v844_v38  ;;  %v833_v28 = vadd.f32 %v4978_v19, %v832_v51  ;;  %9266 = vst [vmem:[#allocation15_spill] sm:$0xff] %v6435_v24  ;;  %v6456_v36 = vld [vmem:[#allocation6 + $0x60] sm:$0xff]  ;;  %v6459_v38 = vld [vmem:[#allocation6 + $0x68] sm:$0xff]  ;;  %v6462_v51 = vld [vmem:[#allocation6 + $0x70] sm:$0xff] }
 0x24f   :  { %9267 = vst [vmem:[#allocation20_spill] sm:$0xff] %v6438_v25 }
 0x250   :  { %4981 = vtanh.f32 %v6373_v27  ;;  %v837_v56 = vsel %vm836_vm3, %v4978_v19, %v833_v28  ;;  %v6418_v19 = vld [vmem:[#allocation6 + $0xf0] sm:$0xff]  ;;  %9268 = vst [vmem:[#allocation28_spill] sm:$0xff] %v6441_v26  ;;  %v6465_v28 = vld [vmem:[#allocation6 + $0x78] sm:$0xff] }
 0x251   :  { %v842_v13 = vsel %vm839_vm4, %v841_v9, %v837_v56  ;;  %9269 = vst [vmem:[#allocation25_spill] sm:$0xff] %v6444_v29  ;;  %v6474_v56 = vld [vmem:[#allocation6 + $0x50] sm:$0xff]  ;;  %v6477_v9 = vld [vmem:[#allocation6 + $0x58] sm:$0xff] }
 0x252   :  { %9270 = vst [vmem:[#allocation18_spill] sm:$0xff] %v6447_v30 }
 0x253   :  { %9271 = vst [vmem:[#allocation24_spill] sm:$0xff] %v6450_v32 }
 0x254   :  { %9272 = vst [vmem:[#allocation31_spill] sm:$0xff] %v6453_v33 }
 0x255   :  { %9273 = vst [vmem:[#allocation29_spill] sm:$0xff] %v6456_v36 }
 0x256   :  { %v4982_v37 = vpop.eup %4981  ;;  %9274 = vst [vmem:[#allocation22_spill] sm:$0xff] %v6459_v38 }
 0x257   :  { %v6376_v14 = vmul.f32 %v4982_v37, %v842_v13  ;;  %9275 = vst [vmem:[#allocation27_spill] sm:$0xff] %v6462_v51  ;;  %v6480_v37 = vld [vmem:[#allocation6 + $0x20] sm:$0xff]  ;;  %v6483_v13 = vld [vmem:[#allocation6 + $0x28] sm:$0xff] }
 0x258   :  { %9276 = vst [vmem:[#allocation33_spill] sm:$0xff] %v6465_v28 }
 0x259   :  { %9258 = vst [vmem:[#allocation14_spill] sm:$0xff] %v6376_v14  ;;  %874 = vmatmul.f32.vlgmr.msra.gmra.mxu0 %v6376_v14  ;;  %894 = vmatmul.f32.vlgmr.msrb.gmra.mxu1 %v6376_v14 }
 0x25a   :  { %914 = vmatmul.f32.vlgmr.msrb.gmra.mxu2 %v6376_v14  ;;  %934 = vmatmul.f32.vlgmr.msrb.gmra.mxu3 %v6376_v14  ;;  %9278 = vst [vmem:[#allocation26_spill] sm:$0xff] %v6471_v35  ;;  %v6486_v14 = vld [vmem:[#allocation6 + $0x30] sm:$0xff] }
 0x25b   :  { %1170 = vmatpush.msra.mxu0 %v6230_v53  ;;  %1190 = vmatpush.msrb.mxu1 %v6233_v12  ;;  %9279 = vst [vmem:[#allocation30_spill] sm:$0xff] %v6474_v56 }
 0x25c   :  { %1210 = vmatpush.msrb.mxu2 %v6236_v46  ;;  %1230 = vmatpush.msrb.mxu3 %v6239_v47  ;;  %9280 = vst [vmem:[#allocation35_spill] sm:$0xff] %v6477_v9 }
 0x25d   :  { %1171 = vmatpush.msra.mxu0 %v6242_v49  ;;  %1191 = vmatpush.msrb.mxu1 %v6245_v50  ;;  %9281 = vst [vmem:[#allocation34_spill] sm:$0xff] %v6480_v37 }
 0x25e   :  { %1211 = vmatpush.msrb.mxu2 %v6248_v54  ;;  %1231 = vmatpush.msrb.mxu3 %v6251_v55  ;;  %9282 = vst [vmem:[#allocation39_spill] sm:$0xff] %v6483_v13 }
 0x25f   :  { %1172 = vmatpush.msra.mxu0 %v6254_v10  ;;  %1192 = vmatpush.msrb.mxu1 %v6257_v5  ;;  %9283 = vst [vmem:[#allocation40_spill] sm:$0xff] %v6486_v14 }
 0x260   :  { %1212 = vmatpush.msrb.mxu2 %v6260_v7  ;;  %1232 = vmatpush.msrb.mxu3 %v6263_v11 }
 0x261   :  { %1173 = vmatpush.msra.mxu0 %v6266_v62  ;;  %1193 = vmatpush.msrb.mxu1 %v6269_v4 }
 0x262   :  { %1213 = vmatpush.msrb.mxu2 %v6272_v0  ;;  %1233 = vmatpush.msrb.mxu3 %v6275_v31 }
 0x263   :  { %1174 = vmatpush.msra.mxu0 %v6278_v59  ;;  %1194 = vmatpush.msrb.mxu1 %v6281_v60 }
 0x264   :  { %1214 = vmatpush.msrb.mxu2 %v6284_v2  ;;  %1234 = vmatpush.msrb.mxu3 %v6287_v44 }
 0x265   :  { %1175 = vmatpush.msra.mxu0 %v6290_v63  ;;  %1195 = vmatpush.msrb.mxu1 %v6293_v57 }
 0x266   :  { %1215 = vmatpush.msrb.mxu2 %v6296_v3  ;;  %1235 = vmatpush.msrb.mxu3 %v6299_v8 }
 0x267   :  { %1176 = vmatpush.msra.mxu0 %v9259_v58  ;;  %1196 = vmatpush.msrb.mxu1 %v9260_v34 }
 0x268   :  { %1216 = vmatpush.msrb.mxu2 %v9261_v15  ;;  %1236 = vmatpush.msrb.mxu3 %v6311_v43 }
 0x269   :  { %1177 = vmatpush.msra.mxu0 %v9262_v16  ;;  %1197 = vmatpush.msrb.mxu1 %v6317_v6 }
 0x26a   :  { %1217 = vmatpush.msrb.mxu2 %v6412_v17  ;;  %1237 = vmatpush.msrb.mxu3 %v6321_v40 }
 0x26b   :  { %1178 = vmatpush.msra.mxu0 %v6324_v41  ;;  %1198 = vmatpush.msrb.mxu1 %v6327_v61 }
 0x26c   :  { %1218 = vmatpush.msrb.mxu2 %v6418_v19  ;;  %1238 = vmatpush.msrb.mxu3 %v6421_v20 }
 0x26d   :  { %1179 = vmatpush.msra.mxu0 %v6332_v45  ;;  %1199 = vmatpush.msrb.mxu1 %v6335_v48 }
 0x26e   :  { %1219 = vmatpush.msrb.mxu2 %v6426_v21  ;;  %1239 = vmatpush.msrb.mxu3 %v6429_v22 }
 0x26f   :  { %1180 = vmatpush.msra.mxu0 %v6432_v23  ;;  %1200 = vmatpush.msrb.mxu1 %v6435_v24 }
 0x270   :  { %1220 = vmatpush.msrb.mxu2 %v6438_v25  ;;  %1240 = vmatpush.msrb.mxu3 %v6441_v26 }
 0x271   :  { %1181 = vmatpush.msra.mxu0 %v6444_v29  ;;  %1201 = vmatpush.msrb.mxu1 %v6447_v30 }
 0x272   :  { %1221 = vmatpush.msrb.mxu2 %v6450_v32  ;;  %1241 = vmatpush.msrb.mxu3 %v6453_v33  ;;  %v9291_v32 = vld [vmem:[#allocation51_spill] sm:$0xff] }
 0x273   :  { %1182 = vmatpush.msra.mxu0 %v6456_v36  ;;  %1202 = vmatpush.msrb.mxu1 %v6459_v38 }
 0x274   :  { %1222 = vmatpush.msrb.mxu2 %v6462_v51  ;;  %1242 = vmatpush.msrb.mxu3 %v6465_v28 }
 0x275   :  { %1183 = vmatpush.msra.mxu0 %v6468_v52  ;;  %1203 = vmatpush.msrb.mxu1 %v6471_v35  ;;  %v6489_v35 = vld [vmem:[#allocation6 + $0x38] sm:$0xff] }
 0x276   :  { %1223 = vmatpush.msrb.mxu2 %v6474_v56  ;;  %1243 = vmatpush.msrb.mxu3 %v6477_v9  ;;  %9284 = vst [vmem:[#allocation43_spill] sm:$0xff] %v6489_v35  ;;  %v6492_v56 = vld [vmem:[#allocation6] sm:$0xff]  ;;  %v6495_v9 = vld [vmem:[#allocation6 + $0x8] sm:$0xff] }
 0x277   :  { %1184 = vmatpush.msra.mxu0 %v6480_v37  ;;  %1204 = vmatpush.msrb.mxu1 %v6483_v13  ;;  %9285 = vst [vmem:[#allocation42_spill] sm:$0xff] %v6492_v56  ;;  %v6498_v37 = vld [vmem:[#allocation6 + $0x10] sm:$0xff]  ;;  %v6501_v13 = vld [vmem:[#allocation6 + $0x18] sm:$0xff] }
 0x278   :  { %1224 = vmatpush.msrb.mxu2 %v6486_v14  ;;  %1244 = vmatpush.msrb.mxu3 %v6489_v35  ;;  %9286 = vst [vmem:[#allocation41_spill] sm:$0xff] %v6495_v9  ;;  %v9289_v14 = vld [vmem:[#allocation45_spill] sm:$0xff]  ;;  %v9290_v35 = vld [vmem:[#allocation48_spill] sm:$0xff] }
 0x279   :  { %1185 = vmatpush.msra.mxu0 %v6492_v56  ;;  %1205 = vmatpush.msrb.mxu1 %v6495_v9  ;;  %9287 = vst [vmem:[#allocation44_spill] sm:$0xff] %v6498_v37  ;;  %v151_v52 = vadd.f32 %v9289_v14, %v9241_v39  ;;  %v192_v28 = vadd.f32 %v9290_v35, %v9243_v42 }
 0x27a   :  { %1225 = vmatpush.msrb.mxu2 %v6498_v37  ;;  %9288 = vst [vmem:[#allocation47_spill] sm:$0xff] %v6501_v13  ;;  %1245 = vmatpush.msrb.mxu3 %v6501_v13  ;;  %v274_v37 = vadd.f32 %v9291_v32, %v9245_v18 }
 0x2d6   :  { %v875_v51 = vpop.f32.mrf.mxu0  ;;  %v895_v56 = vpop.f32.mrf.mxu1 }
 0x2d7   :  { %v938_v38 = vadd.f32 %v875_v51, %v151_v52  ;;  %v939_v36 = vadd.f32 %v895_v56, %v192_v28 }
 0x2d9   :  { %v4855_v33 = vmul.f32 -1.442695, %v938_v38  ;;  %v4856_v9 = vmul.f32 -1.442695, %v939_v36  ;;  %v9292_v38 = vld [vmem:[#allocation50_spill] sm:$0xff] }
 0x2da   :  { %v233_v36 = vadd.f32 %v9292_v38, %v9247_v1 }
 0x2db   :  { %4983 = vpow2.f32 %v4855_v33 }
 0x2dc   :  { %4985 = vpow2.f32 %v4856_v9 }
 0x2dd   :  { %v935_v30 = vpop.f32.mrf.mxu3  ;;  %v915_v35 = vpop.f32.mrf.mxu2 }
 0x2de   :  { %v941_v29 = vadd.f32 %v935_v30, %v274_v37  ;;  %v940_v52 = vadd.f32 %v915_v35, %v233_v36 }
 0x2e0   :  { %v4857_v13 = vmul.f32 -1.442695, %v941_v29 }
 0x2e1   :  { %v4984_v26 = vpop.eup %4983 }
 0x2e2   :  { %v4986_v25 = vpop.eup %4985  ;;  %v945_v14 = vadd.f32 1.0, %v4984_v26  ;;  %4987 = vpow2.f32 %v4857_v13 }
 0x2e3   :  { %v964_v39 = vadd.f32 1.0, %v4986_v25 }
 0x2e4   :  { %4989 = vrcp.f32 %v945_v14  ;;  %v957_v37 = vand.u32 2147483648, %v945_v14  ;;  %v955_v13 = vand.u32 2147483647, %v945_v14  ;;  %vm951_vm7 = vweird.f32 %v945_v14 }
 0x2e5   :  { %4991 = vrcp.f32 %v964_v39  ;;  %v976_v26 = vand.u32 2147483648, %v964_v39  ;;  %v974_v42 = vand.u32 2147483647, %v964_v39  ;;  %vm970_vm8 = vweird.f32 %v964_v39 }
 0x2e6   :  { %v958_v35 = vor.u32 1.1754944e-38, %v957_v37  ;;  %vm956_vm11 = vcmp.eq.f32.partialorder %v955_v13, 8.507059e+37 }
 0x2e7   :  { %vm975_vm12 = vcmp.eq.f32.partialorder %v974_v42, 8.507059e+37 }
 0x2e8   :  { %v4988_v51 = vpop.eup %4987 }
 0x2e9   :  { %v984_v33 = vadd.f32 1.0, %v4988_v51 }
 0x2ea   :  { %v4990_v28 = vpop.eup %4989 }
 0x2eb   :  { %v4992_v32 = vpop.eup %4991  ;;  %v947_v56 = vmul.f32 %v4990_v28, %v945_v14  ;;  %4993 = vrcp.f32 %v984_v33  ;;  %vm952_vm5 = vweird.f32 %v4990_v28  ;;  %vm990_vm14 = vweird.f32 %v984_v33 }
 0x2ec   :  { %v966_v30 = vmul.f32 %v4992_v32, %v964_v39  ;;  %4995 = vtanh.f32 %v940_v52  ;;  %vm971_vm6 = vweird.f32 %v4992_v32  ;;  %vm953_vm9 = vmor %vm951_vm7, %vm952_vm5 }
 0x2ed   :  { %v948_v29 = vsub.f32 1.0, %v947_v56  ;;  %vm972_vm10 = vmor %vm970_vm8, %vm971_vm6  ;;  %v977_v56 = vor.u32 1.1754944e-38, %v976_v26 }
 0x2ee   :  { %v967_v9 = vsub.f32 1.0, %v966_v30 }
 0x2ef   :  { %v949_v25 = vmul.f32 %v4990_v28, %v948_v29 }
 0x2f0   :  { %v968_v18 = vmul.f32 %v4992_v32, %v967_v9 }
 0x2f1   :  { %v4994_v24 = vpop.eup %4993  ;;  %v950_v38 = vadd.f32 %v4990_v28, %v949_v25 }
 0x2f2   :  { %v969_v51 = vadd.f32 %v4992_v32, %v968_v18  ;;  %v986_v36 = vmul.f32 %v4994_v24, %v984_v33  ;;  %v4996_v52 = vpop.eup %4995  ;;  %vm991_vm13 = vweird.f32 %v4994_v24  ;;  %v996_v18 = vand.u32 2147483648, %v984_v33 }
 0x2f3   :  { %v954_v30 = vsel %vm953_vm9, %v4990_v28, %v950_v38  ;;  %v994_v28 = vand.u32 2147483647, %v984_v33  ;;  %vm992_vm15 = vmor %vm990_vm14, %vm991_vm13  ;;  %v9300_v33 = vld [vmem:[#allocation25_spill] sm:$0xff]  ;;  %v9301_v38 = vld [vmem:[#allocation18_spill] sm:$0xff] }
 0x2f4   :  { %v959_v1 = vsel %vm956_vm11, %v958_v35, %v954_v30  ;;  %v973_v29 = vsel %vm972_vm10, %v4992_v32, %v969_v51  ;;  %v987_v23 = vsub.f32 1.0, %v986_v36  ;;  %v997_v26 = vor.u32 1.1754944e-38, %v996_v18  ;;  %v9302_v35 = vld [vmem:[#allocation24_spill] sm:$0xff]  ;;  %v9303_v51 = vld [vmem:[#allocation31_spill] sm:$0xff]  ;;  %v9304_v36 = vld [vmem:[#allocation29_spill] sm:$0xff] }
 0x2f5   :  { %v978_v9 = vsel %vm975_vm12, %v977_v56, %v973_v29  ;;  %v1001_v22 = vmul.f32 %v4996_v52, %v959_v1  ;;  %vm995_vm0 = vcmp.eq.f32.partialorder %v994_v28, 8.507059e+37  ;;  %v9294_v1 = vld [vmem:[#allocation16_spill] sm:$0xff]  ;;  %v9305_v56 = vld [vmem:[#allocation22_spill] sm:$0xff]  ;;  %v9306_v30 = vld [vmem:[#allocation27_spill] sm:$0xff] }
 0x2f6   :  { %v1000_v21 = vmul.f32 %v978_v9, %v6373_v27  ;;  %v988_v25 = vmul.f32 %v4994_v24, %v987_v23  ;;  %v9295_v27 = vld [vmem:[#allocation23_spill] sm:$0xff]  ;;  %v9298_v23 = vld [vmem:[#allocation20_spill] sm:$0xff]  ;;  %v9307_v52 = vld [vmem:[#allocation33_spill] sm:$0xff] }
 0x2f7   :  { %v9308_v29 = vld [vmem:[#allocation32_spill] sm:$0xff]  ;;  %v9309_v9 = vld [vmem:[#allocation26_spill] sm:$0xff]  ;;  %v9313_v28 = vld [vmem:[#allocation39_spill] sm:$0xff] }
 0x2f8   :  { %v6513_v14 = vadd.f32 %v1001_v22, %v1000_v21  ;;  %v989_v39 = vadd.f32 %v4994_v24, %v988_v25  ;;  %v9296_v21 = vld [vmem:[#allocation21_spill] sm:$0xff]  ;;  %v9297_v22 = vld [vmem:[#allocation15_spill] sm:$0xff]  ;;  %v9310_v25 = vld [vmem:[#allocation30_spill] sm:$0xff] }
 0x2f9   :  { %v9312_v18 = vld [vmem:[#allocation34_spill] sm:$0xff] }
 0x2fa   :  { %4997 = vtanh.f32 %v6513_v14  ;;  %v993_v37 = vsel %vm992_vm15, %v4994_v24, %v989_v39  ;;  %v9299_v24 = vld [vmem:[#allocation28_spill] sm:$0xff]  ;;  %v9311_v39 = vld [vmem:[#allocation35_spill] sm:$0xff] }
 0x2fb   :  { %v998_v32 = vsel %vm995_vm0, %v997_v26, %v993_v37  ;;  %v9314_v37 = vld [vmem:[#allocation40_spill] sm:$0xff]  ;;  %v9315_v26 = vld [vmem:[#allocation43_spill] sm:$0xff] }
 0x300   :  { %v4998_v42 = vpop.eup %4997 }
 0x301   :  { %v6516_v13 = vmul.f32 %v4998_v42, %v998_v32  ;;  %v9316_v42 = vld [vmem:[#allocation42_spill] sm:$0xff]  ;;  %v9317_v32 = vld [vmem:[#allocation41_spill] sm:$0xff] }
 0x303   :  { %9293 = vst [vmem:[#allocation46_spill] sm:$0xff] %v6516_v13  ;;  %1030 = vmatmul.f32.vlgmr.msrb.gmra.mxu0 %v6516_v13  ;;  %1050 = vmatmul.f32.vlgmr.msra.gmra.mxu1 %v6516_v13 }
 0x304   :  { %1070 = vmatmul.f32.vlgmr.msra.gmra.mxu2 %v6516_v13  ;;  %1090 = vmatmul.f32.vlgmr.msra.gmra.mxu3 %v6516_v13  ;;  %v9318_v13 = vld [vmem:[#allocation44_spill] sm:$0xff] }
 0x305   :  { %1326 = vmatpush.msrb.mxu0 %v6230_v53  ;;  %1346 = vmatpush.msra.mxu1 %v6233_v12 }
 0x306   :  { %1366 = vmatpush.msra.mxu2 %v6236_v46  ;;  %1386 = vmatpush.msra.mxu3 %v6239_v47 }
 0x307   :  { %1327 = vmatpush.msrb.mxu0 %v6242_v49  ;;  %1347 = vmatpush.msra.mxu1 %v6245_v50 }
 0x308   :  { %1367 = vmatpush.msra.mxu2 %v6248_v54  ;;  %1387 = vmatpush.msra.mxu3 %v6251_v55 }
 0x309   :  { %1328 = vmatpush.msrb.mxu0 %v6254_v10  ;;  %1348 = vmatpush.msra.mxu1 %v6257_v5 }
 0x30a   :  { %1368 = vmatpush.msra.mxu2 %v6260_v7  ;;  %1388 = vmatpush.msra.mxu3 %v6263_v11 }
 0x30b   :  { %1329 = vmatpush.msrb.mxu0 %v6266_v62  ;;  %1349 = vmatpush.msra.mxu1 %v6269_v4 }
 0x30c   :  { %1369 = vmatpush.msra.mxu2 %v6272_v0  ;;  %1389 = vmatpush.msra.mxu3 %v6275_v31 }
 0x30d   :  { %1330 = vmatpush.msrb.mxu0 %v6278_v59  ;;  %1350 = vmatpush.msra.mxu1 %v6281_v60 }
 0x30e   :  { %1370 = vmatpush.msra.mxu2 %v6284_v2  ;;  %1390 = vmatpush.msra.mxu3 %v6287_v44 }
 0x30f   :  { %1331 = vmatpush.msrb.mxu0 %v6290_v63  ;;  %1351 = vmatpush.msra.mxu1 %v6293_v57 }
 0x310   :  { %1371 = vmatpush.msra.mxu2 %v6296_v3  ;;  %1391 = vmatpush.msra.mxu3 %v6299_v8 }
 0x311   :  { %1332 = vmatpush.msrb.mxu0 %v9259_v58  ;;  %1352 = vmatpush.msra.mxu1 %v9260_v34 }
 0x312   :  { %1372 = vmatpush.msra.mxu2 %v9261_v15  ;;  %1392 = vmatpush.msra.mxu3 %v6311_v43 }
 0x313   :  { %1333 = vmatpush.msrb.mxu0 %v9262_v16  ;;  %1353 = vmatpush.msra.mxu1 %v6317_v6 }
 0x314   :  { %1373 = vmatpush.msra.mxu2 %v6412_v17  ;;  %1393 = vmatpush.msra.mxu3 %v6321_v40 }
 0x315   :  { %1334 = vmatpush.msrb.mxu0 %v6324_v41  ;;  %1354 = vmatpush.msra.mxu1 %v6327_v61 }
 0x316   :  { %1374 = vmatpush.msra.mxu2 %v6418_v19  ;;  %1394 = vmatpush.msra.mxu3 %v6421_v20 }
 0x317   :  { %1335 = vmatpush.msrb.mxu0 %v6332_v45  ;;  %1355 = vmatpush.msra.mxu1 %v6335_v48 }
 0x318   :  { %1375 = vmatpush.msra.mxu2 %v9294_v1  ;;  %1395 = vmatpush.msra.mxu3 %v9295_v27 }
 0x319   :  { %1336 = vmatpush.msrb.mxu0 %v9296_v21  ;;  %1356 = vmatpush.msra.mxu1 %v9297_v22 }
 0x31a   :  { %1376 = vmatpush.msra.mxu2 %v9298_v23  ;;  %1396 = vmatpush.msra.mxu3 %v9299_v24 }
 0x31b   :  { %1337 = vmatpush.msrb.mxu0 %v9300_v33  ;;  %1357 = vmatpush.msra.mxu1 %v9301_v38 }
 0x31c   :  { %1377 = vmatpush.msra.mxu2 %v9302_v35  ;;  %1397 = vmatpush.msra.mxu3 %v9303_v51  ;;  %v9325_v35 = vld [vmem:[#allocation54_spill] sm:$0xff] }
 0x31d   :  { %1338 = vmatpush.msrb.mxu0 %v9304_v36  ;;  %1358 = vmatpush.msra.mxu1 %v9305_v56 }
 0x31e   :  { %1378 = vmatpush.msra.mxu2 %v9306_v30  ;;  %1398 = vmatpush.msra.mxu3 %v9307_v52  ;;  %v9323_v30 = vld [vmem:[#allocation52_spill] sm:$0xff] }
 0x31f   :  { %1339 = vmatpush.msrb.mxu0 %v9308_v29  ;;  %1359 = vmatpush.msra.mxu1 %v9309_v9  ;;  %v9319_v29 = vld [vmem:[#allocation47_spill] sm:$0xff]  ;;  %v9320_v9 = vld [vmem:[#allocation56_spill] sm:$0xff] }
 0x320   :  { %1379 = vmatpush.msra.mxu2 %v9310_v25  ;;  %1399 = vmatpush.msra.mxu3 %v9311_v39  ;;  %v9321_v25 = vld [vmem:[#allocation49_spill] sm:$0xff]  ;;  %v9322_v39 = vld [vmem:[#allocation63_spill] sm:$0xff] }
 0x321   :  { %1340 = vmatpush.msrb.mxu0 %v9312_v18  ;;  %1360 = vmatpush.msra.mxu1 %v9313_v28  ;;  %v154_v52 = vadd.f32 %v9321_v25, %v9320_v9  ;;  %v195_v18 = vadd.f32 %v9323_v30, %v9322_v39 }
 0x322   :  { %1380 = vmatpush.msra.mxu2 %v9314_v37  ;;  %1400 = vmatpush.msra.mxu3 %v9315_v26 }
 0x323   :  { %1341 = vmatpush.msrb.mxu0 %v9316_v42  ;;  %1361 = vmatpush.msra.mxu1 %v9317_v32  ;;  %v9324_v42 = vld [vmem:[#allocation65_spill] sm:$0xff] }
 0x324   :  { %1381 = vmatpush.msra.mxu2 %v9318_v13  ;;  %1401 = vmatpush.msra.mxu3 %v9319_v29  ;;  %v277_v32 = vadd.f32 %v9325_v35, %v9324_v42 }
 0x380   :  { %v1031_v56 = vpop.f32.mrf.mxu0  ;;  %v1051_v28 = vpop.f32.mrf.mxu1 }
 0x381   :  { %v1094_v36 = vadd.f32 %v1031_v56, %v154_v52  ;;  %v1095_v37 = vadd.f32 %v1051_v28, %v195_v18  ;;  %v9326_v52 = vld [vmem:[#allocation67_spill] sm:$0xff] }
 0x383   :  { %v4858_v51 = vmul.f32 -1.442695, %v1094_v36  ;;  %v4859_v26 = vmul.f32 -1.442695, %v1095_v37  ;;  %v9327_v36 = vld [vmem:[#allocation53_spill] sm:$0xff] }
 0x384   :  { %v236_v18 = vadd.f32 %v9327_v36, %v9326_v52 }
 0x385   :  { %4999 = vpow2.f32 %v4858_v51 }
 0x386   :  { %5001 = vpow2.f32 %v4859_v26 }
 0x387   :  { %v1091_v13 = vpop.f32.mrf.mxu3  ;;  %v1071_v30 = vpop.f32.mrf.mxu2 }
 0x388   :  { %v1097_v38 = vadd.f32 %v1091_v13, %v277_v32  ;;  %v1096_v37 = vadd.f32 %v1071_v30, %v236_v18 }
 0x38a   :  { %v4860_v29 = vmul.f32 -1.442695, %v1097_v38 }
 0x38b   :  { %v5000_v33 = vpop.eup %4999 }
 0x38c   :  { %v5002_v24 = vpop.eup %5001  ;;  %v1101_v25 = vadd.f32 1.0, %v5000_v33  ;;  %5003 = vpow2.f32 %v4860_v29 }
 0x38d   :  { %v1120_v9 = vadd.f32 1.0, %v5002_v24 }
 0x38e   :  { %5005 = vrcp.f32 %v1101_v25  ;;  %v1113_v42 = vand.u32 2147483648, %v1101_v25  ;;  %v1111_v29 = vand.u32 2147483647, %v1101_v25  ;;  %vm1107_vm3 = vweird.f32 %v1101_v25 }
 0x38f   :  { %5007 = vrcp.f32 %v1120_v9  ;;  %v1132_v33 = vand.u32 2147483648, %v1120_v9  ;;  %v1130_v23 = vand.u32 2147483647, %v1120_v9  ;;  %vm1126_vm4 = vweird.f32 %v1120_v9 }
 0x390   :  { %v1114_v30 = vor.u32 1.1754944e-38, %v1113_v42  ;;  %vm1112_vm7 = vcmp.eq.f32.partialorder %v1111_v29, 8.507059e+37 }
 0x391   :  { %vm1131_vm8 = vcmp.eq.f32.partialorder %v1130_v23, 8.507059e+37 }
 0x392   :  { %v5004_v56 = vpop.eup %5003 }
 0x393   :  { %v1140_v51 = vadd.f32 1.0, %v5004_v56 }
 0x394   :  { %v5006_v28 = vpop.eup %5005 }
 0x395   :  { %v5008_v35 = vpop.eup %5007  ;;  %v1103_v26 = vmul.f32 %v5006_v28, %v1101_v25  ;;  %5009 = vrcp.f32 %v1140_v51  ;;  %vm1108_vm1 = vweird.f32 %v5006_v28  ;;  %vm1146_vm10 = vweird.f32 %v1140_v51 }
 0x396   :  { %v1122_v13 = vmul.f32 %v5008_v35, %v1120_v9  ;;  %5011 = vtanh.f32 %v1096_v37  ;;  %vm1127_vm2 = vweird.f32 %v5008_v35  ;;  %vm1109_vm5 = vmor %vm1107_vm3, %vm1108_vm1  ;;  %v1150_v42 = vand.u32 2147483647, %v1140_v51 }
 0x397   :  { %v1104_v38 = vsub.f32 1.0, %v1103_v26  ;;  %vm1128_vm6 = vmor %vm1126_vm4, %vm1127_vm2  ;;  %v1133_v26 = vor.u32 1.1754944e-38, %v1132_v33 }
 0x398   :  { %v1123_v32 = vsub.f32 1.0, %v1122_v13  ;;  %vm1151_vm12 = vcmp.eq.f32.partialorder %v1150_v42, 8.507059e+37 }
 0x399   :  { %v1105_v24 = vmul.f32 %v5006_v28, %v1104_v38 }
 0x39a   :  { %v1124_v39 = vmul.f32 %v5008_v35, %v1123_v32 }
 0x39b   :  { %v5010_v22 = vpop.eup %5009  ;;  %v1106_v36 = vadd.f32 %v5006_v28, %v1105_v24 }
 0x39c   :  { %v1125_v56 = vadd.f32 %v5008_v35, %v1124_v39  ;;  %v1142_v18 = vmul.f32 %v5010_v22, %v1140_v51  ;;  %v5012_v37 = vpop.eup %5011  ;;  %vm1147_vm9 = vweird.f32 %v5010_v22  ;;  %v1152_v39 = vand.u32 2147483648, %v1140_v51 }
 0x39d   :  { %v1110_v13 = vsel %vm1109_vm5, %v5006_v28, %v1106_v36  ;;  %vm1148_vm11 = vmor %vm1146_vm10, %vm1147_vm9 }
 0x39e   :  { %v1115_v52 = vsel %vm1112_vm7, %v1114_v30, %v1110_v13  ;;  %v1129_v38 = vsel %vm1128_vm6, %v5008_v35, %v1125_v56  ;;  %v1143_v21 = vsub.f32 1.0, %v1142_v18  ;;  %v1153_v33 = vor.u32 1.1754944e-38, %v1152_v39  ;;  %v9360_v13 = vld [vmem:[#allocation67_spill] sm:$0xff] }
 0x39f   :  { %v1134_v32 = vsel %vm1131_vm8, %v1133_v26, %v1129_v38  ;;  %v1157_v27 = vmul.f32 %v5012_v37, %v1115_v52  ;;  %v9361_v37 = vld [vmem:[#allocation57_spill] sm:$0xff] }
 0x3a0   :  { %v1156_v1 = vmul.f32 %v1134_v32, %v6513_v14  ;;  %v1144_v24 = vmul.f32 %v5010_v22, %v1143_v21  ;;  %v9358_v14 = vld [vmem:[#allocation65_spill] sm:$0xff]  ;;  %v239_v38 = vadd.f32 %v9361_v37, %v9360_v13 }
 0x3a1   :  { %v9362_v37 = vld [vmem:[#allocation37_spill] sm:$0xff] }
 0x3a2   :  { %v6595_v25 = vadd.f32 %v1157_v27, %v1156_v1  ;;  %v1145_v9 = vadd.f32 %v5010_v22, %v1144_v24  ;;  %v9359_v1 = vld [vmem:[#allocation58_spill] sm:$0xff] }
 0x3a3   :  { %v280_v27 = vadd.f32 %v9359_v1, %v9358_v14  ;;  %v1691_v1 = vld [vmem:[#allocation4 + $0x1a0] sm:$0xff] }
 0x3a4   :  { %5013 = vtanh.f32 %v6595_v25  ;;  %v1149_v28 = vsel %vm1148_vm11, %v5010_v22, %v1145_v9 }
 0x3a5   :  { %v1154_v35 = vsel %vm1151_vm12, %v1153_v33, %v1149_v28 }
 0x3aa   :  { %v5014_v23 = vpop.eup %5013 }
 0x3ab   :  { %v6598_v29 = vmul.f32 %v5014_v23, %v1154_v35 }
 0x3ad   :  { %1186 = vmatmul.f32.vlgmr.msra.gmra.mxu0 %v6598_v29  ;;  %1206 = vmatmul.f32.vlgmr.msrb.gmra.mxu1 %v6598_v29 }
 0x3ae   :  { %1226 = vmatmul.f32.vlgmr.msrb.gmra.mxu2 %v6598_v29  ;;  %1246 = vmatmul.f32.vlgmr.msrb.gmra.mxu3 %v6598_v29 }
 0x3af   :  { %1482 = vmatpush.msra.mxu0 %v6230_v53  ;;  %1502 = vmatpush.msrb.mxu1 %v6233_v12  ;;  %v9328_v53 = vld [vmem:[#allocation16_spill] sm:$0xff]  ;;  %v9329_v12 = vld [vmem:[#allocation23_spill] sm:$0xff] }
 0x3b0   :  { %1522 = vmatpush.msrb.mxu2 %v6236_v46  ;;  %1542 = vmatpush.msrb.mxu3 %v6239_v47  ;;  %v9331_v46 = vld [vmem:[#allocation15_spill] sm:$0xff]  ;;  %v9332_v47 = vld [vmem:[#allocation20_spill] sm:$0xff] }
 0x3b1   :  { %1483 = vmatpush.msra.mxu0 %v6242_v49  ;;  %1503 = vmatpush.msrb.mxu1 %v6245_v50  ;;  %v9333_v49 = vld [vmem:[#allocation28_spill] sm:$0xff]  ;;  %v9334_v50 = vld [vmem:[#allocation25_spill] sm:$0xff] }
 0x3b2   :  { %1523 = vmatpush.msrb.mxu2 %v6248_v54  ;;  %1543 = vmatpush.msrb.mxu3 %v6251_v55  ;;  %v9335_v54 = vld [vmem:[#allocation18_spill] sm:$0xff]  ;;  %v9336_v55 = vld [vmem:[#allocation24_spill] sm:$0xff] }
 0x3b3   :  { %1484 = vmatpush.msra.mxu0 %v6254_v10  ;;  %1504 = vmatpush.msrb.mxu1 %v6257_v5  ;;  %v9338_v10 = vld [vmem:[#allocation29_spill] sm:$0xff]  ;;  %v9339_v5 = vld [vmem:[#allocation22_spill] sm:$0xff] }
 0x3b4   :  { %1524 = vmatpush.msrb.mxu2 %v6260_v7  ;;  %1544 = vmatpush.msrb.mxu3 %v6263_v11  ;;  %v9340_v7 = vld [vmem:[#allocation27_spill] sm:$0xff]  ;;  %v9341_v11 = vld [vmem:[#allocation33_spill] sm:$0xff] }
 0x3b5   :  { %1485 = vmatpush.msra.mxu0 %v6266_v62  ;;  %1505 = vmatpush.msrb.mxu1 %v6269_v4  ;;  %v9342_v62 = vld [vmem:[#allocation32_spill] sm:$0xff]  ;;  %v9343_v4 = vld [vmem:[#allocation26_spill] sm:$0xff] }
 0x3b6   :  { %1525 = vmatpush.msrb.mxu2 %v6272_v0  ;;  %1545 = vmatpush.msrb.mxu3 %v6275_v31  ;;  %v9344_v0 = vld [vmem:[#allocation30_spill] sm:$0xff]  ;;  %v9345_v31 = vld [vmem:[#allocation35_spill] sm:$0xff] }
 0x3b7   :  { %1486 = vmatpush.msra.mxu0 %v6278_v59  ;;  %1506 = vmatpush.msrb.mxu1 %v6281_v60  ;;  %v9346_v59 = vld [vmem:[#allocation34_spill] sm:$0xff]  ;;  %v9347_v60 = vld [vmem:[#allocation39_spill] sm:$0xff] }
 0x3b8   :  { %1526 = vmatpush.msrb.mxu2 %v6284_v2  ;;  %1546 = vmatpush.msrb.mxu3 %v6287_v44  ;;  %v9348_v2 = vld [vmem:[#allocation40_spill] sm:$0xff]  ;;  %v9349_v44 = vld [vmem:[#allocation43_spill] sm:$0xff] }
 0x3b9   :  { %1487 = vmatpush.msra.mxu0 %v6290_v63  ;;  %1507 = vmatpush.msrb.mxu1 %v6293_v57  ;;  %v9350_v63 = vld [vmem:[#allocation42_spill] sm:$0xff]  ;;  %v9351_v57 = vld [vmem:[#allocation41_spill] sm:$0xff] }
 0x3ba   :  { %1527 = vmatpush.msrb.mxu2 %v6296_v3  ;;  %1547 = vmatpush.msrb.mxu3 %v6299_v8  ;;  %v9352_v3 = vld [vmem:[#allocation44_spill] sm:$0xff]  ;;  %v9353_v8 = vld [vmem:[#allocation47_spill] sm:$0xff] }
 0x3bb   :  { %1488 = vmatpush.msra.mxu0 %v9259_v58  ;;  %1508 = vmatpush.msrb.mxu1 %v9260_v34 }
 0x3bc   :  { %1528 = vmatpush.msrb.mxu2 %v9261_v15  ;;  %1548 = vmatpush.msrb.mxu3 %v6311_v43  ;;  %v9356_v43 = vld [vmem:[#allocation63_spill] sm:$0xff] }
 0x3bd   :  { %1489 = vmatpush.msra.mxu0 %v9262_v16  ;;  %1509 = vmatpush.msrb.mxu1 %v6317_v6  ;;  %v9330_v6 = vld [vmem:[#allocation21_spill] sm:$0xff] }
 0x3be   :  { %1529 = vmatpush.msrb.mxu2 %v6412_v17  ;;  %1549 = vmatpush.msrb.mxu3 %v6321_v40  ;;  %v9354_v40 = vld [vmem:[#allocation56_spill] sm:$0xff] }
 0x3bf   :  { %1490 = vmatpush.msra.mxu0 %v6324_v41  ;;  %1510 = vmatpush.msrb.mxu1 %v6327_v61  ;;  %v9355_v41 = vld [vmem:[#allocation36_spill] sm:$0xff] }
 0x3c0   :  { %1530 = vmatpush.msrb.mxu2 %v6418_v19  ;;  %1550 = vmatpush.msrb.mxu3 %v6421_v20  ;;  %v157_v61 = vadd.f32 %v9355_v41, %v9354_v40 }
 0x3c1   :  { %1491 = vmatpush.msra.mxu0 %v6332_v45  ;;  %1511 = vmatpush.msrb.mxu1 %v6335_v48  ;;  %v9337_v45 = vld [vmem:[#allocation31_spill] sm:$0xff] }
 0x3c2   :  { %1531 = vmatpush.msrb.mxu2 %v9328_v53  ;;  %1551 = vmatpush.msrb.mxu3 %v9329_v12  ;;  %v9357_v48 = vld [vmem:[#allocation55_spill] sm:$0xff] }
 0x3c3   :  { %1492 = vmatpush.msra.mxu0 %v9330_v6  ;;  %1512 = vmatpush.msrb.mxu1 %v9331_v46  ;;  %v198_v58 = vadd.f32 %v9357_v48, %v9356_v43 }
 0x3c4   :  { %1532 = vmatpush.msrb.mxu2 %v9332_v47  ;;  %1552 = vmatpush.msrb.mxu3 %v9333_v49 }
 0x3c5   :  { %1493 = vmatpush.msra.mxu0 %v9334_v50  ;;  %1513 = vmatpush.msrb.mxu1 %v9335_v54 }
 0x3c6   :  { %1533 = vmatpush.msrb.mxu2 %v9336_v55  ;;  %1553 = vmatpush.msrb.mxu3 %v9337_v45 }
 0x3c7   :  { %1494 = vmatpush.msra.mxu0 %v9338_v10  ;;  %1514 = vmatpush.msrb.mxu1 %v9339_v5 }
 0x3c8   :  { %1534 = vmatpush.msrb.mxu2 %v9340_v7  ;;  %1554 = vmatpush.msrb.mxu3 %v9341_v11 }
 0x3c9   :  { %1495 = vmatpush.msra.mxu0 %v9342_v62  ;;  %1515 = vmatpush.msrb.mxu1 %v9343_v4 }
 0x3ca   :  { %1535 = vmatpush.msrb.mxu2 %v9344_v0  ;;  %1555 = vmatpush.msrb.mxu3 %v9345_v31 }
 0x3cb   :  { %1496 = vmatpush.msra.mxu0 %v9346_v59  ;;  %1516 = vmatpush.msrb.mxu1 %v9347_v60 }
 0x3cc   :  { %1536 = vmatpush.msrb.mxu2 %v9348_v2  ;;  %1556 = vmatpush.msrb.mxu3 %v9349_v44 }
 0x3cd   :  { %1497 = vmatpush.msra.mxu0 %v9350_v63  ;;  %1517 = vmatpush.msrb.mxu1 %v9351_v57 }
 0x3ce   :  { %1537 = vmatpush.msrb.mxu2 %v9352_v3  ;;  %1557 = vmatpush.msrb.mxu3 %v9353_v8 }
 0x42a   :  { %v1187_v34 = vpop.f32.mrf.mxu0  ;;  %v1207_v15 = vpop.f32.mrf.mxu1 }
 0x42b   :  { %v1250_v16 = vadd.f32 %v1187_v34, %v157_v61  ;;  %v1251_v17 = vadd.f32 %v1207_v15, %v198_v58  ;;  %v1700_v58 = vld [vmem:[#allocation4 + $0x1e8] sm:$0xff]  ;;  %v1701_v34 = vld [vmem:[#allocation4 + $0x1f0] sm:$0xff]  ;;  %v1702_v15 = vld [vmem:[#allocation4 + $0x1f8] sm:$0xff] }
 0x42d   :  { %v4861_v19 = vmul.f32 -1.442695, %v1250_v16  ;;  %v4862_v20 = vmul.f32 -1.442695, %v1251_v17  ;;  %v1695_v16 = vld [vmem:[#allocation4 + $0x1c0] sm:$0xff]  ;;  %v1696_v17 = vld [vmem:[#allocation4 + $0x1c8] sm:$0xff] }
 0x42f   :  { %5015 = vpow2.f32 %v4861_v19  ;;  %v1697_v19 = vld [vmem:[#allocation4 + $0x1d0] sm:$0xff] }
 0x430   :  { %5017 = vpow2.f32 %v4862_v20  ;;  %v1698_v20 = vld [vmem:[#allocation4 + $0x1d8] sm:$0xff] }
 0x431   :  { %v1247_v21 = vpop.f32.mrf.mxu3  ;;  %v1227_v18 = vpop.f32.mrf.mxu2 }
 0x432   :  { %v1253_v22 = vadd.f32 %v1247_v21, %v280_v27  ;;  %v1252_v9 = vadd.f32 %v1227_v18, %v239_v38  ;;  %v1692_v27 = vld [vmem:[#allocation4 + $0x1a8] sm:$0xff]  ;;  %v1693_v21 = vld [vmem:[#allocation4 + $0x1b0] sm:$0xff]  ;;  %v160_v38 = vadd.f32 %v9362_v37, %v9354_v40 }
 0x433   :  { %v1684_v18 = vld [vmem:[#allocation4 + $0x168] sm:$0xff] }
 0x434   :  { %v4863_v52 = vmul.f32 -1.442695, %v1253_v22  ;;  %v1694_v22 = vld [vmem:[#allocation4 + $0x1b8] sm:$0xff] }
 0x435   :  { %v5016_v51 = vpop.eup %5015 }
 0x436   :  { %v5018_v36 = vpop.eup %5017  ;;  %v1257_v30 = vadd.f32 1.0, %v5016_v51  ;;  %5019 = vpow2.f32 %v4863_v52  ;;  %v1687_v52 = vld [vmem:[#allocation4 + $0x180] sm:$0xff]  ;;  %v1688_v51 = vld [vmem:[#allocation4 + $0x188] sm:$0xff] }
 0x437   :  { %v1276_v56 = vadd.f32 1.0, %v5018_v36  ;;  %v1689_v36 = vld [vmem:[#allocation4 + $0x190] sm:$0xff] }
 0x438   :  { %5021 = vrcp.f32 %v1257_v30  ;;  %v1269_v35 = vand.u32 2147483648, %v1257_v30  ;;  %v1267_v6 = vand.u32 2147483647, %v1257_v30  ;;  %vm1263_vm15 = vweird.f32 %v1257_v30 }
 0x439   :  { %5023 = vrcp.f32 %v1276_v56  ;;  %v1288_v53 = vand.u32 2147483648, %v1276_v56  ;;  %v1286_v47 = vand.u32 2147483647, %v1276_v56  ;;  %vm1282_vm0 = vweird.f32 %v1276_v56 }
 0x43a   :  { %v1270_v54 = vor.u32 1.1754944e-38, %v1269_v35  ;;  %vm1268_vm3 = vcmp.eq.f32.partialorder %v1267_v6, 8.507059e+37  ;;  %v1675_v6 = vld [vmem:[#allocation4 + $0x120] sm:$0xff] }
 0x43b   :  { %v1289_v10 = vor.u32 1.1754944e-38, %v1288_v53  ;;  %vm1287_vm4 = vcmp.eq.f32.partialorder %v1286_v47, 8.507059e+37  ;;  %v1677_v47 = vld [vmem:[#allocation4 + $0x130] sm:$0xff] }
 0x43c   :  { %v5020_v26 = vpop.eup %5019 }
 0x43d   :  { %v1296_v32 = vadd.f32 1.0, %v5020_v26  ;;  %v1685_v26 = vld [vmem:[#allocation4 + $0x170] sm:$0xff] }
 0x43e   :  { %v5022_v24 = vpop.eup %5021 }
 0x43f   :  { %v5024_v39 = vpop.eup %5023  ;;  %v1259_v42 = vmul.f32 %v5022_v24, %v1257_v30  ;;  %5025 = vrcp.f32 %v1296_v32  ;;  %vm1264_vm13 = vweird.f32 %v5022_v24  ;;  %v1308_v63 = vand.u32 2147483648, %v1296_v32  ;;  %v1690_v30 = vld [vmem:[#allocation4 + $0x198] sm:$0xff] }
 0x440   :  { %v1278_v28 = vmul.f32 %v5024_v39, %v1276_v56  ;;  %5027 = vtanh.f32 %v1252_v9  ;;  %vm1283_vm14 = vweird.f32 %v5024_v39  ;;  %vm1265_vm1 = vmor %vm1263_vm15, %vm1264_vm13  ;;  %vm1302_vm6 = vweird.f32 %v1296_v32  ;;  %v1683_v56 = vld [vmem:[#allocation4 + $0x160] sm:$0xff]  ;;  %v1686_v9 = vld [vmem:[#allocation4 + $0x178] sm:$0xff] }
 0x441   :  { %v1260_v33 = vsub.f32 1.0, %v1259_v42  ;;  %vm1284_vm2 = vmor %vm1282_vm0, %vm1283_vm14  ;;  %v1306_v57 = vand.u32 2147483647, %v1296_v32  ;;  %v1309_v8 = vor.u32 1.1754944e-38, %v1308_v63  ;;  %v1664_v63 = vld [vmem:[#allocation4 + $0xc8] sm:$0xff] }
 0x442   :  { %v1279_v23 = vsub.f32 1.0, %v1278_v28  ;;  %v1679_v28 = vld [vmem:[#allocation4 + $0x140] sm:$0xff] }
 0x443   :  { %v1261_v12 = vmul.f32 %v5022_v24, %v1260_v33  ;;  %vm1307_vm8 = vcmp.eq.f32.partialorder %v1306_v57, 8.507059e+37  ;;  %v1680_v33 = vld [vmem:[#allocation4 + $0x148] sm:$0xff]  ;;  %v1665_v57 = vld [vmem:[#allocation4 + $0xd0] sm:$0xff] }
 0x444   :  { %v1280_v46 = vmul.f32 %v5024_v39, %v1279_v23  ;;  %v1681_v23 = vld [vmem:[#allocation4 + $0x150] sm:$0xff] }
 0x445   :  { %v5026_v49 = vpop.eup %5025  ;;  %v1262_v50 = vadd.f32 %v5022_v24, %v1261_v12  ;;  %v1682_v12 = vld [vmem:[#allocation4 + $0x158] sm:$0xff] }
 0x446   :  { %v1281_v55 = vadd.f32 %v5024_v39, %v1280_v46  ;;  %v1298_v45 = vmul.f32 %v5026_v49, %v1296_v32  ;;  %v5028_v7 = vpop.eup %5027  ;;  %vm1303_vm5 = vweird.f32 %v5026_v49  ;;  %v9363_v32 = vld [vmem:[#allocation59_spill] sm:$0xff]  ;;  %v1676_v46 = vld [vmem:[#allocation4 + $0x128] sm:$0xff] }
 0x447   :  { %v1266_v5 = vsel %vm1265_vm1, %v5022_v24, %v1262_v50  ;;  %vm1304_vm7 = vmor %vm1302_vm6, %vm1303_vm5  ;;  %v201_v24 = vadd.f32 %v9363_v32, %v9356_v43  ;;  %v1645_v32 = vld [vmem:[#allocation4 + $0x30] sm:$0xff] }
 0x448   :  { %v1271_v11 = vsel %vm1268_vm3, %v1270_v54, %v1266_v5  ;;  %v1285_v62 = vsel %vm1284_vm2, %v5024_v39, %v1281_v55  ;;  %v1299_v4 = vsub.f32 1.0, %v1298_v45  ;;  %v1678_v54 = vld [vmem:[#allocation4 + $0x138] sm:$0xff]  ;;  %v1671_v55 = vld [vmem:[#allocation4 + $0x100] sm:$0xff]  ;;  %v1672_v45 = vld [vmem:[#allocation4 + $0x108] sm:$0xff] }
 0x449   :  { %v1290_v0 = vsel %vm1287_vm4, %v1289_v10, %v1285_v62  ;;  %v1313_v31 = vmul.f32 %v5028_v7, %v1271_v11  ;;  %v1673_v10 = vld [vmem:[#allocation4 + $0x110] sm:$0xff]  ;;  %v1674_v5 = vld [vmem:[#allocation4 + $0x118] sm:$0xff]  ;;  %v9364_v7 = vld [vmem:[#allocation60_spill] sm:$0xff] }
 0x44a   :  { %v1312_v59 = vmul.f32 %v1290_v0, %v6595_v25  ;;  %v1300_v60 = vmul.f32 %v5026_v49, %v1299_v4  ;;  %v1699_v25 = vld [vmem:[#allocation4 + $0x1e0] sm:$0xff]  ;;  %v283_v11 = vadd.f32 %v9364_v7, %v9358_v14  ;;  %v1668_v4 = vld [vmem:[#allocation4 + $0xe8] sm:$0xff]  ;;  %v1669_v0 = vld [vmem:[#allocation4 + $0xf0] sm:$0xff] }
 0x44b   :  { %v1667_v62 = vld [vmem:[#allocation4 + $0xe0] sm:$0xff] }
 0x44c   :  { %v6677_v2 = vadd.f32 %v1313_v31, %v1312_v59  ;;  %v1301_v44 = vadd.f32 %v5026_v49, %v1300_v60  ;;  %v1670_v59 = vld [vmem:[#allocation4 + $0xf8] sm:$0xff] }
 0x44e   :  { %5029 = vtanh.f32 %v6677_v2  ;;  %v1305_v3 = vsel %vm1304_vm7, %v5026_v49, %v1301_v44  ;;  %v1663_v44 = vld [vmem:[#allocation4 + $0xc0] sm:$0xff] }
 0x44f   :  { %v1310_v61 = vsel %vm1307_vm8, %v1309_v8, %v1305_v3  ;;  %v1666_v3 = vld [vmem:[#allocation4 + $0xd8] sm:$0xff] }
 0x454   :  { %v5030_v41 = vpop.eup %5029 }
 0x455   :  { %v6680_v48 = vmul.f32 %v5030_v41, %v1310_v61  ;;  %v1659_v41 = vld [vmem:[#allocation4 + $0xa0] sm:$0xff]  ;;  %v1660_v61 = vld [vmem:[#allocation4 + $0xa8] sm:$0xff] }
 0x457   :  { %1342 = vmatmul.f32.vlgmr.msrb.gmra.mxu0 %v6680_v48  ;;  %1362 = vmatmul.f32.vlgmr.msra.gmra.mxu1 %v6680_v48 }
 0x458   :  { %1382 = vmatmul.f32.vlgmr.msra.gmra.mxu2 %v6680_v48  ;;  %1402 = vmatmul.f32.vlgmr.msra.gmra.mxu3 %v6680_v48 }
 0x459   :  { %1714 = vmatpush.msrb.mxu0 %v1699_v25  ;;  %1755 = vmatpush.msra.mxu1 %v1700_v58  ;;  %v1661_v25 = vld [vmem:[#allocation4 + $0xb0] sm:$0xff] }
 0x45a   :  { %1796 = vmatpush.msra.mxu2 %v1701_v34  ;;  %1837 = vmatpush.msra.mxu3 %v1702_v15  ;;  %v1662_v34 = vld [vmem:[#allocation4 + $0xb8] sm:$0xff]  ;;  %v1655_v15 = vld [vmem:[#allocation4 + $0x80] sm:$0xff] }
 0x45b   :  { %1715 = vmatpush.msrb.mxu0 %v1695_v16  ;;  %1756 = vmatpush.msra.mxu1 %v1696_v17  ;;  %v1656_v16 = vld [vmem:[#allocation4 + $0x88] sm:$0xff] }
 0x45c   :  { %1797 = vmatpush.msra.mxu2 %v1697_v19  ;;  %1838 = vmatpush.msra.mxu3 %v1698_v20  ;;  %v1657_v20 = vld [vmem:[#allocation4 + $0x90] sm:$0xff] }
 0x45d   :  { %1716 = vmatpush.msrb.mxu0 %v1691_v1  ;;  %1757 = vmatpush.msra.mxu1 %v1692_v27  ;;  %v1658_v1 = vld [vmem:[#allocation4 + $0x98] sm:$0xff] }
 0x45e   :  { %1798 = vmatpush.msra.mxu2 %v1693_v21  ;;  %1839 = vmatpush.msra.mxu3 %v1694_v22  ;;  %v1651_v21 = vld [vmem:[#allocation4 + $0x60] sm:$0xff]  ;;  %v1652_v22 = vld [vmem:[#allocation4 + $0x68] sm:$0xff] }
 0x45f   :  { %1717 = vmatpush.msrb.mxu0 %v1687_v52  ;;  %1758 = vmatpush.msra.mxu1 %v1688_v51  ;;  %v1653_v52 = vld [vmem:[#allocation4 + $0x70] sm:$0xff]  ;;  %v1654_v51 = vld [vmem:[#allocation4 + $0x78] sm:$0xff] }
 0x460   :  { %1799 = vmatpush.msra.mxu2 %v1689_v36  ;;  %1840 = vmatpush.msra.mxu3 %v1690_v30  ;;  %v1647_v36 = vld [vmem:[#allocation4 + $0x40] sm:$0xff]  ;;  %v1648_v30 = vld [vmem:[#allocation4 + $0x48] sm:$0xff] }
 0x461   :  { %1718 = vmatpush.msrb.mxu0 %v1683_v56  ;;  %1759 = vmatpush.msra.mxu1 %v1684_v18  ;;  %v1649_v56 = vld [vmem:[#allocation4 + $0x50] sm:$0xff]  ;;  %v1650_v18 = vld [vmem:[#allocation4 + $0x58] sm:$0xff] }
 0x462   :  { %1800 = vmatpush.msra.mxu2 %v1685_v26  ;;  %1841 = vmatpush.msra.mxu3 %v1686_v9  ;;  %v1643_v26 = vld [vmem:[#allocation4 + $0x20] sm:$0xff] }
 0x463   :  { %1719 = vmatpush.msrb.mxu0 %v1679_v28  ;;  %1760 = vmatpush.msra.mxu1 %v1680_v33  ;;  %v1639_v28 = vld [vmem:[#allocation4] sm:$0xff]  ;;  %v1640_v33 = vld [vmem:[#allocation4 + $0x8] sm:$0xff] }
 0x464   :  { %1801 = vmatpush.msra.mxu2 %v1681_v23  ;;  %1842 = vmatpush.msra.mxu3 %v1682_v12 }
 0x465   :  { %1720 = vmatpush.msrb.mxu0 %v1675_v6  ;;  %1761 = vmatpush.msra.mxu1 %v1676_v46 }
 0x466   :  { %1802 = vmatpush.msra.mxu2 %v1677_v47  ;;  %1843 = vmatpush.msra.mxu3 %v1678_v54 }
 0x467   :  { %1721 = vmatpush.msrb.mxu0 %v1671_v55  ;;  %1762 = vmatpush.msra.mxu1 %v1672_v45 }
 0x468   :  { %1803 = vmatpush.msra.mxu2 %v1673_v10  ;;  %1844 = vmatpush.msra.mxu3 %v1674_v5 }
 0x469   :  { %1722 = vmatpush.msrb.mxu0 %v1667_v62  ;;  %1763 = vmatpush.msra.mxu1 %v1668_v4 }
 0x46a   :  { %1804 = vmatpush.msra.mxu2 %v1669_v0  ;;  %1845 = vmatpush.msra.mxu3 %v1670_v59 }
 0x46b   :  { %1723 = vmatpush.msrb.mxu0 %v1663_v44  ;;  %1764 = vmatpush.msra.mxu1 %v1664_v63 }
 0x46c   :  { %1805 = vmatpush.msra.mxu2 %v1665_v57  ;;  %1846 = vmatpush.msra.mxu3 %v1666_v3 }
 0x46d   :  { %1724 = vmatpush.msrb.mxu0 %v1659_v41  ;;  %1765 = vmatpush.msra.mxu1 %v1660_v61 }
 0x46e   :  { %1806 = vmatpush.msra.mxu2 %v1661_v25  ;;  %1847 = vmatpush.msra.mxu3 %v1662_v34 }
 0x46f   :  { %1725 = vmatpush.msrb.mxu0 %v1655_v15  ;;  %1766 = vmatpush.msra.mxu1 %v1656_v16 }
 0x470   :  { %1807 = vmatpush.msra.mxu2 %v1657_v20  ;;  %1848 = vmatpush.msra.mxu3 %v1658_v1 }
 0x471   :  { %1726 = vmatpush.msrb.mxu0 %v1651_v21  ;;  %1767 = vmatpush.msra.mxu1 %v1652_v22  ;;  %v9367_v22 = vld [vmem:[#allocation13_spill] sm:$0xff] }
 0x472   :  { %1808 = vmatpush.msra.mxu2 %v1653_v52  ;;  %1849 = vmatpush.msra.mxu3 %v1654_v51  ;;  %v9368_v52 = vld [vmem:[#allocation14_spill] sm:$0xff]  ;;  %v6724_v51 = vld [vmem:[#allocation6 + $0x3e0] sm:$0xff] }
 0x473   :  { %1727 = vmatpush.msrb.mxu0 %v1647_v36  ;;  %1768 = vmatpush.msra.mxu1 %v1648_v30  ;;  %9369 = vst [vmem:[#allocation11_spill] sm:$0xff] %v6724_v51  ;;  %v6726_v36 = vld [vmem:[#allocation6 + $0x3e8] sm:$0xff]  ;;  %v6728_v30 = vld [vmem:[#allocation6 + $0x3c0] sm:$0xff] }
 0x474   :  { %1809 = vmatpush.msra.mxu2 %v1649_v56  ;;  %1850 = vmatpush.msra.mxu3 %v1650_v18  ;;  %v6732_v56 = vld [vmem:[#allocation6 + $0x3c8] sm:$0xff]  ;;  %v6734_v18 = vld [vmem:[#allocation6 + $0x3f8] sm:$0xff] }
 0x475   :  { %1728 = vmatpush.msrb.mxu0 %v1643_v26  ;;  %9370 = vst [vmem:[#allocation12_spill] sm:$0xff] %v6732_v56  ;;  %v6737_v26 = vld [vmem:[#allocation6 + $0x3a0] sm:$0xff] }
 0x476   :  { %1810 = vmatpush.msra.mxu2 %v1645_v32  ;;  %v9373_v32 = vld [vmem:[#allocation46_spill] sm:$0xff] }
 0x477   :  { %1729 = vmatpush.msrb.mxu0 %v1639_v28  ;;  %v6772_v28 = vld [vmem:[#allocation6 + $0x388] sm:$0xff] }
 0x4d4   :  { %v1343_v39 = vpop.f32.mrf.mxu0  ;;  %v1363_v42 = vpop.f32.mrf.mxu1 }
 0x4d5   :  { %v1406_v35 = vadd.f32 %v1343_v39, %v160_v38  ;;  %v1407_v53 = vadd.f32 %v1363_v42, %v201_v24  ;;  %v1644_v38 = vld [vmem:[#allocation4 + $0x28] sm:$0xff]  ;;  %v1646_v24 = vld [vmem:[#allocation4 + $0x38] sm:$0xff] }
 0x4d6   :  { %v9365_v39 = vld [vmem:[#allocation62_spill] sm:$0xff]  ;;  %1769 = vmatpush.msra.mxu1 %v1644_v38  ;;  %1851 = vmatpush.msra.mxu3 %v1646_v24  ;;  %v6760_v24 = vld [vmem:[#allocation6 + $0x3f0] sm:$0xff] }
 0x4d7   :  { %v4864_v49 = vmul.f32 -1.442695, %v1406_v35  ;;  %v4865_v50 = vmul.f32 -1.442695, %v1407_v53  ;;  %v242_v42 = vadd.f32 %v9365_v39, %v9360_v13  ;;  %v1641_v35 = vld [vmem:[#allocation4 + $0x10] sm:$0xff]  ;;  %v1642_v53 = vld [vmem:[#allocation4 + $0x18] sm:$0xff] }
 0x4d8   :  { %1770 = vmatpush.msra.mxu1 %v1640_v33  ;;  %1811 = vmatpush.msra.mxu2 %v1641_v35  ;;  %v6741_v38 = vld [vmem:[#allocation6 + $0x3d8] sm:$0xff]  ;;  %v6768_v39 = vld [vmem:[#allocation6 + $0x3b0] sm:$0xff]  ;;  %v6780_v33 = vld [vmem:[#allocation6 + $0x368] sm:$0xff] }
 0x4d9   :  { %5031 = vpow2.f32 %v4864_v49  ;;  %1852 = vmatpush.msra.mxu3 %v1642_v53  ;;  %9372 = vst [vmem:[#allocation17_spill] sm:$0xff] %v6741_v38  ;;  %v6784_v35 = vld [vmem:[#allocation6 + $0x390] sm:$0xff]  ;;  %v6790_v53 = vld [vmem:[#allocation6 + $0x378] sm:$0xff] }
 0x4da   :  { %5033 = vpow2.f32 %v4865_v50 }
 0x4db   :  { %v1403_v31 = vpop.f32.mrf.mxu3  ;;  %v1383_v37 = vpop.f32.mrf.mxu2 }
 0x4dc   :  { %v1409_v60 = vadd.f32 %v1403_v31, %v283_v11  ;;  %v1408_v6 = vadd.f32 %v1383_v37, %v242_v42  ;;  %v6739_v37 = vld [vmem:[#allocation6 + $0x3a8] sm:$0xff]  ;;  %v6770_v42 = vld [vmem:[#allocation6 + $0x380] sm:$0xff] }
 0x4dd   :  { %9371 = vst [vmem:[#allocation19_spill] sm:$0xff] %v6739_v37 }
 0x4de   :  { %v4866_v8 = vmul.f32 -1.442695, %v1409_v60  ;;  %9375 = vst [vmem:[#allocation48_spill] sm:$0xff] %v6770_v42 }
 0x4df   :  { %v5032_v58 = vpop.eup %5031 }
 0x4e0   :  { %v5034_v17 = vpop.eup %5033  ;;  %v6692_v19 = vadd.f32 1.0, %v5032_v58  ;;  %5035 = vpow2.f32 %v4866_v8 }
 0x4e1   :  { %v6694_v27 = vadd.f32 1.0, %v5034_v17 }
 0x4e2   :  { %5037 = vrcp.f32 %v6692_v19  ;;  %v1425_v55 = vand.u32 2147483648, %v6692_v19  ;;  %v1423_v5 = vand.u32 2147483647, %v6692_v19  ;;  %vm1419_vm11 = vweird.f32 %v6692_v19 }
 0x4e3   :  { %5039 = vrcp.f32 %v6694_v27  ;;  %v1444_v45 = vand.u32 2147483648, %v6694_v27  ;;  %v1442_v11 = vand.u32 2147483647, %v6694_v27  ;;  %vm1438_vm12 = vweird.f32 %v6694_v27 }
 0x4e4   :  { %v1426_v0 = vor.u32 1.1754944e-38, %v1425_v55  ;;  %vm1424_vm15 = vcmp.eq.f32.partialorder %v1423_v5, 8.507059e+37  ;;  %v6804_v55 = vld [vmem:[#allocation6 + $0x358] sm:$0xff]  ;;  %v6808_v5 = vld [vmem:[#allocation6 + $0x350] sm:$0xff] }
 0x4e5   :  { %v1445_v60 = vor.u32 1.1754944e-38, %v1444_v45  ;;  %vm1443_vm0 = vcmp.eq.f32.partialorder %v1442_v11, 8.507059e+37 }
 0x4e6   :  { %v5036_v9 = vpop.eup %5035 }
 0x4e7   :  { %v1452_v23 = vadd.f32 1.0, %v5036_v9  ;;  %v6763_v9 = vld [vmem:[#allocation6 + $0x3d0] sm:$0xff] }
 0x4e8   :  { %v5038_v12 = vpop.eup %5037 }
 0x4e9   :  { %v5040_v46 = vpop.eup %5039  ;;  %v1415_v47 = vmul.f32 %v5038_v12, %v6692_v19  ;;  %5041 = vrcp.f32 %v1452_v23  ;;  %vm1420_vm9 = vweird.f32 %v5038_v12  ;;  %v1464_v16 = vand.u32 2147483648, %v1452_v23 }
 0x4ea   :  { %v1434_v49 = vmul.f32 %v5040_v46, %v6694_v27  ;;  %5043 = vtanh.f32 %v1408_v6  ;;  %vm1439_vm10 = vweird.f32 %v5040_v46  ;;  %vm1421_vm13 = vmor %vm1419_vm11, %vm1420_vm9  ;;  %vm1458_vm2 = vweird.f32 %v1452_v23  ;;  %v9376_v6 = vld [vmem:[#allocation38_spill] sm:$0xff] }
 0x4eb   :  { %v1416_v50 = vsub.f32 1.0, %v1415_v47  ;;  %vm1440_vm14 = vmor %vm1438_vm12, %vm1439_vm10  ;;  %v1462_v17 = vand.u32 2147483647, %v1452_v23  ;;  %v1465_v20 = vor.u32 1.1754944e-38, %v1464_v16  ;;  %v9377_v47 = vld [vmem:[#allocation61_spill] sm:$0xff]  ;;  %v6850_v16 = vld [vmem:[#allocation6 + $0x2a0] sm:$0xff] }
 0x4ec   :  { %v1435_v54 = vsub.f32 1.0, %v1434_v49  ;;  %v204_v49 = vadd.f32 %v9377_v47, %v9356_v43  ;;  %v6815_v43 = vld [vmem:[#allocation6 + $0x338] sm:$0xff]  ;;  %9380 = vst [vmem:[#allocation50_spill] sm:$0xff] %v6850_v16 }
 0x4ed   :  { %v1417_v10 = vmul.f32 %v5038_v12, %v1416_v50  ;;  %vm1463_vm4 = vcmp.eq.f32.partialorder %v1462_v17, 8.507059e+37  ;;  %v6800_v50 = vld [vmem:[#allocation6 + $0x340] sm:$0xff]  ;;  %v6852_v17 = vld [vmem:[#allocation6 + $0x2a8] sm:$0xff] }
 0x4ee   :  { %v1436_v7 = vmul.f32 %v5040_v46, %v1435_v54  ;;  %v6802_v54 = vld [vmem:[#allocation6 + $0x348] sm:$0xff]  ;;  %9381 = vst [vmem:[#allocation49_spill] sm:$0xff] %v6852_v17 }
 0x4ef   :  { %v5042_v62 = vpop.eup %5041  ;;  %v1418_v4 = vadd.f32 %v5038_v12, %v1417_v10 }
 0x4f0   :  { %v1437_v31 = vadd.f32 %v5040_v46, %v1436_v7  ;;  %v1454_v59 = vmul.f32 %v5042_v62, %v1452_v23  ;;  %v5044_v63 = vpop.eup %5043  ;;  %vm1459_vm1 = vweird.f32 %v5042_v62  ;;  %v6782_v23 = vld [vmem:[#allocation6 + $0x398] sm:$0xff] }
 0x4f1   :  { %v1422_v44 = vsel %vm1421_vm13, %v5038_v12, %v1418_v4  ;;  %vm1460_vm3 = vmor %vm1458_vm2, %vm1459_vm1  ;;  %v6792_v12 = vld [vmem:[#allocation6 + $0x370] sm:$0xff] }
 0x4f2   :  { %v1427_v57 = vsel %vm1424_vm15, %v1426_v0, %v1422_v44  ;;  %v1441_v3 = vsel %vm1440_vm14, %v5040_v46, %v1437_v31  ;;  %v1455_v8 = vsub.f32 1.0, %v1454_v59  ;;  %v163_v46 = vadd.f32 %v9376_v6, %v9354_v40  ;;  %v6810_v40 = vld [vmem:[#allocation6 + $0x320] sm:$0xff]  ;;  %v6820_v4 = vld [vmem:[#allocation6 + $0x330] sm:$0xff] }
 0x4f3   :  { %v1446_v41 = vsel %vm1443_vm0, %v1445_v60, %v1441_v3  ;;  %v1469_v61 = vmul.f32 %v5044_v63, %v1427_v57  ;;  %v6822_v59 = vld [vmem:[#allocation6 + $0x300] sm:$0xff]  ;;  %v6824_v60 = vld [vmem:[#allocation6 + $0x308] sm:$0xff]  ;;  %v6834_v57 = vld [vmem:[#allocation6 + $0x318] sm:$0xff] }
 0x4f4   :  { %v1468_v25 = vmul.f32 %v1446_v41, %v6677_v2  ;;  %v1456_v58 = vmul.f32 %v5042_v62, %v1455_v8  ;;  %v9366_v2 = vld [vmem:[#allocation68_spill] sm:$0xff]  ;;  %v6830_v44 = vld [vmem:[#allocation6 + $0x2e0] sm:$0xff]  ;;  %v6841_v41 = vld [vmem:[#allocation6 + $0x2f8] sm:$0xff] }
 0x4f5   :  { %v6832_v63 = vld [vmem:[#allocation6 + $0x2e8] sm:$0xff]  ;;  %v6837_v3 = vld [vmem:[#allocation6 + $0x2c0] sm:$0xff] }
 0x4f6   :  { %v6709_v34 = vadd.f32 %v1469_v61, %v1468_v25  ;;  %v1457_v15 = vadd.f32 %v5042_v62, %v1456_v58  ;;  %v6839_v8 = vld [vmem:[#allocation6 + $0x2c8] sm:$0xff]  ;;  %v6847_v58 = vld [vmem:[#allocation6 + $0x2d8] sm:$0xff]  ;;  %v6876_v6 = vld [vmem:[#allocation6 + $0x260] sm:$0xff] }
 0x4f7   :  { %v9378_v61 = vld [vmem:[#allocation64_spill] sm:$0xff]  ;;  %9379 = vst [vmem:[#allocation51_spill] sm:$0xff] %v6847_v58 }
 0x4f8   :  { %5045 = vtanh.f32 %v6709_v34  ;;  %v1461_v19 = vsel %vm1460_vm3, %v5042_v62, %v1457_v15  ;;  %v6812_v62 = vld [vmem:[#allocation6 + $0x328] sm:$0xff]  ;;  %v286_v25 = vadd.f32 %v9378_v61, %v9358_v14  ;;  %v6858_v14 = vld [vmem:[#allocation6 + $0x2b8] sm:$0xff]  ;;  %9387 = vst [vmem:[#allocation21_spill] sm:$0xff] %v6876_v6  ;;  %v6904_v61 = vld [vmem:[#allocation6 + $0x220] sm:$0xff] }
 0x4f9   :  { %v1466_v27 = vsel %vm1463_vm4, %v1465_v20, %v1461_v19  ;;  %v6854_v19 = vld [vmem:[#allocation6 + $0x310] sm:$0xff]  ;;  %9382 = vst [vmem:[#allocation52_spill] sm:$0xff] %v6858_v14 }
 0x4fa   :  { %9394 = vst [vmem:[#allocation31_spill] sm:$0xff] %v6904_v61 }
 0x4fe   :  { %v5046_v1 = vpop.eup %5045 }
 0x4ff   :  { %v1472_v21 = vmul.f32 %v5046_v1, %v1466_v27  ;;  %v6860_v1 = vld [vmem:[#allocation6 + $0x2f0] sm:$0xff]  ;;  %v6864_v27 = vld [vmem:[#allocation6 + $0x280] sm:$0xff] }
 0x500   :  { %9383 = vst [vmem:[#allocation54_spill] sm:$0xff] %v6864_v27 }
 0x501   :  { %1498 = vmatmul.f32.vlgmr.msra.gmra.mxu0 %v1472_v21  ;;  %1518 = vmatmul.f32.vlgmr.msrb.gmra.mxu1 %v1472_v21 }
 0x502   :  { %1538 = vmatmul.f32.vlgmr.msrb.gmra.mxu2 %v1472_v21  ;;  %1558 = vmatmul.f32.vlgmr.msrb.gmra.mxu3 %v1472_v21 }
 0x503   :  { %1979 = vmatpush.msra.mxu0 %v6724_v51  ;;  %1999 = vmatpush.msrb.mxu1 %v6726_v36 }
 0x504   :  { %2039 = vmatpush.msrb.mxu3 %v6734_v18  ;;  %2019 = vmatpush.msrb.mxu2 %v6760_v24 }
 0x505   :  { %1980 = vmatpush.msra.mxu0 %v6728_v30  ;;  %2000 = vmatpush.msrb.mxu1 %v6732_v56 }
 0x506   :  { %2040 = vmatpush.msrb.mxu3 %v6741_v38  ;;  %2020 = vmatpush.msrb.mxu2 %v6763_v9 }
 0x507   :  { %1981 = vmatpush.msra.mxu0 %v6737_v26  ;;  %2001 = vmatpush.msrb.mxu1 %v6739_v37 }
 0x508   :  { %2021 = vmatpush.msrb.mxu2 %v6768_v39 }
 0x509   :  { %1730 = vmatmul.f32.vlgmr.msrb.gmra.mxu0 %v9366_v2  ;;  %1771 = vmatmul.f32.vlgmr.msra.gmra.mxu1 %v9366_v2 }
 0x50a   :  { %1812 = vmatmul.f32.vlgmr.msra.gmra.mxu2 %v9366_v2  ;;  %1853 = vmatmul.f32.vlgmr.msra.gmra.mxu3 %v9366_v2 }
 0x50b   :  { %1982 = vmatpush.msra.mxu0 %v6770_v42  ;;  %2002 = vmatpush.msrb.mxu1 %v6772_v28 }
 0x50c   :  { %2022 = vmatpush.msrb.mxu2 %v6784_v35 }
 0x50d   :  { %2003 = vmatpush.msrb.mxu1 %v6780_v33 }
 0x50e   :  { %2023 = vmatpush.msrb.mxu2 %v6792_v12 }
 0x50f   :  { %2004 = vmatpush.msrb.mxu1 %v6802_v54 }
 0x510   :  { %2024 = vmatpush.msrb.mxu2 %v6808_v5 }
 0x511   :  { %1733 = vmatmul.f32.gmra.mxu0 %v9367_v22  ;;  %1774 = vmatmul.f32.gmra.mxu1 %v9367_v22 }
 0x512   :  { %1815 = vmatmul.f32.gmra.mxu2 %v9367_v22  ;;  %1856 = vmatmul.f32.gmra.mxu3 %v9367_v22  ;;  %v6870_v22 = vld [vmem:[#allocation6 + $0x298] sm:$0xff] }
 0x513   :  { %2005 = vmatpush.msrb.mxu1 %v6812_v62  ;;  %2025 = vmatpush.msrb.mxu2 %v6820_v4  ;;  %9385 = vst [vmem:[#allocation16_spill] sm:$0xff] %v6870_v22 }
 0x515   :  { %2006 = vmatpush.msrb.mxu1 %v6824_v60  ;;  %2026 = vmatpush.msrb.mxu2 %v6854_v19 }
 0x517   :  { %2007 = vmatpush.msrb.mxu1 %v6832_v63  ;;  %2027 = vmatpush.msrb.mxu2 %v6860_v1 }
 0x519   :  { %1736 = vmatmul.f32.gmra.mxu0 %v9368_v52  ;;  %1777 = vmatmul.f32.gmra.mxu1 %v9368_v52 }
 0x51a   :  { %1818 = vmatmul.f32.gmra.mxu2 %v9368_v52  ;;  %1859 = vmatmul.f32.gmra.mxu3 %v9368_v52  ;;  %v6872_v52 = vld [vmem:[#allocation6 + $0x2d0] sm:$0xff] }
 0x51b   :  { %2008 = vmatpush.msrb.mxu1 %v6839_v8  ;;  %9386 = vst [vmem:[#allocation23_spill] sm:$0xff] %v6872_v52  ;;  %2028 = vmatpush.msrb.mxu2 %v6872_v52 }
 0x51d   :  { %2009 = vmatpush.msrb.mxu1 %v6852_v17 }
 0x521   :  { %1739 = vmatmul.f32.gmra.mxu0 %v9373_v32  ;;  %1780 = vmatmul.f32.gmra.mxu1 %v9373_v32 }
 0x522   :  { %1821 = vmatmul.f32.gmra.mxu2 %v9373_v32  ;;  %1862 = vmatmul.f32.gmra.mxu3 %v9373_v32 }
 0x529   :  { %1742 = vmatmul.f32.gmra.mxu0 %v6598_v29  ;;  %1783 = vmatmul.f32.gmra.mxu1 %v6598_v29 }
 0x52a   :  { %1824 = vmatmul.f32.gmra.mxu2 %v6598_v29  ;;  %1865 = vmatmul.f32.gmra.mxu3 %v6598_v29  ;;  %v6766_v29 = vld [vmem:[#allocation6 + $0x3b8] sm:$0xff] }
 0x52b   :  { %9374 = vst [vmem:[#allocation45_spill] sm:$0xff] %v6766_v29  ;;  %2041 = vmatpush.msrb.mxu3 %v6766_v29 }
 0x52d   :  { %2042 = vmatpush.msrb.mxu3 %v6782_v23 }
 0x52f   :  { %2043 = vmatpush.msrb.mxu3 %v6790_v53 }
 0x531   :  { %1745 = vmatmul.f32.gmra.mxu0 %v6680_v48  ;;  %1786 = vmatmul.f32.gmra.mxu1 %v6680_v48 }
 0x532   :  { %1827 = vmatmul.f32.gmra.mxu2 %v6680_v48  ;;  %1868 = vmatmul.f32.gmra.mxu3 %v6680_v48  ;;  %v6775_v48 = vld [vmem:[#allocation6 + $0x360] sm:$0xff] }
 0x533   :  { %1983 = vmatpush.msra.mxu0 %v6775_v48  ;;  %2044 = vmatpush.msrb.mxu3 %v6804_v55 }
 0x535   :  { %1984 = vmatpush.msra.mxu0 %v6800_v50  ;;  %2045 = vmatpush.msrb.mxu3 %v6815_v43 }
 0x537   :  { %1985 = vmatpush.msra.mxu0 %v6810_v40  ;;  %2046 = vmatpush.msrb.mxu3 %v6834_v57 }
 0x539   :  { %1748 = vmatmul.f32.gmra.mxu0 %v1472_v21  ;;  %1789 = vmatmul.f32.gmra.mxu1 %v1472_v21 }
 0x53a   :  { %1830 = vmatmul.f32.gmra.mxu2 %v1472_v21  ;;  %1871 = vmatmul.f32.gmra.mxu3 %v1472_v21  ;;  %v6866_v21 = vld [vmem:[#allocation6 + $0x288] sm:$0xff] }
 0x53b   :  { %1986 = vmatpush.msra.mxu0 %v6822_v59  ;;  %2047 = vmatpush.msrb.mxu3 %v6841_v41  ;;  %9384 = vst [vmem:[#allocation53_spill] sm:$0xff] %v6866_v21 }
 0x53c   :  { %2010 = vmatpush.msrb.mxu1 %v6866_v21 }
 0x53d   :  { %1987 = vmatpush.msra.mxu0 %v6830_v44  ;;  %2048 = vmatpush.msrb.mxu3 %v6847_v58 }
 0x53f   :  { %1988 = vmatpush.msra.mxu0 %v6837_v3  ;;  %2049 = vmatpush.msrb.mxu3 %v6858_v14 }
 0x541   :  { %1989 = vmatpush.msra.mxu0 %v6850_v16  ;;  %2050 = vmatpush.msrb.mxu3 %v6870_v22  ;;  %v6928_v22 = vld [vmem:[#allocation6 + $0x218] sm:$0xff] }
 0x542   :  { %9403 = vst [vmem:[#allocation35_spill] sm:$0xff] %v6928_v22 }
 0x543   :  { %1990 = vmatpush.msra.mxu0 %v6864_v27 }
 0x545   :  { %1991 = vmatpush.msra.mxu0 %v6876_v6 }
 0x57e   :  { %v1499_v45 = vpop.f32.mrf.mxu0  ;;  %v1519_v10 = vpop.f32.mrf.mxu1 }
 0x57f   :  { %v1562_v7 = vadd.f32 %v1499_v45, %v163_v46  ;;  %v1563_v11 = vadd.f32 %v1519_v10, %v204_v49  ;;  %v6878_v46 = vld [vmem:[#allocation6 + $0x268] sm:$0xff]  ;;  %v6884_v45 = vld [vmem:[#allocation6 + $0x2b0] sm:$0xff]  ;;  %v6886_v10 = vld [vmem:[#allocation6 + $0x278] sm:$0xff] }
 0x580   :  { %9388 = vst [vmem:[#allocation15_spill] sm:$0xff] %v6878_v46  ;;  %2011 = vmatpush.msrb.mxu1 %v6878_v46  ;;  %2029 = vmatpush.msrb.mxu2 %v6884_v45  ;;  %v9400_v46 = vld [vmem:[#allocation66_spill] sm:$0xff] }
 0x581   :  { %v4867_v0 = vmul.f32 -1.442695, %v1562_v7  ;;  %v4868_v31 = vmul.f32 -1.442695, %v1563_v11  ;;  %9389 = vst [vmem:[#allocation20_spill] sm:$0xff] %v6884_v45  ;;  %v6892_v11 = vld [vmem:[#allocation6 + $0x240] sm:$0xff]  ;;  %2051 = vmatpush.msrb.mxu3 %v6886_v10  ;;  %v245_v6 = vadd.f32 %v9400_v46, %v9360_v13 }
 0x582   :  { %9390 = vst [vmem:[#allocation28_spill] sm:$0xff] %v6886_v10  ;;  %1992 = vmatpush.msra.mxu0 %v6892_v11  ;;  %v6936_v13 = vld [vmem:[#allocation6 + $0x230] sm:$0xff] }
 0x583   :  { %5047 = vpow2.f32 %v4867_v0  ;;  %9391 = vst [vmem:[#allocation25_spill] sm:$0xff] %v6892_v11  ;;  %v6894_v0 = vld [vmem:[#allocation6 + $0x248] sm:$0xff]  ;;  %v6926_v11 = vld [vmem:[#allocation6 + $0x238] sm:$0xff] }
 0x584   :  { %5049 = vpow2.f32 %v4868_v31  ;;  %9392 = vst [vmem:[#allocation18_spill] sm:$0xff] %v6894_v0  ;;  %v6899_v31 = vld [vmem:[#allocation6 + $0x290] sm:$0xff]  ;;  %2012 = vmatpush.msrb.mxu1 %v6894_v0  ;;  %1993 = vmatpush.msra.mxu0 %v6904_v61 }
 0x585   :  { %v1559_v15 = vpop.f32.mrf.mxu3  ;;  %9393 = vst [vmem:[#allocation24_spill] sm:$0xff] %v6899_v31  ;;  %2030 = vmatpush.msrb.mxu2 %v6899_v31  ;;  %v6924_v0 = vld [vmem:[#allocation6 + $0x250] sm:$0xff] }
 0x586   :  { %v1565_v20 = vadd.f32 %v1559_v15, %v286_v25  ;;  %v6906_v25 = vld [vmem:[#allocation6 + $0x228] sm:$0xff]  ;;  %v6908_v15 = vld [vmem:[#allocation6 + $0x258] sm:$0xff]  ;;  %9401 = vst [vmem:[#allocation26_spill] sm:$0xff] %v6924_v0 }
 0x587   :  { %9395 = vst [vmem:[#allocation29_spill] sm:$0xff] %v6906_v25  ;;  %2052 = vmatpush.msrb.mxu3 %v6908_v15  ;;  %2013 = vmatpush.msrb.mxu1 %v6906_v25 }
 0x588   :  { %v4869_v2 = vmul.f32 -1.442695, %v1565_v20  ;;  %9396 = vst [vmem:[#allocation22_spill] sm:$0xff] %v6908_v15  ;;  %v6912_v20 = vld [vmem:[#allocation6 + $0x270] sm:$0xff] }
 0x589   :  { %v5048_v32 = vpop.eup %5047  ;;  %9397 = vst [vmem:[#allocation27_spill] sm:$0xff] %v6912_v20  ;;  %2031 = vmatpush.msrb.mxu2 %v6912_v20  ;;  %2053 = vmatpush.msrb.mxu3 %v6926_v11 }
 0x58a   :  { %v5050_v47 = vpop.eup %5049  ;;  %v6880_v49 = vadd.f32 1.0, %v5048_v32  ;;  %5051 = vpow2.f32 %v4869_v2  ;;  %v1539_v2 = vpop.f32.mrf.mxu2  ;;  %v6916_v32 = vld [vmem:[#allocation6 + $0x200] sm:$0xff]  ;;  %9402 = vst [vmem:[#allocation30_spill] sm:$0xff] %v6926_v11  ;;  %v6943_v11 = vld [vmem:[#allocation6 + $0x210] sm:$0xff] }
 0x58b   :  { %v6888_v7 = vadd.f32 1.0, %v5050_v47  ;;  %9398 = vst [vmem:[#allocation33_spill] sm:$0xff] %v6916_v32  ;;  %v6918_v47 = vld [vmem:[#allocation6 + $0x208] sm:$0xff]  ;;  %v1564_v21 = vadd.f32 %v1539_v2, %v245_v6  ;;  %1994 = vmatpush.msra.mxu0 %v6916_v32  ;;  %2032 = vmatpush.msrb.mxu2 %v6924_v0 }
 0x58c   :  { %5053 = vrcp.f32 %v6880_v49  ;;  %9399 = vst [vmem:[#allocation32_spill] sm:$0xff] %v6918_v47  ;;  %2014 = vmatpush.msrb.mxu1 %v6918_v47  ;;  %2054 = vmatpush.msrb.mxu3 %v6928_v22  ;;  %v1581_v47 = vand.u32 2147483648, %v6880_v49  ;;  %vm1575_vm7 = vweird.f32 %v6880_v49 }
 0x58d   :  { %5055 = vrcp.f32 %v6888_v7  ;;  %9404 = vst [vmem:[#allocation34_spill] sm:$0xff] %v6936_v13  ;;  %2131 = vmatpush.msrb.mxu0 %v6724_v51  ;;  %2033 = vmatpush.msrb.mxu2 %v6936_v13  ;;  %v1600_v22 = vand.u32 2147483648, %v6888_v7  ;;  %v1579_v51 = vand.u32 2147483647, %v6880_v49  ;;  %vm1594_vm8 = vweird.f32 %v6888_v7 }
 0x58e   :  { %9405 = vst [vmem:[#allocation39_spill] sm:$0xff] %v6943_v11  ;;  %2151 = vmatpush.msra.mxu1 %v6726_v36  ;;  %2191 = vmatpush.msra.mxu3 %v6734_v18 }
 0x58f   :  { %2132 = vmatpush.msrb.mxu0 %v6728_v30  ;;  %2034 = vmatpush.msrb.mxu2 %v6943_v11  ;;  %vm1580_vm11 = vcmp.eq.f32.partialorder %v1579_v51, 8.507059e+37 }
 0x590   :  { %v5052_v10 = vpop.eup %5051  ;;  %2152 = vmatpush.msra.mxu1 %v6732_v56  ;;  %2192 = vmatpush.msra.mxu3 %v6741_v38 }
 0x591   :  { %v6930_v31 = vadd.f32 1.0, %v5052_v10  ;;  %2171 = vmatpush.msra.mxu2 %v6760_v24  ;;  %2133 = vmatpush.msrb.mxu0 %v6737_v26 }
 0x592   :  { %v5054_v15 = vpop.eup %5053  ;;  %2153 = vmatpush.msra.mxu1 %v6739_v37  ;;  %2193 = vmatpush.msra.mxu3 %v6766_v29 }
 0x593   :  { %v5056_v46 = vpop.eup %5055  ;;  %v1571_v25 = vmul.f32 %v5054_v15, %v6880_v49  ;;  %5057 = vrcp.f32 %v6930_v31  ;;  %vm1576_vm5 = vweird.f32 %v5054_v15  ;;  %2172 = vmatpush.msra.mxu2 %v6763_v9  ;;  %2134 = vmatpush.msrb.mxu0 %v6770_v42  ;;  %v1601_v49 = vor.u32 1.1754944e-38, %v1600_v22 }
 0x594   :  { %v1590_v10 = vmul.f32 %v5056_v46, %v6888_v7  ;;  %5059 = vtanh.f32 %v1564_v21  ;;  %vm1595_vm6 = vweird.f32 %v5056_v46  ;;  %vm1577_vm9 = vmor %vm1575_vm7, %vm1576_vm5  ;;  %2154 = vmatpush.msra.mxu1 %v6772_v28  ;;  %2194 = vmatpush.msra.mxu3 %v6782_v23  ;;  %vm1614_vm14 = vweird.f32 %v6930_v31 }
 0x595   :  { %v1572_v6 = vsub.f32 1.0, %v1571_v25  ;;  %vm1596_vm10 = vmor %vm1594_vm8, %vm1595_vm6  ;;  %2173 = vmatpush.msra.mxu2 %v6768_v39  ;;  %2135 = vmatpush.msrb.mxu0 %v6775_v48 }
 0x596   :  { %v1591_v2 = vsub.f32 1.0, %v1590_v10  ;;  %v1598_v10 = vand.u32 2147483647, %v6888_v7  ;;  %2155 = vmatpush.msra.mxu1 %v6780_v33  ;;  %2195 = vmatpush.msra.mxu3 %v6790_v53 }
 0x597   :  { %v1573_v32 = vmul.f32 %v5054_v15, %v1572_v6  ;;  %v1582_v6 = vor.u32 1.1754944e-38, %v1581_v47  ;;  %2174 = vmatpush.msra.mxu2 %v6784_v35  ;;  %2136 = vmatpush.msrb.mxu0 %v6800_v50 }
 0x598   :  { %v1592_v25 = vmul.f32 %v5056_v46, %v1591_v2  ;;  %vm1599_vm12 = vcmp.eq.f32.partialorder %v1598_v10, 8.507059e+37  ;;  %2156 = vmatpush.msra.mxu1 %v6802_v54  ;;  %2196 = vmatpush.msra.mxu3 %v6804_v55  ;;  %v9406_v10 = vld [vmem:[#allocation53_spill] sm:$0xff] }
 0x599   :  { %v6959_v21 = vpop.eup %5057  ;;  %v1574_v56 = vadd.f32 %v5054_v15, %v1573_v32  ;;  %2175 = vmatpush.msra.mxu2 %v6792_v12  ;;  %2137 = vmatpush.msrb.mxu0 %v6810_v40 }
 0x59a   :  { %v1593_v2 = vadd.f32 %v5056_v46, %v1592_v25  ;;  %v1610_v38 = vmul.f32 %v6959_v21, %v6930_v31  ;;  %v5060_v7 = vpop.eup %5059  ;;  %vm1615_vm13 = vweird.f32 %v6959_v21  ;;  %2157 = vmatpush.msra.mxu1 %v6812_v62  ;;  %2197 = vmatpush.msra.mxu3 %v6815_v43 }
 0x59b   :  { %v1578_v32 = vsel %vm1577_vm9, %v5054_v15, %v1574_v56  ;;  %2176 = vmatpush.msra.mxu2 %v6808_v5  ;;  %2138 = vmatpush.msrb.mxu0 %v6822_v59  ;;  %vm1616_vm15 = vmor %vm1614_vm14, %vm1615_vm13 }
 0x59c   :  { %v1583_v29 = vsel %vm1580_vm11, %v1582_v6, %v1578_v32  ;;  %v1597_v47 = vsel %vm1596_vm10, %v5056_v46, %v1593_v2  ;;  %v1611_v25 = vsub.f32 1.0, %v1610_v38  ;;  %2158 = vmatpush.msra.mxu1 %v6824_v60  ;;  %2198 = vmatpush.msra.mxu3 %v6834_v57  ;;  %v9408_v6 = vld [vmem:[#allocation24_spill] sm:$0xff]  ;;  %v9409_v2 = vld [vmem:[#allocation21_spill] sm:$0xff] }
 0x59d   :  { %v1602_v37 = vsel %vm1599_vm12, %v1601_v49, %v1597_v47  ;;  %v1625_v42 = vmul.f32 %v5060_v7, %v1583_v29  ;;  %2177 = vmatpush.msra.mxu2 %v6820_v4  ;;  %2139 = vmatpush.msrb.mxu0 %v6830_v44  ;;  %v9410_v49 = vld [vmem:[#allocation15_spill] sm:$0xff]  ;;  %v9411_v32 = vld [vmem:[#allocation28_spill] sm:$0xff]  ;;  %v9412_v7 = vld [vmem:[#allocation25_spill] sm:$0xff] }
 0x59e   :  { %v1624_v51 = vmul.f32 %v1602_v37, %v6709_v34  ;;  %v1612_v56 = vmul.f32 %v6959_v21, %v1611_v25  ;;  %v1620_v34 = vand.u32 2147483648, %v6930_v31  ;;  %v1618_v37 = vand.u32 2147483647, %v6930_v31  ;;  %2159 = vmatpush.msra.mxu1 %v6832_v63  ;;  %2199 = vmatpush.msra.mxu3 %v6841_v41  ;;  %v9413_v47 = vld [vmem:[#allocation18_spill] sm:$0xff] }
 0x59f   :  { %2178 = vmatpush.msra.mxu2 %v6854_v19  ;;  %2140 = vmatpush.msrb.mxu0 %v6837_v3  ;;  %v9414_v25 = vld [vmem:[#allocation22_spill] sm:$0xff] }
 0x5a0   :  { %v1626_v38 = vadd.f32 %v1625_v42, %v1624_v51  ;;  %v1613_v29 = vadd.f32 %v6959_v21, %v1612_v56  ;;  %v1621_v22 = vor.u32 1.1754944e-38, %v1620_v34  ;;  %vm1619_vm0 = vcmp.eq.f32.partialorder %v1618_v37, 8.507059e+37  ;;  %2160 = vmatpush.msra.mxu1 %v6839_v8  ;;  %2200 = vmatpush.msra.mxu3 %v6847_v58  ;;  %v9416_v56 = vld [vmem:[#allocation29_spill] sm:$0xff]  ;;  %v9419_v34 = vld [vmem:[#allocation32_spill] sm:$0xff]  ;;  %v9420_v37 = vld [vmem:[#allocation35_spill] sm:$0xff] }
 0x5a1   :  { %2179 = vmatpush.msra.mxu2 %v6860_v1  ;;  %2141 = vmatpush.msrb.mxu0 %v6850_v16  ;;  %v9415_v51 = vmov 0.0  }
 0x5a2   :  { %5061 = vtanh.f32 %v1626_v38  ;;  %v1617_v42 = vsel %vm1616_vm15, %v6959_v21, %v1613_v29  ;;  %2161 = vmatpush.msra.mxu1 %v6852_v17  ;;  %2201 = vmatpush.msra.mxu3 %v6858_v14  ;;  %v9407_v21 = vld [vmem:[#allocation16_spill] sm:$0xff]  ;;  %v9417_v38 = vld [vmem:[#allocation30_spill] sm:$0xff]  ;;  %v9418_v29 = vld [vmem:[#allocation33_spill] sm:$0xff] }
 0x5a3   :  { %v1622_v15 = vsel %vm1619_vm0, %v1621_v22, %v1617_v42  ;;  %2180 = vmatpush.msra.mxu2 %v6872_v52  ;;  %2142 = vmatpush.msrb.mxu0 %v6864_v27  ;;  %v9421_v42 = vld [vmem:[#allocation11_spill] sm:$0xff]  ;;  %v9422_v22 = vld [vmem:[#allocation12_spill] sm:$0xff] }
 0x5a4   :  { %2162 = vmatpush.msra.mxu1 %v9406_v10  ;;  %2202 = vmatpush.msra.mxu3 %v9407_v21 }
 0x5a5   :  { %2181 = vmatpush.msra.mxu2 %v6884_v45  ;;  %2143 = vmatpush.msrb.mxu0 %v9409_v2 }
 0x5a6   :  { %2163 = vmatpush.msra.mxu1 %v9410_v49  ;;  %2203 = vmatpush.msra.mxu3 %v9411_v32 }
 0x5a7   :  { %2182 = vmatpush.msra.mxu2 %v9408_v6  ;;  %2144 = vmatpush.msrb.mxu0 %v9412_v7 }
 0x5a8   :  { %v5062_v31 = vpop.eup %5061  ;;  %2164 = vmatpush.msra.mxu1 %v9413_v47  ;;  %2204 = vmatpush.msra.mxu3 %v9414_v25 }
 0x5a9   :  { %v1628_v46 = vmul.f32 %v5062_v31, %v1622_v15  ;;  %2183 = vmatpush.msra.mxu2 %v6912_v20  ;;  %2145 = vmatpush.msrb.mxu0 %v6904_v61  ;;  %v9423_v31 = vld [vmem:[#allocation17_spill] sm:$0xff]  ;;  %v9424_v15 = vld [vmem:[#allocation19_spill] sm:$0xff] }
 0x5aa   :  { %2165 = vmatpush.msra.mxu1 %v9416_v56  ;;  %2205 = vmatpush.msra.mxu3 %v9417_v38 }
 0x5ab   :  { %1751 = vmatmul.f32.gmra.mxu0 %v1628_v46  ;;  %1792 = vmatmul.f32.gmra.mxu1 %v1628_v46 }
 0x5ac   :  { %1833 = vmatmul.f32.gmra.mxu2 %v1628_v46  ;;  %1874 = vmatmul.f32.gmra.mxu3 %v1628_v46  ;;  %v9425_v46 = vld [vmem:[#allocation45_spill] sm:$0xff] }
 0x5ad   :  { %2184 = vmatpush.msra.mxu2 %v6924_v0  ;;  %2146 = vmatpush.msrb.mxu0 %v9418_v29 }
 0x5ae   :  { %2166 = vmatpush.msra.mxu1 %v9419_v34  ;;  %2206 = vmatpush.msra.mxu3 %v9420_v37 }
 0x5af   :  { %2185 = vmatpush.msra.mxu2 %v6936_v13 }
 0x5b1   :  { %2186 = vmatpush.msra.mxu2 %v6943_v11 }
 0x5b3   :  { %1995 = vmatmul.f32.vlgmr.msra.gmra.mxu0 %v9415_v51  ;;  %2015 = vmatmul.f32.vlgmr.msrb.gmra.mxu1 %v9415_v51 }
 0x5b4   :  { %2035 = vmatmul.f32.vlgmr.msrb.gmra.mxu2 %v9415_v51  ;;  %2055 = vmatmul.f32.vlgmr.msrb.gmra.mxu3 %v9415_v51  ;;  %v9426_v51 = vld [vmem:[#allocation48_spill] sm:$0xff] }
 0x5b5   :  { %2283 = vmatpush.msra.mxu0 %v9421_v42  ;;  %2303 = vmatpush.msrb.mxu1 %v6726_v36 }
 0x5b6   :  { %2323 = vmatpush.msrb.mxu2 %v6760_v24  ;;  %2343 = vmatpush.msrb.mxu3 %v6734_v18 }
 0x5b7   :  { %2284 = vmatpush.msra.mxu0 %v6728_v30  ;;  %2304 = vmatpush.msrb.mxu1 %v9422_v22 }
 0x5b8   :  { %2324 = vmatpush.msrb.mxu2 %v6763_v9  ;;  %2344 = vmatpush.msrb.mxu3 %v9423_v31 }
 0x5b9   :  { %2285 = vmatpush.msra.mxu0 %v6737_v26  ;;  %2305 = vmatpush.msrb.mxu1 %v9424_v15 }
 0x5ba   :  { %2325 = vmatpush.msrb.mxu2 %v6768_v39  ;;  %2345 = vmatpush.msrb.mxu3 %v9425_v46 }
 0x5bb   :  { %2286 = vmatpush.msra.mxu0 %v9426_v51  ;;  %2306 = vmatpush.msrb.mxu1 %v6772_v28 }
 0x5bc   :  { %2326 = vmatpush.msrb.mxu2 %v6784_v35  ;;  %2346 = vmatpush.msrb.mxu3 %v6782_v23 }
 0x5bd   :  { %2287 = vmatpush.msra.mxu0 %v6775_v48  ;;  %2307 = vmatpush.msrb.mxu1 %v6780_v33 }
 0x5be   :  { %2327 = vmatpush.msrb.mxu2 %v6792_v12  ;;  %2347 = vmatpush.msrb.mxu3 %v6790_v53 }
 0x5bf   :  { %2288 = vmatpush.msra.mxu0 %v6800_v50  ;;  %2308 = vmatpush.msrb.mxu1 %v6802_v54 }
 0x5c0   :  { %2328 = vmatpush.msrb.mxu2 %v6808_v5  ;;  %2348 = vmatpush.msrb.mxu3 %v6804_v55 }
 0x5c1   :  { %2289 = vmatpush.msra.mxu0 %v6810_v40  ;;  %2309 = vmatpush.msrb.mxu1 %v6812_v62 }
 0x5c2   :  { %2329 = vmatpush.msrb.mxu2 %v6820_v4  ;;  %2349 = vmatpush.msrb.mxu3 %v6815_v43 }
 0x5c3   :  { %2290 = vmatpush.msra.mxu0 %v6822_v59  ;;  %2310 = vmatpush.msrb.mxu1 %v6824_v60 }
 0x5c4   :  { %2330 = vmatpush.msrb.mxu2 %v6854_v19  ;;  %2350 = vmatpush.msrb.mxu3 %v6834_v57 }
 0x5c5   :  { %2291 = vmatpush.msra.mxu0 %v6830_v44  ;;  %2311 = vmatpush.msrb.mxu1 %v6832_v63 }
 0x5c6   :  { %2331 = vmatpush.msrb.mxu2 %v6860_v1  ;;  %2351 = vmatpush.msrb.mxu3 %v6841_v41 }
 0x5c7   :  { %2292 = vmatpush.msra.mxu0 %v6837_v3  ;;  %2312 = vmatpush.msrb.mxu1 %v6839_v8 }
 0x5c8   :  { %2332 = vmatpush.msrb.mxu2 %v6872_v52  ;;  %2352 = vmatpush.msrb.mxu3 %v6847_v58 }
 0x5c9   :  { %2293 = vmatpush.msra.mxu0 %v6850_v16  ;;  %2313 = vmatpush.msrb.mxu1 %v6852_v17 }
 0x5ca   :  { %2333 = vmatpush.msrb.mxu2 %v6884_v45  ;;  %2353 = vmatpush.msrb.mxu3 %v6858_v14 }
 0x5cb   :  { %2294 = vmatpush.msra.mxu0 %v6864_v27  ;;  %2314 = vmatpush.msrb.mxu1 %v9406_v10 }
 0x5cc   :  { %2334 = vmatpush.msrb.mxu2 %v9408_v6  ;;  %2354 = vmatpush.msrb.mxu3 %v9407_v21 }
 0x5cd   :  { %2295 = vmatpush.msra.mxu0 %v9409_v2  ;;  %2315 = vmatpush.msrb.mxu1 %v9410_v49 }
 0x5ce   :  { %2335 = vmatpush.msrb.mxu2 %v6912_v20  ;;  %2355 = vmatpush.msrb.mxu3 %v9411_v32 }
 0x5cf   :  { %2296 = vmatpush.msra.mxu0 %v9412_v7  ;;  %2316 = vmatpush.msrb.mxu1 %v9413_v47  ;;  %v1731_v47 = vpop.f32.mrf.mxu0  ;;  %v1854_v7 = vpop.f32.mrf.mxu3 }
 0x5d0   :  { %2336 = vmatpush.msrb.mxu2 %v6924_v0  ;;  %2356 = vmatpush.msrb.mxu3 %v9414_v25  ;;  %v1772_v0 = vpop.f32.mrf.mxu1 }
 0x5d1   :  { %2297 = vmatpush.msra.mxu0 %v6904_v61  ;;  %2317 = vmatpush.msrb.mxu1 %v9416_v56  ;;  %v1813_v56 = vpop.f32.mrf.mxu2 }
 0x5d2   :  { %2337 = vmatpush.msrb.mxu2 %v6936_v13  ;;  %2357 = vmatpush.msrb.mxu3 %v9417_v38 }
 0x5d3   :  { %2298 = vmatpush.msra.mxu0 %v9418_v29  ;;  %2318 = vmatpush.msrb.mxu1 %v9419_v34 }
 0x5d4   :  { %2338 = vmatpush.msrb.mxu2 %v6943_v11  ;;  %2358 = vmatpush.msrb.mxu3 %v9420_v37 }
 0x5d7   :  { %v7099_v25 = vpop.f32.mrf.mxu0  ;;  %v7103_v32 = vpop.f32.mrf.mxu3 }
 0x5d8   :  { %9427 = vst [vmem:[#allocation40_spill] sm:$0xff] %v7099_v25  ;;  %v7101_v61 = vpop.f32.mrf.mxu1 }
 0x5d9   :  { %9428 = vst [vmem:[#allocation43_spill] sm:$0xff] %v7101_v61  ;;  %v7109_v29 = vpop.f32.mrf.mxu2 }
 0x5da   :  { %9429 = vst [vmem:[#allocation42_spill] sm:$0xff] %v7103_v32 }
 0x5db   :  { %9432 = vst [vmem:[#allocation47_spill] sm:$0xff] %v7109_v29 }
 0x5df   :  { %v7105_v13 = vpop.f32.mrf.mxu0  ;;  %v7111_v34 = vpop.f32.mrf.mxu3 }
 0x5e0   :  { %9430 = vst [vmem:[#allocation41_spill] sm:$0xff] %v7105_v13  ;;  %v7107_v38 = vpop.f32.mrf.mxu1 }
 0x5e1   :  { %9431 = vst [vmem:[#allocation44_spill] sm:$0xff] %v7107_v38  ;;  %v7117_v20 = vpop.f32.mrf.mxu2 }
 0x5e2   :  { %9433 = vst [vmem:[#allocation56_spill] sm:$0xff] %v7111_v34 }
 0x5e3   :  { %9436 = vst [vmem:[#allocation55_spill] sm:$0xff] %v7117_v20 }
 0x5e7   :  { %v7113_v11 = vpop.f32.mrf.mxu0  ;;  %v7119_v25 = vpop.f32.mrf.mxu3 }
 0x5e8   :  { %9434 = vst [vmem:[#allocation36_spill] sm:$0xff] %v7113_v11  ;;  %v7115_v37 = vpop.f32.mrf.mxu1 }
 0x5e9   :  { %9435 = vst [vmem:[#allocation63_spill] sm:$0xff] %v7115_v37  ;;  %v7125_v32 = vpop.f32.mrf.mxu2 }
 0x5ea   :  { %9437 = vst [vmem:[#allocation65_spill] sm:$0xff] %v7119_v25 }
 0x5eb   :  { %9440 = vst [vmem:[#allocation57_spill] sm:$0xff] %v7125_v32 }
 0x5ef   :  { %v7121_v61 = vpop.f32.mrf.mxu0  ;;  %v7127_v13 = vpop.f32.mrf.mxu3 }
 0x5f0   :  { %9438 = vst [vmem:[#allocation58_spill] sm:$0xff] %v7121_v61  ;;  %v7123_v49 = vpop.f32.mrf.mxu1 }
 0x5f1   :  { %9439 = vst [vmem:[#allocation67_spill] sm:$0xff] %v7123_v49  ;;  %v7133_v34 = vpop.f32.mrf.mxu2 }
 0x5f2   :  { %9441 = vst [vmem:[#allocation37_spill] sm:$0xff] %v7127_v13  ;;  %v4870_v13 = vld [vmem:[%s8743_s4 + $0x4] sm:$0xf] }
 0x5f3   :  { %9444 = vst [vmem:[#allocation62_spill] sm:$0xff] %v7133_v34  ;;  %v7154_v34 = vperm.slane %v4870_v13, 1  ;;  %v7162_v6 = vperm.slane %v4870_v13, 3 }
 0x5f5   :  { %9453 = vst [vmem:[#allocation11_spill] sm:$0xff] %v7154_v34  ;;  %v1855_v10 = vadd.f32 %v1854_v7, %v7162_v6 }
 0x5f6   :  { %9456 = vst [vmem:[#allocation19_spill] sm:$0xff] %v7162_v6 }
 0x5f7   :  { %v7129_v38 = vpop.f32.mrf.mxu0  ;;  %v7135_v11 = vpop.f32.mrf.mxu3 }
 0x5f8   :  { %9442 = vst [vmem:[#allocation59_spill] sm:$0xff] %v7129_v38  ;;  %v7131_v29 = vpop.f32.mrf.mxu1 }
 0x5f9   :  { %9443 = vst [vmem:[#allocation60_spill] sm:$0xff] %v7131_v29  ;;  %v7141_v25 = vpop.f32.mrf.mxu2  ;;  %v7152_v29 = vperm.slane %v4870_v13, 0 }
 0x5fa   :  { %9445 = vst [vmem:[#allocation68_spill] sm:$0xff] %v7135_v11 }
 0x5fb   :  { %9448 = vst [vmem:[#allocation46_spill] sm:$0xff] %v7141_v25 }
 0x5fc   :  { %9452 = vst [vmem:[#allocation66_spill] sm:$0xff] %v7152_v29 }
 0x5ff   :  { %v7137_v37 = vpop.f32.mrf.mxu0  ;;  %v7143_v61 = vpop.f32.mrf.mxu3 }
 0x600   :  { %9446 = vst [vmem:[#allocation13_spill] sm:$0xff] %v7137_v37  ;;  %v7139_v20 = vpop.f32.mrf.mxu1  ;;  %v1732_v37 = vadd.f32 %v1731_v47, %v7152_v29 }
 0x601   :  { %9447 = vst [vmem:[#allocation14_spill] sm:$0xff] %v7139_v20  ;;  %v1773_v20 = vadd.f32 %v1772_v0, %v7154_v34  ;;  %v7158_v11 = vpop.f32.mrf.mxu2 }
 0x602   :  { %9449 = vst [vmem:[#allocation38_spill] sm:$0xff] %v7143_v61 }
 0x603   :  { %9454 = vst [vmem:[#allocation12_spill] sm:$0xff] %v7158_v11 }
 0x628   :  { %v7148_v49 = vpop.f32.mrf.mxu0  ;;  %v7150_v38 = vpop.f32.mrf.mxu1 }
 0x629   :  { %9450 = vst [vmem:[#allocation61_spill] sm:$0xff] %v7148_v49 }
 0x62a   :  { %9451 = vst [vmem:[#allocation64_spill] sm:$0xff] %v7150_v38 }
 0x62f   :  { %v7160_v25 = vpop.f32.mrf.mxu3  ;;  %v7165_v27 = vpop.f32.mrf.mxu2 }
 0x630   :  { %9455 = vst [vmem:[#allocation17_spill] sm:$0xff] %v7160_v25  ;;  %v1996_v61 = vpop.f32.mrf.mxu0  ;;  %v2016_v32 = vpop.f32.mrf.mxu1 }
 0x631   :  { %v2059_v2 = vadd.f32 %v1996_v61, %v1732_v37  ;;  %v2060_v21 = vadd.f32 %v2016_v32, %v1773_v20  ;;  %9457 = vst [vmem:[#allocation45_spill] sm:$0xff] %v7165_v27  ;;  %v7167_v61 = vperm.slane %v4870_v13, 2 }
 0x633   :  { %v4871_v49 = vmul.f32 -1.442695, %v2059_v2  ;;  %v4872_v38 = vmul.f32 -1.442695, %v2060_v21  ;;  %9458 = vst [vmem:[#allocation48_spill] sm:$0xff] %v7167_v61  ;;  %v1814_v2 = vadd.f32 %v1813_v56, %v7167_v61 }
 0x635   :  { %5063 = vpow2.f32 %v4871_v49 }
 0x636   :  { %5065 = vpow2.f32 %v4872_v38 }
 0x637   :  { %v2056_v47 = vpop.f32.mrf.mxu3  ;;  %v2036_v20 = vpop.f32.mrf.mxu2 }
 0x638   :  { %v2062_v0 = vadd.f32 %v2056_v47, %v1855_v10  ;;  %v2061_v7 = vadd.f32 %v2036_v20, %v1814_v2 }
 0x63a   :  { %v4873_v34 = vmul.f32 -1.442695, %v2062_v0 }
 0x63b   :  { %v5064_v11 = vpop.eup %5063 }
 0x63c   :  { %v5066_v29 = vpop.eup %5065  ;;  %v2066_v25 = vadd.f32 1.0, %v5064_v11  ;;  %5067 = vpow2.f32 %v4873_v34 }
 0x63d   :  { %v2085_v14 = vadd.f32 1.0, %v5066_v29 }
 0x63e   :  { %5069 = vrcp.f32 %v2066_v25  ;;  %v2078_v11 = vand.u32 2147483648, %v2066_v25  ;;  %v2076_v34 = vand.u32 2147483647, %v2066_v25  ;;  %vm2072_vm3 = vweird.f32 %v2066_v25 }
 0x63f   :  { %5071 = vrcp.f32 %v2085_v14  ;;  %v2097_v29 = vand.u32 2147483648, %v2085_v14  ;;  %v2095_v6 = vand.u32 2147483647, %v2085_v14  ;;  %vm2091_vm4 = vweird.f32 %v2085_v14 }
 0x640   :  { %v2079_v20 = vor.u32 1.1754944e-38, %v2078_v11  ;;  %vm2077_vm6 = vcmp.eq.f32.partialorder %v2076_v34, 8.507059e+37 }
 0x641   :  { %v2098_v61 = vor.u32 1.1754944e-38, %v2097_v29  ;;  %vm2096_vm8 = vcmp.eq.f32.partialorder %v2095_v6, 8.507059e+37 }
 0x642   :  { %v5068_v21 = vpop.eup %5067 }
 0x643   :  { %v2105_v49 = vadd.f32 1.0, %v5068_v21 }
 0x644   :  { %v5070_v32 = vpop.eup %5069 }
 0x645   :  { %v5072_v38 = vpop.eup %5071  ;;  %v2068_v37 = vmul.f32 %v5070_v32, %v2066_v25  ;;  %5073 = vrcp.f32 %v2105_v49  ;;  %vm2073_vm1 = vweird.f32 %v5070_v32  ;;  %vm2111_vm10 = vweird.f32 %v2105_v49 }
 0x646   :  { %v2087_v10 = vmul.f32 %v5072_v38, %v2085_v14  ;;  %5075 = vtanh.f32 %v2061_v7  ;;  %vm2092_vm2 = vweird.f32 %v5072_v38  ;;  %vm2074_vm5 = vmor %vm2072_vm3, %vm2073_vm1  ;;  %v2115_v25 = vand.u32 2147483647, %v2105_v49 }
 0x647   :  { %v2069_v47 = vsub.f32 1.0, %v2068_v37  ;;  %vm2093_vm7 = vmor %vm2091_vm4, %vm2092_vm2 }
 0x648   :  { %v2088_v0 = vsub.f32 1.0, %v2087_v10  ;;  %vm2116_vm12 = vcmp.eq.f32.partialorder %v2115_v25, 8.507059e+37 }
 0x649   :  { %v2070_v13 = vmul.f32 %v5070_v32, %v2069_v47 }
 0x64a   :  { %v2089_v27 = vmul.f32 %v5072_v38, %v2088_v0 }
 0x64b   :  { %v5074_v45 = vpop.eup %5073  ;;  %v2071_v56 = vadd.f32 %v5070_v32, %v2070_v13 }
 0x64c   :  { %v2090_v21 = vadd.f32 %v5072_v38, %v2089_v27  ;;  %v2107_v2 = vmul.f32 %v5074_v45, %v2105_v49  ;;  %v5076_v7 = vpop.eup %5075  ;;  %vm2112_vm9 = vweird.f32 %v5074_v45  ;;  %v2117_v27 = vand.u32 2147483648, %v2105_v49 }
 0x64d   :  { %v2075_v37 = vsel %vm2074_vm5, %v5070_v32, %v2071_v56  ;;  %vm2113_vm11 = vmor %vm2111_vm10, %vm2112_vm9 }
 0x64e   :  { %v2080_v10 = vsel %vm2077_vm6, %v2079_v20, %v2075_v37  ;;  %v2094_v47 = vsel %vm2093_vm7, %v5072_v38, %v2090_v21  ;;  %v2108_v17 = vsub.f32 1.0, %v2107_v2  ;;  %v2118_v11 = vor.u32 1.1754944e-38, %v2117_v27  ;;  %v9492_v37 = vld [vmem:[#allocation48_spill] sm:$0xff] }
 0x64f   :  { %v2099_v0 = vsel %vm2096_vm8, %v2098_v61, %v2094_v47  ;;  %v2122_v16 = vmul.f32 %v5076_v7, %v2080_v10  ;;  %v9493_v7 = vld [vmem:[#allocation47_spill] sm:$0xff] }
 0x650   :  { %v2121_v58 = vmul.f32 0.0, %v2099_v0  ;;  %v2109_v52 = vmul.f32 %v5074_v45, %v2108_v17  ;;  %v1817_v10 = vadd.f32 %v9493_v7, %v9492_v37  ;;  %v7315_v7 = vld [vmem:[#allocation6 + $0x370] sm:$0xff] }
 0x652   :  { %v7170_v13 = vadd.f32 %v2122_v16, %v2121_v58  ;;  %v2110_v14 = vadd.f32 %v5074_v45, %v2109_v52  ;;  %v9489_v58 = vld [vmem:[#allocation43_spill] sm:$0xff] }
 0x654   :  { %5077 = vtanh.f32 %v7170_v13  ;;  %v2114_v32 = vsel %vm2113_vm11, %v5074_v45, %v2110_v14 }
 0x655   :  { %v2119_v6 = vsel %vm2116_vm12, %v2118_v11, %v2114_v32 }
 0x65a   :  { %v5078_v38 = vpop.eup %5077 }
 0x65b   :  { %v7173_v29 = vmul.f32 %v5078_v38, %v2119_v6 }
 0x65d   :  { %9459 = vst [vmem:[#allocation69_spill] sm:$0xff] %v7173_v29  ;;  %2147 = vmatmul.f32.vlgmr.msrb.gmra.mxu0 %v7173_v29  ;;  %2167 = vmatmul.f32.vlgmr.msra.gmra.mxu1 %v7173_v29 }
 0x65e   :  { %2187 = vmatmul.f32.vlgmr.msra.gmra.mxu2 %v7173_v29  ;;  %2207 = vmatmul.f32.vlgmr.msra.gmra.mxu3 %v7173_v29  ;;  %v7432_v29 = vld [vmem:[#allocation6 + $0x228] sm:$0xff] }
 0x65f   :  { %2435 = vmatpush.msrb.mxu0 %v9421_v42  ;;  %2455 = vmatpush.msra.mxu1 %v6726_v36  ;;  %v9460_v36 = vld [vmem:[#allocation23_spill] sm:$0xff] }
 0x660   :  { %2475 = vmatpush.msra.mxu2 %v6760_v24  ;;  %2495 = vmatpush.msra.mxu3 %v6734_v18  ;;  %v9462_v18 = vld [vmem:[#allocation50_spill] sm:$0xff]  ;;  %v9464_v24 = vld [vmem:[#allocation20_spill] sm:$0xff]  ;;  %v9490_v42 = vld [vmem:[#allocation19_spill] sm:$0xff] }
 0x661   :  { %2436 = vmatpush.msrb.mxu0 %v6728_v30  ;;  %2456 = vmatpush.msra.mxu1 %v9422_v22  ;;  %v9461_v30 = vld [vmem:[#allocation51_spill] sm:$0xff]  ;;  %v9491_v22 = vld [vmem:[#allocation42_spill] sm:$0xff] }
 0x662   :  { %2476 = vmatpush.msra.mxu2 %v6763_v9  ;;  %2496 = vmatpush.msra.mxu3 %v9423_v31  ;;  %v9465_v9 = vld [vmem:[#allocation52_spill] sm:$0xff]  ;;  %v1858_v31 = vadd.f32 %v9491_v22, %v9490_v42  ;;  %v7282_v22 = vld [vmem:[#allocation6 + $0x3d8] sm:$0xff] }
 0x663   :  { %2437 = vmatpush.msrb.mxu0 %v6737_v26  ;;  %2457 = vmatpush.msra.mxu1 %v9424_v15  ;;  %v9463_v26 = vld [vmem:[#allocation49_spill] sm:$0xff] }
 0x664   :  { %2477 = vmatpush.msra.mxu2 %v6768_v39  ;;  %2497 = vmatpush.msra.mxu3 %v9425_v46  ;;  %v9466_v39 = vld [vmem:[#allocation54_spill] sm:$0xff] }
 0x665   :  { %2438 = vmatpush.msrb.mxu0 %v9426_v51  ;;  %2458 = vmatpush.msra.mxu1 %v6772_v28  ;;  %v9467_v28 = vld [vmem:[#allocation53_spill] sm:$0xff] }
 0x666   :  { %2478 = vmatpush.msra.mxu2 %v6784_v35  ;;  %2498 = vmatpush.msra.mxu3 %v6782_v23  ;;  %v9470_v23 = vld [vmem:[#allocation21_spill] sm:$0xff]  ;;  %v9471_v35 = vld [vmem:[#allocation15_spill] sm:$0xff] }
 0x667   :  { %2439 = vmatpush.msrb.mxu0 %v6775_v48  ;;  %2459 = vmatpush.msra.mxu1 %v6780_v33  ;;  %v9468_v48 = vld [vmem:[#allocation24_spill] sm:$0xff] }
 0x668   :  { %2479 = vmatpush.msra.mxu2 %v6792_v12  ;;  %2499 = vmatpush.msra.mxu3 %v6790_v53  ;;  %v9469_v33 = vld [vmem:[#allocation16_spill] sm:$0xff]  ;;  %v9472_v53 = vld [vmem:[#allocation27_spill] sm:$0xff] }
 0x669   :  { %2440 = vmatpush.msrb.mxu0 %v6800_v50  ;;  %2460 = vmatpush.msra.mxu1 %v6802_v54  ;;  %v9473_v12 = vld [vmem:[#allocation28_spill] sm:$0xff]  ;;  %v9474_v50 = vld [vmem:[#allocation25_spill] sm:$0xff]  ;;  %v9475_v54 = vld [vmem:[#allocation18_spill] sm:$0xff] }
 0x66a   :  { %2480 = vmatpush.msra.mxu2 %v6808_v5  ;;  %2500 = vmatpush.msra.mxu3 %v6804_v55  ;;  %v9476_v55 = vld [vmem:[#allocation26_spill] sm:$0xff] }
 0x66b   :  { %2441 = vmatpush.msrb.mxu0 %v6810_v40  ;;  %2461 = vmatpush.msra.mxu1 %v6812_v62  ;;  %v9477_v5 = vld [vmem:[#allocation22_spill] sm:$0xff]  ;;  %v9478_v40 = vld [vmem:[#allocation31_spill] sm:$0xff]  ;;  %v9479_v62 = vld [vmem:[#allocation29_spill] sm:$0xff] }
 0x66c   :  { %2481 = vmatpush.msra.mxu2 %v6820_v4  ;;  %2501 = vmatpush.msra.mxu3 %v6815_v43  ;;  %v9480_v43 = vld [vmem:[#allocation34_spill] sm:$0xff] }
 0x66d   :  { %2442 = vmatpush.msrb.mxu0 %v6822_v59  ;;  %2462 = vmatpush.msra.mxu1 %v6824_v60  ;;  %v9481_v4 = vld [vmem:[#allocation30_spill] sm:$0xff]  ;;  %v9482_v59 = vld [vmem:[#allocation33_spill] sm:$0xff]  ;;  %v9483_v60 = vld [vmem:[#allocation32_spill] sm:$0xff]  ;;  %9514 = vst [vmem:[#allocation34_spill] sm:$0xff] %v7432_v29 }
 0x66e   :  { %2482 = vmatpush.msra.mxu2 %v6854_v19  ;;  %2502 = vmatpush.msra.mxu3 %v6834_v57  ;;  %v9486_v57 = vld [vmem:[#allocation66_spill] sm:$0xff] }
 0x66f   :  { %2443 = vmatpush.msrb.mxu0 %v6830_v44  ;;  %2463 = vmatpush.msra.mxu1 %v6832_v63  ;;  %v9484_v44 = vld [vmem:[#allocation39_spill] sm:$0xff] }
 0x670   :  { %2483 = vmatpush.msra.mxu2 %v6860_v1  ;;  %2503 = vmatpush.msra.mxu3 %v6841_v41  ;;  %v9485_v63 = vld [vmem:[#allocation35_spill] sm:$0xff] }
 0x671   :  { %2444 = vmatpush.msrb.mxu0 %v6837_v3  ;;  %2464 = vmatpush.msra.mxu1 %v6839_v8  ;;  %v9487_v3 = vld [vmem:[#allocation40_spill] sm:$0xff]  ;;  %v9488_v41 = vld [vmem:[#allocation11_spill] sm:$0xff] }
 0x672   :  { %2484 = vmatpush.msra.mxu2 %v9460_v36  ;;  %2504 = vmatpush.msra.mxu3 %v9461_v30  ;;  %v1735_v8 = vadd.f32 %v9487_v3, %v9486_v57  ;;  %v1776_v16 = vadd.f32 %v9489_v58, %v9488_v41 }
 0x673   :  { %2445 = vmatpush.msrb.mxu0 %v9462_v18  ;;  %2465 = vmatpush.msra.mxu1 %v9463_v26 }
 0x674   :  { %2485 = vmatpush.msra.mxu2 %v9464_v24  ;;  %2505 = vmatpush.msra.mxu3 %v9465_v9 }
 0x675   :  { %2446 = vmatpush.msrb.mxu0 %v9466_v39  ;;  %2466 = vmatpush.msra.mxu1 %v9467_v28 }
 0x676   :  { %2486 = vmatpush.msra.mxu2 %v9468_v48  ;;  %2506 = vmatpush.msra.mxu3 %v9469_v33 }
 0x677   :  { %2447 = vmatpush.msrb.mxu0 %v9470_v23  ;;  %2467 = vmatpush.msra.mxu1 %v9471_v35 }
 0x678   :  { %2487 = vmatpush.msra.mxu2 %v9472_v53  ;;  %2507 = vmatpush.msra.mxu3 %v9473_v12 }
 0x679   :  { %2448 = vmatpush.msrb.mxu0 %v9474_v50  ;;  %2468 = vmatpush.msra.mxu1 %v9475_v54 }
 0x67a   :  { %2488 = vmatpush.msra.mxu2 %v9476_v55  ;;  %2508 = vmatpush.msra.mxu3 %v9477_v5 }
 0x67b   :  { %2449 = vmatpush.msrb.mxu0 %v9478_v40  ;;  %2469 = vmatpush.msra.mxu1 %v9479_v62 }
 0x67c   :  { %2489 = vmatpush.msra.mxu2 %v9480_v43  ;;  %2509 = vmatpush.msra.mxu3 %v9481_v4 }
 0x67d   :  { %2450 = vmatpush.msrb.mxu0 %v9482_v59  ;;  %2470 = vmatpush.msra.mxu1 %v9483_v60 }
 0x67e   :  { %2490 = vmatpush.msra.mxu2 %v9484_v44  ;;  %2510 = vmatpush.msra.mxu3 %v9485_v63 }
 0x6da   :  { %v2148_v17 = vpop.f32.mrf.mxu0  ;;  %v2168_v19 = vpop.f32.mrf.mxu1 }
 0x6db   :  { %v2211_v1 = vadd.f32 %v2148_v17, %v1735_v8  ;;  %v2212_v52 = vadd.f32 %v2168_v19, %v1776_v16  ;;  %v7264_v17 = vld [vmem:[#allocation6 + $0x3e8] sm:$0xff]  ;;  %v7267_v19 = vld [vmem:[#allocation6 + $0x3f0] sm:$0xff] }
 0x6dd   :  { %v4874_v45 = vmul.f32 -1.442695, %v2211_v1  ;;  %v4875_v51 = vmul.f32 -1.442695, %v2212_v52  ;;  %v7270_v1 = vld [vmem:[#allocation6 + $0x3f8] sm:$0xff]  ;;  %v7273_v52 = vld [vmem:[#allocation6 + $0x3c0] sm:$0xff] }
 0x6df   :  { %5079 = vpow2.f32 %v4874_v45  ;;  %v7276_v45 = vld [vmem:[#allocation6 + $0x3c8] sm:$0xff] }
 0x6e0   :  { %5081 = vpow2.f32 %v4875_v51  ;;  %v7279_v51 = vld [vmem:[#allocation6 + $0x3d0] sm:$0xff] }
 0x6e1   :  { %v2208_v15 = vpop.f32.mrf.mxu3  ;;  %v2188_v21 = vpop.f32.mrf.mxu2 }
 0x6e2   :  { %v2214_v46 = vadd.f32 %v2208_v15, %v1858_v31  ;;  %v2213_v14 = vadd.f32 %v2188_v21, %v1817_v10  ;;  %v7285_v31 = vld [vmem:[#allocation6 + $0x3a0] sm:$0xff]  ;;  %v7288_v15 = vld [vmem:[#allocation6 + $0x3a8] sm:$0xff]  ;;  %v7318_v10 = vld [vmem:[#allocation6 + $0x378] sm:$0xff] }
 0x6e3   :  { %v7309_v21 = vld [vmem:[#allocation6 + $0x360] sm:$0xff] }
 0x6e4   :  { %v4876_v61 = vmul.f32 -1.442695, %v2214_v46  ;;  %v7291_v46 = vld [vmem:[#allocation6 + $0x3b0] sm:$0xff] }
 0x6e5   :  { %v5080_v49 = vpop.eup %5079 }
 0x6e6   :  { %v5082_v34 = vpop.eup %5081  ;;  %v2218_v56 = vadd.f32 1.0, %v5080_v49  ;;  %5083 = vpow2.f32 %v4876_v61  ;;  %v7294_v61 = vld [vmem:[#allocation6 + $0x3b8] sm:$0xff]  ;;  %v7297_v49 = vld [vmem:[#allocation6 + $0x380] sm:$0xff] }
 0x6e7   :  { %v2237_v20 = vadd.f32 1.0, %v5082_v34  ;;  %v7300_v34 = vld [vmem:[#allocation6 + $0x388] sm:$0xff] }
 0x6e8   :  { %5085 = vrcp.f32 %v2218_v56  ;;  %v2230_v6 = vand.u32 2147483648, %v2218_v56  ;;  %v2228_v18 = vand.u32 2147483647, %v2218_v56  ;;  %vm2224_vm15 = vweird.f32 %v2218_v56 }
 0x6e9   :  { %5087 = vrcp.f32 %v2237_v20  ;;  %v2249_v36 = vand.u32 2147483648, %v2237_v20  ;;  %v2247_v24 = vand.u32 2147483647, %v2237_v20  ;;  %vm2243_vm0 = vweird.f32 %v2237_v20 }
 0x6ea   :  { %v2231_v28 = vor.u32 1.1754944e-38, %v2230_v6  ;;  %vm2229_vm3 = vcmp.eq.f32.partialorder %v2228_v18, 8.507059e+37  ;;  %v7345_v6 = vld [vmem:[#allocation6 + $0x300] sm:$0xff]  ;;  %v7354_v18 = vld [vmem:[#allocation6 + $0x318] sm:$0xff] }
 0x6eb   :  { %v2250_v23 = vor.u32 1.1754944e-38, %v2249_v36  ;;  %vm2248_vm4 = vcmp.eq.f32.partialorder %v2247_v24, 8.507059e+37  ;;  %v7348_v36 = vld [vmem:[#allocation6 + $0x308] sm:$0xff] }
 0x6ec   :  { %v5084_v2 = vpop.eup %5083  ;;  %v7360_v24 = vld [vmem:[#allocation6 + $0x2e8] sm:$0xff] }
 0x6ed   :  { %v2257_v47 = vadd.f32 1.0, %v5084_v2  ;;  %v7312_v2 = vld [vmem:[#allocation6 + $0x368] sm:$0xff] }
 0x6ee   :  { %v5086_v0 = vpop.eup %5085 }
 0x6ef   :  { %v5088_v27 = vpop.eup %5087  ;;  %v2220_v25 = vmul.f32 %v5086_v0, %v2218_v56  ;;  %5089 = vrcp.f32 %v2257_v47  ;;  %vm2225_vm13 = vweird.f32 %v5086_v0  ;;  %v2269_v59 = vand.u32 2147483648, %v2257_v47  ;;  %v7303_v56 = vld [vmem:[#allocation6 + $0x390] sm:$0xff] }
 0x6f0   :  { %v2239_v32 = vmul.f32 %v5088_v27, %v2237_v20  ;;  %5091 = vtanh.f32 %v2213_v14  ;;  %vm2244_vm14 = vweird.f32 %v5088_v27  ;;  %vm2226_vm1 = vmor %vm2224_vm15, %vm2225_vm13  ;;  %vm2263_vm6 = vweird.f32 %v2257_v47  ;;  %v7306_v20 = vld [vmem:[#allocation6 + $0x398] sm:$0xff]  ;;  %v7327_v14 = vld [vmem:[#allocation6 + $0x350] sm:$0xff] }
 0x6f1   :  { %v2221_v11 = vsub.f32 1.0, %v2220_v25  ;;  %vm2245_vm2 = vmor %vm2243_vm0, %vm2244_vm14  ;;  %v2267_v60 = vand.u32 2147483647, %v2257_v47  ;;  %v2270_v3 = vor.u32 1.1754944e-38, %v2269_v59  ;;  %v7333_v25 = vld [vmem:[#allocation6 + $0x320] sm:$0xff]  ;;  %v7411_v59 = vld [vmem:[#allocation6 + $0x270] sm:$0xff] }
 0x6f2   :  { %v2240_v38 = vsub.f32 1.0, %v2239_v32  ;;  %v7336_v32 = vld [vmem:[#allocation6 + $0x328] sm:$0xff]  ;;  %9507 = vst [vmem:[#allocation28_spill] sm:$0xff] %v7411_v59 }
 0x6f3   :  { %v2222_v30 = vmul.f32 %v5086_v0, %v2221_v11  ;;  %vm2268_vm8 = vcmp.eq.f32.partialorder %v2267_v60, 8.507059e+37  ;;  %v7339_v11 = vld [vmem:[#allocation6 + $0x330] sm:$0xff]  ;;  %v7414_v60 = vld [vmem:[#allocation6 + $0x278] sm:$0xff] }
 0x6f4   :  { %v2241_v26 = vmul.f32 %v5088_v27, %v2240_v38  ;;  %v7342_v38 = vld [vmem:[#allocation6 + $0x338] sm:$0xff]  ;;  %9508 = vst [vmem:[#allocation25_spill] sm:$0xff] %v7414_v60 }
 0x6f5   :  { %v5090_v9 = vpop.eup %5089  ;;  %v2223_v39 = vadd.f32 %v5086_v0, %v2222_v30  ;;  %v7351_v30 = vld [vmem:[#allocation6 + $0x310] sm:$0xff] }
 0x6f6   :  { %v2242_v48 = vadd.f32 %v5088_v27, %v2241_v26  ;;  %v2259_v33 = vmul.f32 %v5090_v9, %v2257_v47  ;;  %v5092_v53 = vpop.eup %5091  ;;  %vm2264_vm5 = vweird.f32 %v5090_v9  ;;  %v7321_v47 = vld [vmem:[#allocation6 + $0x340] sm:$0xff] }
 0x6f7   :  { %v2227_v35 = vsel %vm2226_vm1, %v5086_v0, %v2223_v39  ;;  %vm2265_vm7 = vmor %vm2263_vm6, %vm2264_vm5  ;;  %v7324_v0 = vld [vmem:[#allocation6 + $0x348] sm:$0xff]  ;;  %v7357_v26 = vld [vmem:[#allocation6 + $0x2e0] sm:$0xff] }
 0x6f8   :  { %v2232_v12 = vsel %vm2229_vm3, %v2231_v28, %v2227_v35  ;;  %v2246_v50 = vsel %vm2245_vm2, %v5088_v27, %v2242_v48  ;;  %v2260_v54 = vsub.f32 1.0, %v2259_v33  ;;  %v7330_v27 = vld [vmem:[#allocation6 + $0x358] sm:$0xff]  ;;  %v7369_v28 = vld [vmem:[#allocation6 + $0x2c0] sm:$0xff]  ;;  %v7372_v48 = vld [vmem:[#allocation6 + $0x2c8] sm:$0xff] }
 0x6f9   :  { %v2251_v55 = vsel %vm2248_vm4, %v2250_v23, %v2246_v50  ;;  %v2274_v5 = vmul.f32 %v5092_v53, %v2232_v12  ;;  %v7366_v39 = vld [vmem:[#allocation6 + $0x2f8] sm:$0xff]  ;;  %v7375_v33 = vld [vmem:[#allocation6 + $0x2d0] sm:$0xff]  ;;  %v7381_v35 = vld [vmem:[#allocation6 + $0x2a0] sm:$0xff] }
 0x6fa   :  { %v2273_v40 = vmul.f32 %v2251_v55, %v7170_v13  ;;  %v2261_v62 = vmul.f32 %v5090_v9, %v2260_v54  ;;  %v7261_v13 = vld [vmem:[#allocation6 + $0x3e0] sm:$0xff]  ;;  %9495 = vst [vmem:[#allocation51_spill] sm:$0xff] %v7375_v33  ;;  %v7378_v23 = vld [vmem:[#allocation6 + $0x2d8] sm:$0xff]  ;;  %v7384_v53 = vld [vmem:[#allocation6 + $0x2a8] sm:$0xff] }
 0x6fb   :  { %9496 = vst [vmem:[#allocation50_spill] sm:$0xff] %v7378_v23  ;;  %v7387_v12 = vld [vmem:[#allocation6 + $0x2b0] sm:$0xff]  ;;  %v7390_v50 = vld [vmem:[#allocation6 + $0x2b8] sm:$0xff]  ;;  %v7393_v54 = vld [vmem:[#allocation6 + $0x280] sm:$0xff] }
 0x6fc   :  { %v7252_v43 = vadd.f32 %v2274_v5, %v2273_v40  ;;  %v2262_v4 = vadd.f32 %v5090_v9, %v2261_v62  ;;  %9497 = vst [vmem:[#allocation49_spill] sm:$0xff] %v7381_v35  ;;  %v7396_v55 = vld [vmem:[#allocation6 + $0x288] sm:$0xff]  ;;  %v7399_v5 = vld [vmem:[#allocation6 + $0x290] sm:$0xff]  ;;  %v7402_v40 = vld [vmem:[#allocation6 + $0x298] sm:$0xff] }
 0x6fd   :  { %9498 = vst [vmem:[#allocation20_spill] sm:$0xff] %v7384_v53  ;;  %v7405_v62 = vld [vmem:[#allocation6 + $0x260] sm:$0xff] }
 0x6fe   :  { %5093 = vtanh.f32 %v7252_v43  ;;  %v2266_v63 = vsel %vm2265_vm7, %v5090_v9, %v2262_v4  ;;  %v7363_v9 = vld [vmem:[#allocation6 + $0x2f0] sm:$0xff]  ;;  %9499 = vst [vmem:[#allocation52_spill] sm:$0xff] %v7387_v12  ;;  %v7408_v4 = vld [vmem:[#allocation6 + $0x268] sm:$0xff] }
 0x6ff   :  { %v2271_v58 = vsel %vm2268_vm8, %v2270_v3, %v2266_v63  ;;  %9500 = vst [vmem:[#allocation54_spill] sm:$0xff] %v7390_v50  ;;  %v7417_v63 = vld [vmem:[#allocation6 + $0x240] sm:$0xff]  ;;  %v7420_v3 = vld [vmem:[#allocation6 + $0x248] sm:$0xff] }
 0x700   :  { %9501 = vst [vmem:[#allocation53_spill] sm:$0xff] %v7393_v54 }
 0x701   :  { %9502 = vst [vmem:[#allocation24_spill] sm:$0xff] %v7396_v55 }
 0x702   :  { %9503 = vst [vmem:[#allocation16_spill] sm:$0xff] %v7399_v5 }
 0x703   :  { %9504 = vst [vmem:[#allocation21_spill] sm:$0xff] %v7402_v40 }
 0x704   :  { %v5094_v8 = vpop.eup %5093  ;;  %9505 = vst [vmem:[#allocation15_spill] sm:$0xff] %v7405_v62 }
 0x705   :  { %v7255_v16 = vmul.f32 %v5094_v8, %v2271_v58  ;;  %9506 = vst [vmem:[#allocation27_spill] sm:$0xff] %v7408_v4  ;;  %v7423_v8 = vld [vmem:[#allocation6 + $0x250] sm:$0xff]  ;;  %v7426_v58 = vld [vmem:[#allocation6 + $0x258] sm:$0xff] }
 0x706   :  { %9509 = vst [vmem:[#allocation18_spill] sm:$0xff] %v7417_v63 }
 0x707   :  { %9494 = vst [vmem:[#allocation23_spill] sm:$0xff] %v7255_v16  ;;  %2299 = vmatmul.f32.vlgmr.msra.gmra.mxu0 %v7255_v16  ;;  %2319 = vmatmul.f32.vlgmr.msrb.gmra.mxu1 %v7255_v16 }
 0x708   :  { %2339 = vmatmul.f32.vlgmr.msrb.gmra.mxu2 %v7255_v16  ;;  %2359 = vmatmul.f32.vlgmr.msrb.gmra.mxu3 %v7255_v16  ;;  %9510 = vst [vmem:[#allocation26_spill] sm:$0xff] %v7420_v3  ;;  %v7429_v16 = vld [vmem:[#allocation6 + $0x220] sm:$0xff] }
 0x709   :  { %2587 = vmatpush.msra.mxu0 %v7261_v13  ;;  %2607 = vmatpush.msrb.mxu1 %v7264_v17  ;;  %9511 = vst [vmem:[#allocation22_spill] sm:$0xff] %v7423_v8 }
 0x70a   :  { %2627 = vmatpush.msrb.mxu2 %v7267_v19  ;;  %2647 = vmatpush.msrb.mxu3 %v7270_v1  ;;  %9512 = vst [vmem:[#allocation31_spill] sm:$0xff] %v7426_v58 }
 0x70b   :  { %2588 = vmatpush.msra.mxu0 %v7273_v52  ;;  %2608 = vmatpush.msrb.mxu1 %v7276_v45  ;;  %9513 = vst [vmem:[#allocation29_spill] sm:$0xff] %v7429_v16 }
 0x70c   :  { %2628 = vmatpush.msrb.mxu2 %v7279_v51  ;;  %2648 = vmatpush.msrb.mxu3 %v7282_v22 }
 0x70d   :  { %2589 = vmatpush.msra.mxu0 %v7285_v31  ;;  %2609 = vmatpush.msrb.mxu1 %v7288_v15 }
 0x70e   :  { %2629 = vmatpush.msrb.mxu2 %v7291_v46  ;;  %2649 = vmatpush.msrb.mxu3 %v7294_v61 }
 0x70f   :  { %2590 = vmatpush.msra.mxu0 %v7297_v49  ;;  %2610 = vmatpush.msrb.mxu1 %v7300_v34 }
 0x710   :  { %2630 = vmatpush.msrb.mxu2 %v7303_v56  ;;  %2650 = vmatpush.msrb.mxu3 %v7306_v20 }
 0x711   :  { %2591 = vmatpush.msra.mxu0 %v7309_v21  ;;  %2611 = vmatpush.msrb.mxu1 %v7312_v2 }
 0x712   :  { %2631 = vmatpush.msrb.mxu2 %v7315_v7  ;;  %2651 = vmatpush.msrb.mxu3 %v7318_v10 }
 0x713   :  { %2592 = vmatpush.msra.mxu0 %v7321_v47  ;;  %2612 = vmatpush.msrb.mxu1 %v7324_v0 }
 0x714   :  { %2632 = vmatpush.msrb.mxu2 %v7327_v14  ;;  %2652 = vmatpush.msrb.mxu3 %v7330_v27 }
 0x715   :  { %2593 = vmatpush.msra.mxu0 %v7333_v25  ;;  %2613 = vmatpush.msrb.mxu1 %v7336_v32 }
 0x716   :  { %2633 = vmatpush.msrb.mxu2 %v7339_v11  ;;  %2653 = vmatpush.msrb.mxu3 %v7342_v38 }
 0x717   :  { %2594 = vmatpush.msra.mxu0 %v7345_v6  ;;  %2614 = vmatpush.msrb.mxu1 %v7348_v36 }
 0x718   :  { %2634 = vmatpush.msrb.mxu2 %v7351_v30  ;;  %2654 = vmatpush.msrb.mxu3 %v7354_v18 }
 0x719   :  { %2595 = vmatpush.msra.mxu0 %v7357_v26  ;;  %2615 = vmatpush.msrb.mxu1 %v7360_v24 }
 0x71a   :  { %2635 = vmatpush.msrb.mxu2 %v7363_v9  ;;  %2655 = vmatpush.msrb.mxu3 %v7366_v39 }
 0x71b   :  { %2596 = vmatpush.msra.mxu0 %v7369_v28  ;;  %2616 = vmatpush.msrb.mxu1 %v7372_v48 }
 0x71c   :  { %2636 = vmatpush.msrb.mxu2 %v7375_v33  ;;  %2656 = vmatpush.msrb.mxu3 %v7378_v23 }
 0x71d   :  { %2597 = vmatpush.msra.mxu0 %v7381_v35  ;;  %2617 = vmatpush.msrb.mxu1 %v7384_v53 }
 0x71e   :  { %2637 = vmatpush.msrb.mxu2 %v7387_v12  ;;  %2657 = vmatpush.msrb.mxu3 %v7390_v50 }
 0x71f   :  { %2598 = vmatpush.msra.mxu0 %v7393_v54  ;;  %2618 = vmatpush.msrb.mxu1 %v7396_v55 }
 0x720   :  { %2638 = vmatpush.msrb.mxu2 %v7399_v5  ;;  %2658 = vmatpush.msrb.mxu3 %v7402_v40 }
 0x721   :  { %2599 = vmatpush.msra.mxu0 %v7405_v62  ;;  %2619 = vmatpush.msrb.mxu1 %v7408_v4 }
 0x722   :  { %2639 = vmatpush.msrb.mxu2 %v7411_v59  ;;  %2659 = vmatpush.msrb.mxu3 %v7414_v60  ;;  %v9521_v60 = vld [vmem:[#allocation44_spill] sm:$0xff] }
 0x723   :  { %2600 = vmatpush.msra.mxu0 %v7417_v63  ;;  %2620 = vmatpush.msrb.mxu1 %v7420_v3  ;;  %v7435_v63 = vld [vmem:[#allocation6 + $0x230] sm:$0xff]  ;;  %v7438_v3 = vld [vmem:[#allocation6 + $0x238] sm:$0xff] }
 0x724   :  { %2640 = vmatpush.msrb.mxu2 %v7423_v8  ;;  %2660 = vmatpush.msrb.mxu3 %v7426_v58  ;;  %9515 = vst [vmem:[#allocation30_spill] sm:$0xff] %v7435_v63  ;;  %v7441_v8 = vld [vmem:[#allocation6 + $0x200] sm:$0xff]  ;;  %v7444_v58 = vld [vmem:[#allocation6 + $0x208] sm:$0xff] }
 0x725   :  { %2601 = vmatpush.msra.mxu0 %v7429_v16  ;;  %2621 = vmatpush.msrb.mxu1 %v7432_v29  ;;  %9516 = vst [vmem:[#allocation33_spill] sm:$0xff] %v7438_v3  ;;  %v7448_v16 = vld [vmem:[#allocation6 + $0x218] sm:$0xff] }
 0x726   :  { %2641 = vmatpush.msrb.mxu2 %v7435_v63  ;;  %2661 = vmatpush.msrb.mxu3 %v7438_v3  ;;  %9517 = vst [vmem:[#allocation32_spill] sm:$0xff] %v7441_v8  ;;  %v9520_v63 = vld [vmem:[#allocation41_spill] sm:$0xff]  ;;  %v1779_v3 = vadd.f32 %v9521_v60, %v9488_v41 }
 0x727   :  { %2602 = vmatpush.msra.mxu0 %v7441_v8  ;;  %9518 = vst [vmem:[#allocation39_spill] sm:$0xff] %v7444_v58  ;;  %2622 = vmatpush.msrb.mxu1 %v7444_v58  ;;  %v1738_v29 = vadd.f32 %v9520_v63, %v9486_v57  ;;  %v9522_v58 = vld [vmem:[#allocation56_spill] sm:$0xff] }
 0x728   :  { %2642 = vmatpush.msrb.mxu2 %v9484_v44  ;;  %9519 = vst [vmem:[#allocation35_spill] sm:$0xff] %v7448_v16  ;;  %2662 = vmatpush.msrb.mxu3 %v7448_v16  ;;  %v1861_v44 = vadd.f32 %v9522_v58, %v9490_v42 }
 0x784   :  { %v2300_v59 = vpop.f32.mrf.mxu0  ;;  %v2320_v4 = vpop.f32.mrf.mxu1 }
 0x785   :  { %v2363_v62 = vadd.f32 %v2300_v59, %v1738_v29  ;;  %v2364_v8 = vadd.f32 %v2320_v4, %v1779_v3 }
 0x787   :  { %v4877_v40 = vmul.f32 -1.442695, %v2363_v62  ;;  %v4878_v5 = vmul.f32 -1.442695, %v2364_v8  ;;  %v9523_v62 = vld [vmem:[#allocation55_spill] sm:$0xff] }
 0x788   :  { %v1820_v4 = vadd.f32 %v9523_v62, %v9492_v37 }
 0x789   :  { %5095 = vpow2.f32 %v4877_v40 }
 0x78a   :  { %5097 = vpow2.f32 %v4878_v5 }
 0x78b   :  { %v2360_v55 = vpop.f32.mrf.mxu3  ;;  %v2340_v60 = vpop.f32.mrf.mxu2 }
 0x78c   :  { %v2366_v54 = vadd.f32 %v2360_v55, %v1861_v44  ;;  %v2365_v3 = vadd.f32 %v2340_v60, %v1820_v4 }
 0x78e   :  { %v4879_v16 = vmul.f32 -1.442695, %v2366_v54 }
 0x78f   :  { %v5096_v50 = vpop.eup %5095 }
 0x790   :  { %v5098_v12 = vpop.eup %5097  ;;  %v2370_v63 = vadd.f32 1.0, %v5096_v50  ;;  %5099 = vpow2.f32 %v4879_v16 }
 0x791   :  { %v2389_v57 = vadd.f32 1.0, %v5098_v12 }
 0x792   :  { %5101 = vrcp.f32 %v2370_v63  ;;  %v2382_v44 = vand.u32 2147483648, %v2370_v63  ;;  %v2380_v50 = vand.u32 2147483647, %v2370_v63  ;;  %vm2376_vm11 = vweird.f32 %v2370_v63 }
 0x793   :  { %5103 = vrcp.f32 %v2389_v57  ;;  %v2401_v16 = vand.u32 2147483648, %v2389_v57  ;;  %v2399_v41 = vand.u32 2147483647, %v2389_v57  ;;  %vm2395_vm12 = vweird.f32 %v2389_v57 }
 0x794   :  { %v2383_v60 = vor.u32 1.1754944e-38, %v2382_v44  ;;  %vm2381_vm15 = vcmp.eq.f32.partialorder %v2380_v50, 8.507059e+37 }
 0x795   :  { %vm2400_vm0 = vcmp.eq.f32.partialorder %v2399_v41, 8.507059e+37 }
 0x796   :  { %v5100_v29 = vpop.eup %5099 }
 0x797   :  { %v2409_v40 = vadd.f32 1.0, %v5100_v29 }
 0x798   :  { %v5102_v59 = vpop.eup %5101 }
 0x799   :  { %v5104_v8 = vpop.eup %5103  ;;  %v2372_v5 = vmul.f32 %v5102_v59, %v2370_v63  ;;  %5105 = vrcp.f32 %v2409_v40  ;;  %vm2377_vm9 = vweird.f32 %v5102_v59  ;;  %vm2415_vm2 = vweird.f32 %v2409_v40 }
 0x79a   :  { %v2391_v55 = vmul.f32 %v5104_v8, %v2389_v57  ;;  %5107 = vtanh.f32 %v2365_v3  ;;  %vm2396_vm10 = vweird.f32 %v5104_v8  ;;  %vm2378_vm13 = vmor %vm2376_vm11, %vm2377_vm9 }
 0x79b   :  { %v2373_v54 = vsub.f32 1.0, %v2372_v5  ;;  %vm2397_vm14 = vmor %vm2395_vm12, %vm2396_vm10  ;;  %v2402_v5 = vor.u32 1.1754944e-38, %v2401_v16 }
 0x79c   :  { %v2392_v58 = vsub.f32 1.0, %v2391_v55 }
 0x79d   :  { %v2374_v12 = vmul.f32 %v5102_v59, %v2373_v54 }
 0x79e   :  { %v2393_v42 = vmul.f32 %v5104_v8, %v2392_v58 }
 0x79f   :  { %v5106_v53 = vpop.eup %5105  ;;  %v2375_v62 = vadd.f32 %v5102_v59, %v2374_v12 }
 0x7a0   :  { %v2394_v29 = vadd.f32 %v5104_v8, %v2393_v42  ;;  %v2411_v4 = vmul.f32 %v5106_v53, %v2409_v40  ;;  %v5108_v3 = vpop.eup %5107  ;;  %vm2416_vm1 = vweird.f32 %v5106_v53  ;;  %v2421_v42 = vand.u32 2147483648, %v2409_v40 }
 0x7a1   :  { %v2379_v55 = vsel %vm2378_vm13, %v5102_v59, %v2375_v62  ;;  %v2419_v59 = vand.u32 2147483647, %v2409_v40  ;;  %vm2417_vm3 = vmor %vm2415_vm2, %vm2416_vm1  ;;  %v9531_v40 = vld [vmem:[#allocation53_spill] sm:$0xff]  ;;  %v9532_v62 = vld [vmem:[#allocation24_spill] sm:$0xff] }
 0x7a2   :  { %v2384_v37 = vsel %vm2381_vm15, %v2383_v60, %v2379_v55  ;;  %v2398_v54 = vsel %vm2397_vm14, %v5104_v8, %v2394_v29  ;;  %v2412_v35 = vsub.f32 1.0, %v2411_v4  ;;  %v2422_v16 = vor.u32 1.1754944e-38, %v2421_v42  ;;  %v9533_v60 = vld [vmem:[#allocation16_spill] sm:$0xff]  ;;  %v9534_v29 = vld [vmem:[#allocation21_spill] sm:$0xff]  ;;  %v9535_v4 = vld [vmem:[#allocation15_spill] sm:$0xff] }
 0x7a3   :  { %v2403_v58 = vsel %vm2400_vm0, %v2402_v5, %v2398_v54  ;;  %v2426_v23 = vmul.f32 %v5108_v3, %v2384_v37  ;;  %vm2420_vm4 = vcmp.eq.f32.partialorder %v2419_v59, 8.507059e+37  ;;  %v9525_v37 = vld [vmem:[#allocation51_spill] sm:$0xff]  ;;  %v9537_v55 = vld [vmem:[#allocation28_spill] sm:$0xff]  ;;  %v9538_v3 = vld [vmem:[#allocation25_spill] sm:$0xff] }
 0x7a4   :  { %v2425_v33 = vmul.f32 %v2403_v58, %v7252_v43  ;;  %v2413_v12 = vmul.f32 %v5106_v53, %v2412_v35  ;;  %v9526_v43 = vld [vmem:[#allocation50_spill] sm:$0xff]  ;;  %v9529_v35 = vld [vmem:[#allocation52_spill] sm:$0xff]  ;;  %v9536_v5 = vld [vmem:[#allocation27_spill] sm:$0xff] }
 0x7a5   :  { %v9539_v54 = vld [vmem:[#allocation18_spill] sm:$0xff]  ;;  %v9543_v42 = vld [vmem:[#allocation29_spill] sm:$0xff] }
 0x7a6   :  { %v7460_v63 = vadd.f32 %v2426_v23, %v2425_v33  ;;  %v2414_v57 = vadd.f32 %v5106_v53, %v2413_v12  ;;  %v9527_v33 = vld [vmem:[#allocation49_spill] sm:$0xff]  ;;  %v9528_v23 = vld [vmem:[#allocation20_spill] sm:$0xff]  ;;  %v9540_v58 = vld [vmem:[#allocation26_spill] sm:$0xff] }
 0x7a7   :  { %v9541_v12 = vld [vmem:[#allocation22_spill] sm:$0xff] }
 0x7a8   :  { %5109 = vtanh.f32 %v7460_v63  ;;  %v2418_v44 = vsel %vm2417_vm3, %v5106_v53, %v2414_v57  ;;  %v9530_v53 = vld [vmem:[#allocation54_spill] sm:$0xff]  ;;  %v9542_v57 = vld [vmem:[#allocation31_spill] sm:$0xff] }
 0x7a9   :  { %v2423_v8 = vsel %vm2420_vm4, %v2422_v16, %v2418_v44  ;;  %v9544_v59 = vld [vmem:[#allocation34_spill] sm:$0xff]  ;;  %v9546_v16 = vld [vmem:[#allocation33_spill] sm:$0xff] }
 0x7aa   :  { %v9545_v44 = vld [vmem:[#allocation30_spill] sm:$0xff] }
 0x7ae   :  { %v5110_v41 = vpop.eup %5109 }
 0x7af   :  { %v7463_v50 = vmul.f32 %v5110_v41, %v2423_v8  ;;  %v9547_v41 = vld [vmem:[#allocation32_spill] sm:$0xff]  ;;  %v9548_v8 = vld [vmem:[#allocation39_spill] sm:$0xff] }
 0x7b1   :  { %9524 = vst [vmem:[#allocation40_spill] sm:$0xff] %v7463_v50  ;;  %2451 = vmatmul.f32.vlgmr.msrb.gmra.mxu0 %v7463_v50  ;;  %2471 = vmatmul.f32.vlgmr.msra.gmra.mxu1 %v7463_v50 }
 0x7b2   :  { %2491 = vmatmul.f32.vlgmr.msra.gmra.mxu2 %v7463_v50  ;;  %2511 = vmatmul.f32.vlgmr.msra.gmra.mxu3 %v7463_v50  ;;  %v7531_v50 = vld [vmem:[#allocation6 + $0x210] sm:$0xff] }
 0x7b3   :  { %2739 = vmatpush.msrb.mxu0 %v7261_v13  ;;  %2759 = vmatpush.msra.mxu1 %v7264_v17  ;;  %9549 = vst [vmem:[#allocation43_spill] sm:$0xff] %v7531_v50 }
 0x7b4   :  { %2779 = vmatpush.msra.mxu2 %v7267_v19  ;;  %2799 = vmatpush.msra.mxu3 %v7270_v1 }
 0x7b5   :  { %2740 = vmatpush.msrb.mxu0 %v7273_v52  ;;  %2760 = vmatpush.msra.mxu1 %v7276_v45 }
 0x7b6   :  { %2780 = vmatpush.msra.mxu2 %v7279_v51  ;;  %2800 = vmatpush.msra.mxu3 %v7282_v22 }
 0x7b7   :  { %2741 = vmatpush.msrb.mxu0 %v7285_v31  ;;  %2761 = vmatpush.msra.mxu1 %v7288_v15 }
 0x7b8   :  { %2781 = vmatpush.msra.mxu2 %v7291_v46  ;;  %2801 = vmatpush.msra.mxu3 %v7294_v61 }
 0x7b9   :  { %2742 = vmatpush.msrb.mxu0 %v7297_v49  ;;  %2762 = vmatpush.msra.mxu1 %v7300_v34 }
 0x7ba   :  { %2782 = vmatpush.msra.mxu2 %v7303_v56  ;;  %2802 = vmatpush.msra.mxu3 %v7306_v20 }
 0x7bb   :  { %2743 = vmatpush.msrb.mxu0 %v7309_v21  ;;  %2763 = vmatpush.msra.mxu1 %v7312_v2 }
 0x7bc   :  { %2783 = vmatpush.msra.mxu2 %v7315_v7  ;;  %2803 = vmatpush.msra.mxu3 %v7318_v10 }
 0x7bd   :  { %2744 = vmatpush.msrb.mxu0 %v7321_v47  ;;  %2764 = vmatpush.msra.mxu1 %v7324_v0 }
 0x7be   :  { %2784 = vmatpush.msra.mxu2 %v7327_v14  ;;  %2804 = vmatpush.msra.mxu3 %v7330_v27 }
 0x7bf   :  { %2745 = vmatpush.msrb.mxu0 %v7333_v25  ;;  %2765 = vmatpush.msra.mxu1 %v7336_v32 }
 0x7c0   :  { %2785 = vmatpush.msra.mxu2 %v7339_v11  ;;  %2805 = vmatpush.msra.mxu3 %v7342_v38 }
 0x7c1   :  { %2746 = vmatpush.msrb.mxu0 %v7345_v6  ;;  %2766 = vmatpush.msra.mxu1 %v7348_v36 }
 0x7c2   :  { %2786 = vmatpush.msra.mxu2 %v7351_v30  ;;  %2806 = vmatpush.msra.mxu3 %v7354_v18 }
 0x7c3   :  { %2747 = vmatpush.msrb.mxu0 %v7357_v26  ;;  %2767 = vmatpush.msra.mxu1 %v7360_v24 }
 0x7c4   :  { %2787 = vmatpush.msra.mxu2 %v7363_v9  ;;  %2807 = vmatpush.msra.mxu3 %v7366_v39 }
 0x7c5   :  { %2748 = vmatpush.msrb.mxu0 %v7369_v28  ;;  %2768 = vmatpush.msra.mxu1 %v7372_v48 }
 0x7c6   :  { %2788 = vmatpush.msra.mxu2 %v9525_v37  ;;  %2808 = vmatpush.msra.mxu3 %v9526_v43 }
 0x7c7   :  { %2749 = vmatpush.msrb.mxu0 %v9527_v33  ;;  %2769 = vmatpush.msra.mxu1 %v9528_v23 }
 0x7c8   :  { %2789 = vmatpush.msra.mxu2 %v9529_v35  ;;  %2809 = vmatpush.msra.mxu3 %v9530_v53 }
 0x7c9   :  { %2750 = vmatpush.msrb.mxu0 %v9531_v40  ;;  %2770 = vmatpush.msra.mxu1 %v9532_v62 }
 0x7ca   :  { %2790 = vmatpush.msra.mxu2 %v9533_v60  ;;  %2810 = vmatpush.msra.mxu3 %v9534_v29  ;;  %v9556_v29 = vld [vmem:[#allocation65_spill] sm:$0xff] }
 0x7cb   :  { %2751 = vmatpush.msrb.mxu0 %v9535_v4  ;;  %2771 = vmatpush.msra.mxu1 %v9536_v5 }
 0x7cc   :  { %2791 = vmatpush.msra.mxu2 %v9537_v55  ;;  %2811 = vmatpush.msra.mxu3 %v9538_v3  ;;  %v9554_v3 = vld [vmem:[#allocation63_spill] sm:$0xff] }
 0x7cd   :  { %2752 = vmatpush.msrb.mxu0 %v9539_v54  ;;  %2772 = vmatpush.msra.mxu1 %v9540_v58  ;;  %v9550_v58 = vld [vmem:[#allocation35_spill] sm:$0xff] }
 0x7ce   :  { %2792 = vmatpush.msra.mxu2 %v9541_v12  ;;  %2812 = vmatpush.msra.mxu3 %v9542_v57  ;;  %v9551_v12 = vld [vmem:[#allocation66_spill] sm:$0xff]  ;;  %v9552_v57 = vld [vmem:[#allocation36_spill] sm:$0xff] }
 0x7cf   :  { %2753 = vmatpush.msrb.mxu0 %v9543_v42  ;;  %2773 = vmatpush.msra.mxu1 %v9544_v59  ;;  %v1741_v54 = vadd.f32 %v9552_v57, %v9551_v12  ;;  %v9553_v42 = vld [vmem:[#allocation11_spill] sm:$0xff] }
 0x7d0   :  { %2793 = vmatpush.msra.mxu2 %v9545_v44  ;;  %2813 = vmatpush.msra.mxu3 %v9546_v16  ;;  %v1782_v59 = vadd.f32 %v9554_v3, %v9553_v42 }
 0x7d1   :  { %2754 = vmatpush.msrb.mxu0 %v9547_v41  ;;  %2774 = vmatpush.msra.mxu1 %v9548_v8  ;;  %v9555_v8 = vld [vmem:[#allocation19_spill] sm:$0xff] }
 0x7d2   :  { %2794 = vmatpush.msra.mxu2 %v7531_v50  ;;  %2814 = vmatpush.msra.mxu3 %v9550_v58  ;;  %v1864_v60 = vadd.f32 %v9556_v29, %v9555_v8 }
 0x82e   :  { %v2452_v55 = vpop.f32.mrf.mxu0  ;;  %v2472_v44 = vpop.f32.mrf.mxu1 }
 0x82f   :  { %v2515_v5 = vadd.f32 %v2452_v55, %v1741_v54  ;;  %v2516_v16 = vadd.f32 %v2472_v44, %v1782_v59  ;;  %v9557_v54 = vld [vmem:[#allocation48_spill] sm:$0xff] }
 0x831   :  { %v4880_v4 = vmul.f32 -1.442695, %v2515_v5  ;;  %v4881_v41 = vmul.f32 -1.442695, %v2516_v16  ;;  %v9558_v5 = vld [vmem:[#allocation57_spill] sm:$0xff] }
 0x832   :  { %v1823_v59 = vadd.f32 %v9558_v5, %v9557_v54 }
 0x833   :  { %5111 = vpow2.f32 %v4880_v4 }
 0x834   :  { %5113 = vpow2.f32 %v4881_v41 }
 0x835   :  { %v2512_v50 = vpop.f32.mrf.mxu3  ;;  %v2492_v3 = vpop.f32.mrf.mxu2 }
 0x836   :  { %v2518_v62 = vadd.f32 %v2512_v50, %v1864_v60  ;;  %v2517_v16 = vadd.f32 %v2492_v3, %v1823_v59 }
 0x838   :  { %v4882_v58 = vmul.f32 -1.442695, %v2518_v62 }
 0x839   :  { %v5112_v40 = vpop.eup %5111 }
 0x83a   :  { %v5114_v53 = vpop.eup %5113  ;;  %v2522_v57 = vadd.f32 1.0, %v5112_v40  ;;  %5115 = vpow2.f32 %v4882_v58 }
 0x83b   :  { %v2541_v12 = vadd.f32 1.0, %v5114_v53 }
 0x83c   :  { %5117 = vrcp.f32 %v2522_v57  ;;  %v2534_v8 = vand.u32 2147483648, %v2522_v57  ;;  %v2532_v58 = vand.u32 2147483647, %v2522_v57  ;;  %vm2528_vm7 = vweird.f32 %v2522_v57 }
 0x83d   :  { %5119 = vrcp.f32 %v2541_v12  ;;  %v2553_v40 = vand.u32 2147483648, %v2541_v12  ;;  %v2551_v35 = vand.u32 2147483647, %v2541_v12  ;;  %vm2547_vm8 = vweird.f32 %v2541_v12 }
 0x83e   :  { %v2535_v3 = vor.u32 1.1754944e-38, %v2534_v8  ;;  %vm2533_vm11 = vcmp.eq.f32.partialorder %v2532_v58, 8.507059e+37 }
 0x83f   :  { %vm2552_vm12 = vcmp.eq.f32.partialorder %v2551_v35, 8.507059e+37 }
 0x840   :  { %v5116_v55 = vpop.eup %5115 }
 0x841   :  { %v2561_v4 = vadd.f32 1.0, %v5116_v55 }
 0x842   :  { %v5118_v44 = vpop.eup %5117 }
 0x843   :  { %v5120_v29 = vpop.eup %5119  ;;  %v2524_v41 = vmul.f32 %v5118_v44, %v2522_v57  ;;  %5121 = vrcp.f32 %v2561_v4  ;;  %vm2529_vm5 = vweird.f32 %v5118_v44  ;;  %vm2567_vm14 = vweird.f32 %v2561_v4 }
 0x844   :  { %v2543_v50 = vmul.f32 %v5120_v29, %v2541_v12  ;;  %5123 = vtanh.f32 %v2517_v16  ;;  %vm2548_vm6 = vweird.f32 %v5120_v29  ;;  %vm2530_vm9 = vmor %vm2528_vm7, %vm2529_vm5  ;;  %v2571_v8 = vand.u32 2147483647, %v2561_v4 }
 0x845   :  { %v2525_v62 = vsub.f32 1.0, %v2524_v41  ;;  %vm2549_vm10 = vmor %vm2547_vm8, %vm2548_vm6  ;;  %v2554_v41 = vor.u32 1.1754944e-38, %v2553_v40 }
 0x846   :  { %v2544_v60 = vsub.f32 1.0, %v2543_v50  ;;  %vm2572_vm0 = vcmp.eq.f32.partialorder %v2571_v8, 8.507059e+37  ;;  %v9579_v8 = vld [vmem:[#allocation34_spill] sm:$0xff] }
 0x847   :  { %v2526_v53 = vmul.f32 %v5118_v44, %v2525_v62 }
 0x848   :  { %v2545_v42 = vmul.f32 %v5120_v29, %v2544_v60 }
 0x849   :  { %v5122_v23 = vpop.eup %5121  ;;  %v2527_v5 = vadd.f32 %v5118_v44, %v2526_v53 }
 0x84a   :  { %v2546_v55 = vadd.f32 %v5120_v29, %v2545_v42  ;;  %v2563_v59 = vmul.f32 %v5122_v23, %v2561_v4  ;;  %v5124_v16 = vpop.eup %5123  ;;  %vm2568_vm13 = vweird.f32 %v5122_v23  ;;  %v2573_v42 = vand.u32 2147483648, %v2561_v4  ;;  %v9566_v4 = vld [vmem:[#allocation53_spill] sm:$0xff] }
 0x84b   :  { %v2531_v50 = vsel %vm2530_vm9, %v5118_v44, %v2527_v5  ;;  %vm2569_vm15 = vmor %vm2567_vm14, %vm2568_vm13  ;;  %v9567_v5 = vld [vmem:[#allocation24_spill] sm:$0xff] }
 0x84c   :  { %v2536_v54 = vsel %vm2533_vm11, %v2535_v3, %v2531_v50  ;;  %v2550_v62 = vsel %vm2549_vm10, %v5120_v29, %v2546_v55  ;;  %v2564_v33 = vsub.f32 1.0, %v2563_v59  ;;  %v2574_v40 = vor.u32 1.1754944e-38, %v2573_v42  ;;  %v9568_v3 = vld [vmem:[#allocation16_spill] sm:$0xff]  ;;  %v9569_v55 = vld [vmem:[#allocation21_spill] sm:$0xff]  ;;  %v9570_v59 = vld [vmem:[#allocation15_spill] sm:$0xff] }
 0x84d   :  { %v2555_v60 = vsel %vm2552_vm12, %v2554_v41, %v2550_v62  ;;  %v2578_v43 = vmul.f32 %v5124_v16, %v2536_v54  ;;  %v9565_v54 = vld [vmem:[#allocation54_spill] sm:$0xff]  ;;  %v9571_v41 = vld [vmem:[#allocation27_spill] sm:$0xff]  ;;  %v9572_v50 = vld [vmem:[#allocation28_spill] sm:$0xff] }
 0x84e   :  { %v2577_v37 = vmul.f32 %v2555_v60, %v7460_v63  ;;  %v2565_v53 = vmul.f32 %v5122_v23, %v2564_v33  ;;  %v9560_v63 = vld [vmem:[#allocation51_spill] sm:$0xff]  ;;  %v9563_v33 = vld [vmem:[#allocation20_spill] sm:$0xff]  ;;  %v9573_v16 = vld [vmem:[#allocation25_spill] sm:$0xff] }
 0x84f   :  { %v9574_v62 = vld [vmem:[#allocation18_spill] sm:$0xff]  ;;  %v9578_v42 = vld [vmem:[#allocation29_spill] sm:$0xff] }
 0x850   :  { %v7544_v57 = vadd.f32 %v2578_v43, %v2577_v37  ;;  %v2566_v12 = vadd.f32 %v5122_v23, %v2565_v53  ;;  %v9561_v37 = vld [vmem:[#allocation50_spill] sm:$0xff]  ;;  %v9562_v43 = vld [vmem:[#allocation49_spill] sm:$0xff] }
 0x851   :  { %v9575_v60 = vld [vmem:[#allocation26_spill] sm:$0xff] }
 0x852   :  { %5125 = vtanh.f32 %v7544_v57  ;;  %v2570_v44 = vsel %vm2569_vm15, %v5122_v23, %v2566_v12  ;;  %v9564_v23 = vld [vmem:[#allocation52_spill] sm:$0xff]  ;;  %v9576_v53 = vld [vmem:[#allocation22_spill] sm:$0xff]  ;;  %v9577_v12 = vld [vmem:[#allocation31_spill] sm:$0xff] }
 0x853   :  { %v2575_v29 = vsel %vm2572_vm0, %v2574_v40, %v2570_v44  ;;  %v9580_v44 = vld [vmem:[#allocation30_spill] sm:$0xff]  ;;  %v9581_v40 = vld [vmem:[#allocation33_spill] sm:$0xff] }
 0x858   :  { %v5126_v35 = vpop.eup %5125 }
 0x859   :  { %v7547_v58 = vmul.f32 %v5126_v35, %v2575_v29  ;;  %v9582_v35 = vld [vmem:[#allocation32_spill] sm:$0xff]  ;;  %v9583_v29 = vld [vmem:[#allocation39_spill] sm:$0xff] }
 0x85b   :  { %9559 = vst [vmem:[#allocation42_spill] sm:$0xff] %v7547_v58  ;;  %2603 = vmatmul.f32.vlgmr.msra.gmra.mxu0 %v7547_v58  ;;  %2623 = vmatmul.f32.vlgmr.msrb.gmra.mxu1 %v7547_v58 }
 0x85c   :  { %2643 = vmatmul.f32.vlgmr.msrb.gmra.mxu2 %v7547_v58  ;;  %2663 = vmatmul.f32.vlgmr.msrb.gmra.mxu3 %v7547_v58  ;;  %v9584_v58 = vld [vmem:[#allocation43_spill] sm:$0xff] }
 0x85d   :  { %2891 = vmatpush.msra.mxu0 %v7261_v13  ;;  %2911 = vmatpush.msrb.mxu1 %v7264_v17 }
 0x85e   :  { %2931 = vmatpush.msrb.mxu2 %v7267_v19  ;;  %2951 = vmatpush.msrb.mxu3 %v7270_v1 }
 0x85f   :  { %2892 = vmatpush.msra.mxu0 %v7273_v52  ;;  %2912 = vmatpush.msrb.mxu1 %v7276_v45 }
 0x860   :  { %2932 = vmatpush.msrb.mxu2 %v7279_v51  ;;  %2952 = vmatpush.msrb.mxu3 %v7282_v22 }
 0x861   :  { %2893 = vmatpush.msra.mxu0 %v7285_v31  ;;  %2913 = vmatpush.msrb.mxu1 %v7288_v15 }
 0x862   :  { %2933 = vmatpush.msrb.mxu2 %v7291_v46  ;;  %2953 = vmatpush.msrb.mxu3 %v7294_v61 }
 0x863   :  { %2894 = vmatpush.msra.mxu0 %v7297_v49  ;;  %2914 = vmatpush.msrb.mxu1 %v7300_v34 }
 0x864   :  { %2934 = vmatpush.msrb.mxu2 %v7303_v56  ;;  %2954 = vmatpush.msrb.mxu3 %v7306_v20 }
 0x865   :  { %2895 = vmatpush.msra.mxu0 %v7309_v21  ;;  %2915 = vmatpush.msrb.mxu1 %v7312_v2 }
 0x866   :  { %2935 = vmatpush.msrb.mxu2 %v7315_v7  ;;  %2955 = vmatpush.msrb.mxu3 %v7318_v10 }
 0x867   :  { %2896 = vmatpush.msra.mxu0 %v7321_v47  ;;  %2916 = vmatpush.msrb.mxu1 %v7324_v0 }
 0x868   :  { %2936 = vmatpush.msrb.mxu2 %v7327_v14  ;;  %2956 = vmatpush.msrb.mxu3 %v7330_v27 }
 0x869   :  { %2897 = vmatpush.msra.mxu0 %v7333_v25  ;;  %2917 = vmatpush.msrb.mxu1 %v7336_v32 }
 0x86a   :  { %2937 = vmatpush.msrb.mxu2 %v7339_v11  ;;  %2957 = vmatpush.msrb.mxu3 %v7342_v38 }
 0x86b   :  { %2898 = vmatpush.msra.mxu0 %v7345_v6  ;;  %2918 = vmatpush.msrb.mxu1 %v7348_v36 }
 0x86c   :  { %2938 = vmatpush.msrb.mxu2 %v7351_v30  ;;  %2958 = vmatpush.msrb.mxu3 %v7354_v18 }
 0x86d   :  { %2899 = vmatpush.msra.mxu0 %v7357_v26  ;;  %2919 = vmatpush.msrb.mxu1 %v7360_v24 }
 0x86e   :  { %2939 = vmatpush.msrb.mxu2 %v7363_v9  ;;  %2959 = vmatpush.msrb.mxu3 %v7366_v39 }
 0x86f   :  { %2900 = vmatpush.msra.mxu0 %v7369_v28  ;;  %2920 = vmatpush.msrb.mxu1 %v7372_v48 }
 0x870   :  { %2940 = vmatpush.msrb.mxu2 %v9560_v63  ;;  %2960 = vmatpush.msrb.mxu3 %v9561_v37 }
 0x871   :  { %2901 = vmatpush.msra.mxu0 %v9562_v43  ;;  %2921 = vmatpush.msrb.mxu1 %v9563_v33 }
 0x872   :  { %2941 = vmatpush.msrb.mxu2 %v9564_v23  ;;  %2961 = vmatpush.msrb.mxu3 %v9565_v54 }
 0x873   :  { %2902 = vmatpush.msra.mxu0 %v9566_v4  ;;  %2922 = vmatpush.msrb.mxu1 %v9567_v5 }
 0x874   :  { %2942 = vmatpush.msrb.mxu2 %v9568_v3  ;;  %2962 = vmatpush.msrb.mxu3 %v9569_v55  ;;  %v9591_v3 = vld [vmem:[#allocation37_spill] sm:$0xff] }
 0x875   :  { %2903 = vmatpush.msra.mxu0 %v9570_v59  ;;  %2923 = vmatpush.msrb.mxu1 %v9571_v41 }
 0x876   :  { %2943 = vmatpush.msrb.mxu2 %v9572_v50  ;;  %2963 = vmatpush.msrb.mxu3 %v9573_v16  ;;  %v9589_v50 = vld [vmem:[#allocation67_spill] sm:$0xff] }
 0x877   :  { %2904 = vmatpush.msra.mxu0 %v9574_v62  ;;  %2924 = vmatpush.msrb.mxu1 %v9575_v60  ;;  %v9585_v62 = vld [vmem:[#allocation35_spill] sm:$0xff]  ;;  %v9586_v60 = vld [vmem:[#allocation66_spill] sm:$0xff] }
 0x878   :  { %2944 = vmatpush.msrb.mxu2 %v9576_v53  ;;  %2964 = vmatpush.msrb.mxu3 %v9577_v12  ;;  %v9587_v53 = vld [vmem:[#allocation58_spill] sm:$0xff]  ;;  %v9588_v12 = vld [vmem:[#allocation11_spill] sm:$0xff] }
 0x879   :  { %2905 = vmatpush.msra.mxu0 %v9578_v42  ;;  %2925 = vmatpush.msrb.mxu1 %v9579_v8  ;;  %v1744_v16 = vadd.f32 %v9587_v53, %v9586_v60  ;;  %v1785_v42 = vadd.f32 %v9589_v50, %v9588_v12 }
 0x87a   :  { %2945 = vmatpush.msrb.mxu2 %v9580_v44  ;;  %2965 = vmatpush.msrb.mxu3 %v9581_v40 }
 0x87b   :  { %2906 = vmatpush.msra.mxu0 %v9582_v35  ;;  %2926 = vmatpush.msrb.mxu1 %v9583_v29  ;;  %v9590_v35 = vld [vmem:[#allocation19_spill] sm:$0xff] }
 0x87c   :  { %2946 = vmatpush.msrb.mxu2 %v9584_v58  ;;  %2966 = vmatpush.msrb.mxu3 %v9585_v62  ;;  %v1867_v29 = vadd.f32 %v9591_v3, %v9590_v35 }
 0x8d8   :  { %v2604_v41 = vpop.f32.mrf.mxu0  ;;  %v2624_v8 = vpop.f32.mrf.mxu1 }
 0x8d9   :  { %v2667_v59 = vadd.f32 %v2604_v41, %v1744_v16  ;;  %v2668_v44 = vadd.f32 %v2624_v8, %v1785_v42  ;;  %v9592_v16 = vld [vmem:[#allocation48_spill] sm:$0xff] }
 0x8db   :  { %v4883_v55 = vmul.f32 -1.442695, %v2667_v59  ;;  %v4884_v40 = vmul.f32 -1.442695, %v2668_v44  ;;  %v9593_v59 = vld [vmem:[#allocation62_spill] sm:$0xff] }
 0x8dc   :  { %v1826_v42 = vadd.f32 %v9593_v59, %v9592_v16 }
 0x8dd   :  { %5127 = vpow2.f32 %v4883_v55 }
 0x8de   :  { %5129 = vpow2.f32 %v4884_v40 }
 0x8df   :  { %v2664_v58 = vpop.f32.mrf.mxu3  ;;  %v2644_v50 = vpop.f32.mrf.mxu2 }
 0x8e0   :  { %v2670_v5 = vadd.f32 %v2664_v58, %v1867_v29  ;;  %v2669_v44 = vadd.f32 %v2644_v50, %v1826_v42 }
 0x8e2   :  { %v4885_v62 = vmul.f32 -1.442695, %v2670_v5 }
 0x8e3   :  { %v5128_v4 = vpop.eup %5127 }
 0x8e4   :  { %v5130_v54 = vpop.eup %5129  ;;  %v2674_v53 = vadd.f32 1.0, %v5128_v4  ;;  %5131 = vpow2.f32 %v4885_v62 }
 0x8e5   :  { %v2693_v60 = vadd.f32 1.0, %v5130_v54 }
 0x8e6   :  { %5133 = vrcp.f32 %v2674_v53  ;;  %v2686_v35 = vand.u32 2147483648, %v2674_v53  ;;  %v2684_v62 = vand.u32 2147483647, %v2674_v53  ;;  %vm2680_vm3 = vweird.f32 %v2674_v53 }
 0x8e7   :  { %5135 = vrcp.f32 %v2693_v60  ;;  %v2705_v4 = vand.u32 2147483648, %v2693_v60  ;;  %v2703_v23 = vand.u32 2147483647, %v2693_v60  ;;  %vm2699_vm4 = vweird.f32 %v2693_v60 }
 0x8e8   :  { %v2687_v50 = vor.u32 1.1754944e-38, %v2686_v35  ;;  %vm2685_vm7 = vcmp.eq.f32.partialorder %v2684_v62, 8.507059e+37 }
 0x8e9   :  { %vm2704_vm8 = vcmp.eq.f32.partialorder %v2703_v23, 8.507059e+37 }
 0x8ea   :  { %v5132_v41 = vpop.eup %5131 }
 0x8eb   :  { %v2713_v55 = vadd.f32 1.0, %v5132_v41 }
 0x8ec   :  { %v5134_v8 = vpop.eup %5133 }
 0x8ed   :  { %v5136_v3 = vpop.eup %5135  ;;  %v2676_v40 = vmul.f32 %v5134_v8, %v2674_v53  ;;  %5137 = vrcp.f32 %v2713_v55  ;;  %vm2681_vm1 = vweird.f32 %v5134_v8  ;;  %vm2719_vm10 = vweird.f32 %v2713_v55 }
 0x8ee   :  { %v2695_v58 = vmul.f32 %v5136_v3, %v2693_v60  ;;  %5139 = vtanh.f32 %v2669_v44  ;;  %vm2700_vm2 = vweird.f32 %v5136_v3  ;;  %vm2682_vm5 = vmor %vm2680_vm3, %vm2681_vm1  ;;  %v2723_v35 = vand.u32 2147483647, %v2713_v55 }
 0x8ef   :  { %v2677_v5 = vsub.f32 1.0, %v2676_v40  ;;  %vm2701_vm6 = vmor %vm2699_vm4, %vm2700_vm2  ;;  %v2706_v40 = vor.u32 1.1754944e-38, %v2705_v4 }
 0x8f0   :  { %v2696_v29 = vsub.f32 1.0, %v2695_v58  ;;  %vm2724_vm12 = vcmp.eq.f32.partialorder %v2723_v35, 8.507059e+37 }
 0x8f1   :  { %v2678_v54 = vmul.f32 %v5134_v8, %v2677_v5 }
 0x8f2   :  { %v2697_v12 = vmul.f32 %v5136_v3, %v2696_v29 }
 0x8f3   :  { %v5138_v33 = vpop.eup %5137  ;;  %v2679_v59 = vadd.f32 %v5134_v8, %v2678_v54 }
 0x8f4   :  { %v2698_v41 = vadd.f32 %v5136_v3, %v2697_v12  ;;  %v2715_v42 = vmul.f32 %v5138_v33, %v2713_v55  ;;  %v5140_v44 = vpop.eup %5139  ;;  %vm2720_vm9 = vweird.f32 %v5138_v33  ;;  %v2725_v12 = vand.u32 2147483648, %v2713_v55 }
 0x8f5   :  { %v2683_v58 = vsel %vm2682_vm5, %v5134_v8, %v2679_v59  ;;  %vm2721_vm11 = vmor %vm2719_vm10, %vm2720_vm9 }
 0x8f6   :  { %v2688_v16 = vsel %vm2685_vm7, %v2687_v50, %v2683_v58  ;;  %v2702_v5 = vsel %vm2701_vm6, %v5136_v3, %v2698_v41  ;;  %v2716_v43 = vsub.f32 1.0, %v2715_v42  ;;  %v2726_v4 = vor.u32 1.1754944e-38, %v2725_v12  ;;  %v9626_v58 = vld [vmem:[#allocation48_spill] sm:$0xff] }
 0x8f7   :  { %v2707_v29 = vsel %vm2704_vm8, %v2706_v40, %v2702_v5  ;;  %v2730_v37 = vmul.f32 %v5140_v44, %v2688_v16  ;;  %v9627_v44 = vld [vmem:[#allocation46_spill] sm:$0xff] }
 0x8f8   :  { %v2729_v63 = vmul.f32 %v2707_v29, %v7544_v57  ;;  %v2717_v54 = vmul.f32 %v5138_v33, %v2716_v43  ;;  %v9624_v57 = vld [vmem:[#allocation19_spill] sm:$0xff]  ;;  %v1829_v5 = vadd.f32 %v9627_v44, %v9626_v58  ;;  %v9628_v44 = vld [vmem:[#allocation13_spill] sm:$0xff] }
 0x8fa   :  { %v7626_v53 = vadd.f32 %v2730_v37, %v2729_v63  ;;  %v2718_v60 = vadd.f32 %v5138_v33, %v2717_v54  ;;  %v9625_v63 = vld [vmem:[#allocation68_spill] sm:$0xff] }
 0x8fb   :  { %v1870_v37 = vadd.f32 %v9625_v63, %v9624_v57  ;;  %v3252_v63 = vld [vmem:[#allocation4 + $0x3a0] sm:$0xff] }
 0x8fc   :  { %5141 = vtanh.f32 %v7626_v53  ;;  %v2722_v8 = vsel %vm2721_vm11, %v5138_v33, %v2718_v60 }
 0x8fd   :  { %v2727_v3 = vsel %vm2724_vm12, %v2726_v4, %v2722_v8 }
 0x902   :  { %v5142_v23 = vpop.eup %5141 }
 0x903   :  { %v7629_v62 = vmul.f32 %v5142_v23, %v2727_v3 }
 0x905   :  { %2755 = vmatmul.f32.vlgmr.msrb.gmra.mxu0 %v7629_v62  ;;  %2775 = vmatmul.f32.vlgmr.msra.gmra.mxu1 %v7629_v62 }
 0x906   :  { %2795 = vmatmul.f32.vlgmr.msra.gmra.mxu2 %v7629_v62  ;;  %2815 = vmatmul.f32.vlgmr.msra.gmra.mxu3 %v7629_v62 }
 0x907   :  { %3043 = vmatpush.msrb.mxu0 %v7261_v13  ;;  %3063 = vmatpush.msra.mxu1 %v7264_v17  ;;  %v9594_v13 = vld [vmem:[#allocation51_spill] sm:$0xff]  ;;  %v9595_v17 = vld [vmem:[#allocation50_spill] sm:$0xff] }
 0x908   :  { %3083 = vmatpush.msra.mxu2 %v7267_v19  ;;  %3103 = vmatpush.msra.mxu3 %v7270_v1  ;;  %v9596_v19 = vld [vmem:[#allocation49_spill] sm:$0xff]  ;;  %v9597_v1 = vld [vmem:[#allocation20_spill] sm:$0xff] }
 0x909   :  { %3044 = vmatpush.msrb.mxu0 %v7273_v52  ;;  %3064 = vmatpush.msra.mxu1 %v7276_v45  ;;  %v9598_v52 = vld [vmem:[#allocation52_spill] sm:$0xff]  ;;  %v9599_v45 = vld [vmem:[#allocation54_spill] sm:$0xff] }
 0x90a   :  { %3084 = vmatpush.msra.mxu2 %v7279_v51  ;;  %3104 = vmatpush.msra.mxu3 %v7282_v22  ;;  %v9600_v51 = vld [vmem:[#allocation53_spill] sm:$0xff]  ;;  %v9601_v22 = vld [vmem:[#allocation24_spill] sm:$0xff] }
 0x90b   :  { %3045 = vmatpush.msrb.mxu0 %v7285_v31  ;;  %3065 = vmatpush.msra.mxu1 %v7288_v15  ;;  %v9602_v31 = vld [vmem:[#allocation16_spill] sm:$0xff]  ;;  %v9603_v15 = vld [vmem:[#allocation21_spill] sm:$0xff] }
 0x90c   :  { %3085 = vmatpush.msra.mxu2 %v7291_v46  ;;  %3105 = vmatpush.msra.mxu3 %v7294_v61  ;;  %v9604_v46 = vld [vmem:[#allocation15_spill] sm:$0xff] }
 0x90d   :  { %3046 = vmatpush.msrb.mxu0 %v7297_v49  ;;  %3066 = vmatpush.msra.mxu1 %v7300_v34  ;;  %v9605_v61 = vld [vmem:[#allocation27_spill] sm:$0xff]  ;;  %v9606_v49 = vld [vmem:[#allocation28_spill] sm:$0xff]  ;;  %v9607_v34 = vld [vmem:[#allocation25_spill] sm:$0xff] }
 0x90e   :  { %3086 = vmatpush.msra.mxu2 %v7303_v56  ;;  %3106 = vmatpush.msra.mxu3 %v7306_v20  ;;  %v9608_v56 = vld [vmem:[#allocation18_spill] sm:$0xff] }
 0x90f   :  { %3047 = vmatpush.msrb.mxu0 %v7309_v21  ;;  %3067 = vmatpush.msra.mxu1 %v7312_v2  ;;  %v9609_v20 = vld [vmem:[#allocation26_spill] sm:$0xff]  ;;  %v9611_v2 = vld [vmem:[#allocation31_spill] sm:$0xff] }
 0x910   :  { %3087 = vmatpush.msra.mxu2 %v7315_v7  ;;  %3107 = vmatpush.msra.mxu3 %v7318_v10  ;;  %v9610_v21 = vld [vmem:[#allocation22_spill] sm:$0xff]  ;;  %v9612_v7 = vld [vmem:[#allocation29_spill] sm:$0xff] }
 0x911   :  { %3048 = vmatpush.msrb.mxu0 %v7321_v47  ;;  %3068 = vmatpush.msra.mxu1 %v7324_v0  ;;  %v9613_v10 = vld [vmem:[#allocation34_spill] sm:$0xff]  ;;  %v9615_v0 = vld [vmem:[#allocation33_spill] sm:$0xff] }
 0x912   :  { %3088 = vmatpush.msra.mxu2 %v7327_v14  ;;  %3108 = vmatpush.msra.mxu3 %v7330_v27  ;;  %v9614_v47 = vld [vmem:[#allocation30_spill] sm:$0xff]  ;;  %v9616_v14 = vld [vmem:[#allocation32_spill] sm:$0xff]  ;;  %v9617_v27 = vld [vmem:[#allocation39_spill] sm:$0xff] }
 0x913   :  { %3049 = vmatpush.msrb.mxu0 %v7333_v25  ;;  %3069 = vmatpush.msra.mxu1 %v7336_v32  ;;  %v9618_v25 = vld [vmem:[#allocation43_spill] sm:$0xff] }
 0x914   :  { %3089 = vmatpush.msra.mxu2 %v7339_v11  ;;  %3109 = vmatpush.msra.mxu3 %v7342_v38  ;;  %v9619_v32 = vld [vmem:[#allocation35_spill] sm:$0xff]  ;;  %v9620_v11 = vld [vmem:[#allocation66_spill] sm:$0xff] }
 0x915   :  { %3050 = vmatpush.msrb.mxu0 %v7345_v6  ;;  %3070 = vmatpush.msra.mxu1 %v7348_v36  ;;  %v9621_v38 = vld [vmem:[#allocation59_spill] sm:$0xff] }
 0x916   :  { %3090 = vmatpush.msra.mxu2 %v7351_v30  ;;  %3110 = vmatpush.msra.mxu3 %v7354_v18  ;;  %v1747_v6 = vadd.f32 %v9621_v38, %v9620_v11  ;;  %v9622_v36 = vld [vmem:[#allocation11_spill] sm:$0xff]  ;;  %v9623_v30 = vld [vmem:[#allocation60_spill] sm:$0xff] }
 0x917   :  { %3051 = vmatpush.msrb.mxu0 %v7357_v26  ;;  %3071 = vmatpush.msra.mxu1 %v7360_v24  ;;  %v1788_v18 = vadd.f32 %v9623_v30, %v9622_v36 }
 0x918   :  { %3091 = vmatpush.msra.mxu2 %v7363_v9  ;;  %3111 = vmatpush.msra.mxu3 %v7366_v39 }
 0x919   :  { %3052 = vmatpush.msrb.mxu0 %v7369_v28  ;;  %3072 = vmatpush.msra.mxu1 %v7372_v48 }
 0x91a   :  { %3092 = vmatpush.msra.mxu2 %v9594_v13  ;;  %3112 = vmatpush.msra.mxu3 %v9595_v17 }
 0x91b   :  { %3053 = vmatpush.msrb.mxu0 %v9596_v19  ;;  %3073 = vmatpush.msra.mxu1 %v9597_v1 }
 0x91c   :  { %3093 = vmatpush.msra.mxu2 %v9598_v52  ;;  %3113 = vmatpush.msra.mxu3 %v9599_v45 }
 0x91d   :  { %3054 = vmatpush.msrb.mxu0 %v9600_v51  ;;  %3074 = vmatpush.msra.mxu1 %v9601_v22 }
 0x91e   :  { %3094 = vmatpush.msra.mxu2 %v9602_v31  ;;  %3114 = vmatpush.msra.mxu3 %v9603_v15 }
 0x91f   :  { %3055 = vmatpush.msrb.mxu0 %v9604_v46  ;;  %3075 = vmatpush.msra.mxu1 %v9605_v61 }
 0x920   :  { %3095 = vmatpush.msra.mxu2 %v9606_v49  ;;  %3115 = vmatpush.msra.mxu3 %v9607_v34 }
 0x921   :  { %3056 = vmatpush.msrb.mxu0 %v9608_v56  ;;  %3076 = vmatpush.msra.mxu1 %v9609_v20 }
 0x922   :  { %3096 = vmatpush.msra.mxu2 %v9610_v21  ;;  %3116 = vmatpush.msra.mxu3 %v9611_v2 }
 0x923   :  { %3057 = vmatpush.msrb.mxu0 %v9612_v7  ;;  %3077 = vmatpush.msra.mxu1 %v9613_v10 }
 0x924   :  { %3097 = vmatpush.msra.mxu2 %v9614_v47  ;;  %3117 = vmatpush.msra.mxu3 %v9615_v0 }
 0x925   :  { %3058 = vmatpush.msrb.mxu0 %v9616_v14  ;;  %3078 = vmatpush.msra.mxu1 %v9617_v27 }
 0x926   :  { %3098 = vmatpush.msra.mxu2 %v9618_v25  ;;  %3118 = vmatpush.msra.mxu3 %v9619_v32 }
 0x982   :  { %v2756_v26 = vpop.f32.mrf.mxu0  ;;  %v2776_v24 = vpop.f32.mrf.mxu1 }
 0x983   :  { %v2819_v9 = vadd.f32 %v2756_v26, %v1747_v6  ;;  %v2820_v39 = vadd.f32 %v2776_v24, %v1788_v18  ;;  %v3261_v18 = vld [vmem:[#allocation4 + $0x3e8] sm:$0xff]  ;;  %v3262_v26 = vld [vmem:[#allocation4 + $0x3f0] sm:$0xff]  ;;  %v3263_v24 = vld [vmem:[#allocation4 + $0x3f8] sm:$0xff] }
 0x985   :  { %v4886_v28 = vmul.f32 -1.442695, %v2819_v9  ;;  %v4887_v48 = vmul.f32 -1.442695, %v2820_v39  ;;  %v3256_v9 = vld [vmem:[#allocation4 + $0x3c0] sm:$0xff]  ;;  %v3257_v39 = vld [vmem:[#allocation4 + $0x3c8] sm:$0xff] }
 0x987   :  { %5143 = vpow2.f32 %v4886_v28  ;;  %v3258_v28 = vld [vmem:[#allocation4 + $0x3d0] sm:$0xff] }
 0x988   :  { %5145 = vpow2.f32 %v4887_v48  ;;  %v3259_v48 = vld [vmem:[#allocation4 + $0x3d8] sm:$0xff] }
 0x989   :  { %v2816_v43 = vpop.f32.mrf.mxu3  ;;  %v2796_v42 = vpop.f32.mrf.mxu2 }
 0x98a   :  { %v2822_v33 = vadd.f32 %v2816_v43, %v1870_v37  ;;  %v2821_v60 = vadd.f32 %v2796_v42, %v1829_v5  ;;  %v3253_v37 = vld [vmem:[#allocation4 + $0x3a8] sm:$0xff]  ;;  %v3254_v43 = vld [vmem:[#allocation4 + $0x3b0] sm:$0xff]  ;;  %v1750_v5 = vadd.f32 %v9628_v44, %v9620_v11 }
 0x98b   :  { %v3245_v42 = vld [vmem:[#allocation4 + $0x368] sm:$0xff] }
 0x98c   :  { %v4888_v16 = vmul.f32 -1.442695, %v2822_v33  ;;  %v3255_v33 = vld [vmem:[#allocation4 + $0x3b8] sm:$0xff] }
 0x98d   :  { %v5144_v55 = vpop.eup %5143 }
 0x98e   :  { %v5146_v59 = vpop.eup %5145  ;;  %v2826_v50 = vadd.f32 1.0, %v5144_v55  ;;  %5147 = vpow2.f32 %v4888_v16  ;;  %v3248_v16 = vld [vmem:[#allocation4 + $0x380] sm:$0xff]  ;;  %v3249_v55 = vld [vmem:[#allocation4 + $0x388] sm:$0xff] }
 0x98f   :  { %v2845_v41 = vadd.f32 1.0, %v5146_v59  ;;  %v3250_v59 = vld [vmem:[#allocation4 + $0x390] sm:$0xff] }
 0x990   :  { %5149 = vrcp.f32 %v2826_v50  ;;  %v2838_v3 = vand.u32 2147483648, %v2826_v50  ;;  %v2836_v19 = vand.u32 2147483647, %v2826_v50  ;;  %vm2832_vm15 = vweird.f32 %v2826_v50 }
 0x991   :  { %5151 = vrcp.f32 %v2845_v41  ;;  %v2857_v13 = vand.u32 2147483648, %v2845_v41  ;;  %v2855_v52 = vand.u32 2147483647, %v2845_v41  ;;  %vm2851_vm0 = vweird.f32 %v2845_v41 }
 0x992   :  { %v2839_v22 = vor.u32 1.1754944e-38, %v2838_v3  ;;  %vm2837_vm3 = vcmp.eq.f32.partialorder %v2836_v19, 8.507059e+37  ;;  %v3236_v19 = vld [vmem:[#allocation4 + $0x320] sm:$0xff] }
 0x993   :  { %v2858_v46 = vor.u32 1.1754944e-38, %v2857_v13  ;;  %vm2856_vm4 = vcmp.eq.f32.partialorder %v2855_v52, 8.507059e+37  ;;  %v3238_v52 = vld [vmem:[#allocation4 + $0x330] sm:$0xff] }
 0x994   :  { %v5148_v40 = vpop.eup %5147 }
 0x995   :  { %v2865_v29 = vadd.f32 1.0, %v5148_v40  ;;  %v3246_v40 = vld [vmem:[#allocation4 + $0x370] sm:$0xff] }
 0x996   :  { %v5150_v54 = vpop.eup %5149 }
 0x997   :  { %v5152_v12 = vpop.eup %5151  ;;  %v2828_v35 = vmul.f32 %v5150_v54, %v2826_v50  ;;  %5153 = vrcp.f32 %v2865_v29  ;;  %vm2833_vm13 = vweird.f32 %v5150_v54  ;;  %v2877_v14 = vand.u32 2147483648, %v2865_v29  ;;  %v3251_v50 = vld [vmem:[#allocation4 + $0x398] sm:$0xff] }
 0x998   :  { %v2847_v8 = vmul.f32 %v5152_v12, %v2845_v41  ;;  %5155 = vtanh.f32 %v2821_v60  ;;  %vm2852_vm14 = vweird.f32 %v5152_v12  ;;  %vm2834_vm1 = vmor %vm2832_vm15, %vm2833_vm13  ;;  %vm2871_vm6 = vweird.f32 %v2865_v29  ;;  %v3244_v41 = vld [vmem:[#allocation4 + $0x360] sm:$0xff]  ;;  %v3247_v60 = vld [vmem:[#allocation4 + $0x378] sm:$0xff] }
 0x999   :  { %v2829_v4 = vsub.f32 1.0, %v2828_v35  ;;  %vm2853_vm2 = vmor %vm2851_vm0, %vm2852_vm14  ;;  %v2875_v27 = vand.u32 2147483647, %v2865_v29  ;;  %v2878_v32 = vor.u32 1.1754944e-38, %v2877_v14  ;;  %v3225_v14 = vld [vmem:[#allocation4 + $0x2c8] sm:$0xff] }
 0x99a   :  { %v2848_v23 = vsub.f32 1.0, %v2847_v8  ;;  %v3240_v8 = vld [vmem:[#allocation4 + $0x340] sm:$0xff] }
 0x99b   :  { %v2830_v17 = vmul.f32 %v5150_v54, %v2829_v4  ;;  %vm2876_vm8 = vcmp.eq.f32.partialorder %v2875_v27, 8.507059e+37  ;;  %v3241_v4 = vld [vmem:[#allocation4 + $0x348] sm:$0xff]  ;;  %v3226_v27 = vld [vmem:[#allocation4 + $0x2d0] sm:$0xff] }
 0x99c   :  { %v2849_v1 = vmul.f32 %v5152_v12, %v2848_v23  ;;  %v3242_v23 = vld [vmem:[#allocation4 + $0x350] sm:$0xff] }
 0x99d   :  { %v5154_v45 = vpop.eup %5153  ;;  %v2831_v51 = vadd.f32 %v5150_v54, %v2830_v17  ;;  %v3243_v17 = vld [vmem:[#allocation4 + $0x358] sm:$0xff] }
 0x99e   :  { %v2850_v31 = vadd.f32 %v5152_v12, %v2849_v1  ;;  %v2867_v15 = vmul.f32 %v5154_v45, %v2865_v29  ;;  %v5156_v49 = vpop.eup %5155  ;;  %vm2872_vm5 = vweird.f32 %v5154_v45  ;;  %v9629_v29 = vld [vmem:[#allocation14_spill] sm:$0xff]  ;;  %v3237_v1 = vld [vmem:[#allocation4 + $0x328] sm:$0xff] }
 0x99f   :  { %v2835_v61 = vsel %vm2834_vm1, %v5150_v54, %v2831_v51  ;;  %vm2873_vm7 = vmor %vm2871_vm6, %vm2872_vm5  ;;  %v1791_v54 = vadd.f32 %v9629_v29, %v9622_v36  ;;  %v3206_v29 = vld [vmem:[#allocation4 + $0x230] sm:$0xff] }
 0x9a0   :  { %v2840_v34 = vsel %vm2837_vm3, %v2839_v22, %v2835_v61  ;;  %v2854_v56 = vsel %vm2853_vm2, %v5152_v12, %v2850_v31  ;;  %v2868_v20 = vsub.f32 1.0, %v2867_v15  ;;  %v3239_v22 = vld [vmem:[#allocation4 + $0x338] sm:$0xff]  ;;  %v3232_v31 = vld [vmem:[#allocation4 + $0x300] sm:$0xff]  ;;  %v3233_v15 = vld [vmem:[#allocation4 + $0x308] sm:$0xff] }
 0x9a1   :  { %v2859_v21 = vsel %vm2856_vm4, %v2858_v46, %v2854_v56  ;;  %v2882_v2 = vmul.f32 %v5156_v49, %v2840_v34  ;;  %v3234_v46 = vld [vmem:[#allocation4 + $0x310] sm:$0xff]  ;;  %v3235_v61 = vld [vmem:[#allocation4 + $0x318] sm:$0xff]  ;;  %v3228_v56 = vld [vmem:[#allocation4 + $0x2e0] sm:$0xff] }
 0x9a2   :  { %v2881_v7 = vmul.f32 %v2859_v21, %v7626_v53  ;;  %v2869_v10 = vmul.f32 %v5154_v45, %v2868_v20  ;;  %v3260_v53 = vld [vmem:[#allocation4 + $0x3e0] sm:$0xff]  ;;  %v9630_v49 = vld [vmem:[#allocation38_spill] sm:$0xff]  ;;  %v3229_v20 = vld [vmem:[#allocation4 + $0x2e8] sm:$0xff] }
 0x9a3   :  { %v1873_v34 = vadd.f32 %v9630_v49, %v9624_v57  ;;  %v3230_v21 = vld [vmem:[#allocation4 + $0x2f0] sm:$0xff] }
 0x9a4   :  { %v7708_v47 = vadd.f32 %v2882_v2, %v2881_v7  ;;  %v2870_v0 = vadd.f32 %v5154_v45, %v2869_v10  ;;  %v3231_v7 = vld [vmem:[#allocation4 + $0x2f8] sm:$0xff] }
 0x9a6   :  { %5157 = vtanh.f32 %v7708_v47  ;;  %v2874_v25 = vsel %vm2873_vm7, %v5154_v45, %v2870_v0  ;;  %v3224_v0 = vld [vmem:[#allocation4 + $0x2c0] sm:$0xff] }
 0x9a7   :  { %v2879_v6 = vsel %vm2876_vm8, %v2878_v32, %v2874_v25  ;;  %v3227_v25 = vld [vmem:[#allocation4 + $0x2d8] sm:$0xff] }
 0x9ac   :  { %v5158_v38 = vpop.eup %5157 }
 0x9ad   :  { %v7711_v30 = vmul.f32 %v5158_v38, %v2879_v6  ;;  %v3220_v38 = vld [vmem:[#allocation4 + $0x2a0] sm:$0xff]  ;;  %v3221_v6 = vld [vmem:[#allocation4 + $0x2a8] sm:$0xff] }
 0x9af   :  { %2907 = vmatmul.f32.vlgmr.msra.gmra.mxu0 %v7711_v30  ;;  %2927 = vmatmul.f32.vlgmr.msrb.gmra.mxu1 %v7711_v30 }
 0x9b0   :  { %2947 = vmatmul.f32.vlgmr.msrb.gmra.mxu2 %v7711_v30  ;;  %2967 = vmatmul.f32.vlgmr.msrb.gmra.mxu3 %v7711_v30 }
 0x9b1   :  { %3275 = vmatpush.msra.mxu0 %v3260_v53  ;;  %3316 = vmatpush.msrb.mxu1 %v3261_v18  ;;  %v3222_v53 = vld [vmem:[#allocation4 + $0x2b0] sm:$0xff] }
 0x9b2   :  { %3357 = vmatpush.msrb.mxu2 %v3262_v26  ;;  %3398 = vmatpush.msrb.mxu3 %v3263_v24  ;;  %v3223_v26 = vld [vmem:[#allocation4 + $0x2b8] sm:$0xff]  ;;  %v3216_v24 = vld [vmem:[#allocation4 + $0x280] sm:$0xff] }
 0x9b3   :  { %3276 = vmatpush.msra.mxu0 %v3256_v9  ;;  %3317 = vmatpush.msrb.mxu1 %v3257_v39  ;;  %v3217_v9 = vld [vmem:[#allocation4 + $0x288] sm:$0xff] }
 0x9b4   :  { %3358 = vmatpush.msrb.mxu2 %v3258_v28  ;;  %3399 = vmatpush.msrb.mxu3 %v3259_v48  ;;  %v3218_v48 = vld [vmem:[#allocation4 + $0x290] sm:$0xff] }
 0x9b5   :  { %3277 = vmatpush.msra.mxu0 %v3252_v63  ;;  %3318 = vmatpush.msrb.mxu1 %v3253_v37  ;;  %v3219_v63 = vld [vmem:[#allocation4 + $0x298] sm:$0xff] }
 0x9b6   :  { %3359 = vmatpush.msrb.mxu2 %v3254_v43  ;;  %3400 = vmatpush.msrb.mxu3 %v3255_v33  ;;  %v3212_v43 = vld [vmem:[#allocation4 + $0x260] sm:$0xff]  ;;  %v3213_v33 = vld [vmem:[#allocation4 + $0x268] sm:$0xff] }
 0x9b7   :  { %3278 = vmatpush.msra.mxu0 %v3248_v16  ;;  %3319 = vmatpush.msrb.mxu1 %v3249_v55  ;;  %v3214_v16 = vld [vmem:[#allocation4 + $0x270] sm:$0xff]  ;;  %v3215_v55 = vld [vmem:[#allocation4 + $0x278] sm:$0xff] }
 0x9b8   :  { %3360 = vmatpush.msrb.mxu2 %v3250_v59  ;;  %3401 = vmatpush.msrb.mxu3 %v3251_v50  ;;  %v3208_v59 = vld [vmem:[#allocation4 + $0x240] sm:$0xff]  ;;  %v3209_v50 = vld [vmem:[#allocation4 + $0x248] sm:$0xff] }
 0x9b9   :  { %3279 = vmatpush.msra.mxu0 %v3244_v41  ;;  %3320 = vmatpush.msrb.mxu1 %v3245_v42  ;;  %v3210_v41 = vld [vmem:[#allocation4 + $0x250] sm:$0xff]  ;;  %v3211_v42 = vld [vmem:[#allocation4 + $0x258] sm:$0xff] }
 0x9ba   :  { %3361 = vmatpush.msrb.mxu2 %v3246_v40  ;;  %3402 = vmatpush.msrb.mxu3 %v3247_v60  ;;  %v3204_v40 = vld [vmem:[#allocation4 + $0x220] sm:$0xff] }
 0x9bb   :  { %3280 = vmatpush.msra.mxu0 %v3240_v8  ;;  %3321 = vmatpush.msrb.mxu1 %v3241_v4  ;;  %v3200_v8 = vld [vmem:[#allocation4 + $0x200] sm:$0xff]  ;;  %v3201_v4 = vld [vmem:[#allocation4 + $0x208] sm:$0xff] }
 0x9bc   :  { %3362 = vmatpush.msrb.mxu2 %v3242_v23  ;;  %3403 = vmatpush.msrb.mxu3 %v3243_v17 }
 0x9bd   :  { %3281 = vmatpush.msra.mxu0 %v3236_v19  ;;  %3322 = vmatpush.msrb.mxu1 %v3237_v1 }
 0x9be   :  { %3363 = vmatpush.msrb.mxu2 %v3238_v52  ;;  %3404 = vmatpush.msrb.mxu3 %v3239_v22 }
 0x9bf   :  { %3282 = vmatpush.msra.mxu0 %v3232_v31  ;;  %3323 = vmatpush.msrb.mxu1 %v3233_v15 }
 0x9c0   :  { %3364 = vmatpush.msrb.mxu2 %v3234_v46  ;;  %3405 = vmatpush.msrb.mxu3 %v3235_v61 }
 0x9c1   :  { %3283 = vmatpush.msra.mxu0 %v3228_v56  ;;  %3324 = vmatpush.msrb.mxu1 %v3229_v20 }
 0x9c2   :  { %3365 = vmatpush.msrb.mxu2 %v3230_v21  ;;  %3406 = vmatpush.msrb.mxu3 %v3231_v7 }
 0x9c3   :  { %3284 = vmatpush.msra.mxu0 %v3224_v0  ;;  %3325 = vmatpush.msrb.mxu1 %v3225_v14 }
 0x9c4   :  { %3366 = vmatpush.msrb.mxu2 %v3226_v27  ;;  %3407 = vmatpush.msrb.mxu3 %v3227_v25 }
 0x9c5   :  { %3285 = vmatpush.msra.mxu0 %v3220_v38  ;;  %3326 = vmatpush.msrb.mxu1 %v3221_v6 }
 0x9c6   :  { %3367 = vmatpush.msrb.mxu2 %v3222_v53  ;;  %3408 = vmatpush.msrb.mxu3 %v3223_v26 }
 0x9c7   :  { %3286 = vmatpush.msra.mxu0 %v3216_v24  ;;  %3327 = vmatpush.msrb.mxu1 %v3217_v9 }
 0x9c8   :  { %3368 = vmatpush.msrb.mxu2 %v3218_v48  ;;  %3409 = vmatpush.msrb.mxu3 %v3219_v63 }
 0x9c9   :  { %3287 = vmatpush.msra.mxu0 %v3212_v43  ;;  %3328 = vmatpush.msrb.mxu1 %v3213_v33  ;;  %v9633_v33 = vld [vmem:[#allocation23_spill] sm:$0xff] }
 0x9ca   :  { %3369 = vmatpush.msrb.mxu2 %v3214_v16  ;;  %3410 = vmatpush.msrb.mxu3 %v3215_v55  ;;  %v9634_v16 = vld [vmem:[#allocation40_spill] sm:$0xff]  ;;  %v7755_v55 = vld [vmem:[#allocation6 + $0x5e0] sm:$0xff] }
 0x9cb   :  { %3288 = vmatpush.msra.mxu0 %v3208_v59  ;;  %3329 = vmatpush.msrb.mxu1 %v3209_v50  ;;  %9635 = vst [vmem:[#allocation47_spill] sm:$0xff] %v7755_v55  ;;  %v7757_v59 = vld [vmem:[#allocation6 + $0x5e8] sm:$0xff]  ;;  %v7759_v50 = vld [vmem:[#allocation6 + $0x5c0] sm:$0xff] }
 0x9cc   :  { %3370 = vmatpush.msrb.mxu2 %v3210_v41  ;;  %3411 = vmatpush.msrb.mxu3 %v3211_v42  ;;  %v7763_v41 = vld [vmem:[#allocation6 + $0x5c8] sm:$0xff]  ;;  %v7765_v42 = vld [vmem:[#allocation6 + $0x5f8] sm:$0xff] }
 0x9cd   :  { %3289 = vmatpush.msra.mxu0 %v3204_v40  ;;  %9636 = vst [vmem:[#allocation41_spill] sm:$0xff] %v7763_v41  ;;  %v7768_v40 = vld [vmem:[#allocation6 + $0x5a0] sm:$0xff] }
 0x9ce   :  { %3371 = vmatpush.msrb.mxu2 %v3206_v29  ;;  %v9639_v29 = vld [vmem:[#allocation42_spill] sm:$0xff] }
 0x9cf   :  { %3290 = vmatpush.msra.mxu0 %v3200_v8  ;;  %v7803_v8 = vld [vmem:[#allocation6 + $0x588] sm:$0xff] }
 0xa2c   :  { %v2908_v12 = vpop.f32.mrf.mxu0  ;;  %v2928_v35 = vpop.f32.mrf.mxu1 }
 0xa2d   :  { %v2971_v3 = vadd.f32 %v2908_v12, %v1750_v5  ;;  %v2972_v13 = vadd.f32 %v2928_v35, %v1791_v54  ;;  %v3205_v5 = vld [vmem:[#allocation4 + $0x228] sm:$0xff]  ;;  %v3207_v54 = vld [vmem:[#allocation4 + $0x238] sm:$0xff] }
 0xa2e   :  { %v9631_v12 = vld [vmem:[#allocation12_spill] sm:$0xff]  ;;  %3330 = vmatpush.msrb.mxu1 %v3205_v5  ;;  %3412 = vmatpush.msrb.mxu3 %v3207_v54  ;;  %v7772_v5 = vld [vmem:[#allocation6 + $0x5d8] sm:$0xff]  ;;  %v7791_v54 = vld [vmem:[#allocation6 + $0x5f0] sm:$0xff] }
 0xa2f   :  { %v4889_v45 = vmul.f32 -1.442695, %v2971_v3  ;;  %v4890_v51 = vmul.f32 -1.442695, %v2972_v13  ;;  %v1832_v35 = vadd.f32 %v9631_v12, %v9626_v58  ;;  %v3202_v3 = vld [vmem:[#allocation4 + $0x210] sm:$0xff]  ;;  %v3203_v13 = vld [vmem:[#allocation4 + $0x218] sm:$0xff] }
 0xa30   :  { %3331 = vmatpush.msrb.mxu1 %v3201_v4  ;;  %3372 = vmatpush.msrb.mxu2 %v3202_v3  ;;  %9638 = vst [vmem:[#allocation56_spill] sm:$0xff] %v7772_v5  ;;  %v7799_v12 = vld [vmem:[#allocation6 + $0x5b0] sm:$0xff]  ;;  %v7811_v4 = vld [vmem:[#allocation6 + $0x568] sm:$0xff] }
 0xa31   :  { %5159 = vpow2.f32 %v4889_v45  ;;  %3413 = vmatpush.msrb.mxu3 %v3203_v13  ;;  %v7815_v3 = vld [vmem:[#allocation6 + $0x590] sm:$0xff]  ;;  %v7821_v13 = vld [vmem:[#allocation6 + $0x578] sm:$0xff] }
 0xa32   :  { %5161 = vpow2.f32 %v4890_v51 }
 0xa33   :  { %v2968_v2 = vpop.f32.mrf.mxu3  ;;  %v2948_v44 = vpop.f32.mrf.mxu2 }
 0xa34   :  { %v2974_v10 = vadd.f32 %v2968_v2, %v1873_v34  ;;  %v2973_v19 = vadd.f32 %v2948_v44, %v1832_v35  ;;  %v7770_v44 = vld [vmem:[#allocation6 + $0x5a8] sm:$0xff]  ;;  %v7801_v35 = vld [vmem:[#allocation6 + $0x580] sm:$0xff] }
 0xa35   :  { %9637 = vst [vmem:[#allocation44_spill] sm:$0xff] %v7770_v44 }
 0xa36   :  { %v4891_v32 = vmul.f32 -1.442695, %v2974_v10  ;;  %9641 = vst [vmem:[#allocation36_spill] sm:$0xff] %v7801_v35 }
 0xa37   :  { %v5160_v18 = vpop.eup %5159 }
 0xa38   :  { %v5162_v39 = vpop.eup %5161  ;;  %v7723_v28 = vadd.f32 1.0, %v5160_v18  ;;  %5163 = vpow2.f32 %v4891_v32 }
 0xa39   :  { %v7725_v37 = vadd.f32 1.0, %v5162_v39 }
 0xa3a   :  { %5165 = vrcp.f32 %v7723_v28  ;;  %v2990_v31 = vand.u32 2147483648, %v7723_v28  ;;  %v2988_v61 = vand.u32 2147483647, %v7723_v28  ;;  %vm2984_vm11 = vweird.f32 %v7723_v28 }
 0xa3b   :  { %5167 = vrcp.f32 %v7725_v37  ;;  %v3009_v15 = vand.u32 2147483648, %v7725_v37  ;;  %v3007_v34 = vand.u32 2147483647, %v7725_v37  ;;  %vm3003_vm12 = vweird.f32 %v7725_v37 }
 0xa3c   :  { %v2991_v21 = vor.u32 1.1754944e-38, %v2990_v31  ;;  %vm2989_vm15 = vcmp.eq.f32.partialorder %v2988_v61, 8.507059e+37  ;;  %v7835_v31 = vld [vmem:[#allocation6 + $0x558] sm:$0xff]  ;;  %v7839_v61 = vld [vmem:[#allocation6 + $0x550] sm:$0xff] }
 0xa3d   :  { %v3010_v10 = vor.u32 1.1754944e-38, %v3009_v15  ;;  %vm3008_vm0 = vcmp.eq.f32.partialorder %v3007_v34, 8.507059e+37 }
 0xa3e   :  { %v5164_v60 = vpop.eup %5163 }
 0xa3f   :  { %v3017_v23 = vadd.f32 1.0, %v5164_v60  ;;  %v7794_v60 = vld [vmem:[#allocation6 + $0x5d0] sm:$0xff] }
 0xa40   :  { %v5166_v17 = vpop.eup %5165 }
 0xa41   :  { %v5168_v1 = vpop.eup %5167  ;;  %v2980_v52 = vmul.f32 %v5166_v17, %v7723_v28  ;;  %5169 = vrcp.f32 %v3017_v23  ;;  %vm2985_vm9 = vweird.f32 %v5166_v17  ;;  %v3029_v9 = vand.u32 2147483648, %v3017_v23 }
 0xa42   :  { %v2999_v45 = vmul.f32 %v5168_v1, %v7725_v37  ;;  %5171 = vtanh.f32 %v2973_v19  ;;  %vm3004_vm10 = vweird.f32 %v5168_v1  ;;  %vm2986_vm13 = vmor %vm2984_vm11, %vm2985_vm9  ;;  %vm3023_vm2 = vweird.f32 %v3017_v23  ;;  %v9642_v19 = vld [vmem:[#allocation61_spill] sm:$0xff] }
 0xa43   :  { %v2981_v51 = vsub.f32 1.0, %v2980_v52  ;;  %vm3005_vm14 = vmor %vm3003_vm12, %vm3004_vm10  ;;  %v3027_v39 = vand.u32 2147483647, %v3017_v23  ;;  %v3030_v48 = vor.u32 1.1754944e-38, %v3029_v9  ;;  %v9643_v52 = vld [vmem:[#allocation64_spill] sm:$0xff]  ;;  %v7881_v9 = vld [vmem:[#allocation6 + $0x4a0] sm:$0xff] }
 0xa44   :  { %v3000_v22 = vsub.f32 1.0, %v2999_v45  ;;  %v1794_v45 = vadd.f32 %v9643_v52, %v9622_v36  ;;  %v7846_v36 = vld [vmem:[#allocation6 + $0x538] sm:$0xff]  ;;  %9646 = vst [vmem:[#allocation65_spill] sm:$0xff] %v7881_v9 }
 0xa45   :  { %v2982_v46 = vmul.f32 %v5166_v17, %v2981_v51  ;;  %vm3028_vm4 = vcmp.eq.f32.partialorder %v3027_v39, 8.507059e+37  ;;  %v7831_v51 = vld [vmem:[#allocation6 + $0x540] sm:$0xff]  ;;  %v7883_v39 = vld [vmem:[#allocation6 + $0x4a8] sm:$0xff] }
 0xa46   :  { %v3001_v49 = vmul.f32 %v5168_v1, %v3000_v22  ;;  %v7833_v22 = vld [vmem:[#allocation6 + $0x548] sm:$0xff]  ;;  %9647 = vst [vmem:[#allocation57_spill] sm:$0xff] %v7883_v39 }
 0xa47   :  { %v5170_v56 = vpop.eup %5169  ;;  %v2983_v20 = vadd.f32 %v5166_v17, %v2982_v46 }
 0xa48   :  { %v3002_v2 = vadd.f32 %v5168_v1, %v3001_v49  ;;  %v3019_v7 = vmul.f32 %v5170_v56, %v3017_v23  ;;  %v5172_v14 = vpop.eup %5171  ;;  %vm3024_vm1 = vweird.f32 %v5170_v56  ;;  %v7813_v23 = vld [vmem:[#allocation6 + $0x598] sm:$0xff] }
 0xa49   :  { %v2987_v0 = vsel %vm2986_vm13, %v5166_v17, %v2983_v20  ;;  %vm3025_vm3 = vmor %vm3023_vm2, %vm3024_vm1  ;;  %v7823_v17 = vld [vmem:[#allocation6 + $0x570] sm:$0xff] }
 0xa4a   :  { %v2992_v27 = vsel %vm2989_vm15, %v2991_v21, %v2987_v0  ;;  %v3006_v25 = vsel %vm3005_vm14, %v5168_v1, %v3002_v2  ;;  %v3020_v32 = vsub.f32 1.0, %v3019_v7  ;;  %v1753_v1 = vadd.f32 %v9642_v19, %v9620_v11  ;;  %v7841_v11 = vld [vmem:[#allocation6 + $0x520] sm:$0xff]  ;;  %v7851_v20 = vld [vmem:[#allocation6 + $0x530] sm:$0xff] }
 0xa4b   :  { %v3011_v38 = vsel %vm3008_vm0, %v3010_v10, %v3006_v25  ;;  %v3034_v6 = vmul.f32 %v5172_v14, %v2992_v27  ;;  %v7853_v7 = vld [vmem:[#allocation6 + $0x500] sm:$0xff]  ;;  %v7855_v10 = vld [vmem:[#allocation6 + $0x508] sm:$0xff]  ;;  %v7865_v27 = vld [vmem:[#allocation6 + $0x518] sm:$0xff] }
 0xa4c   :  { %v3033_v53 = vmul.f32 %v3011_v38, %v7708_v47  ;;  %v3021_v18 = vmul.f32 %v5170_v56, %v3020_v32  ;;  %v9632_v47 = vld [vmem:[#allocation69_spill] sm:$0xff]  ;;  %v7861_v0 = vld [vmem:[#allocation6 + $0x4e0] sm:$0xff]  ;;  %v7863_v14 = vld [vmem:[#allocation6 + $0x4e8] sm:$0xff] }
 0xa4d   :  { %v7868_v25 = vld [vmem:[#allocation6 + $0x4c0] sm:$0xff]  ;;  %v7870_v32 = vld [vmem:[#allocation6 + $0x4c8] sm:$0xff]  ;;  %v7872_v38 = vld [vmem:[#allocation6 + $0x4f8] sm:$0xff] }
 0xa4e   :  { %v7740_v26 = vadd.f32 %v3034_v6, %v3033_v53  ;;  %v3022_v24 = vadd.f32 %v5170_v56, %v3021_v18  ;;  %v9644_v6 = vld [vmem:[#allocation17_spill] sm:$0xff]  ;;  %v7878_v18 = vld [vmem:[#allocation6 + $0x4d8] sm:$0xff]  ;;  %v7907_v19 = vld [vmem:[#allocation6 + $0x460] sm:$0xff] }
 0xa4f   :  { %v1876_v53 = vadd.f32 %v9644_v6, %v9624_v57  ;;  %9645 = vst [vmem:[#allocation63_spill] sm:$0xff] %v7878_v18  ;;  %v7889_v57 = vld [vmem:[#allocation6 + $0x4b8] sm:$0xff]  ;;  %v7935_v6 = vld [vmem:[#allocation6 + $0x420] sm:$0xff] }
 0xa50   :  { %5173 = vtanh.f32 %v7740_v26  ;;  %v3026_v28 = vsel %vm3025_vm3, %v5170_v56, %v3022_v24  ;;  %v7843_v56 = vld [vmem:[#allocation6 + $0x528] sm:$0xff]  ;;  %9648 = vst [vmem:[#allocation58_spill] sm:$0xff] %v7889_v57 }
 0xa51   :  { %v3031_v37 = vsel %vm3028_vm4, %v3030_v48, %v3026_v28  ;;  %v7885_v28 = vld [vmem:[#allocation6 + $0x510] sm:$0xff]  ;;  %9653 = vst [vmem:[#allocation50_spill] sm:$0xff] %v7907_v19 }
 0xa52   :  { %9660 = vst [vmem:[#allocation16_spill] sm:$0xff] %v7935_v6 }
 0xa56   :  { %v5174_v63 = vpop.eup %5173 }
 0xa57   :  { %v3037_v43 = vmul.f32 %v5174_v63, %v3031_v37  ;;  %v7891_v63 = vld [vmem:[#allocation6 + $0x4f0] sm:$0xff]  ;;  %v7895_v37 = vld [vmem:[#allocation6 + $0x480] sm:$0xff] }
 0xa58   :  { %9649 = vst [vmem:[#allocation67_spill] sm:$0xff] %v7895_v37 }
 0xa59   :  { %3059 = vmatmul.f32.vlgmr.msrb.gmra.mxu0 %v3037_v43  ;;  %3079 = vmatmul.f32.vlgmr.msra.gmra.mxu1 %v3037_v43 }
 0xa5a   :  { %3099 = vmatmul.f32.vlgmr.msra.gmra.mxu2 %v3037_v43  ;;  %3119 = vmatmul.f32.vlgmr.msra.gmra.mxu3 %v3037_v43 }
 0xa5b   :  { %3540 = vmatpush.msrb.mxu0 %v7755_v55  ;;  %3560 = vmatpush.msra.mxu1 %v7757_v59 }
 0xa5c   :  { %3600 = vmatpush.msra.mxu3 %v7765_v42  ;;  %3580 = vmatpush.msra.mxu2 %v7791_v54 }
 0xa5d   :  { %3541 = vmatpush.msrb.mxu0 %v7759_v50  ;;  %3561 = vmatpush.msra.mxu1 %v7763_v41 }
 0xa5e   :  { %3601 = vmatpush.msra.mxu3 %v7772_v5  ;;  %3581 = vmatpush.msra.mxu2 %v7794_v60 }
 0xa5f   :  { %3542 = vmatpush.msrb.mxu0 %v7768_v40  ;;  %3562 = vmatpush.msra.mxu1 %v7770_v44 }
 0xa60   :  { %3582 = vmatpush.msra.mxu2 %v7799_v12 }
 0xa61   :  { %3291 = vmatmul.f32.vlgmr.msra.gmra.mxu0 %v9632_v47  ;;  %3332 = vmatmul.f32.vlgmr.msrb.gmra.mxu1 %v9632_v47 }
 0xa62   :  { %3373 = vmatmul.f32.vlgmr.msrb.gmra.mxu2 %v9632_v47  ;;  %3414 = vmatmul.f32.vlgmr.msrb.gmra.mxu3 %v9632_v47 }
 0xa63   :  { %3543 = vmatpush.msrb.mxu0 %v7801_v35  ;;  %3563 = vmatpush.msra.mxu1 %v7803_v8 }
 0xa64   :  { %3583 = vmatpush.msra.mxu2 %v7815_v3 }
 0xa65   :  { %3564 = vmatpush.msra.mxu1 %v7811_v4 }
 0xa66   :  { %3584 = vmatpush.msra.mxu2 %v7823_v17 }
 0xa67   :  { %3565 = vmatpush.msra.mxu1 %v7833_v22 }
 0xa68   :  { %3585 = vmatpush.msra.mxu2 %v7839_v61 }
 0xa69   :  { %3294 = vmatmul.f32.gmra.mxu0 %v9633_v33  ;;  %3335 = vmatmul.f32.gmra.mxu1 %v9633_v33 }
 0xa6a   :  { %3376 = vmatmul.f32.gmra.mxu2 %v9633_v33  ;;  %3417 = vmatmul.f32.gmra.mxu3 %v9633_v33  ;;  %v7901_v33 = vld [vmem:[#allocation6 + $0x498] sm:$0xff] }
 0xa6b   :  { %3566 = vmatpush.msra.mxu1 %v7843_v56  ;;  %3586 = vmatpush.msra.mxu2 %v7851_v20  ;;  %9651 = vst [vmem:[#allocation62_spill] sm:$0xff] %v7901_v33 }
 0xa6d   :  { %3567 = vmatpush.msra.mxu1 %v7855_v10  ;;  %3587 = vmatpush.msra.mxu2 %v7885_v28 }
 0xa6f   :  { %3568 = vmatpush.msra.mxu1 %v7863_v14  ;;  %3588 = vmatpush.msra.mxu2 %v7891_v63 }
 0xa71   :  { %3297 = vmatmul.f32.gmra.mxu0 %v9634_v16  ;;  %3338 = vmatmul.f32.gmra.mxu1 %v9634_v16 }
 0xa72   :  { %3379 = vmatmul.f32.gmra.mxu2 %v9634_v16  ;;  %3420 = vmatmul.f32.gmra.mxu3 %v9634_v16  ;;  %v7903_v16 = vld [vmem:[#allocation6 + $0x4d0] sm:$0xff] }
 0xa73   :  { %3569 = vmatpush.msra.mxu1 %v7870_v32  ;;  %9652 = vst [vmem:[#allocation51_spill] sm:$0xff] %v7903_v16  ;;  %3589 = vmatpush.msra.mxu2 %v7903_v16 }
 0xa75   :  { %3570 = vmatpush.msra.mxu1 %v7883_v39 }
 0xa79   :  { %3300 = vmatmul.f32.gmra.mxu0 %v9639_v29  ;;  %3341 = vmatmul.f32.gmra.mxu1 %v9639_v29 }
 0xa7a   :  { %3382 = vmatmul.f32.gmra.mxu2 %v9639_v29  ;;  %3423 = vmatmul.f32.gmra.mxu3 %v9639_v29 }
 0xa81   :  { %3303 = vmatmul.f32.gmra.mxu0 %v7629_v62  ;;  %3344 = vmatmul.f32.gmra.mxu1 %v7629_v62 }
 0xa82   :  { %3385 = vmatmul.f32.gmra.mxu2 %v7629_v62  ;;  %3426 = vmatmul.f32.gmra.mxu3 %v7629_v62  ;;  %v7797_v62 = vld [vmem:[#allocation6 + $0x5b8] sm:$0xff] }
 0xa83   :  { %9640 = vst [vmem:[#allocation55_spill] sm:$0xff] %v7797_v62  ;;  %3602 = vmatpush.msra.mxu3 %v7797_v62 }
 0xa85   :  { %3603 = vmatpush.msra.mxu3 %v7813_v23 }
 0xa87   :  { %3604 = vmatpush.msra.mxu3 %v7821_v13 }
 0xa89   :  { %3306 = vmatmul.f32.gmra.mxu0 %v7711_v30  ;;  %3347 = vmatmul.f32.gmra.mxu1 %v7711_v30 }
 0xa8a   :  { %3388 = vmatmul.f32.gmra.mxu2 %v7711_v30  ;;  %3429 = vmatmul.f32.gmra.mxu3 %v7711_v30  ;;  %v7806_v30 = vld [vmem:[#allocation6 + $0x560] sm:$0xff] }
 0xa8b   :  { %3544 = vmatpush.msrb.mxu0 %v7806_v30  ;;  %3605 = vmatpush.msra.mxu3 %v7835_v31 }
 0xa8d   :  { %3545 = vmatpush.msrb.mxu0 %v7831_v51  ;;  %3606 = vmatpush.msra.mxu3 %v7846_v36 }
 0xa8f   :  { %3546 = vmatpush.msrb.mxu0 %v7841_v11  ;;  %3607 = vmatpush.msra.mxu3 %v7865_v27 }
 0xa91   :  { %3309 = vmatmul.f32.gmra.mxu0 %v3037_v43  ;;  %3350 = vmatmul.f32.gmra.mxu1 %v3037_v43 }
 0xa92   :  { %3391 = vmatmul.f32.gmra.mxu2 %v3037_v43  ;;  %3432 = vmatmul.f32.gmra.mxu3 %v3037_v43  ;;  %v7897_v43 = vld [vmem:[#allocation6 + $0x488] sm:$0xff] }
 0xa93   :  { %3547 = vmatpush.msrb.mxu0 %v7853_v7  ;;  %3608 = vmatpush.msra.mxu3 %v7872_v38  ;;  %9650 = vst [vmem:[#allocation37_spill] sm:$0xff] %v7897_v43 }
 0xa94   :  { %3571 = vmatpush.msra.mxu1 %v7897_v43 }
 0xa95   :  { %3548 = vmatpush.msrb.mxu0 %v7861_v0  ;;  %3609 = vmatpush.msra.mxu3 %v7878_v18 }
 0xa97   :  { %3549 = vmatpush.msrb.mxu0 %v7868_v25  ;;  %3610 = vmatpush.msra.mxu3 %v7889_v57 }
 0xa99   :  { %3550 = vmatpush.msrb.mxu0 %v7881_v9  ;;  %3611 = vmatpush.msra.mxu3 %v7901_v33  ;;  %v7959_v33 = vld [vmem:[#allocation6 + $0x418] sm:$0xff] }
 0xa9a   :  { %9669 = vst [vmem:[#allocation22_spill] sm:$0xff] %v7959_v33 }
 0xa9b   :  { %3551 = vmatpush.msrb.mxu0 %v7895_v37 }
 0xa9d   :  { %3552 = vmatpush.msrb.mxu0 %v7907_v19 }
 0xad6   :  { %v3060_v15 = vpop.f32.mrf.mxu0  ;;  %v3080_v46 = vpop.f32.mrf.mxu1 }
 0xad7   :  { %v3123_v49 = vadd.f32 %v3060_v15, %v1753_v1  ;;  %v3124_v34 = vadd.f32 %v3080_v46, %v1794_v45  ;;  %v7909_v1 = vld [vmem:[#allocation6 + $0x468] sm:$0xff]  ;;  %v7915_v15 = vld [vmem:[#allocation6 + $0x4b0] sm:$0xff]  ;;  %v7917_v46 = vld [vmem:[#allocation6 + $0x478] sm:$0xff] }
 0xad8   :  { %9654 = vst [vmem:[#allocation49_spill] sm:$0xff] %v7909_v1  ;;  %3572 = vmatpush.msra.mxu1 %v7909_v1  ;;  %3590 = vmatpush.msra.mxu2 %v7915_v15  ;;  %v9666_v1 = vld [vmem:[#allocation45_spill] sm:$0xff] }
 0xad9   :  { %v4892_v21 = vmul.f32 -1.442695, %v3123_v49  ;;  %v4893_v2 = vmul.f32 -1.442695, %v3124_v34  ;;  %9655 = vst [vmem:[#allocation20_spill] sm:$0xff] %v7915_v15  ;;  %v7923_v34 = vld [vmem:[#allocation6 + $0x440] sm:$0xff]  ;;  %3612 = vmatpush.msra.mxu3 %v7917_v46  ;;  %v1835_v19 = vadd.f32 %v9666_v1, %v9626_v58 }
 0xada   :  { %9656 = vst [vmem:[#allocation52_spill] sm:$0xff] %v7917_v46  ;;  %3553 = vmatpush.msrb.mxu0 %v7923_v34  ;;  %v7967_v58 = vld [vmem:[#allocation6 + $0x430] sm:$0xff] }
 0xadb   :  { %5175 = vpow2.f32 %v4892_v21  ;;  %9657 = vst [vmem:[#allocation54_spill] sm:$0xff] %v7923_v34  ;;  %v7925_v21 = vld [vmem:[#allocation6 + $0x448] sm:$0xff]  ;;  %v7957_v34 = vld [vmem:[#allocation6 + $0x438] sm:$0xff] }
 0xadc   :  { %5177 = vpow2.f32 %v4893_v2  ;;  %9658 = vst [vmem:[#allocation53_spill] sm:$0xff] %v7925_v21  ;;  %v7930_v2 = vld [vmem:[#allocation6 + $0x490] sm:$0xff]  ;;  %3573 = vmatpush.msra.mxu1 %v7925_v21  ;;  %3554 = vmatpush.msrb.mxu0 %v7935_v6 }
 0xadd   :  { %v3120_v24 = vpop.f32.mrf.mxu3  ;;  %9659 = vst [vmem:[#allocation24_spill] sm:$0xff] %v7930_v2  ;;  %3591 = vmatpush.msra.mxu2 %v7930_v2  ;;  %v7955_v21 = vld [vmem:[#allocation6 + $0x450] sm:$0xff] }
 0xade   :  { %v3126_v48 = vadd.f32 %v3120_v24, %v1876_v53  ;;  %v7937_v53 = vld [vmem:[#allocation6 + $0x428] sm:$0xff]  ;;  %v7939_v24 = vld [vmem:[#allocation6 + $0x458] sm:$0xff]  ;;  %9667 = vst [vmem:[#allocation18_spill] sm:$0xff] %v7955_v21 }
 0xadf   :  { %9661 = vst [vmem:[#allocation21_spill] sm:$0xff] %v7937_v53  ;;  %3613 = vmatpush.msra.mxu3 %v7939_v24  ;;  %3574 = vmatpush.msra.mxu1 %v7937_v53 }
 0xae0   :  { %v4894_v47 = vmul.f32 -1.442695, %v3126_v48  ;;  %9662 = vst [vmem:[#allocation15_spill] sm:$0xff] %v7939_v24  ;;  %v7943_v48 = vld [vmem:[#allocation6 + $0x470] sm:$0xff] }
 0xae1   :  { %v5176_v29 = vpop.eup %5175  ;;  %9663 = vst [vmem:[#allocation27_spill] sm:$0xff] %v7943_v48  ;;  %3592 = vmatpush.msra.mxu2 %v7943_v48  ;;  %3614 = vmatpush.msra.mxu3 %v7957_v34 }
 0xae2   :  { %v5178_v52 = vpop.eup %5177  ;;  %v7911_v45 = vadd.f32 1.0, %v5176_v29  ;;  %5179 = vpow2.f32 %v4894_v47  ;;  %v3100_v47 = vpop.f32.mrf.mxu2  ;;  %v7947_v29 = vld [vmem:[#allocation6 + $0x400] sm:$0xff]  ;;  %9668 = vst [vmem:[#allocation26_spill] sm:$0xff] %v7957_v34  ;;  %v7974_v34 = vld [vmem:[#allocation6 + $0x410] sm:$0xff] }
 0xae3   :  { %v7919_v49 = vadd.f32 1.0, %v5178_v52  ;;  %9664 = vst [vmem:[#allocation28_spill] sm:$0xff] %v7947_v29  ;;  %v7949_v52 = vld [vmem:[#allocation6 + $0x408] sm:$0xff]  ;;  %v3125_v43 = vadd.f32 %v3100_v47, %v1835_v19  ;;  %3555 = vmatpush.msrb.mxu0 %v7947_v29  ;;  %3593 = vmatpush.msra.mxu2 %v7955_v21 }
 0xae4   :  { %5181 = vrcp.f32 %v7911_v45  ;;  %9665 = vst [vmem:[#allocation25_spill] sm:$0xff] %v7949_v52  ;;  %3575 = vmatpush.msra.mxu1 %v7949_v52  ;;  %3615 = vmatpush.msra.mxu3 %v7959_v33  ;;  %v3142_v52 = vand.u32 2147483648, %v7911_v45  ;;  %vm3136_vm7 = vweird.f32 %v7911_v45 }
 0xae5   :  { %5183 = vrcp.f32 %v7919_v49  ;;  %9670 = vst [vmem:[#allocation31_spill] sm:$0xff] %v7967_v58  ;;  %3691 = vmatpush.msra.mxu0 %v7755_v55  ;;  %3594 = vmatpush.msra.mxu2 %v7967_v58  ;;  %v3161_v33 = vand.u32 2147483648, %v7919_v49  ;;  %v3140_v55 = vand.u32 2147483647, %v7911_v45  ;;  %vm3155_vm8 = vweird.f32 %v7919_v49 }
 0xae6   :  { %9671 = vst [vmem:[#allocation29_spill] sm:$0xff] %v7974_v34  ;;  %3711 = vmatpush.msrb.mxu1 %v7757_v59  ;;  %3751 = vmatpush.msrb.mxu3 %v7765_v42 }
 0xae7   :  { %3692 = vmatpush.msra.mxu0 %v7759_v50  ;;  %3595 = vmatpush.msra.mxu2 %v7974_v34  ;;  %vm3141_vm11 = vcmp.eq.f32.partialorder %v3140_v55, 8.507059e+37 }
 0xae8   :  { %v5180_v46 = vpop.eup %5179  ;;  %3712 = vmatpush.msrb.mxu1 %v7763_v41  ;;  %3752 = vmatpush.msrb.mxu3 %v7772_v5 }
 0xae9   :  { %v7961_v2 = vadd.f32 1.0, %v5180_v46  ;;  %3731 = vmatpush.msrb.mxu2 %v7791_v54  ;;  %3693 = vmatpush.msra.mxu0 %v7768_v40 }
 0xaea   :  { %v5182_v24 = vpop.eup %5181  ;;  %3713 = vmatpush.msrb.mxu1 %v7770_v44  ;;  %3753 = vmatpush.msrb.mxu3 %v7797_v62 }
 0xaeb   :  { %v5184_v1 = vpop.eup %5183  ;;  %v3132_v53 = vmul.f32 %v5182_v24, %v7911_v45  ;;  %5185 = vrcp.f32 %v7961_v2  ;;  %vm3137_vm5 = vweird.f32 %v5182_v24  ;;  %3732 = vmatpush.msrb.mxu2 %v7794_v60  ;;  %3694 = vmatpush.msra.mxu0 %v7801_v35  ;;  %v3162_v45 = vor.u32 1.1754944e-38, %v3161_v33 }
 0xaec   :  { %v3151_v46 = vmul.f32 %v5184_v1, %v7919_v49  ;;  %5187 = vtanh.f32 %v3125_v43  ;;  %vm3156_vm6 = vweird.f32 %v5184_v1  ;;  %vm3138_vm9 = vmor %vm3136_vm7, %vm3137_vm5  ;;  %3714 = vmatpush.msrb.mxu1 %v7803_v8  ;;  %3754 = vmatpush.msrb.mxu3 %v7813_v23  ;;  %vm3175_vm14 = vweird.f32 %v7961_v2 }
 0xaed   :  { %v3133_v19 = vsub.f32 1.0, %v3132_v53  ;;  %vm3157_vm10 = vmor %vm3155_vm8, %vm3156_vm6  ;;  %3733 = vmatpush.msrb.mxu2 %v7799_v12  ;;  %3695 = vmatpush.msra.mxu0 %v7806_v30 }
 0xaee   :  { %v3152_v47 = vsub.f32 1.0, %v3151_v46  ;;  %v3159_v46 = vand.u32 2147483647, %v7919_v49  ;;  %3715 = vmatpush.msrb.mxu1 %v7811_v4  ;;  %3755 = vmatpush.msrb.mxu3 %v7821_v13 }
 0xaef   :  { %v3134_v29 = vmul.f32 %v5182_v24, %v3133_v19  ;;  %v3143_v19 = vor.u32 1.1754944e-38, %v3142_v52  ;;  %3734 = vmatpush.msrb.mxu2 %v7815_v3  ;;  %3696 = vmatpush.msra.mxu0 %v7831_v51 }
 0xaf0   :  { %v3153_v53 = vmul.f32 %v5184_v1, %v3152_v47  ;;  %vm3160_vm12 = vcmp.eq.f32.partialorder %v3159_v46, 8.507059e+37  ;;  %3716 = vmatpush.msrb.mxu1 %v7833_v22  ;;  %3756 = vmatpush.msrb.mxu3 %v7835_v31  ;;  %v9672_v46 = vld [vmem:[#allocation37_spill] sm:$0xff] }
 0xaf1   :  { %v7990_v43 = vpop.eup %5185  ;;  %v3135_v41 = vadd.f32 %v5182_v24, %v3134_v29  ;;  %3735 = vmatpush.msrb.mxu2 %v7823_v17  ;;  %3697 = vmatpush.msra.mxu0 %v7841_v11 }
 0xaf2   :  { %v3154_v47 = vadd.f32 %v5184_v1, %v3153_v53  ;;  %v3171_v5 = vmul.f32 %v7990_v43, %v7961_v2  ;;  %v5188_v49 = vpop.eup %5187  ;;  %vm3176_vm13 = vweird.f32 %v7990_v43  ;;  %3717 = vmatpush.msrb.mxu1 %v7843_v56  ;;  %3757 = vmatpush.msrb.mxu3 %v7846_v36 }
 0xaf3   :  { %v3139_v29 = vsel %vm3138_vm9, %v5182_v24, %v3135_v41  ;;  %3736 = vmatpush.msrb.mxu2 %v7839_v61  ;;  %3698 = vmatpush.msra.mxu0 %v7853_v7  ;;  %vm3177_vm15 = vmor %vm3175_vm14, %vm3176_vm13 }
 0xaf4   :  { %v3144_v62 = vsel %vm3141_vm11, %v3143_v19, %v3139_v29  ;;  %v3158_v52 = vsel %vm3157_vm10, %v5184_v1, %v3154_v47  ;;  %v3172_v53 = vsub.f32 1.0, %v3171_v5  ;;  %3718 = vmatpush.msrb.mxu1 %v7855_v10  ;;  %3758 = vmatpush.msrb.mxu3 %v7865_v27  ;;  %v9674_v19 = vld [vmem:[#allocation24_spill] sm:$0xff]  ;;  %v9675_v47 = vld [vmem:[#allocation50_spill] sm:$0xff] }
 0xaf5   :  { %v3163_v44 = vsel %vm3160_vm12, %v3162_v45, %v3158_v52  ;;  %v3186_v35 = vmul.f32 %v5188_v49, %v3144_v62  ;;  %3737 = vmatpush.msrb.mxu2 %v7851_v20  ;;  %3699 = vmatpush.msra.mxu0 %v7861_v0  ;;  %v9676_v45 = vld [vmem:[#allocation49_spill] sm:$0xff]  ;;  %v9677_v29 = vld [vmem:[#allocation52_spill] sm:$0xff]  ;;  %v9678_v49 = vld [vmem:[#allocation54_spill] sm:$0xff] }
 0xaf6   :  { %v3185_v55 = vmul.f32 %v3163_v44, %v7740_v26  ;;  %v3173_v41 = vmul.f32 %v7990_v43, %v3172_v53  ;;  %v3181_v26 = vand.u32 2147483648, %v7961_v2  ;;  %v3179_v44 = vand.u32 2147483647, %v7961_v2  ;;  %3719 = vmatpush.msrb.mxu1 %v7863_v14  ;;  %3759 = vmatpush.msrb.mxu3 %v7872_v38  ;;  %v9679_v52 = vld [vmem:[#allocation53_spill] sm:$0xff]  ;;  %v9680_v53 = vld [vmem:[#allocation15_spill] sm:$0xff] }
 0xaf7   :  { %3738 = vmatpush.msrb.mxu2 %v7885_v28  ;;  %3700 = vmatpush.msra.mxu0 %v7868_v25 }
 0xaf8   :  { %v3187_v5 = vadd.f32 %v3186_v35, %v3185_v55  ;;  %v3174_v62 = vadd.f32 %v7990_v43, %v3173_v41  ;;  %v3182_v33 = vor.u32 1.1754944e-38, %v3181_v26  ;;  %vm3180_vm0 = vcmp.eq.f32.partialorder %v3179_v44, 8.507059e+37  ;;  %3720 = vmatpush.msrb.mxu1 %v7870_v32  ;;  %3760 = vmatpush.msrb.mxu3 %v7878_v18  ;;  %v9682_v41 = vld [vmem:[#allocation21_spill] sm:$0xff]  ;;  %v9686_v44 = vld [vmem:[#allocation22_spill] sm:$0xff] }
 0xaf9   :  { %3739 = vmatpush.msrb.mxu2 %v7891_v63  ;;  %3701 = vmatpush.msra.mxu0 %v7881_v9  ;;  %v9681_v55 = vmov 0.0   ;;  %v9685_v26 = vld [vmem:[#allocation25_spill] sm:$0xff] }
 0xafa   :  { %5189 = vtanh.f32 %v3187_v5  ;;  %v3178_v35 = vsel %vm3177_vm15, %v7990_v43, %v3174_v62  ;;  %3721 = vmatpush.msrb.mxu1 %v7883_v39  ;;  %3761 = vmatpush.msrb.mxu3 %v7889_v57  ;;  %v9673_v43 = vld [vmem:[#allocation62_spill] sm:$0xff]  ;;  %v9684_v62 = vld [vmem:[#allocation28_spill] sm:$0xff] }
 0xafb   :  { %v3183_v24 = vsel %vm3180_vm0, %v3182_v33, %v3178_v35  ;;  %3740 = vmatpush.msrb.mxu2 %v7903_v16  ;;  %3702 = vmatpush.msra.mxu0 %v7895_v37  ;;  %v9683_v5 = vld [vmem:[#allocation26_spill] sm:$0xff]  ;;  %v9687_v35 = vld [vmem:[#allocation47_spill] sm:$0xff]  ;;  %v9688_v33 = vld [vmem:[#allocation41_spill] sm:$0xff] }
 0xafc   :  { %3722 = vmatpush.msrb.mxu1 %v9672_v46  ;;  %3762 = vmatpush.msrb.mxu3 %v9673_v43 }
 0xafd   :  { %3741 = vmatpush.msrb.mxu2 %v7915_v15  ;;  %3703 = vmatpush.msra.mxu0 %v9675_v47 }
 0xafe   :  { %3723 = vmatpush.msrb.mxu1 %v9676_v45  ;;  %3763 = vmatpush.msrb.mxu3 %v9677_v29 }
 0xaff   :  { %3742 = vmatpush.msrb.mxu2 %v9674_v19  ;;  %3704 = vmatpush.msra.mxu0 %v9678_v49 }
 0xb00   :  { %v5190_v2 = vpop.eup %5189  ;;  %3724 = vmatpush.msrb.mxu1 %v9679_v52  ;;  %3764 = vmatpush.msrb.mxu3 %v9680_v53 }
 0xb01   :  { %v3189_v1 = vmul.f32 %v5190_v2, %v3183_v24  ;;  %3743 = vmatpush.msrb.mxu2 %v7943_v48  ;;  %3705 = vmatpush.msra.mxu0 %v7935_v6  ;;  %v9689_v2 = vld [vmem:[#allocation56_spill] sm:$0xff] }
 0xb02   :  { %3725 = vmatpush.msrb.mxu1 %v9682_v41  ;;  %3765 = vmatpush.msrb.mxu3 %v9683_v5  ;;  %v9690_v24 = vld [vmem:[#allocation44_spill] sm:$0xff] }
 0xb03   :  { %3312 = vmatmul.f32.gmra.mxu0 %v3189_v1  ;;  %3353 = vmatmul.f32.gmra.mxu1 %v3189_v1 }
 0xb04   :  { %3394 = vmatmul.f32.gmra.mxu2 %v3189_v1  ;;  %3435 = vmatmul.f32.gmra.mxu3 %v3189_v1  ;;  %v9691_v1 = vld [vmem:[#allocation55_spill] sm:$0xff] }
 0xb05   :  { %3744 = vmatpush.msrb.mxu2 %v7955_v21  ;;  %3706 = vmatpush.msra.mxu0 %v9684_v62 }
 0xb06   :  { %3726 = vmatpush.msrb.mxu1 %v9685_v26  ;;  %3766 = vmatpush.msrb.mxu3 %v9686_v44 }
 0xb07   :  { %3745 = vmatpush.msrb.mxu2 %v7967_v58 }
 0xb09   :  { %3746 = vmatpush.msrb.mxu2 %v7974_v34 }
 0xb0b   :  { %3556 = vmatmul.f32.vlgmr.msrb.gmra.mxu0 %v9681_v55  ;;  %3576 = vmatmul.f32.vlgmr.msra.gmra.mxu1 %v9681_v55 }
 0xb0c   :  { %3596 = vmatmul.f32.vlgmr.msra.gmra.mxu2 %v9681_v55  ;;  %3616 = vmatmul.f32.vlgmr.msra.gmra.mxu3 %v9681_v55  ;;  %v9692_v55 = vld [vmem:[#allocation36_spill] sm:$0xff] }
 0xb0d   :  { %3842 = vmatpush.msrb.mxu0 %v9687_v35  ;;  %3862 = vmatpush.msra.mxu1 %v7757_v59 }
 0xb0e   :  { %3882 = vmatpush.msra.mxu2 %v7791_v54  ;;  %3902 = vmatpush.msra.mxu3 %v7765_v42 }
 0xb0f   :  { %3843 = vmatpush.msrb.mxu0 %v7759_v50  ;;  %3863 = vmatpush.msra.mxu1 %v9688_v33 }
 0xb10   :  { %3883 = vmatpush.msra.mxu2 %v7794_v60  ;;  %3903 = vmatpush.msra.mxu3 %v9689_v2 }
 0xb11   :  { %3844 = vmatpush.msrb.mxu0 %v7768_v40  ;;  %3864 = vmatpush.msra.mxu1 %v9690_v24 }
 0xb12   :  { %3884 = vmatpush.msra.mxu2 %v7799_v12  ;;  %3904 = vmatpush.msra.mxu3 %v9691_v1 }
 0xb13   :  { %3845 = vmatpush.msrb.mxu0 %v9692_v55  ;;  %3865 = vmatpush.msra.mxu1 %v7803_v8 }
 0xb14   :  { %3885 = vmatpush.msra.mxu2 %v7815_v3  ;;  %3905 = vmatpush.msra.mxu3 %v7813_v23 }
 0xb15   :  { %3846 = vmatpush.msrb.mxu0 %v7806_v30  ;;  %3866 = vmatpush.msra.mxu1 %v7811_v4 }
 0xb16   :  { %3886 = vmatpush.msra.mxu2 %v7823_v17  ;;  %3906 = vmatpush.msra.mxu3 %v7821_v13 }
 0xb17   :  { %3847 = vmatpush.msrb.mxu0 %v7831_v51  ;;  %3867 = vmatpush.msra.mxu1 %v7833_v22 }
 0xb18   :  { %3887 = vmatpush.msra.mxu2 %v7839_v61  ;;  %3907 = vmatpush.msra.mxu3 %v7835_v31 }
 0xb19   :  { %3848 = vmatpush.msrb.mxu0 %v7841_v11  ;;  %3868 = vmatpush.msra.mxu1 %v7843_v56 }
 0xb1a   :  { %3888 = vmatpush.msra.mxu2 %v7851_v20  ;;  %3908 = vmatpush.msra.mxu3 %v7846_v36 }
 0xb1b   :  { %3849 = vmatpush.msrb.mxu0 %v7853_v7  ;;  %3869 = vmatpush.msra.mxu1 %v7855_v10 }
 0xb1c   :  { %3889 = vmatpush.msra.mxu2 %v7885_v28  ;;  %3909 = vmatpush.msra.mxu3 %v7865_v27 }
 0xb1d   :  { %3850 = vmatpush.msrb.mxu0 %v7861_v0  ;;  %3870 = vmatpush.msra.mxu1 %v7863_v14 }
 0xb1e   :  { %3890 = vmatpush.msra.mxu2 %v7891_v63  ;;  %3910 = vmatpush.msra.mxu3 %v7872_v38 }
 0xb1f   :  { %3851 = vmatpush.msrb.mxu0 %v7868_v25  ;;  %3871 = vmatpush.msra.mxu1 %v7870_v32 }
 0xb20   :  { %3891 = vmatpush.msra.mxu2 %v7903_v16  ;;  %3911 = vmatpush.msra.mxu3 %v7878_v18 }
 0xb21   :  { %3852 = vmatpush.msrb.mxu0 %v7881_v9  ;;  %3872 = vmatpush.msra.mxu1 %v7883_v39 }
 0xb22   :  { %3892 = vmatpush.msra.mxu2 %v7915_v15  ;;  %3912 = vmatpush.msra.mxu3 %v7889_v57 }
 0xb23   :  { %3853 = vmatpush.msrb.mxu0 %v7895_v37  ;;  %3873 = vmatpush.msra.mxu1 %v9672_v46 }
 0xb24   :  { %3893 = vmatpush.msra.mxu2 %v9674_v19  ;;  %3913 = vmatpush.msra.mxu3 %v9673_v43 }
 0xb25   :  { %3854 = vmatpush.msrb.mxu0 %v9675_v47  ;;  %3874 = vmatpush.msra.mxu1 %v9676_v45 }
 0xb26   :  { %3894 = vmatpush.msra.mxu2 %v7943_v48  ;;  %3914 = vmatpush.msra.mxu3 %v9677_v29 }
 0xb27   :  { %3855 = vmatpush.msrb.mxu0 %v9678_v49  ;;  %3875 = vmatpush.msra.mxu1 %v9679_v52  ;;  %v3292_v52 = vpop.f32.mrf.mxu0  ;;  %v3415_v49 = vpop.f32.mrf.mxu3 }
 0xb28   :  { %3895 = vmatpush.msra.mxu2 %v7955_v21  ;;  %3915 = vmatpush.msra.mxu3 %v9680_v53  ;;  %v3333_v21 = vpop.f32.mrf.mxu1 }
 0xb29   :  { %3856 = vmatpush.msrb.mxu0 %v7935_v6  ;;  %3876 = vmatpush.msra.mxu1 %v9682_v41  ;;  %v3374_v41 = vpop.f32.mrf.mxu2 }
 0xb2a   :  { %3896 = vmatpush.msra.mxu2 %v7967_v58  ;;  %3916 = vmatpush.msra.mxu3 %v9683_v5 }
 0xb2b   :  { %3857 = vmatpush.msrb.mxu0 %v9684_v62  ;;  %3877 = vmatpush.msra.mxu1 %v9685_v26 }
 0xb2c   :  { %3897 = vmatpush.msra.mxu2 %v7974_v34  ;;  %3917 = vmatpush.msra.mxu3 %v9686_v44 }
 0xb2f   :  { %v8130_v53 = vpop.f32.mrf.mxu0  ;;  %v8134_v29 = vpop.f32.mrf.mxu3 }
 0xb30   :  { %9693 = vst [vmem:[#allocation34_spill] sm:$0xff] %v8130_v53  ;;  %v8132_v6 = vpop.f32.mrf.mxu1 }
 0xb31   :  { %9694 = vst [vmem:[#allocation30_spill] sm:$0xff] %v8132_v6  ;;  %v8140_v62 = vpop.f32.mrf.mxu2 }
 0xb32   :  { %9695 = vst [vmem:[#allocation33_spill] sm:$0xff] %v8134_v29 }
 0xb33   :  { %9698 = vst [vmem:[#allocation43_spill] sm:$0xff] %v8140_v62 }
 0xb37   :  { %v8136_v58 = vpop.f32.mrf.mxu0  ;;  %v8142_v26 = vpop.f32.mrf.mxu3 }
 0xb38   :  { %9696 = vst [vmem:[#allocation32_spill] sm:$0xff] %v8136_v58  ;;  %v8138_v5 = vpop.f32.mrf.mxu1 }
 0xb39   :  { %9697 = vst [vmem:[#allocation39_spill] sm:$0xff] %v8138_v5  ;;  %v8148_v48 = vpop.f32.mrf.mxu2 }
 0xb3a   :  { %9699 = vst [vmem:[#allocation35_spill] sm:$0xff] %v8142_v26 }
 0xb3b   :  { %9702 = vst [vmem:[#allocation11_spill] sm:$0xff] %v8148_v48 }
 0xb3f   :  { %v8144_v34 = vpop.f32.mrf.mxu0  ;;  %v8150_v53 = vpop.f32.mrf.mxu3 }
 0xb40   :  { %9700 = vst [vmem:[#allocation66_spill] sm:$0xff] %v8144_v34  ;;  %v8146_v44 = vpop.f32.mrf.mxu1 }
 0xb41   :  { %9701 = vst [vmem:[#allocation59_spill] sm:$0xff] %v8146_v44  ;;  %v8156_v29 = vpop.f32.mrf.mxu2 }
 0xb42   :  { %9703 = vst [vmem:[#allocation60_spill] sm:$0xff] %v8150_v53 }
 0xb43   :  { %9706 = vst [vmem:[#allocation48_spill] sm:$0xff] %v8156_v29 }
 0xb47   :  { %v8152_v6 = vpop.f32.mrf.mxu0  ;;  %v8158_v58 = vpop.f32.mrf.mxu3 }
 0xb48   :  { %9704 = vst [vmem:[#allocation19_spill] sm:$0xff] %v8152_v6  ;;  %v8154_v45 = vpop.f32.mrf.mxu1 }
 0xb49   :  { %9705 = vst [vmem:[#allocation68_spill] sm:$0xff] %v8154_v45  ;;  %v8164_v26 = vpop.f32.mrf.mxu2 }
 0xb4a   :  { %9707 = vst [vmem:[#allocation46_spill] sm:$0xff] %v8158_v58  ;;  %v4895_v58 = vld [vmem:[%s8743_s4 + $0x8] sm:$0xf] }
 0xb4b   :  { %9710 = vst [vmem:[#allocation38_spill] sm:$0xff] %v8164_v26  ;;  %v8185_v26 = vperm.slane %v4895_v58, 1  ;;  %v8193_v19 = vperm.slane %v4895_v58, 3 }
 0xb4d   :  { %9719 = vst [vmem:[#allocation45_spill] sm:$0xff] %v8185_v26  ;;  %v3416_v46 = vadd.f32 %v3415_v49, %v8193_v19 }
 0xb4e   :  { %9722 = vst [vmem:[#allocation56_spill] sm:$0xff] %v8193_v19 }
 0xb4f   :  { %v8160_v5 = vpop.f32.mrf.mxu0  ;;  %v8166_v34 = vpop.f32.mrf.mxu3 }
 0xb50   :  { %9708 = vst [vmem:[#allocation13_spill] sm:$0xff] %v8160_v5  ;;  %v8162_v62 = vpop.f32.mrf.mxu1 }
 0xb51   :  { %9709 = vst [vmem:[#allocation14_spill] sm:$0xff] %v8162_v62  ;;  %v8172_v53 = vpop.f32.mrf.mxu2  ;;  %v8183_v62 = vperm.slane %v4895_v58, 0 }
 0xb52   :  { %9711 = vst [vmem:[#allocation12_spill] sm:$0xff] %v8166_v34 }
 0xb53   :  { %9714 = vst [vmem:[#allocation40_spill] sm:$0xff] %v8172_v53 }
 0xb54   :  { %9718 = vst [vmem:[#allocation17_spill] sm:$0xff] %v8183_v62 }
 0xb57   :  { %v8168_v44 = vpop.f32.mrf.mxu0  ;;  %v8174_v6 = vpop.f32.mrf.mxu3 }
 0xb58   :  { %9712 = vst [vmem:[#allocation69_spill] sm:$0xff] %v8168_v44  ;;  %v8170_v48 = vpop.f32.mrf.mxu1  ;;  %v3293_v44 = vadd.f32 %v3292_v52, %v8183_v62 }
 0xb59   :  { %9713 = vst [vmem:[#allocation23_spill] sm:$0xff] %v8170_v48  ;;  %v3334_v48 = vadd.f32 %v3333_v21, %v8185_v26  ;;  %v8189_v34 = vpop.f32.mrf.mxu2 }
 0xb5a   :  { %9715 = vst [vmem:[#allocation42_spill] sm:$0xff] %v8174_v6 }
 0xb5b   :  { %9720 = vst [vmem:[#allocation47_spill] sm:$0xff] %v8189_v34 }
 0xb80   :  { %v8179_v45 = vpop.f32.mrf.mxu0  ;;  %v8181_v5 = vpop.f32.mrf.mxu1 }
 0xb81   :  { %9716 = vst [vmem:[#allocation61_spill] sm:$0xff] %v8179_v45 }
 0xb82   :  { %9717 = vst [vmem:[#allocation64_spill] sm:$0xff] %v8181_v5 }
 0xb87   :  { %v8191_v53 = vpop.f32.mrf.mxu3  ;;  %v8196_v37 = vpop.f32.mrf.mxu2 }
 0xb88   :  { %9721 = vst [vmem:[#allocation41_spill] sm:$0xff] %v8191_v53  ;;  %v3557_v6 = vpop.f32.mrf.mxu0  ;;  %v3577_v29 = vpop.f32.mrf.mxu1 }
 0xb89   :  { %v3620_v47 = vadd.f32 %v3557_v6, %v3293_v44  ;;  %v3621_v43 = vadd.f32 %v3577_v29, %v3334_v48  ;;  %9723 = vst [vmem:[#allocation44_spill] sm:$0xff] %v8196_v37  ;;  %v8198_v6 = vperm.slane %v4895_v58, 2 }
 0xb8b   :  { %v4896_v45 = vmul.f32 -1.442695, %v3620_v47  ;;  %v4897_v5 = vmul.f32 -1.442695, %v3621_v43  ;;  %9724 = vst [vmem:[#allocation55_spill] sm:$0xff] %v8198_v6  ;;  %v3375_v47 = vadd.f32 %v3374_v41, %v8198_v6 }
 0xb8d   :  { %5191 = vpow2.f32 %v4896_v45 }
 0xb8e   :  { %5193 = vpow2.f32 %v4897_v5 }
 0xb8f   :  { %v3617_v52 = vpop.f32.mrf.mxu3  ;;  %v3597_v48 = vpop.f32.mrf.mxu2 }
 0xb90   :  { %v3623_v21 = vadd.f32 %v3617_v52, %v3416_v46  ;;  %v3622_v49 = vadd.f32 %v3597_v48, %v3375_v47 }
 0xb92   :  { %v4898_v26 = vmul.f32 -1.442695, %v3623_v21 }
 0xb93   :  { %v5192_v34 = vpop.eup %5191 }
 0xb94   :  { %v5194_v62 = vpop.eup %5193  ;;  %v3627_v53 = vadd.f32 1.0, %v5192_v34  ;;  %5195 = vpow2.f32 %v4898_v26 }
 0xb95   :  { %v3646_v57 = vadd.f32 1.0, %v5194_v62 }
 0xb96   :  { %5197 = vrcp.f32 %v3627_v53  ;;  %v3639_v34 = vand.u32 2147483648, %v3627_v53  ;;  %v3637_v26 = vand.u32 2147483647, %v3627_v53  ;;  %vm3633_vm3 = vweird.f32 %v3627_v53 }
 0xb97   :  { %5199 = vrcp.f32 %v3646_v57  ;;  %v3658_v62 = vand.u32 2147483648, %v3646_v57  ;;  %v3656_v19 = vand.u32 2147483647, %v3646_v57  ;;  %vm3652_vm4 = vweird.f32 %v3646_v57 }
 0xb98   :  { %v3640_v48 = vor.u32 1.1754944e-38, %v3639_v34  ;;  %vm3638_vm6 = vcmp.eq.f32.partialorder %v3637_v26, 8.507059e+37 }
 0xb99   :  { %v3659_v6 = vor.u32 1.1754944e-38, %v3658_v62  ;;  %vm3657_vm8 = vcmp.eq.f32.partialorder %v3656_v19, 8.507059e+37 }
 0xb9a   :  { %v5196_v43 = vpop.eup %5195 }
 0xb9b   :  { %v3666_v45 = vadd.f32 1.0, %v5196_v43 }
 0xb9c   :  { %v5198_v29 = vpop.eup %5197 }
 0xb9d   :  { %v5200_v5 = vpop.eup %5199  ;;  %v3629_v44 = vmul.f32 %v5198_v29, %v3627_v53  ;;  %5201 = vrcp.f32 %v3666_v45  ;;  %vm3634_vm1 = vweird.f32 %v5198_v29  ;;  %vm3672_vm10 = vweird.f32 %v3666_v45 }
 0xb9e   :  { %v3648_v46 = vmul.f32 %v5200_v5, %v3646_v57  ;;  %5203 = vtanh.f32 %v3622_v49  ;;  %vm3653_vm2 = vweird.f32 %v5200_v5  ;;  %vm3635_vm5 = vmor %vm3633_vm3, %vm3634_vm1  ;;  %v3676_v53 = vand.u32 2147483647, %v3666_v45 }
 0xb9f   :  { %v3630_v52 = vsub.f32 1.0, %v3629_v44  ;;  %vm3654_vm7 = vmor %vm3652_vm4, %vm3653_vm2 }
 0xba0   :  { %v3649_v21 = vsub.f32 1.0, %v3648_v46  ;;  %vm3677_vm12 = vcmp.eq.f32.partialorder %v3676_v53, 8.507059e+37 }
 0xba1   :  { %v3631_v58 = vmul.f32 %v5198_v29, %v3630_v52 }
 0xba2   :  { %v3650_v37 = vmul.f32 %v5200_v5, %v3649_v21 }
 0xba3   :  { %v5202_v15 = vpop.eup %5201  ;;  %v3632_v41 = vadd.f32 %v5198_v29, %v3631_v58 }
 0xba4   :  { %v3651_v43 = vadd.f32 %v5200_v5, %v3650_v37  ;;  %v3668_v47 = vmul.f32 %v5202_v15, %v3666_v45  ;;  %v5204_v49 = vpop.eup %5203  ;;  %vm3673_vm9 = vweird.f32 %v5202_v15  ;;  %v3678_v37 = vand.u32 2147483648, %v3666_v45 }
 0xba5   :  { %v3636_v44 = vsel %vm3635_vm5, %v5198_v29, %v3632_v41  ;;  %vm3674_vm11 = vmor %vm3672_vm10, %vm3673_vm9 }
 0xba6   :  { %v3641_v46 = vsel %vm3638_vm6, %v3640_v48, %v3636_v44  ;;  %v3655_v52 = vsel %vm3654_vm7, %v5200_v5, %v3651_v43  ;;  %v3669_v39 = vsub.f32 1.0, %v3668_v47  ;;  %v3679_v34 = vor.u32 1.1754944e-38, %v3678_v37  ;;  %v9757_v44 = vld [vmem:[#allocation55_spill] sm:$0xff] }
 0xba7   :  { %v3660_v21 = vsel %vm3657_vm8, %v3659_v6, %v3655_v52  ;;  %v3683_v9 = vmul.f32 %v5204_v49, %v3641_v46  ;;  %v9758_v49 = vld [vmem:[#allocation43_spill] sm:$0xff] }
 0xba8   :  { %v3682_v18 = vmul.f32 0.0, %v3660_v21  ;;  %v3670_v16 = vmul.f32 %v5202_v15, %v3669_v39  ;;  %v3378_v46 = vadd.f32 %v9758_v49, %v9757_v44  ;;  %v8337_v49 = vld [vmem:[#allocation6 + $0x578] sm:$0xff] }
 0xbaa   :  { %v8201_v58 = vadd.f32 %v3683_v9, %v3682_v18  ;;  %v3671_v57 = vadd.f32 %v5202_v15, %v3670_v16  ;;  %v9754_v18 = vld [vmem:[#allocation30_spill] sm:$0xff] }
 0xbac   :  { %5205 = vtanh.f32 %v8201_v58  ;;  %v3675_v29 = vsel %vm3674_vm11, %v5202_v15, %v3671_v57 }
 0xbad   :  { %v3680_v19 = vsel %vm3677_vm12, %v3679_v34, %v3675_v29 }
 0xbb2   :  { %v5206_v5 = vpop.eup %5205 }
 0xbb3   :  { %v3686_v62 = vmul.f32 %v5206_v5, %v3680_v19 }
 0xbb5   :  { %3707 = vmatmul.f32.vlgmr.msra.gmra.mxu0 %v3686_v62  ;;  %3727 = vmatmul.f32.vlgmr.msrb.gmra.mxu1 %v3686_v62 }
 0xbb6   :  { %3747 = vmatmul.f32.vlgmr.msrb.gmra.mxu2 %v3686_v62  ;;  %3767 = vmatmul.f32.vlgmr.msrb.gmra.mxu3 %v3686_v62 }
 0xbb7   :  { %3993 = vmatpush.msra.mxu0 %v9687_v35  ;;  %4013 = vmatpush.msrb.mxu1 %v7757_v59  ;;  %v9725_v59 = vld [vmem:[#allocation51_spill] sm:$0xff] }
 0xbb8   :  { %4033 = vmatpush.msrb.mxu2 %v7791_v54  ;;  %4053 = vmatpush.msrb.mxu3 %v7765_v42  ;;  %v9727_v42 = vld [vmem:[#allocation65_spill] sm:$0xff]  ;;  %v9729_v54 = vld [vmem:[#allocation20_spill] sm:$0xff] }
 0xbb9   :  { %3994 = vmatpush.msra.mxu0 %v7759_v50  ;;  %4014 = vmatpush.msrb.mxu1 %v9688_v33  ;;  %v9726_v50 = vld [vmem:[#allocation63_spill] sm:$0xff]  ;;  %v9755_v33 = vld [vmem:[#allocation56_spill] sm:$0xff] }
 0xbba   :  { %4034 = vmatpush.msrb.mxu2 %v7794_v60  ;;  %4054 = vmatpush.msrb.mxu3 %v9689_v2  ;;  %v9730_v60 = vld [vmem:[#allocation58_spill] sm:$0xff]  ;;  %v9756_v2 = vld [vmem:[#allocation33_spill] sm:$0xff] }
 0xbbb   :  { %3995 = vmatpush.msra.mxu0 %v7768_v40  ;;  %4015 = vmatpush.msrb.mxu1 %v9690_v24  ;;  %v9728_v40 = vld [vmem:[#allocation57_spill] sm:$0xff]  ;;  %v3419_v24 = vadd.f32 %v9756_v2, %v9755_v33  ;;  %v8304_v2 = vld [vmem:[#allocation6 + $0x5a0] sm:$0xff] }
 0xbbc   :  { %4035 = vmatpush.msrb.mxu2 %v7799_v12  ;;  %4055 = vmatpush.msrb.mxu3 %v9691_v1  ;;  %v9731_v12 = vld [vmem:[#allocation67_spill] sm:$0xff] }
 0xbbd   :  { %3996 = vmatpush.msra.mxu0 %v9692_v55  ;;  %4016 = vmatpush.msrb.mxu1 %v7803_v8  ;;  %v9732_v8 = vld [vmem:[#allocation37_spill] sm:$0xff] }
 0xbbe   :  { %4036 = vmatpush.msrb.mxu2 %v7815_v3  ;;  %4056 = vmatpush.msrb.mxu3 %v7813_v23  ;;  %v9735_v23 = vld [vmem:[#allocation50_spill] sm:$0xff]  ;;  %v9736_v3 = vld [vmem:[#allocation49_spill] sm:$0xff] }
 0xbbf   :  { %3997 = vmatpush.msra.mxu0 %v7806_v30  ;;  %4017 = vmatpush.msrb.mxu1 %v7811_v4  ;;  %v9733_v30 = vld [vmem:[#allocation24_spill] sm:$0xff]  ;;  %v9734_v4 = vld [vmem:[#allocation62_spill] sm:$0xff] }
 0xbc0   :  { %4037 = vmatpush.msrb.mxu2 %v7823_v17  ;;  %4057 = vmatpush.msrb.mxu3 %v7821_v13  ;;  %v9737_v13 = vld [vmem:[#allocation27_spill] sm:$0xff]  ;;  %v9738_v17 = vld [vmem:[#allocation52_spill] sm:$0xff] }
 0xbc1   :  { %3998 = vmatpush.msra.mxu0 %v7831_v51  ;;  %4018 = vmatpush.msrb.mxu1 %v7833_v22  ;;  %v9739_v51 = vld [vmem:[#allocation54_spill] sm:$0xff]  ;;  %v9740_v22 = vld [vmem:[#allocation53_spill] sm:$0xff] }
 0xbc2   :  { %4038 = vmatpush.msrb.mxu2 %v7839_v61  ;;  %4058 = vmatpush.msrb.mxu3 %v7835_v31  ;;  %v9741_v31 = vld [vmem:[#allocation18_spill] sm:$0xff]  ;;  %v9742_v61 = vld [vmem:[#allocation15_spill] sm:$0xff] }
 0xbc3   :  { %3999 = vmatpush.msra.mxu0 %v7841_v11  ;;  %4019 = vmatpush.msrb.mxu1 %v7843_v56  ;;  %v9743_v11 = vld [vmem:[#allocation16_spill] sm:$0xff]  ;;  %v9744_v56 = vld [vmem:[#allocation21_spill] sm:$0xff] }
 0xbc4   :  { %4039 = vmatpush.msrb.mxu2 %v7851_v20  ;;  %4059 = vmatpush.msrb.mxu3 %v7846_v36  ;;  %v9745_v36 = vld [vmem:[#allocation31_spill] sm:$0xff]  ;;  %v9746_v20 = vld [vmem:[#allocation26_spill] sm:$0xff] }
 0xbc5   :  { %4000 = vmatpush.msra.mxu0 %v7853_v7  ;;  %4020 = vmatpush.msrb.mxu1 %v7855_v10  ;;  %v9747_v7 = vld [vmem:[#allocation28_spill] sm:$0xff]  ;;  %v9748_v10 = vld [vmem:[#allocation25_spill] sm:$0xff] }
 0xbc6   :  { %4040 = vmatpush.msrb.mxu2 %v7885_v28  ;;  %4060 = vmatpush.msrb.mxu3 %v7865_v27  ;;  %v9751_v27 = vld [vmem:[#allocation17_spill] sm:$0xff] }
 0xbc7   :  { %4001 = vmatpush.msra.mxu0 %v7861_v0  ;;  %4021 = vmatpush.msrb.mxu1 %v7863_v14  ;;  %v9749_v0 = vld [vmem:[#allocation29_spill] sm:$0xff]  ;;  %v9750_v14 = vld [vmem:[#allocation22_spill] sm:$0xff] }
 0xbc8   :  { %4041 = vmatpush.msrb.mxu2 %v7891_v63  ;;  %4061 = vmatpush.msrb.mxu3 %v7872_v38  ;;  %v9753_v38 = vld [vmem:[#allocation45_spill] sm:$0xff] }
 0xbc9   :  { %4002 = vmatpush.msra.mxu0 %v7868_v25  ;;  %4022 = vmatpush.msrb.mxu1 %v7870_v32  ;;  %v9752_v25 = vld [vmem:[#allocation34_spill] sm:$0xff]  ;;  %v3337_v9 = vadd.f32 %v9754_v18, %v9753_v38 }
 0xbca   :  { %4042 = vmatpush.msrb.mxu2 %v9725_v59  ;;  %4062 = vmatpush.msrb.mxu3 %v9726_v50  ;;  %v3296_v32 = vadd.f32 %v9752_v25, %v9751_v27 }
 0xbcb   :  { %4003 = vmatpush.msra.mxu0 %v9727_v42  ;;  %4023 = vmatpush.msrb.mxu1 %v9728_v40 }
 0xbcc   :  { %4043 = vmatpush.msrb.mxu2 %v9729_v54  ;;  %4063 = vmatpush.msrb.mxu3 %v9730_v60 }
 0xbcd   :  { %4004 = vmatpush.msra.mxu0 %v9731_v12  ;;  %4024 = vmatpush.msrb.mxu1 %v9732_v8 }
 0xbce   :  { %4044 = vmatpush.msrb.mxu2 %v9733_v30  ;;  %4064 = vmatpush.msrb.mxu3 %v9734_v4 }
 0xbcf   :  { %4005 = vmatpush.msra.mxu0 %v9735_v23  ;;  %4025 = vmatpush.msrb.mxu1 %v9736_v3 }
 0xbd0   :  { %4045 = vmatpush.msrb.mxu2 %v9737_v13  ;;  %4065 = vmatpush.msrb.mxu3 %v9738_v17 }
 0xbd1   :  { %4006 = vmatpush.msra.mxu0 %v9739_v51  ;;  %4026 = vmatpush.msrb.mxu1 %v9740_v22 }
 0xbd2   :  { %4046 = vmatpush.msrb.mxu2 %v9741_v31  ;;  %4066 = vmatpush.msrb.mxu3 %v9742_v61 }
 0xbd3   :  { %4007 = vmatpush.msra.mxu0 %v9743_v11  ;;  %4027 = vmatpush.msrb.mxu1 %v9744_v56 }
 0xbd4   :  { %4047 = vmatpush.msrb.mxu2 %v9745_v36  ;;  %4067 = vmatpush.msrb.mxu3 %v9746_v20 }
 0xbd5   :  { %4008 = vmatpush.msra.mxu0 %v9747_v7  ;;  %4028 = vmatpush.msrb.mxu1 %v9748_v10 }
 0xbd6   :  { %4048 = vmatpush.msrb.mxu2 %v9749_v0  ;;  %4068 = vmatpush.msrb.mxu3 %v9750_v14 }
 0xc32   :  { %v3708_v39 = vpop.f32.mrf.mxu0  ;;  %v3728_v28 = vpop.f32.mrf.mxu1 }
 0xc33   :  { %v3771_v63 = vadd.f32 %v3708_v39, %v3296_v32  ;;  %v3772_v16 = vadd.f32 %v3728_v28, %v3337_v9  ;;  %v8283_v9 = vld [vmem:[#allocation6 + $0x5e8] sm:$0xff]  ;;  %v8286_v39 = vld [vmem:[#allocation6 + $0x5f0] sm:$0xff]  ;;  %v8289_v28 = vld [vmem:[#allocation6 + $0x5f8] sm:$0xff] }
 0xc35   :  { %v4899_v15 = vmul.f32 -1.442695, %v3771_v63  ;;  %v4900_v35 = vmul.f32 -1.442695, %v3772_v16  ;;  %v8292_v63 = vld [vmem:[#allocation6 + $0x5c0] sm:$0xff]  ;;  %v8295_v16 = vld [vmem:[#allocation6 + $0x5c8] sm:$0xff] }
 0xc37   :  { %5207 = vpow2.f32 %v4899_v15  ;;  %v8298_v15 = vld [vmem:[#allocation6 + $0x5d0] sm:$0xff] }
 0xc38   :  { %5209 = vpow2.f32 %v4900_v35  ;;  %v8301_v35 = vld [vmem:[#allocation6 + $0x5d8] sm:$0xff] }
 0xc39   :  { %v3768_v1 = vpop.f32.mrf.mxu3  ;;  %v3748_v43 = vpop.f32.mrf.mxu2 }
 0xc3a   :  { %v3774_v55 = vadd.f32 %v3768_v1, %v3419_v24  ;;  %v3773_v57 = vadd.f32 %v3748_v43, %v3378_v46  ;;  %v8307_v24 = vld [vmem:[#allocation6 + $0x5a8] sm:$0xff]  ;;  %v8310_v1 = vld [vmem:[#allocation6 + $0x5b0] sm:$0xff]  ;;  %v8340_v46 = vld [vmem:[#allocation6 + $0x540] sm:$0xff] }
 0xc3b   :  { %v8331_v43 = vld [vmem:[#allocation6 + $0x568] sm:$0xff] }
 0xc3c   :  { %v4901_v6 = vmul.f32 -1.442695, %v3774_v55  ;;  %v8313_v55 = vld [vmem:[#allocation6 + $0x5b8] sm:$0xff] }
 0xc3d   :  { %v5208_v45 = vpop.eup %5207 }
 0xc3e   :  { %v5210_v26 = vpop.eup %5209  ;;  %v3778_v41 = vadd.f32 1.0, %v5208_v45  ;;  %5211 = vpow2.f32 %v4901_v6  ;;  %v8316_v6 = vld [vmem:[#allocation6 + $0x580] sm:$0xff]  ;;  %v8319_v45 = vld [vmem:[#allocation6 + $0x588] sm:$0xff] }
 0xc3f   :  { %v3797_v48 = vadd.f32 1.0, %v5210_v26  ;;  %v8322_v26 = vld [vmem:[#allocation6 + $0x590] sm:$0xff] }
 0xc40   :  { %5213 = vrcp.f32 %v3778_v41  ;;  %v3790_v19 = vand.u32 2147483648, %v3778_v41  ;;  %v3788_v50 = vand.u32 2147483647, %v3778_v41  ;;  %vm3784_vm15 = vweird.f32 %v3778_v41 }
 0xc41   :  { %5215 = vrcp.f32 %v3797_v48  ;;  %v3809_v62 = vand.u32 2147483648, %v3797_v48  ;;  %v3807_v40 = vand.u32 2147483647, %v3797_v48  ;;  %vm3803_vm0 = vweird.f32 %v3797_v48 }
 0xc42   :  { %v3791_v12 = vor.u32 1.1754944e-38, %v3790_v19  ;;  %vm3789_vm3 = vcmp.eq.f32.partialorder %v3788_v50, 8.507059e+37  ;;  %v8367_v19 = vld [vmem:[#allocation6 + $0x508] sm:$0xff]  ;;  %v8376_v50 = vld [vmem:[#allocation6 + $0x4e0] sm:$0xff] }
 0xc43   :  { %v3810_v4 = vor.u32 1.1754944e-38, %v3809_v62  ;;  %vm3808_vm4 = vcmp.eq.f32.partialorder %v3807_v40, 8.507059e+37  ;;  %v8370_v62 = vld [vmem:[#allocation6 + $0x510] sm:$0xff] }
 0xc44   :  { %v5212_v47 = vpop.eup %5211  ;;  %v8382_v40 = vld [vmem:[#allocation6 + $0x4f0] sm:$0xff] }
 0xc45   :  { %v3817_v52 = vadd.f32 1.0, %v5212_v47  ;;  %v8334_v47 = vld [vmem:[#allocation6 + $0x570] sm:$0xff] }
 0xc46   :  { %v5214_v21 = vpop.eup %5213 }
 0xc47   :  { %v5216_v37 = vpop.eup %5215  ;;  %v3780_v53 = vmul.f32 %v5214_v21, %v3778_v41  ;;  %5217 = vrcp.f32 %v3817_v52  ;;  %vm3785_vm13 = vweird.f32 %v5214_v21  ;;  %v3829_v20 = vand.u32 2147483648, %v3817_v52  ;;  %v8325_v41 = vld [vmem:[#allocation6 + $0x598] sm:$0xff] }
 0xc48   :  { %v3799_v29 = vmul.f32 %v5216_v37, %v3797_v48  ;;  %5219 = vtanh.f32 %v3773_v57  ;;  %vm3804_vm14 = vweird.f32 %v5216_v37  ;;  %vm3786_vm1 = vmor %vm3784_vm15, %vm3785_vm13  ;;  %vm3823_vm6 = vweird.f32 %v3817_v52  ;;  %v8328_v48 = vld [vmem:[#allocation6 + $0x560] sm:$0xff]  ;;  %v8349_v57 = vld [vmem:[#allocation6 + $0x558] sm:$0xff] }
 0xc49   :  { %v3781_v34 = vsub.f32 1.0, %v3780_v53  ;;  %vm3805_vm2 = vmor %vm3803_vm0, %vm3804_vm14  ;;  %v3827_v7 = vand.u32 2147483647, %v3817_v52  ;;  %v3830_v14 = vor.u32 1.1754944e-38, %v3829_v20  ;;  %v8355_v53 = vld [vmem:[#allocation6 + $0x528] sm:$0xff]  ;;  %v8433_v20 = vld [vmem:[#allocation6 + $0x478] sm:$0xff] }
 0xc4a   :  { %v3800_v5 = vsub.f32 1.0, %v3799_v29  ;;  %v8358_v29 = vld [vmem:[#allocation6 + $0x530] sm:$0xff]  ;;  %9772 = vst [vmem:[#allocation27_spill] sm:$0xff] %v8433_v20 }
 0xc4b   :  { %v3782_v59 = vmul.f32 %v5214_v21, %v3781_v34  ;;  %vm3828_vm8 = vcmp.eq.f32.partialorder %v3827_v7, 8.507059e+37  ;;  %v8361_v34 = vld [vmem:[#allocation6 + $0x538] sm:$0xff]  ;;  %v8436_v7 = vld [vmem:[#allocation6 + $0x440] sm:$0xff] }
 0xc4c   :  { %v3801_v42 = vmul.f32 %v5216_v37, %v3800_v5  ;;  %v8364_v5 = vld [vmem:[#allocation6 + $0x500] sm:$0xff]  ;;  %9773 = vst [vmem:[#allocation52_spill] sm:$0xff] %v8436_v7 }
 0xc4d   :  { %v5218_v54 = vpop.eup %5217  ;;  %v3783_v60 = vadd.f32 %v5214_v21, %v3782_v59  ;;  %v8373_v59 = vld [vmem:[#allocation6 + $0x518] sm:$0xff] }
 0xc4e   :  { %v3802_v8 = vadd.f32 %v5216_v37, %v3801_v42  ;;  %v3819_v30 = vmul.f32 %v5218_v54, %v3817_v52  ;;  %v5220_v3 = vpop.eup %5219  ;;  %vm3824_vm5 = vweird.f32 %v5218_v54  ;;  %v8343_v52 = vld [vmem:[#allocation6 + $0x548] sm:$0xff] }
 0xc4f   :  { %v3787_v23 = vsel %vm3786_vm1, %v5214_v21, %v3783_v60  ;;  %vm3825_vm7 = vmor %vm3823_vm6, %vm3824_vm5  ;;  %v8346_v21 = vld [vmem:[#allocation6 + $0x550] sm:$0xff]  ;;  %v8379_v42 = vld [vmem:[#allocation6 + $0x4e8] sm:$0xff] }
 0xc50   :  { %v3792_v13 = vsel %vm3789_vm3, %v3791_v12, %v3787_v23  ;;  %v3806_v17 = vsel %vm3805_vm2, %v5216_v37, %v3802_v8  ;;  %v3820_v51 = vsub.f32 1.0, %v3819_v30  ;;  %v8352_v37 = vld [vmem:[#allocation6 + $0x520] sm:$0xff]  ;;  %v8391_v12 = vld [vmem:[#allocation6 + $0x4c8] sm:$0xff]  ;;  %v8394_v8 = vld [vmem:[#allocation6 + $0x4d0] sm:$0xff] }
 0xc51   :  { %v3811_v22 = vsel %vm3808_vm4, %v3810_v4, %v3806_v17  ;;  %v3834_v31 = vmul.f32 %v5220_v3, %v3792_v13  ;;  %v8388_v60 = vld [vmem:[#allocation6 + $0x4c0] sm:$0xff]  ;;  %9759 = vst [vmem:[#allocation36_spill] sm:$0xff] %v8394_v8  ;;  %v8397_v30 = vld [vmem:[#allocation6 + $0x4d8] sm:$0xff]  ;;  %v8403_v23 = vld [vmem:[#allocation6 + $0x4a8] sm:$0xff] }
 0xc52   :  { %v3833_v61 = vmul.f32 %v3811_v22, %v8201_v58  ;;  %v3821_v11 = vmul.f32 %v5218_v54, %v3820_v51  ;;  %v8280_v58 = vld [vmem:[#allocation6 + $0x5e0] sm:$0xff]  ;;  %9760 = vst [vmem:[#allocation51_spill] sm:$0xff] %v8397_v30  ;;  %v8406_v3 = vld [vmem:[#allocation6 + $0x4b0] sm:$0xff]  ;;  %v8409_v13 = vld [vmem:[#allocation6 + $0x4b8] sm:$0xff] }
 0xc53   :  { %v8400_v4 = vld [vmem:[#allocation6 + $0x4a0] sm:$0xff]  ;;  %9762 = vst [vmem:[#allocation65_spill] sm:$0xff] %v8403_v23  ;;  %v8415_v51 = vld [vmem:[#allocation6 + $0x488] sm:$0xff]  ;;  %v8418_v22 = vld [vmem:[#allocation6 + $0x490] sm:$0xff] }
 0xc54   :  { %v8277_v56 = vadd.f32 %v3834_v31, %v3833_v61  ;;  %v3822_v36 = vadd.f32 %v5218_v54, %v3821_v11  ;;  %9761 = vst [vmem:[#allocation63_spill] sm:$0xff] %v8400_v4  ;;  %v8412_v17 = vld [vmem:[#allocation6 + $0x480] sm:$0xff]  ;;  %v8421_v31 = vld [vmem:[#allocation6 + $0x498] sm:$0xff]  ;;  %v8427_v11 = vld [vmem:[#allocation6 + $0x468] sm:$0xff] }
 0xc55   :  { %9763 = vst [vmem:[#allocation57_spill] sm:$0xff] %v8406_v3  ;;  %v8424_v61 = vld [vmem:[#allocation6 + $0x460] sm:$0xff] }
 0xc56   :  { %5221 = vtanh.f32 %v8277_v56  ;;  %v3826_v10 = vsel %vm3825_vm7, %v5218_v54, %v3822_v36  ;;  %v8385_v54 = vld [vmem:[#allocation6 + $0x4f8] sm:$0xff]  ;;  %9764 = vst [vmem:[#allocation20_spill] sm:$0xff] %v8409_v13  ;;  %v8430_v36 = vld [vmem:[#allocation6 + $0x470] sm:$0xff] }
 0xc57   :  { %v3831_v32 = vsel %vm3828_vm8, %v3830_v14, %v3826_v10  ;;  %9765 = vst [vmem:[#allocation58_spill] sm:$0xff] %v8412_v17  ;;  %v8439_v10 = vld [vmem:[#allocation6 + $0x448] sm:$0xff]  ;;  %v8442_v14 = vld [vmem:[#allocation6 + $0x450] sm:$0xff] }
 0xc58   :  { %9766 = vst [vmem:[#allocation67_spill] sm:$0xff] %v8415_v51 }
 0xc59   :  { %9767 = vst [vmem:[#allocation37_spill] sm:$0xff] %v8418_v22 }
 0xc5a   :  { %9768 = vst [vmem:[#allocation24_spill] sm:$0xff] %v8421_v31 }
 0xc5b   :  { %9769 = vst [vmem:[#allocation62_spill] sm:$0xff] %v8424_v61 }
 0xc5c   :  { %v5222_v25 = vpop.eup %5221  ;;  %9770 = vst [vmem:[#allocation50_spill] sm:$0xff] %v8427_v11 }
 0xc5d   :  { %v3837_v18 = vmul.f32 %v5222_v25, %v3831_v32  ;;  %9771 = vst [vmem:[#allocation49_spill] sm:$0xff] %v8430_v36  ;;  %v8445_v25 = vld [vmem:[#allocation6 + $0x458] sm:$0xff]  ;;  %v8448_v32 = vld [vmem:[#allocation6 + $0x420] sm:$0xff] }
 0xc5e   :  { %9774 = vst [vmem:[#allocation54_spill] sm:$0xff] %v8439_v10 }
 0xc5f   :  { %3858 = vmatmul.f32.vlgmr.msrb.gmra.mxu0 %v3837_v18  ;;  %3878 = vmatmul.f32.vlgmr.msra.gmra.mxu1 %v3837_v18  ;;  %9775 = vst [vmem:[#allocation53_spill] sm:$0xff] %v8442_v14 }
 0xc60   :  { %3898 = vmatmul.f32.vlgmr.msra.gmra.mxu2 %v3837_v18  ;;  %3918 = vmatmul.f32.vlgmr.msra.gmra.mxu3 %v3837_v18  ;;  %9776 = vst [vmem:[#allocation18_spill] sm:$0xff] %v8445_v25  ;;  %v8451_v18 = vld [vmem:[#allocation6 + $0x428] sm:$0xff] }
 0xc61   :  { %4144 = vmatpush.msrb.mxu0 %v8280_v58  ;;  %4164 = vmatpush.msra.mxu1 %v8283_v9  ;;  %9777 = vst [vmem:[#allocation15_spill] sm:$0xff] %v8448_v32 }
 0xc62   :  { %4184 = vmatpush.msra.mxu2 %v8286_v39  ;;  %4204 = vmatpush.msra.mxu3 %v8289_v28  ;;  %9778 = vst [vmem:[#allocation16_spill] sm:$0xff] %v8451_v18 }
 0xc63   :  { %4145 = vmatpush.msrb.mxu0 %v8292_v63  ;;  %4165 = vmatpush.msra.mxu1 %v8295_v16 }
 0xc64   :  { %4185 = vmatpush.msra.mxu2 %v8298_v15  ;;  %4205 = vmatpush.msra.mxu3 %v8301_v35 }
 0xc65   :  { %4146 = vmatpush.msrb.mxu0 %v8304_v2  ;;  %4166 = vmatpush.msra.mxu1 %v8307_v24 }
 0xc66   :  { %4186 = vmatpush.msra.mxu2 %v8310_v1  ;;  %4206 = vmatpush.msra.mxu3 %v8313_v55 }
 0xc67   :  { %4147 = vmatpush.msrb.mxu0 %v8316_v6  ;;  %4167 = vmatpush.msra.mxu1 %v8319_v45 }
 0xc68   :  { %4187 = vmatpush.msra.mxu2 %v8322_v26  ;;  %4207 = vmatpush.msra.mxu3 %v8325_v41 }
 0xc69   :  { %4148 = vmatpush.msrb.mxu0 %v8328_v48  ;;  %4168 = vmatpush.msra.mxu1 %v8331_v43 }
 0xc6a   :  { %4188 = vmatpush.msra.mxu2 %v8334_v47  ;;  %4208 = vmatpush.msra.mxu3 %v8337_v49 }
 0xc6b   :  { %4149 = vmatpush.msrb.mxu0 %v8340_v46  ;;  %4169 = vmatpush.msra.mxu1 %v8343_v52 }
 0xc6c   :  { %4189 = vmatpush.msra.mxu2 %v8346_v21  ;;  %4209 = vmatpush.msra.mxu3 %v8349_v57 }
 0xc6d   :  { %4150 = vmatpush.msrb.mxu0 %v8352_v37  ;;  %4170 = vmatpush.msra.mxu1 %v8355_v53 }
 0xc6e   :  { %4190 = vmatpush.msra.mxu2 %v8358_v29  ;;  %4210 = vmatpush.msra.mxu3 %v8361_v34 }
 0xc6f   :  { %4151 = vmatpush.msrb.mxu0 %v8364_v5  ;;  %4171 = vmatpush.msra.mxu1 %v8367_v19 }
 0xc70   :  { %4191 = vmatpush.msra.mxu2 %v8370_v62  ;;  %4211 = vmatpush.msra.mxu3 %v8373_v59 }
 0xc71   :  { %4152 = vmatpush.msrb.mxu0 %v8376_v50  ;;  %4172 = vmatpush.msra.mxu1 %v8379_v42 }
 0xc72   :  { %4192 = vmatpush.msra.mxu2 %v8382_v40  ;;  %4212 = vmatpush.msra.mxu3 %v8385_v54 }
 0xc73   :  { %4153 = vmatpush.msrb.mxu0 %v8388_v60  ;;  %4173 = vmatpush.msra.mxu1 %v8391_v12 }
 0xc74   :  { %4193 = vmatpush.msra.mxu2 %v8394_v8  ;;  %4213 = vmatpush.msra.mxu3 %v8397_v30 }
 0xc75   :  { %4154 = vmatpush.msrb.mxu0 %v8400_v4  ;;  %4174 = vmatpush.msra.mxu1 %v8403_v23 }
 0xc76   :  { %4194 = vmatpush.msra.mxu2 %v8406_v3  ;;  %4214 = vmatpush.msra.mxu3 %v8409_v13 }
 0xc77   :  { %4155 = vmatpush.msrb.mxu0 %v8412_v17  ;;  %4175 = vmatpush.msra.mxu1 %v8415_v51 }
 0xc78   :  { %4195 = vmatpush.msra.mxu2 %v8418_v22  ;;  %4215 = vmatpush.msra.mxu3 %v8421_v31 }
 0xc79   :  { %4156 = vmatpush.msrb.mxu0 %v8424_v61  ;;  %4176 = vmatpush.msra.mxu1 %v8427_v11 }
 0xc7a   :  { %4196 = vmatpush.msra.mxu2 %v8430_v36  ;;  %4216 = vmatpush.msra.mxu3 %v8433_v20  ;;  %v9785_v20 = vld [vmem:[#allocation39_spill] sm:$0xff] }
 0xc7b   :  { %4157 = vmatpush.msrb.mxu0 %v8436_v7  ;;  %4177 = vmatpush.msra.mxu1 %v8439_v10  ;;  %v8454_v7 = vld [vmem:[#allocation6 + $0x430] sm:$0xff]  ;;  %v8457_v10 = vld [vmem:[#allocation6 + $0x438] sm:$0xff] }
 0xc7c   :  { %4197 = vmatpush.msra.mxu2 %v8442_v14  ;;  %4217 = vmatpush.msra.mxu3 %v8445_v25  ;;  %9779 = vst [vmem:[#allocation21_spill] sm:$0xff] %v8454_v7  ;;  %v8460_v14 = vld [vmem:[#allocation6 + $0x400] sm:$0xff]  ;;  %v8463_v25 = vld [vmem:[#allocation6 + $0x408] sm:$0xff] }
 0xc7d   :  { %4158 = vmatpush.msrb.mxu0 %v8448_v32  ;;  %4178 = vmatpush.msra.mxu1 %v8451_v18  ;;  %9780 = vst [vmem:[#allocation31_spill] sm:$0xff] %v8457_v10  ;;  %v8467_v32 = vld [vmem:[#allocation6 + $0x418] sm:$0xff] }
 0xc7e   :  { %4198 = vmatpush.msra.mxu2 %v8454_v7  ;;  %4218 = vmatpush.msra.mxu3 %v8457_v10  ;;  %9781 = vst [vmem:[#allocation26_spill] sm:$0xff] %v8460_v14  ;;  %v9784_v7 = vld [vmem:[#allocation32_spill] sm:$0xff]  ;;  %v3340_v10 = vadd.f32 %v9785_v20, %v9753_v38 }
 0xc7f   :  { %4159 = vmatpush.msrb.mxu0 %v8460_v14  ;;  %9782 = vst [vmem:[#allocation28_spill] sm:$0xff] %v8463_v25  ;;  %4179 = vmatpush.msra.mxu1 %v8463_v25  ;;  %v3299_v18 = vadd.f32 %v9784_v7, %v9751_v27  ;;  %v9786_v25 = vld [vmem:[#allocation35_spill] sm:$0xff] }
 0xc80   :  { %4199 = vmatpush.msra.mxu2 %v9749_v0  ;;  %9783 = vst [vmem:[#allocation25_spill] sm:$0xff] %v8467_v32  ;;  %4219 = vmatpush.msra.mxu3 %v8467_v32  ;;  %v3422_v0 = vadd.f32 %v9786_v25, %v9755_v33 }
 0xcdc   :  { %v3859_v36 = vpop.f32.mrf.mxu0  ;;  %v3879_v11 = vpop.f32.mrf.mxu1 }
 0xcdd   :  { %v3922_v61 = vadd.f32 %v3859_v36, %v3299_v18  ;;  %v3923_v14 = vadd.f32 %v3879_v11, %v3340_v10 }
 0xcdf   :  { %v4902_v31 = vmul.f32 -1.442695, %v3922_v61  ;;  %v4903_v22 = vmul.f32 -1.442695, %v3923_v14  ;;  %v9787_v61 = vld [vmem:[#allocation11_spill] sm:$0xff] }
 0xce0   :  { %v3381_v11 = vadd.f32 %v9787_v61, %v9757_v44 }
 0xce1   :  { %5223 = vpow2.f32 %v4902_v31 }
 0xce2   :  { %5225 = vpow2.f32 %v4903_v22 }
 0xce3   :  { %v3919_v51 = vpop.f32.mrf.mxu3  ;;  %v3899_v20 = vpop.f32.mrf.mxu2 }
 0xce4   :  { %v3925_v17 = vadd.f32 %v3919_v51, %v3422_v0  ;;  %v3924_v14 = vadd.f32 %v3899_v20, %v3381_v11 }
 0xce6   :  { %v4904_v32 = vmul.f32 -1.442695, %v3925_v17 }
 0xce7   :  { %v5224_v13 = vpop.eup %5223 }
 0xce8   :  { %v5226_v3 = vpop.eup %5225  ;;  %v3929_v7 = vadd.f32 1.0, %v5224_v13  ;;  %5227 = vpow2.f32 %v4904_v32 }
 0xce9   :  { %v3948_v27 = vadd.f32 1.0, %v5226_v3 }
 0xcea   :  { %5229 = vrcp.f32 %v3929_v7  ;;  %v3941_v0 = vand.u32 2147483648, %v3929_v7  ;;  %v3939_v32 = vand.u32 2147483647, %v3929_v7  ;;  %vm3935_vm11 = vweird.f32 %v3929_v7 }
 0xceb   :  { %5231 = vrcp.f32 %v3948_v27  ;;  %v3960_v13 = vand.u32 2147483648, %v3948_v27  ;;  %v3958_v38 = vand.u32 2147483647, %v3948_v27  ;;  %vm3954_vm12 = vweird.f32 %v3948_v27 }
 0xcec   :  { %v3942_v20 = vor.u32 1.1754944e-38, %v3941_v0  ;;  %vm3940_vm15 = vcmp.eq.f32.partialorder %v3939_v32, 8.507059e+37 }
 0xced   :  { %vm3959_vm0 = vcmp.eq.f32.partialorder %v3958_v38, 8.507059e+37 }
 0xcee   :  { %v5228_v36 = vpop.eup %5227 }
 0xcef   :  { %v3968_v31 = vadd.f32 1.0, %v5228_v36 }
 0xcf0   :  { %v5230_v10 = vpop.eup %5229 }
 0xcf1   :  { %v5232_v25 = vpop.eup %5231  ;;  %v3931_v22 = vmul.f32 %v5230_v10, %v3929_v7  ;;  %5233 = vrcp.f32 %v3968_v31  ;;  %vm3936_vm9 = vweird.f32 %v5230_v10  ;;  %vm3974_vm2 = vweird.f32 %v3968_v31 }
 0xcf2   :  { %v3950_v51 = vmul.f32 %v5232_v25, %v3948_v27  ;;  %5235 = vtanh.f32 %v3924_v14  ;;  %vm3955_vm10 = vweird.f32 %v5232_v25  ;;  %vm3937_vm13 = vmor %vm3935_vm11, %vm3936_vm9 }
 0xcf3   :  { %v3932_v17 = vsub.f32 1.0, %v3931_v22  ;;  %vm3956_vm14 = vmor %vm3954_vm12, %vm3955_vm10  ;;  %v3961_v22 = vor.u32 1.1754944e-38, %v3960_v13 }
 0xcf4   :  { %v3951_v18 = vsub.f32 1.0, %v3950_v51 }
 0xcf5   :  { %v3933_v3 = vmul.f32 %v5230_v10, %v3932_v17 }
 0xcf6   :  { %v3952_v33 = vmul.f32 %v5232_v25, %v3951_v18 }
 0xcf7   :  { %v5234_v23 = vpop.eup %5233  ;;  %v3934_v61 = vadd.f32 %v5230_v10, %v3933_v3 }
 0xcf8   :  { %v3953_v36 = vadd.f32 %v5232_v25, %v3952_v33  ;;  %v3970_v11 = vmul.f32 %v5234_v23, %v3968_v31  ;;  %v5236_v14 = vpop.eup %5235  ;;  %vm3975_vm1 = vweird.f32 %v5234_v23  ;;  %v3980_v33 = vand.u32 2147483648, %v3968_v31 }
 0xcf9   :  { %v3938_v51 = vsel %vm3937_vm13, %v5230_v10, %v3934_v61  ;;  %v3978_v10 = vand.u32 2147483647, %v3968_v31  ;;  %vm3976_vm3 = vmor %vm3974_vm2, %vm3975_vm1  ;;  %v9794_v31 = vld [vmem:[#allocation58_spill] sm:$0xff]  ;;  %v9795_v61 = vld [vmem:[#allocation67_spill] sm:$0xff] }
 0xcfa   :  { %v3943_v44 = vsel %vm3940_vm15, %v3942_v20, %v3938_v51  ;;  %v3957_v17 = vsel %vm3956_vm14, %v5232_v25, %v3953_v36  ;;  %v3971_v4 = vsub.f32 1.0, %v3970_v11  ;;  %v3981_v13 = vor.u32 1.1754944e-38, %v3980_v33  ;;  %v9796_v20 = vld [vmem:[#allocation37_spill] sm:$0xff]  ;;  %v9797_v36 = vld [vmem:[#allocation24_spill] sm:$0xff]  ;;  %v9798_v11 = vld [vmem:[#allocation62_spill] sm:$0xff] }
 0xcfb   :  { %v3962_v18 = vsel %vm3959_vm0, %v3961_v22, %v3957_v17  ;;  %v3985_v30 = vmul.f32 %v5236_v14, %v3943_v44  ;;  %vm3979_vm4 = vcmp.eq.f32.partialorder %v3978_v10, 8.507059e+37  ;;  %v9788_v44 = vld [vmem:[#allocation36_spill] sm:$0xff]  ;;  %v9799_v22 = vld [vmem:[#allocation50_spill] sm:$0xff]  ;;  %v9800_v51 = vld [vmem:[#allocation49_spill] sm:$0xff] }
 0xcfc   :  { %v3984_v8 = vmul.f32 %v3962_v18, %v8277_v56  ;;  %v3972_v3 = vmul.f32 %v5234_v23, %v3971_v4  ;;  %v9789_v56 = vld [vmem:[#allocation51_spill] sm:$0xff]  ;;  %v9792_v4 = vld [vmem:[#allocation57_spill] sm:$0xff]  ;;  %v9802_v17 = vld [vmem:[#allocation52_spill] sm:$0xff] }
 0xcfd   :  { %v9801_v14 = vld [vmem:[#allocation27_spill] sm:$0xff]  ;;  %v9803_v18 = vld [vmem:[#allocation54_spill] sm:$0xff]  ;;  %v9807_v10 = vld [vmem:[#allocation16_spill] sm:$0xff] }
 0xcfe   :  { %v8479_v7 = vadd.f32 %v3985_v30, %v3984_v8  ;;  %v3973_v27 = vadd.f32 %v5234_v23, %v3972_v3  ;;  %v9790_v8 = vld [vmem:[#allocation63_spill] sm:$0xff]  ;;  %v9791_v30 = vld [vmem:[#allocation65_spill] sm:$0xff] }
 0xcff   :  { %v9804_v3 = vld [vmem:[#allocation53_spill] sm:$0xff]  ;;  %v9806_v33 = vld [vmem:[#allocation15_spill] sm:$0xff] }
 0xd00   :  { %5237 = vtanh.f32 %v8479_v7  ;;  %v3977_v0 = vsel %vm3976_vm3, %v5234_v23, %v3973_v27  ;;  %v9793_v23 = vld [vmem:[#allocation20_spill] sm:$0xff]  ;;  %v9805_v27 = vld [vmem:[#allocation18_spill] sm:$0xff] }
 0xd01   :  { %v3982_v25 = vsel %vm3979_vm4, %v3981_v13, %v3977_v0  ;;  %v9808_v0 = vld [vmem:[#allocation21_spill] sm:$0xff]  ;;  %v9809_v13 = vld [vmem:[#allocation31_spill] sm:$0xff] }
 0xd06   :  { %v5238_v38 = vpop.eup %5237 }
 0xd07   :  { %v3988_v32 = vmul.f32 %v5238_v38, %v3982_v25  ;;  %v9810_v38 = vld [vmem:[#allocation26_spill] sm:$0xff]  ;;  %v9811_v25 = vld [vmem:[#allocation28_spill] sm:$0xff] }
 0xd09   :  { %4009 = vmatmul.f32.vlgmr.msra.gmra.mxu0 %v3988_v32  ;;  %4029 = vmatmul.f32.vlgmr.msrb.gmra.mxu1 %v3988_v32 }
 0xd0a   :  { %4049 = vmatmul.f32.vlgmr.msrb.gmra.mxu2 %v3988_v32  ;;  %4069 = vmatmul.f32.vlgmr.msrb.gmra.mxu3 %v3988_v32  ;;  %v8544_v32 = vld [vmem:[#allocation6 + $0x410] sm:$0xff] }
 0xd0b   :  { %4295 = vmatpush.msra.mxu0 %v8280_v58  ;;  %4315 = vmatpush.msrb.mxu1 %v8283_v9  ;;  %9812 = vst [vmem:[#allocation29_spill] sm:$0xff] %v8544_v32 }
 0xd0c   :  { %4335 = vmatpush.msrb.mxu2 %v8286_v39  ;;  %4355 = vmatpush.msrb.mxu3 %v8289_v28 }
 0xd0d   :  { %4296 = vmatpush.msra.mxu0 %v8292_v63  ;;  %4316 = vmatpush.msrb.mxu1 %v8295_v16 }
 0xd0e   :  { %4336 = vmatpush.msrb.mxu2 %v8298_v15  ;;  %4356 = vmatpush.msrb.mxu3 %v8301_v35 }
 0xd0f   :  { %4297 = vmatpush.msra.mxu0 %v8304_v2  ;;  %4317 = vmatpush.msrb.mxu1 %v8307_v24 }
 0xd10   :  { %4337 = vmatpush.msrb.mxu2 %v8310_v1  ;;  %4357 = vmatpush.msrb.mxu3 %v8313_v55 }
 0xd11   :  { %4298 = vmatpush.msra.mxu0 %v8316_v6  ;;  %4318 = vmatpush.msrb.mxu1 %v8319_v45 }
 0xd12   :  { %4338 = vmatpush.msrb.mxu2 %v8322_v26  ;;  %4358 = vmatpush.msrb.mxu3 %v8325_v41 }
 0xd13   :  { %4299 = vmatpush.msra.mxu0 %v8328_v48  ;;  %4319 = vmatpush.msrb.mxu1 %v8331_v43 }
 0xd14   :  { %4339 = vmatpush.msrb.mxu2 %v8334_v47  ;;  %4359 = vmatpush.msrb.mxu3 %v8337_v49 }
 0xd15   :  { %4300 = vmatpush.msra.mxu0 %v8340_v46  ;;  %4320 = vmatpush.msrb.mxu1 %v8343_v52 }
 0xd16   :  { %4340 = vmatpush.msrb.mxu2 %v8346_v21  ;;  %4360 = vmatpush.msrb.mxu3 %v8349_v57 }
 0xd17   :  { %4301 = vmatpush.msra.mxu0 %v8352_v37  ;;  %4321 = vmatpush.msrb.mxu1 %v8355_v53 }
 0xd18   :  { %4341 = vmatpush.msrb.mxu2 %v8358_v29  ;;  %4361 = vmatpush.msrb.mxu3 %v8361_v34 }
 0xd19   :  { %4302 = vmatpush.msra.mxu0 %v8364_v5  ;;  %4322 = vmatpush.msrb.mxu1 %v8367_v19 }
 0xd1a   :  { %4342 = vmatpush.msrb.mxu2 %v8370_v62  ;;  %4362 = vmatpush.msrb.mxu3 %v8373_v59 }
 0xd1b   :  { %4303 = vmatpush.msra.mxu0 %v8376_v50  ;;  %4323 = vmatpush.msrb.mxu1 %v8379_v42 }
 0xd1c   :  { %4343 = vmatpush.msrb.mxu2 %v8382_v40  ;;  %4363 = vmatpush.msrb.mxu3 %v8385_v54 }
 0xd1d   :  { %4304 = vmatpush.msra.mxu0 %v8388_v60  ;;  %4324 = vmatpush.msrb.mxu1 %v8391_v12 }
 0xd1e   :  { %4344 = vmatpush.msrb.mxu2 %v9788_v44  ;;  %4364 = vmatpush.msrb.mxu3 %v9789_v56 }
 0xd1f   :  { %4305 = vmatpush.msra.mxu0 %v9790_v8  ;;  %4325 = vmatpush.msrb.mxu1 %v9791_v30 }
 0xd20   :  { %4345 = vmatpush.msrb.mxu2 %v9792_v4  ;;  %4365 = vmatpush.msrb.mxu3 %v9793_v23 }
 0xd21   :  { %4306 = vmatpush.msra.mxu0 %v9794_v31  ;;  %4326 = vmatpush.msrb.mxu1 %v9795_v61 }
 0xd22   :  { %4346 = vmatpush.msrb.mxu2 %v9796_v20  ;;  %4366 = vmatpush.msrb.mxu3 %v9797_v36  ;;  %v9819_v36 = vld [vmem:[#allocation60_spill] sm:$0xff] }
 0xd23   :  { %4307 = vmatpush.msra.mxu0 %v9798_v11  ;;  %4327 = vmatpush.msrb.mxu1 %v9799_v22 }
 0xd24   :  { %4347 = vmatpush.msrb.mxu2 %v9800_v51  ;;  %4367 = vmatpush.msrb.mxu3 %v9801_v14  ;;  %v9817_v14 = vld [vmem:[#allocation59_spill] sm:$0xff] }
 0xd25   :  { %4308 = vmatpush.msra.mxu0 %v9802_v17  ;;  %4328 = vmatpush.msrb.mxu1 %v9803_v18  ;;  %v9813_v18 = vld [vmem:[#allocation25_spill] sm:$0xff] }
 0xd26   :  { %4348 = vmatpush.msrb.mxu2 %v9804_v3  ;;  %4368 = vmatpush.msrb.mxu3 %v9805_v27  ;;  %v9814_v3 = vld [vmem:[#allocation17_spill] sm:$0xff]  ;;  %v9815_v27 = vld [vmem:[#allocation66_spill] sm:$0xff] }
 0xd27   :  { %4309 = vmatpush.msra.mxu0 %v9806_v33  ;;  %4329 = vmatpush.msrb.mxu1 %v9807_v10  ;;  %v3302_v17 = vadd.f32 %v9815_v27, %v9814_v3  ;;  %v9816_v33 = vld [vmem:[#allocation45_spill] sm:$0xff] }
 0xd28   :  { %4349 = vmatpush.msrb.mxu2 %v9808_v0  ;;  %4369 = vmatpush.msrb.mxu3 %v9809_v13  ;;  %v3343_v10 = vadd.f32 %v9817_v14, %v9816_v33 }
 0xd29   :  { %4310 = vmatpush.msra.mxu0 %v9810_v38  ;;  %4330 = vmatpush.msrb.mxu1 %v9811_v25  ;;  %v9818_v25 = vld [vmem:[#allocation56_spill] sm:$0xff] }
 0xd2a   :  { %4350 = vmatpush.msrb.mxu2 %v8544_v32  ;;  %4370 = vmatpush.msrb.mxu3 %v9813_v18  ;;  %v3425_v20 = vadd.f32 %v9819_v36, %v9818_v25 }
 0xd86   :  { %v4010_v51 = vpop.f32.mrf.mxu0  ;;  %v4030_v0 = vpop.f32.mrf.mxu1 }
 0xd87   :  { %v4073_v22 = vadd.f32 %v4010_v51, %v3302_v17  ;;  %v4074_v13 = vadd.f32 %v4030_v0, %v3343_v10  ;;  %v9820_v17 = vld [vmem:[#allocation55_spill] sm:$0xff] }
 0xd89   :  { %v4905_v11 = vmul.f32 -1.442695, %v4073_v22  ;;  %v4906_v38 = vmul.f32 -1.442695, %v4074_v13  ;;  %v9821_v22 = vld [vmem:[#allocation48_spill] sm:$0xff] }
 0xd8a   :  { %v3384_v10 = vadd.f32 %v9821_v22, %v9820_v17 }
 0xd8b   :  { %5239 = vpow2.f32 %v4905_v11 }
 0xd8c   :  { %5241 = vpow2.f32 %v4906_v38 }
 0xd8d   :  { %v4070_v32 = vpop.f32.mrf.mxu3  ;;  %v4050_v14 = vpop.f32.mrf.mxu2 }
 0xd8e   :  { %v4076_v61 = vadd.f32 %v4070_v32, %v3425_v20  ;;  %v4075_v13 = vadd.f32 %v4050_v14, %v3384_v10 }
 0xd90   :  { %v4907_v18 = vmul.f32 -1.442695, %v4076_v61 }
 0xd91   :  { %v5240_v31 = vpop.eup %5239 }
 0xd92   :  { %v5242_v23 = vpop.eup %5241  ;;  %v4080_v27 = vadd.f32 1.0, %v5240_v31  ;;  %5243 = vpow2.f32 %v4907_v18 }
 0xd93   :  { %v4099_v3 = vadd.f32 1.0, %v5242_v23 }
 0xd94   :  { %5245 = vrcp.f32 %v4080_v27  ;;  %v4092_v25 = vand.u32 2147483648, %v4080_v27  ;;  %v4090_v18 = vand.u32 2147483647, %v4080_v27  ;;  %vm4086_vm7 = vweird.f32 %v4080_v27 }
 0xd95   :  { %5247 = vrcp.f32 %v4099_v3  ;;  %v4111_v31 = vand.u32 2147483648, %v4099_v3  ;;  %v4109_v4 = vand.u32 2147483647, %v4099_v3  ;;  %vm4105_vm8 = vweird.f32 %v4099_v3 }
 0xd96   :  { %v4093_v14 = vor.u32 1.1754944e-38, %v4092_v25  ;;  %vm4091_vm11 = vcmp.eq.f32.partialorder %v4090_v18, 8.507059e+37 }
 0xd97   :  { %vm4110_vm12 = vcmp.eq.f32.partialorder %v4109_v4, 8.507059e+37 }
 0xd98   :  { %v5244_v51 = vpop.eup %5243 }
 0xd99   :  { %v4119_v11 = vadd.f32 1.0, %v5244_v51 }
 0xd9a   :  { %v5246_v0 = vpop.eup %5245 }
 0xd9b   :  { %v5248_v36 = vpop.eup %5247  ;;  %v4082_v38 = vmul.f32 %v5246_v0, %v4080_v27  ;;  %5249 = vrcp.f32 %v4119_v11  ;;  %vm4087_vm5 = vweird.f32 %v5246_v0  ;;  %vm4125_vm14 = vweird.f32 %v4119_v11 }
 0xd9c   :  { %v4101_v20 = vmul.f32 %v5248_v36, %v4099_v3  ;;  %5251 = vtanh.f32 %v4075_v13  ;;  %vm4106_vm6 = vweird.f32 %v5248_v36  ;;  %vm4088_vm9 = vmor %vm4086_vm7, %vm4087_vm5  ;;  %v4129_v25 = vand.u32 2147483647, %v4119_v11 }
 0xd9d   :  { %v4083_v61 = vsub.f32 1.0, %v4082_v38  ;;  %vm4107_vm10 = vmor %vm4105_vm8, %vm4106_vm6  ;;  %v4112_v38 = vor.u32 1.1754944e-38, %v4111_v31 }
 0xd9e   :  { %v4102_v32 = vsub.f32 1.0, %v4101_v20  ;;  %vm4130_vm0 = vcmp.eq.f32.partialorder %v4129_v25, 8.507059e+37  ;;  %v9841_v25 = vld [vmem:[#allocation16_spill] sm:$0xff] }
 0xd9f   :  { %v4084_v23 = vmul.f32 %v5246_v0, %v4083_v61 }
 0xda0   :  { %v4103_v33 = vmul.f32 %v5248_v36, %v4102_v32 }
 0xda1   :  { %v5250_v30 = vpop.eup %5249  ;;  %v4085_v22 = vadd.f32 %v5246_v0, %v4084_v23 }
 0xda2   :  { %v4104_v51 = vadd.f32 %v5248_v36, %v4103_v33  ;;  %v4121_v10 = vmul.f32 %v5250_v30, %v4119_v11  ;;  %v5252_v13 = vpop.eup %5251  ;;  %vm4126_vm13 = vweird.f32 %v5250_v30  ;;  %v4131_v33 = vand.u32 2147483648, %v4119_v11  ;;  %v9828_v11 = vld [vmem:[#allocation58_spill] sm:$0xff] }
 0xda3   :  { %v4089_v20 = vsel %vm4088_vm9, %v5246_v0, %v4085_v22  ;;  %vm4127_vm15 = vmor %vm4125_vm14, %vm4126_vm13  ;;  %v9829_v22 = vld [vmem:[#allocation67_spill] sm:$0xff] }
 0xda4   :  { %v4094_v17 = vsel %vm4091_vm11, %v4093_v14, %v4089_v20  ;;  %v4108_v61 = vsel %vm4107_vm10, %v5248_v36, %v4104_v51  ;;  %v4122_v8 = vsub.f32 1.0, %v4121_v10  ;;  %v4132_v31 = vor.u32 1.1754944e-38, %v4131_v33  ;;  %v9830_v14 = vld [vmem:[#allocation37_spill] sm:$0xff]  ;;  %v9831_v51 = vld [vmem:[#allocation24_spill] sm:$0xff]  ;;  %v9832_v10 = vld [vmem:[#allocation62_spill] sm:$0xff] }
 0xda5   :  { %v4113_v32 = vsel %vm4110_vm12, %v4112_v38, %v4108_v61  ;;  %v4136_v56 = vmul.f32 %v5252_v13, %v4094_v17  ;;  %v9827_v17 = vld [vmem:[#allocation20_spill] sm:$0xff]  ;;  %v9833_v38 = vld [vmem:[#allocation50_spill] sm:$0xff]  ;;  %v9834_v20 = vld [vmem:[#allocation49_spill] sm:$0xff] }
 0xda6   :  { %v4135_v44 = vmul.f32 %v4113_v32, %v8479_v7  ;;  %v4123_v23 = vmul.f32 %v5250_v30, %v4122_v8  ;;  %v9822_v7 = vld [vmem:[#allocation36_spill] sm:$0xff]  ;;  %v9825_v8 = vld [vmem:[#allocation65_spill] sm:$0xff]  ;;  %v9835_v13 = vld [vmem:[#allocation27_spill] sm:$0xff] }
 0xda7   :  { %v9836_v61 = vld [vmem:[#allocation52_spill] sm:$0xff]  ;;  %v9837_v32 = vld [vmem:[#allocation54_spill] sm:$0xff]  ;;  %v9840_v33 = vld [vmem:[#allocation15_spill] sm:$0xff] }
 0xda8   :  { %v8557_v27 = vadd.f32 %v4136_v56, %v4135_v44  ;;  %v4124_v3 = vadd.f32 %v5250_v30, %v4123_v23  ;;  %v9823_v44 = vld [vmem:[#allocation51_spill] sm:$0xff]  ;;  %v9838_v23 = vld [vmem:[#allocation53_spill] sm:$0xff] }
 0xda9   :  { %v9824_v56 = vld [vmem:[#allocation63_spill] sm:$0xff] }
 0xdaa   :  { %5253 = vtanh.f32 %v8557_v27  ;;  %v4128_v0 = vsel %vm4127_vm15, %v5250_v30, %v4124_v3  ;;  %v9826_v30 = vld [vmem:[#allocation57_spill] sm:$0xff]  ;;  %v9839_v3 = vld [vmem:[#allocation18_spill] sm:$0xff] }
 0xdab   :  { %v4133_v36 = vsel %vm4130_vm0, %v4132_v31, %v4128_v0  ;;  %v9842_v0 = vld [vmem:[#allocation21_spill] sm:$0xff]  ;;  %v9843_v31 = vld [vmem:[#allocation31_spill] sm:$0xff] }
 0xdb0   :  { %v5254_v4 = vpop.eup %5253 }
 0xdb1   :  { %v4139_v18 = vmul.f32 %v5254_v4, %v4133_v36  ;;  %v9844_v4 = vld [vmem:[#allocation26_spill] sm:$0xff]  ;;  %v9845_v36 = vld [vmem:[#allocation28_spill] sm:$0xff] }
 0xdb3   :  { %4160 = vmatmul.f32.vlgmr.msrb.gmra.mxu0 %v4139_v18  ;;  %4180 = vmatmul.f32.vlgmr.msra.gmra.mxu1 %v4139_v18 }
 0xdb4   :  { %4200 = vmatmul.f32.vlgmr.msra.gmra.mxu2 %v4139_v18  ;;  %4220 = vmatmul.f32.vlgmr.msra.gmra.mxu3 %v4139_v18  ;;  %v9846_v18 = vld [vmem:[#allocation29_spill] sm:$0xff] }
 0xdb5   :  { %4446 = vmatpush.msrb.mxu0 %v8280_v58  ;;  %4466 = vmatpush.msra.mxu1 %v8283_v9 }
 0xdb6   :  { %4486 = vmatpush.msra.mxu2 %v8286_v39  ;;  %4506 = vmatpush.msra.mxu3 %v8289_v28 }
 0xdb7   :  { %4447 = vmatpush.msrb.mxu0 %v8292_v63  ;;  %4467 = vmatpush.msra.mxu1 %v8295_v16 }
 0xdb8   :  { %4487 = vmatpush.msra.mxu2 %v8298_v15  ;;  %4507 = vmatpush.msra.mxu3 %v8301_v35 }
 0xdb9   :  { %4448 = vmatpush.msrb.mxu0 %v8304_v2  ;;  %4468 = vmatpush.msra.mxu1 %v8307_v24 }
 0xdba   :  { %4488 = vmatpush.msra.mxu2 %v8310_v1  ;;  %4508 = vmatpush.msra.mxu3 %v8313_v55 }
 0xdbb   :  { %4449 = vmatpush.msrb.mxu0 %v8316_v6  ;;  %4469 = vmatpush.msra.mxu1 %v8319_v45 }
 0xdbc   :  { %4489 = vmatpush.msra.mxu2 %v8322_v26  ;;  %4509 = vmatpush.msra.mxu3 %v8325_v41 }
 0xdbd   :  { %4450 = vmatpush.msrb.mxu0 %v8328_v48  ;;  %4470 = vmatpush.msra.mxu1 %v8331_v43 }
 0xdbe   :  { %4490 = vmatpush.msra.mxu2 %v8334_v47  ;;  %4510 = vmatpush.msra.mxu3 %v8337_v49 }
 0xdbf   :  { %4451 = vmatpush.msrb.mxu0 %v8340_v46  ;;  %4471 = vmatpush.msra.mxu1 %v8343_v52 }
 0xdc0   :  { %4491 = vmatpush.msra.mxu2 %v8346_v21  ;;  %4511 = vmatpush.msra.mxu3 %v8349_v57 }
 0xdc1   :  { %4452 = vmatpush.msrb.mxu0 %v8352_v37  ;;  %4472 = vmatpush.msra.mxu1 %v8355_v53 }
 0xdc2   :  { %4492 = vmatpush.msra.mxu2 %v8358_v29  ;;  %4512 = vmatpush.msra.mxu3 %v8361_v34 }
 0xdc3   :  { %4453 = vmatpush.msrb.mxu0 %v8364_v5  ;;  %4473 = vmatpush.msra.mxu1 %v8367_v19 }
 0xdc4   :  { %4493 = vmatpush.msra.mxu2 %v8370_v62  ;;  %4513 = vmatpush.msra.mxu3 %v8373_v59 }
 0xdc5   :  { %4454 = vmatpush.msrb.mxu0 %v8376_v50  ;;  %4474 = vmatpush.msra.mxu1 %v8379_v42 }
 0xdc6   :  { %4494 = vmatpush.msra.mxu2 %v8382_v40  ;;  %4514 = vmatpush.msra.mxu3 %v8385_v54 }
 0xdc7   :  { %4455 = vmatpush.msrb.mxu0 %v8388_v60  ;;  %4475 = vmatpush.msra.mxu1 %v8391_v12 }
 0xdc8   :  { %4495 = vmatpush.msra.mxu2 %v9822_v7  ;;  %4515 = vmatpush.msra.mxu3 %v9823_v44 }
 0xdc9   :  { %4456 = vmatpush.msrb.mxu0 %v9824_v56  ;;  %4476 = vmatpush.msra.mxu1 %v9825_v8 }
 0xdca   :  { %4496 = vmatpush.msra.mxu2 %v9826_v30  ;;  %4516 = vmatpush.msra.mxu3 %v9827_v17 }
 0xdcb   :  { %4457 = vmatpush.msrb.mxu0 %v9828_v11  ;;  %4477 = vmatpush.msra.mxu1 %v9829_v22 }
 0xdcc   :  { %4497 = vmatpush.msra.mxu2 %v9830_v14  ;;  %4517 = vmatpush.msra.mxu3 %v9831_v51  ;;  %v9853_v14 = vld [vmem:[#allocation46_spill] sm:$0xff] }
 0xdcd   :  { %4458 = vmatpush.msrb.mxu0 %v9832_v10  ;;  %4478 = vmatpush.msra.mxu1 %v9833_v38 }
 0xdce   :  { %4498 = vmatpush.msra.mxu2 %v9834_v20  ;;  %4518 = vmatpush.msra.mxu3 %v9835_v13  ;;  %v9851_v20 = vld [vmem:[#allocation68_spill] sm:$0xff] }
 0xdcf   :  { %4459 = vmatpush.msrb.mxu0 %v9836_v61  ;;  %4479 = vmatpush.msra.mxu1 %v9837_v32  ;;  %v9847_v61 = vld [vmem:[#allocation25_spill] sm:$0xff] }
 0xdd0   :  { %4499 = vmatpush.msra.mxu2 %v9838_v23  ;;  %4519 = vmatpush.msra.mxu3 %v9839_v3  ;;  %v9848_v32 = vld [vmem:[#allocation17_spill] sm:$0xff]  ;;  %v9849_v23 = vld [vmem:[#allocation19_spill] sm:$0xff] }
 0xdd1   :  { %4460 = vmatpush.msrb.mxu0 %v9840_v33  ;;  %4480 = vmatpush.msra.mxu1 %v9841_v25  ;;  %v3305_v13 = vadd.f32 %v9849_v23, %v9848_v32  ;;  %v9850_v3 = vld [vmem:[#allocation45_spill] sm:$0xff] }
 0xdd2   :  { %4500 = vmatpush.msra.mxu2 %v9842_v0  ;;  %4520 = vmatpush.msra.mxu3 %v9843_v31  ;;  %v3346_v33 = vadd.f32 %v9851_v20, %v9850_v3 }
 0xdd3   :  { %4461 = vmatpush.msrb.mxu0 %v9844_v4  ;;  %4481 = vmatpush.msra.mxu1 %v9845_v36  ;;  %v9852_v4 = vld [vmem:[#allocation56_spill] sm:$0xff] }
 0xdd4   :  { %4501 = vmatpush.msra.mxu2 %v9846_v18  ;;  %4521 = vmatpush.msra.mxu3 %v9847_v61  ;;  %v3428_v36 = vadd.f32 %v9853_v14, %v9852_v4 }
 0xe30   :  { %v4161_v38 = vpop.f32.mrf.mxu0  ;;  %v4181_v25 = vpop.f32.mrf.mxu1 }
 0xe31   :  { %v4224_v10 = vadd.f32 %v4161_v38, %v3305_v13  ;;  %v4225_v0 = vadd.f32 %v4181_v25, %v3346_v33  ;;  %v9854_v13 = vld [vmem:[#allocation55_spill] sm:$0xff] }
 0xe33   :  { %v4908_v51 = vmul.f32 -1.442695, %v4224_v10  ;;  %v4909_v31 = vmul.f32 -1.442695, %v4225_v0  ;;  %v9855_v10 = vld [vmem:[#allocation38_spill] sm:$0xff] }
 0xe34   :  { %v3387_v33 = vadd.f32 %v9855_v10, %v9854_v13 }
 0xe35   :  { %5255 = vpow2.f32 %v4908_v51 }
 0xe36   :  { %5257 = vpow2.f32 %v4909_v31 }
 0xe37   :  { %v4221_v18 = vpop.f32.mrf.mxu3  ;;  %v4201_v20 = vpop.f32.mrf.mxu2 }
 0xe38   :  { %v4227_v22 = vadd.f32 %v4221_v18, %v3428_v36  ;;  %v4226_v0 = vadd.f32 %v4201_v20, %v3387_v33 }
 0xe3a   :  { %v4910_v61 = vmul.f32 -1.442695, %v4227_v22 }
 0xe3b   :  { %v5256_v11 = vpop.eup %5255 }
 0xe3c   :  { %v5258_v17 = vpop.eup %5257  ;;  %v4231_v23 = vadd.f32 1.0, %v5256_v11  ;;  %5259 = vpow2.f32 %v4910_v61 }
 0xe3d   :  { %v4250_v32 = vadd.f32 1.0, %v5258_v17 }
 0xe3e   :  { %5261 = vrcp.f32 %v4231_v23  ;;  %v4243_v4 = vand.u32 2147483648, %v4231_v23  ;;  %v4241_v61 = vand.u32 2147483647, %v4231_v23  ;;  %vm4237_vm3 = vweird.f32 %v4231_v23 }
 0xe3f   :  { %5263 = vrcp.f32 %v4250_v32  ;;  %v4262_v11 = vand.u32 2147483648, %v4250_v32  ;;  %v4260_v30 = vand.u32 2147483647, %v4250_v32  ;;  %vm4256_vm4 = vweird.f32 %v4250_v32 }
 0xe40   :  { %v4244_v20 = vor.u32 1.1754944e-38, %v4243_v4  ;;  %vm4242_vm7 = vcmp.eq.f32.partialorder %v4241_v61, 8.507059e+37 }
 0xe41   :  { %vm4261_vm8 = vcmp.eq.f32.partialorder %v4260_v30, 8.507059e+37 }
 0xe42   :  { %v5260_v38 = vpop.eup %5259 }
 0xe43   :  { %v4270_v51 = vadd.f32 1.0, %v5260_v38 }
 0xe44   :  { %v5262_v25 = vpop.eup %5261 }
 0xe45   :  { %v5264_v14 = vpop.eup %5263  ;;  %v4233_v31 = vmul.f32 %v5262_v25, %v4231_v23  ;;  %5265 = vrcp.f32 %v4270_v51  ;;  %vm4238_vm1 = vweird.f32 %v5262_v25  ;;  %vm4276_vm10 = vweird.f32 %v4270_v51 }
 0xe46   :  { %v4252_v36 = vmul.f32 %v5264_v14, %v4250_v32  ;;  %5267 = vtanh.f32 %v4226_v0  ;;  %vm4257_vm2 = vweird.f32 %v5264_v14  ;;  %vm4239_vm5 = vmor %vm4237_vm3, %vm4238_vm1  ;;  %v4280_v4 = vand.u32 2147483647, %v4270_v51 }
 0xe47   :  { %v4234_v22 = vsub.f32 1.0, %v4233_v31  ;;  %vm4258_vm6 = vmor %vm4256_vm4, %vm4257_vm2  ;;  %v4263_v31 = vor.u32 1.1754944e-38, %v4262_v11 }
 0xe48   :  { %v4253_v18 = vsub.f32 1.0, %v4252_v36  ;;  %vm4281_vm12 = vcmp.eq.f32.partialorder %v4280_v4, 8.507059e+37 }
 0xe49   :  { %v4235_v17 = vmul.f32 %v5262_v25, %v4234_v22 }
 0xe4a   :  { %v4254_v3 = vmul.f32 %v5264_v14, %v4253_v18 }
 0xe4b   :  { %v5266_v8 = vpop.eup %5265  ;;  %v4236_v10 = vadd.f32 %v5262_v25, %v4235_v17 }
 0xe4c   :  { %v4255_v38 = vadd.f32 %v5264_v14, %v4254_v3  ;;  %v4272_v33 = vmul.f32 %v5266_v8, %v4270_v51  ;;  %v5268_v0 = vpop.eup %5267  ;;  %vm4277_vm9 = vweird.f32 %v5266_v8  ;;  %v4282_v3 = vand.u32 2147483648, %v4270_v51 }
 0xe4d   :  { %v4240_v36 = vsel %vm4239_vm5, %v5262_v25, %v4236_v10  ;;  %vm4278_vm11 = vmor %vm4276_vm10, %vm4277_vm9 }
 0xe4e   :  { %v4245_v13 = vsel %vm4242_vm7, %v4244_v20, %v4240_v36  ;;  %v4259_v22 = vsel %vm4258_vm6, %v5264_v14, %v4255_v38  ;;  %v4273_v56 = vsub.f32 1.0, %v4272_v33  ;;  %v4283_v11 = vor.u32 1.1754944e-38, %v4282_v3  ;;  %v9888_v36 = vld [vmem:[#allocation55_spill] sm:$0xff] }
 0xe4f   :  { %v4264_v18 = vsel %vm4261_vm8, %v4263_v31, %v4259_v22  ;;  %v4287_v44 = vmul.f32 %v5268_v0, %v4245_v13  ;;  %v9889_v0 = vld [vmem:[#allocation40_spill] sm:$0xff] }
 0xe50   :  { %v4286_v7 = vmul.f32 %v4264_v18, %v8557_v27  ;;  %v4274_v17 = vmul.f32 %v5266_v8, %v4273_v56  ;;  %v9886_v27 = vld [vmem:[#allocation56_spill] sm:$0xff]  ;;  %v3390_v22 = vadd.f32 %v9889_v0, %v9888_v36 }
 0xe52   :  { %v8633_v23 = vadd.f32 %v4287_v44, %v4286_v7  ;;  %v4275_v32 = vadd.f32 %v5266_v8, %v4274_v17  ;;  %v9887_v7 = vld [vmem:[#allocation12_spill] sm:$0xff] }
 0xe53   :  { %v3431_v44 = vadd.f32 %v9887_v7, %v9886_v27 }
 0xe54   :  { %5269 = vtanh.f32 %v8633_v23  ;;  %v4279_v25 = vsel %vm4278_vm11, %v5266_v8, %v4275_v32 }
 0xe55   :  { %v4284_v14 = vsel %vm4281_vm12, %v4283_v11, %v4279_v25 }
 0xe5a   :  { %v5270_v30 = vpop.eup %5269 }
 0xe5b   :  { %v4290_v61 = vmul.f32 %v5270_v30, %v4284_v14 }
 0xe5d   :  { %4311 = vmatmul.f32.vlgmr.msra.gmra.mxu0 %v4290_v61  ;;  %4331 = vmatmul.f32.vlgmr.msrb.gmra.mxu1 %v4290_v61 }
 0xe5e   :  { %4351 = vmatmul.f32.vlgmr.msrb.gmra.mxu2 %v4290_v61  ;;  %4371 = vmatmul.f32.vlgmr.msrb.gmra.mxu3 %v4290_v61 }
 0xe5f   :  { %4597 = vmatpush.msra.mxu0 %v8280_v58  ;;  %4617 = vmatpush.msrb.mxu1 %v8283_v9  ;;  %v9856_v58 = vld [vmem:[#allocation36_spill] sm:$0xff]  ;;  %v9857_v9 = vld [vmem:[#allocation51_spill] sm:$0xff] }
 0xe60   :  { %4637 = vmatpush.msrb.mxu2 %v8286_v39  ;;  %4657 = vmatpush.msrb.mxu3 %v8289_v28  ;;  %v9858_v39 = vld [vmem:[#allocation63_spill] sm:$0xff]  ;;  %v9859_v28 = vld [vmem:[#allocation65_spill] sm:$0xff] }
 0xe61   :  { %4598 = vmatpush.msra.mxu0 %v8292_v63  ;;  %4618 = vmatpush.msrb.mxu1 %v8295_v16  ;;  %v9860_v63 = vld [vmem:[#allocation57_spill] sm:$0xff]  ;;  %v9861_v16 = vld [vmem:[#allocation20_spill] sm:$0xff] }
 0xe62   :  { %4638 = vmatpush.msrb.mxu2 %v8298_v15  ;;  %4658 = vmatpush.msrb.mxu3 %v8301_v35  ;;  %v9862_v15 = vld [vmem:[#allocation58_spill] sm:$0xff]  ;;  %v9863_v35 = vld [vmem:[#allocation67_spill] sm:$0xff] }
 0xe63   :  { %4599 = vmatpush.msra.mxu0 %v8304_v2  ;;  %4619 = vmatpush.msrb.mxu1 %v8307_v24  ;;  %v9864_v2 = vld [vmem:[#allocation37_spill] sm:$0xff]  ;;  %v9865_v24 = vld [vmem:[#allocation24_spill] sm:$0xff] }
 0xe64   :  { %4639 = vmatpush.msrb.mxu2 %v8310_v1  ;;  %4659 = vmatpush.msrb.mxu3 %v8313_v55  ;;  %v9866_v1 = vld [vmem:[#allocation62_spill] sm:$0xff] }
 0xe65   :  { %4600 = vmatpush.msra.mxu0 %v8316_v6  ;;  %4620 = vmatpush.msrb.mxu1 %v8319_v45  ;;  %v9867_v55 = vld [vmem:[#allocation50_spill] sm:$0xff]  ;;  %v9868_v6 = vld [vmem:[#allocation49_spill] sm:$0xff]  ;;  %v9869_v45 = vld [vmem:[#allocation27_spill] sm:$0xff] }
 0xe66   :  { %4640 = vmatpush.msrb.mxu2 %v8322_v26  ;;  %4660 = vmatpush.msrb.mxu3 %v8325_v41  ;;  %v9870_v26 = vld [vmem:[#allocation52_spill] sm:$0xff]  ;;  %v9871_v41 = vld [vmem:[#allocation54_spill] sm:$0xff] }
 0xe67   :  { %4601 = vmatpush.msra.mxu0 %v8328_v48  ;;  %4621 = vmatpush.msrb.mxu1 %v8331_v43  ;;  %v9872_v48 = vld [vmem:[#allocation53_spill] sm:$0xff]  ;;  %v9873_v43 = vld [vmem:[#allocation18_spill] sm:$0xff] }
 0xe68   :  { %4641 = vmatpush.msrb.mxu2 %v8334_v47  ;;  %4661 = vmatpush.msrb.mxu3 %v8337_v49  ;;  %v9874_v47 = vld [vmem:[#allocation15_spill] sm:$0xff]  ;;  %v9875_v49 = vld [vmem:[#allocation16_spill] sm:$0xff] }
 0xe69   :  { %4602 = vmatpush.msra.mxu0 %v8340_v46  ;;  %4622 = vmatpush.msrb.mxu1 %v8343_v52  ;;  %v9876_v46 = vld [vmem:[#allocation21_spill] sm:$0xff]  ;;  %v9877_v52 = vld [vmem:[#allocation31_spill] sm:$0xff] }
 0xe6a   :  { %4642 = vmatpush.msrb.mxu2 %v8346_v21  ;;  %4662 = vmatpush.msrb.mxu3 %v8349_v57  ;;  %v9878_v21 = vld [vmem:[#allocation26_spill] sm:$0xff]  ;;  %v9879_v57 = vld [vmem:[#allocation28_spill] sm:$0xff] }
 0xe6b   :  { %4603 = vmatpush.msra.mxu0 %v8352_v37  ;;  %4623 = vmatpush.msrb.mxu1 %v8355_v53  ;;  %v9880_v37 = vld [vmem:[#allocation29_spill] sm:$0xff] }
 0xe6c   :  { %4643 = vmatpush.msrb.mxu2 %v8358_v29  ;;  %4663 = vmatpush.msrb.mxu3 %v8361_v34  ;;  %v9881_v53 = vld [vmem:[#allocation25_spill] sm:$0xff] }
 0xe6d   :  { %4604 = vmatpush.msra.mxu0 %v8364_v5  ;;  %4624 = vmatpush.msrb.mxu1 %v8367_v19  ;;  %v9882_v29 = vld [vmem:[#allocation17_spill] sm:$0xff] }
 0xe6e   :  { %4644 = vmatpush.msrb.mxu2 %v8370_v62  ;;  %4664 = vmatpush.msrb.mxu3 %v8373_v59  ;;  %v9883_v34 = vld [vmem:[#allocation13_spill] sm:$0xff]  ;;  %v9885_v62 = vld [vmem:[#allocation14_spill] sm:$0xff] }
 0xe6f   :  { %4605 = vmatpush.msra.mxu0 %v8376_v50  ;;  %4625 = vmatpush.msrb.mxu1 %v8379_v42  ;;  %v3308_v5 = vadd.f32 %v9883_v34, %v9882_v29  ;;  %v9884_v19 = vld [vmem:[#allocation45_spill] sm:$0xff] }
 0xe70   :  { %4645 = vmatpush.msrb.mxu2 %v8382_v40  ;;  %4665 = vmatpush.msrb.mxu3 %v8385_v54  ;;  %v3349_v59 = vadd.f32 %v9885_v62, %v9884_v19 }
 0xe71   :  { %4606 = vmatpush.msra.mxu0 %v8388_v60  ;;  %4626 = vmatpush.msrb.mxu1 %v8391_v12 }
 0xe72   :  { %4646 = vmatpush.msrb.mxu2 %v9856_v58  ;;  %4666 = vmatpush.msrb.mxu3 %v9857_v9 }
 0xe73   :  { %4607 = vmatpush.msra.mxu0 %v9858_v39  ;;  %4627 = vmatpush.msrb.mxu1 %v9859_v28 }
 0xe74   :  { %4647 = vmatpush.msrb.mxu2 %v9860_v63  ;;  %4667 = vmatpush.msrb.mxu3 %v9861_v16 }
 0xe75   :  { %4608 = vmatpush.msra.mxu0 %v9862_v15  ;;  %4628 = vmatpush.msrb.mxu1 %v9863_v35 }
 0xe76   :  { %4648 = vmatpush.msrb.mxu2 %v9864_v2  ;;  %4668 = vmatpush.msrb.mxu3 %v9865_v24 }
 0xe77   :  { %4609 = vmatpush.msra.mxu0 %v9866_v1  ;;  %4629 = vmatpush.msrb.mxu1 %v9867_v55 }
 0xe78   :  { %4649 = vmatpush.msrb.mxu2 %v9868_v6  ;;  %4669 = vmatpush.msrb.mxu3 %v9869_v45 }
 0xe79   :  { %4610 = vmatpush.msra.mxu0 %v9870_v26  ;;  %4630 = vmatpush.msrb.mxu1 %v9871_v41 }
 0xe7a   :  { %4650 = vmatpush.msrb.mxu2 %v9872_v48  ;;  %4670 = vmatpush.msrb.mxu3 %v9873_v43 }
 0xe7b   :  { %4611 = vmatpush.msra.mxu0 %v9874_v47  ;;  %4631 = vmatpush.msrb.mxu1 %v9875_v49 }
 0xe7c   :  { %4651 = vmatpush.msrb.mxu2 %v9876_v46  ;;  %4671 = vmatpush.msrb.mxu3 %v9877_v52 }
 0xe7d   :  { %4612 = vmatpush.msra.mxu0 %v9878_v21  ;;  %4632 = vmatpush.msrb.mxu1 %v9879_v57 }
 0xe7e   :  { %4652 = vmatpush.msrb.mxu2 %v9880_v37  ;;  %4672 = vmatpush.msrb.mxu3 %v9881_v53 }
 0xeda   :  { %v4312_v50 = vpop.f32.mrf.mxu0  ;;  %v4332_v42 = vpop.f32.mrf.mxu1 }
 0xedb   :  { %v4375_v40 = vadd.f32 %v4312_v50, %v3308_v5  ;;  %v4376_v54 = vadd.f32 %v4332_v42, %v3349_v59  ;;  %v9891_v59 = vld [vmem:[#allocation23_spill] sm:$0xff] }
 0xedc   :  { %v3352_v50 = vadd.f32 %v9891_v59, %v9884_v19  ;;  %v4758_v59 = vld [vmem:[#allocation8 + $0x70] sm:$0xff] }
 0xedd   :  { %v4911_v60 = vmul.f32 -1.442695, %v4375_v40  ;;  %v4912_v12 = vmul.f32 -1.442695, %v4376_v54 }
 0xedf   :  { %5271 = vpow2.f32 %v4911_v60 }
 0xee0   :  { %5273 = vpow2.f32 %v4912_v12 }
 0xee1   :  { %v4372_v56 = vpop.f32.mrf.mxu3  ;;  %v4352_v33 = vpop.f32.mrf.mxu2 }
 0xee2   :  { %v4378_v8 = vadd.f32 %v4372_v56, %v3431_v44  ;;  %v4377_v32 = vadd.f32 %v4352_v33, %v3390_v22  ;;  %v9892_v44 = vld [vmem:[#allocation42_spill] sm:$0xff]  ;;  %v9893_v22 = vld [vmem:[#allocation47_spill] sm:$0xff] }
 0xee3   :  { %v3434_v56 = vadd.f32 %v9892_v44, %v9886_v27  ;;  %v9894_v44 = vld [vmem:[#allocation61_spill] sm:$0xff] }
 0xee4   :  { %v4913_v13 = vmul.f32 -1.442695, %v4378_v8 }
 0xee5   :  { %v5272_v51 = vpop.eup %5271 }
 0xee6   :  { %v5274_v10 = vpop.eup %5273  ;;  %v4382_v20 = vadd.f32 1.0, %v5272_v51  ;;  %5275 = vpow2.f32 %v4913_v13 }
 0xee7   :  { %v4401_v38 = vadd.f32 1.0, %v5274_v10 }
 0xee8   :  { %5277 = vrcp.f32 %v4382_v20  ;;  %v4394_v14 = vand.u32 2147483648, %v4382_v20  ;;  %v4392_v9 = vand.u32 2147483647, %v4382_v20  ;;  %vm4388_vm15 = vweird.f32 %v4382_v20 }
 0xee9   :  { %5279 = vrcp.f32 %v4401_v38  ;;  %v4413_v61 = vand.u32 2147483648, %v4401_v38  ;;  %v4411_v28 = vand.u32 2147483647, %v4401_v38  ;;  %vm4407_vm0 = vweird.f32 %v4401_v38 }
 0xeea   :  { %v4395_v15 = vor.u32 1.1754944e-38, %v4394_v14  ;;  %vm4393_vm3 = vcmp.eq.f32.partialorder %v4392_v9, 8.507059e+37 }
 0xeeb   :  { %v4414_v24 = vor.u32 1.1754944e-38, %v4413_v61  ;;  %vm4412_vm4 = vcmp.eq.f32.partialorder %v4411_v28, 8.507059e+37 }
 0xeec   :  { %v5276_v31 = vpop.eup %5275 }
 0xeed   :  { %v4421_v18 = vadd.f32 1.0, %v5276_v31 }
 0xeee   :  { %v5278_v17 = vpop.eup %5277 }
 0xeef   :  { %v5280_v3 = vpop.eup %5279  ;;  %v4384_v4 = vmul.f32 %v5278_v17, %v4382_v20  ;;  %5281 = vrcp.f32 %v4421_v18  ;;  %vm4389_vm13 = vweird.f32 %v5278_v17  ;;  %v4433_v52 = vand.u32 2147483648, %v4421_v18 }
 0xef0   :  { %v4403_v25 = vmul.f32 %v5280_v3, %v4401_v38  ;;  %5283 = vtanh.f32 %v4377_v32  ;;  %vm4408_vm14 = vweird.f32 %v5280_v3  ;;  %vm4390_vm1 = vmor %vm4388_vm15, %vm4389_vm13  ;;  %vm4427_vm6 = vweird.f32 %v4421_v18 }
 0xef1   :  { %v4385_v11 = vsub.f32 1.0, %v4384_v4  ;;  %vm4409_vm2 = vmor %vm4407_vm0, %vm4408_vm14  ;;  %v4431_v21 = vand.u32 2147483647, %v4421_v18  ;;  %v4434_v37 = vor.u32 1.1754944e-38, %v4433_v52 }
 0xef2   :  { %v4404_v30 = vsub.f32 1.0, %v4403_v25 }
 0xef3   :  { %v4386_v58 = vmul.f32 %v5278_v17, %v4385_v11  ;;  %vm4432_vm8 = vcmp.eq.f32.partialorder %v4431_v21, 8.507059e+37 }
 0xef4   :  { %v4405_v39 = vmul.f32 %v5280_v3, %v4404_v30 }
 0xef5   :  { %v5282_v63 = vpop.eup %5281  ;;  %v4387_v16 = vadd.f32 %v5278_v17, %v4386_v58 }
 0xef6   :  { %v4406_v35 = vadd.f32 %v5280_v3, %v4405_v39  ;;  %v4423_v2 = vmul.f32 %v5282_v63, %v4421_v18  ;;  %v5284_v55 = vpop.eup %5283  ;;  %vm4428_vm5 = vweird.f32 %v5282_v63  ;;  %v3393_v18 = vadd.f32 %v9893_v22, %v9888_v36 }
 0xef7   :  { %v4391_v1 = vsel %vm4390_vm1, %v5278_v17, %v4387_v16  ;;  %vm4429_vm7 = vmor %vm4427_vm6, %vm4428_vm5 }
 0xef8   :  { %v4396_v6 = vsel %vm4393_vm3, %v4395_v15, %v4391_v1  ;;  %v4410_v45 = vsel %vm4409_vm2, %v5280_v3, %v4406_v35  ;;  %v4424_v26 = vsub.f32 1.0, %v4423_v2 }
 0xef9   :  { %v4415_v41 = vsel %vm4412_vm4, %v4414_v24, %v4410_v45  ;;  %v4438_v48 = vmul.f32 %v5284_v55, %v4396_v6 }
 0xefa   :  { %v4437_v43 = vmul.f32 %v4415_v41, %v8633_v23  ;;  %v4425_v47 = vmul.f32 %v5282_v63, %v4424_v26  ;;  %v9890_v23 = vld [vmem:[#allocation69_spill] sm:$0xff] }
 0xefb   :  { %v3311_v62 = vadd.f32 %v9890_v23, %v9882_v29 }
 0xefc   :  { %v8709_v49 = vadd.f32 %v4438_v48, %v4437_v43  ;;  %v4426_v46 = vadd.f32 %v5282_v63, %v4425_v47 }
 0xefe   :  { %5285 = vtanh.f32 %v8709_v49  ;;  %v4430_v57 = vsel %vm4429_vm7, %v5282_v63, %v4426_v46 }
 0xeff   :  { %v4435_v34 = vsel %vm4432_vm8, %v4434_v37, %v4430_v57 }
 0xf04   :  { %v5286_v53 = vpop.eup %5285 }
 0xf05   :  { %v4441_v5 = vmul.f32 %v5286_v53, %v4435_v34 }
 0xf07   :  { %4462 = vmatmul.f32.vlgmr.msrb.gmra.mxu0 %v4441_v5  ;;  %4482 = vmatmul.f32.vlgmr.msra.gmra.mxu1 %v4441_v5 }
 0xf08   :  { %4502 = vmatmul.f32.vlgmr.msra.gmra.mxu2 %v4441_v5  ;;  %4522 = vmatmul.f32.vlgmr.msra.gmra.mxu3 %v4441_v5 }
 0xf84   :  { %v4463_v42 = vpop.f32.mrf.mxu0  ;;  %v4483_v40 = vpop.f32.mrf.mxu1 }
 0xf85   :  { %v4526_v54 = vadd.f32 %v4463_v42, %v3311_v62  ;;  %v4527_v60 = vadd.f32 %v4483_v40, %v3352_v50  ;;  %v4757_v50 = vld [vmem:[#allocation8 + $0x68] sm:$0xff]  ;;  %v4756_v42 = vld [vmem:[#allocation8 + $0x60] sm:$0xff]  ;;  %v4755_v40 = vld [vmem:[#allocation8 + $0x58] sm:$0xff] }
 0xf87   :  { %v4914_v12 = vmul.f32 -1.442695, %v4526_v54  ;;  %v4915_v7 = vmul.f32 -1.442695, %v4527_v60  ;;  %v4754_v54 = vld [vmem:[#allocation8 + $0x50] sm:$0xff]  ;;  %v4753_v60 = vld [vmem:[#allocation8 + $0x48] sm:$0xff] }
 0xf89   :  { %5287 = vpow2.f32 %v4914_v12  ;;  %v4752_v12 = vld [vmem:[#allocation8 + $0x40] sm:$0xff] }
 0xf8a   :  { %5289 = vpow2.f32 %v4915_v7  ;;  %v4751_v7 = vld [vmem:[#allocation8 + $0x38] sm:$0xff] }
 0xf8b   :  { %v4523_v8 = vpop.f32.mrf.mxu3  ;;  %v4503_v31 = vpop.f32.mrf.mxu2 }
 0xf8c   :  { %v4529_v13 = vadd.f32 %v4523_v8, %v3434_v56  ;;  %v4528_v3 = vadd.f32 %v4503_v31, %v3393_v18  ;;  %v3314_v56 = vadd.f32 %v9894_v44, %v9882_v29  ;;  %v9895_v8 = vld [vmem:[#allocation64_spill] sm:$0xff]  ;;  %v4748_v18 = vld [vmem:[#allocation8 + $0x20] sm:$0xff]  ;;  %v9896_v29 = vld [vmem:[#allocation41_spill] sm:$0xff] }
 0xf8d   :  { %v4749_v31 = vld [vmem:[#allocation8 + $0x28] sm:$0xff] }
 0xf8e   :  { %v4916_v51 = vmul.f32 -1.442695, %v4529_v13  ;;  %v3355_v13 = vadd.f32 %v9895_v8, %v9884_v19  ;;  %v4746_v19 = vld [vmem:[#allocation8 + $0x10] sm:$0xff] }
 0xf8f   :  { %v5288_v10 = vpop.eup %5287 }
 0xf90   :  { %v5290_v20 = vpop.eup %5289  ;;  %v4533_v38 = vadd.f32 1.0, %v5288_v10  ;;  %5291 = vpow2.f32 %v4916_v51 }
 0xf91   :  { %v4552_v33 = vadd.f32 1.0, %v5290_v20  ;;  %v4750_v20 = vld [vmem:[#allocation8 + $0x30] sm:$0xff] }
 0xf92   :  { %5293 = vrcp.f32 %v4533_v38  ;;  %v4545_v61 = vand.u32 2147483648, %v4533_v38  ;;  %v4543_v39 = vand.u32 2147483647, %v4533_v38  ;;  %vm4539_vm11 = vweird.f32 %v4533_v38 }
 0xf93   :  { %5295 = vrcp.f32 %v4552_v33  ;;  %v4564_v58 = vand.u32 2147483648, %v4552_v33  ;;  %v4562_v63 = vand.u32 2147483647, %v4552_v33  ;;  %vm4558_vm12 = vweird.f32 %v4552_v33 }
 0xf94   :  { %v4546_v35 = vor.u32 1.1754944e-38, %v4545_v61  ;;  %vm4544_vm15 = vcmp.eq.f32.partialorder %v4543_v39, 8.507059e+37 }
 0xf95   :  { %v4565_v1 = vor.u32 1.1754944e-38, %v4564_v58  ;;  %vm4563_vm0 = vcmp.eq.f32.partialorder %v4562_v63, 8.507059e+37 }
 0xf96   :  { %v5292_v0 = vpop.eup %5291 }
 0xf97   :  { %v4572_v17 = vadd.f32 1.0, %v5292_v0 }
 0xf98   :  { %v5294_v32 = vpop.eup %5293 }
 0xf99   :  { %v5296_v4 = vpop.eup %5295  ;;  %v4535_v25 = vmul.f32 %v5294_v32, %v4533_v38  ;;  %5297 = vrcp.f32 %v4572_v17  ;;  %vm4540_vm9 = vweird.f32 %v5294_v32  ;;  %v4584_v57 = vand.u32 2147483648, %v4572_v17 }
 0xf9a   :  { %v4554_v11 = vmul.f32 %v5296_v4, %v4552_v33  ;;  %5299 = vtanh.f32 %v4528_v3  ;;  %vm4559_vm10 = vweird.f32 %v5296_v4  ;;  %vm4541_vm13 = vmor %vm4539_vm11, %vm4540_vm9  ;;  %vm4578_vm2 = vweird.f32 %v4572_v17 }
 0xf9b   :  { %v4536_v30 = vsub.f32 1.0, %v4535_v25  ;;  %vm4560_vm14 = vmor %vm4558_vm12, %vm4559_vm10  ;;  %v4582_v37 = vand.u32 2147483647, %v4572_v17  ;;  %v4585_v34 = vor.u32 1.1754944e-38, %v4584_v57  ;;  %v4745_v25 = vld [vmem:[#allocation8 + $0x8] sm:$0xff] }
 0xf9c   :  { %v4555_v14 = vsub.f32 1.0, %v4554_v11 }
 0xf9d   :  { %v4537_v9 = vmul.f32 %v5294_v32, %v4536_v30  ;;  %vm4583_vm4 = vcmp.eq.f32.partialorder %v4582_v37, 8.507059e+37  ;;  %v4744_v30 = vld [vmem:[#allocation8] sm:$0xff] }
 0xf9e   :  { %v4556_v28 = vmul.f32 %v5296_v4, %v4555_v14 }
 0xf9f   :  { %v5298_v16 = vpop.eup %5297  ;;  %v4538_v15 = vadd.f32 %v5294_v32, %v4537_v9 }
 0xfa0   :  { %v4557_v2 = vadd.f32 %v5296_v4, %v4556_v28  ;;  %v4574_v24 = vmul.f32 %v5298_v16, %v4572_v17  ;;  %v5300_v6 = vpop.eup %5299  ;;  %vm4579_vm1 = vweird.f32 %v5298_v16  ;;  %v4747_v17 = vld [vmem:[#allocation8 + $0x18] sm:$0xff]  ;;  %v9897_v28 = vld [vmem:[#allocation44_spill] sm:$0xff] }
 0xfa1   :  { %v4542_v55 = vsel %vm4541_vm13, %v5294_v32, %v4538_v15  ;;  %vm4580_vm3 = vmor %vm4578_vm2, %vm4579_vm1  ;;  %v3437_v32 = vadd.f32 %v9896_v29, %v9886_v27  ;;  %v3396_v63 = vadd.f32 %v9897_v28, %v9888_v36 }
 0xfa2   :  { %v4547_v45 = vsel %vm4544_vm15, %v4546_v35, %v4542_v55  ;;  %v4561_v26 = vsel %vm4560_vm14, %v5296_v4, %v4557_v2  ;;  %v4575_v41 = vsub.f32 1.0, %v4574_v24 }
 0xfa3   :  { %v4566_v48 = vsel %vm4563_vm0, %v4565_v1, %v4561_v26  ;;  %v4589_v43 = vmul.f32 %v5300_v6, %v4547_v45 }
 0xfa4   :  { %v4588_v47 = vmul.f32 %v4566_v48, %v8709_v49  ;;  %v4576_v46 = vmul.f32 %v5298_v16, %v4575_v41  ;;  %v4759_v49 = vld [vmem:[#allocation8 + $0x78] sm:$0xff] }
 0xfa5   :  { %4764 = vmatpush.msrb.mxu0 %v4759_v49 }
 0xfa6   :  { %v8721_v52 = vadd.f32 %v4589_v43, %v4588_v47  ;;  %v4577_v21 = vadd.f32 %v5298_v16, %v4576_v46 }
 0xfa7   :  { %4765 = vmatpush.msrb.mxu0 %v4758_v59 }
 0xfa8   :  { %5301 = vtanh.f32 %v8721_v52  ;;  %v4581_v53 = vsel %vm4580_vm3, %v5298_v16, %v4577_v21 }
 0xfa9   :  { %v4586_v23 = vsel %vm4583_vm4, %v4585_v34, %v4581_v53  ;;  %4766 = vmatpush.msrb.mxu0 %v4757_v50 }
 0xfab   :  { %4767 = vmatpush.msrb.mxu0 %v4756_v42 }
 0xfad   :  { %4768 = vmatpush.msrb.mxu0 %v4755_v40 }
 0xfae   :  { %v5302_v5 = vpop.eup %5301 }
 0xfaf   :  { %v4592_v62 = vmul.f32 %v5302_v5, %v4586_v23  ;;  %4769 = vmatpush.msrb.mxu0 %v4754_v54 }
 0xfb1   :  { %4613 = vmatmul.f32.vlgmr.msra.gmra.mxu0 %v4592_v62  ;;  %4633 = vmatmul.f32.vlgmr.msrb.gmra.mxu1 %v4592_v62 }
 0xfb2   :  { %4653 = vmatmul.f32.vlgmr.msrb.gmra.mxu2 %v4592_v62  ;;  %4673 = vmatmul.f32.vlgmr.msrb.gmra.mxu3 %v4592_v62 }
 0xfb3   :  { %4770 = vmatpush.msrb.mxu0 %v4753_v60 }
 0xfb5   :  { %4771 = vmatpush.msrb.mxu0 %v4752_v12 }
 0xfb7   :  { %4772 = vmatpush.msrb.mxu0 %v4751_v7 }
 0xfb9   :  { %4773 = vmatpush.msrb.mxu0 %v4750_v20 }
 0xfbb   :  { %4774 = vmatpush.msrb.mxu0 %v4749_v31 }
 0xfbd   :  { %4775 = vmatpush.msrb.mxu0 %v4748_v18 }
 0xfbf   :  { %4776 = vmatpush.msrb.mxu0 %v4747_v17 }
 0xfc1   :  { %4777 = vmatpush.msrb.mxu0 %v4746_v19 }
 0xfc3   :  { %4778 = vmatpush.msrb.mxu0 %v4745_v25 }
 0xfc5   :  { %4779 = vmatpush.msrb.mxu0 %v4744_v30 }
0x102e   :  { %v4614_v51 = vpop.f32.mrf.mxu0  ;;  %v4634_v10 = vpop.f32.mrf.mxu1 }
0x102f   :  { %v4677_v38 = vadd.f32 %v4614_v51, %v3314_v56  ;;  %v4678_v33 = vadd.f32 %v4634_v10, %v3355_v13 }
0x1031   :  { %v4917_v0 = vmul.f32 -1.442695, %v4677_v38  ;;  %v4918_v22 = vmul.f32 -1.442695, %v4678_v33 }
0x1033   :  { %5303 = vpow2.f32 %v4917_v0 }
0x1034   :  { %5305 = vpow2.f32 %v4918_v22 }
0x1035   :  { %v4674_v3 = vpop.f32.mrf.mxu3  ;;  %v4654_v39 = vpop.f32.mrf.mxu2 }
0x1036   :  { %v4680_v4 = vadd.f32 %v4674_v3, %v3437_v32  ;;  %v4679_v35 = vadd.f32 %v4654_v39, %v3396_v63 }
0x1038   :  { %v4919_v11 = vmul.f32 -1.442695, %v4680_v4 }
0x1039   :  { %v5304_v14 = vpop.eup %5303 }
0x103a   :  { %v5306_v61 = vpop.eup %5305  ;;  %v4684_v58 = vadd.f32 1.0, %v5304_v14  ;;  %5307 = vpow2.f32 %v4919_v11 }
0x103b   :  { %v4703_v9 = vadd.f32 1.0, %v5306_v61 }
0x103c   :  { %5309 = vrcp.f32 %v4684_v58  ;;  %v4696_v45 = vand.u32 2147483648, %v4684_v58  ;;  %v4694_v48 = vand.u32 2147483647, %v4684_v58  ;;  %vm4690_vm7 = vweird.f32 %v4684_v58 }
0x103d   :  { %5311 = vrcp.f32 %v4703_v9  ;;  %v4715_v26 = vand.u32 2147483648, %v4703_v9  ;;  %v4713_v47 = vand.u32 2147483647, %v4703_v9  ;;  %vm4709_vm8 = vweird.f32 %v4703_v9 }
0x103e   :  { %v4697_v21 = vor.u32 1.1754944e-38, %v4696_v45  ;;  %vm4695_vm11 = vcmp.eq.f32.partialorder %v4694_v48, 8.507059e+37 }
0x103f   :  { %v4716_v53 = vor.u32 1.1754944e-38, %v4715_v26  ;;  %vm4714_vm12 = vcmp.eq.f32.partialorder %v4713_v47, 8.507059e+37 }
0x1040   :  { %v5308_v27 = vpop.eup %5307 }
0x1041   :  { %v4723_v16 = vadd.f32 1.0, %v5308_v27 }
0x1042   :  { %v5310_v15 = vpop.eup %5309 }
0x1043   :  { %v5312_v2 = vpop.eup %5311  ;;  %v4686_v24 = vmul.f32 %v5310_v15, %v4684_v58  ;;  %5313 = vrcp.f32 %v4723_v16  ;;  %vm4691_vm5 = vweird.f32 %v5310_v15  ;;  %v4735_v12 = vand.u32 2147483648, %v4723_v16 }
0x1044   :  { %v4705_v1 = vmul.f32 %v5312_v2, %v4703_v9  ;;  %5315 = vtanh.f32 %v4679_v35  ;;  %vm4710_vm6 = vweird.f32 %v5312_v2  ;;  %vm4692_vm9 = vmor %vm4690_vm7, %vm4691_vm5  ;;  %vm4729_vm14 = vweird.f32 %v4723_v16 }
0x1045   :  { %v4687_v55 = vsub.f32 1.0, %v4686_v24  ;;  %vm4711_vm10 = vmor %vm4709_vm8, %vm4710_vm6  ;;  %v4733_v7 = vand.u32 2147483647, %v4723_v16  ;;  %v4736_v56 = vor.u32 1.1754944e-38, %v4735_v12 }
0x1046   :  { %v4706_v6 = vsub.f32 1.0, %v4705_v1 }
0x1047   :  { %v4688_v41 = vmul.f32 %v5310_v15, %v4687_v55  ;;  %vm4734_vm0 = vcmp.eq.f32.partialorder %v4733_v7, 8.507059e+37 }
0x1048   :  { %v4707_v43 = vmul.f32 %v5312_v2, %v4706_v6 }
0x1049   :  { %v5314_v46 = vpop.eup %5313  ;;  %v4689_v36 = vadd.f32 %v5310_v15, %v4688_v41 }
0x104a   :  { %v4708_v57 = vadd.f32 %v5312_v2, %v4707_v43  ;;  %v4725_v37 = vmul.f32 %v5314_v46, %v4723_v16  ;;  %v5316_v5 = vpop.eup %5315  ;;  %vm4730_vm13 = vweird.f32 %v5314_v46 }
0x104b   :  { %v4693_v34 = vsel %vm4692_vm9, %v5310_v15, %v4689_v36  ;;  %vm4731_vm15 = vmor %vm4729_vm14, %vm4730_vm13 }
0x104c   :  { %v4698_v23 = vsel %vm4695_vm11, %v4697_v21, %v4693_v34  ;;  %v4712_v62 = vsel %vm4711_vm10, %v5312_v2, %v4708_v57  ;;  %v4726_v49 = vsub.f32 1.0, %v4725_v37 }
0x104d   :  { %v4717_v59 = vsel %vm4714_vm12, %v4716_v53, %v4712_v62  ;;  %v4740_v50 = vmul.f32 %v5316_v5, %v4698_v23 }
0x104e   :  { %v4739_v42 = vmul.f32 %v4717_v59, %v8721_v52  ;;  %v4727_v40 = vmul.f32 %v5314_v46, %v4726_v49  ;;  %v4934_v52 = vld [vmem:[%s8745_s6] ss:$0 sm:$0xff] }
0x1050   :  { %v4741_v54 = vadd.f32 %v4740_v50, %v4739_v42  ;;  %v4728_v60 = vadd.f32 %v5314_v46, %v4727_v40 }
0x1052   :  { %5317 = vtanh.f32 %v4741_v54  ;;  %v4732_v44 = vsel %vm4731_vm15, %v5314_v46, %v4728_v60 }
0x1053   :  { %v4737_v13 = vsel %vm4734_vm0, %v4736_v56, %v4732_v44 }
0x1058   :  { %v5318_v8 = vpop.eup %5317 }
0x1059   :  { %v4743_v51 = vmul.f32 %v5318_v8, %v4737_v13 }
0x105b   :  { %4780 = vmatmul.f32.vlgmr.msrb.gmra.mxu0 %v4743_v51 }
0x10d8   :  { %v4781_v10 = vpop.f32.mrf.mxu0 }
0x10d9   :  { %v4782_v20 = vadd.f32 %v4934_v52, %v4781_v10 }
0x10db   :  { %v4784_v38 = vmax.f32 %v4782_v20, 0.0 }
0x10dd   :  { %v4785_v33 = vmul.f32 %v4784_v38, %v4784_v38 }
0x10df   :  { %4786 = vadd.xlane.f32.xlu0 %v4785_v33 }
0x1152   :  { %v4787_v31 = vpop.xlane.xlu0 %4786 }
0x1153   :  { %v4788_v0 = vadd.f32 1e-12, %v4787_v31 }
0x1155   :  { %5319 = vrsqrt.f32 %v4788_v0  ;;  %vm4795_vm2 = vweird.f32 %v4788_v0 }
0x115b   :  { %v5320_v22 = vpop.eup %5319 }
0x115c   :  { %v4790_v18 = vmul.f32 %v5320_v22, %v4788_v0  ;;  %vm4796_vm1 = vweird.f32 %v5320_v22 }
0x115d   :  { %vm4797_vm3 = vmor %vm4795_vm2, %vm4796_vm1 }
0x115e   :  { %v4791_v17 = vmul.f32 %v5320_v22, %v4790_v18 }
0x1160   :  { %v4792_v29 = vmul.f32 0.5, %v4791_v17 }
0x1162   :  { %v4793_v32 = vsub.f32 1.5, %v4792_v29 }
0x1164   :  { %v4794_v19 = vmul.f32 %v5320_v22, %v4793_v32 }
0x1166   :  { %v4798_v3 = vsel %vm4797_vm3, %v5320_v22, %v4794_v19 }
0x1167   :  { %v4799_v4 = vmul.f32 %v4798_v3, %v4784_v38 }
0x1169   :  { %4800 = vst [vmem:[%s8746_s7] sm:$0xff] %v4799_v4 }
0x116a   :  { %4805 = vsyncpa [#allocation5], 1 }
0x116b   :  { %4806 = vsyncpa [#allocation7], 1 }

</bundles_post_ra>
